<compile_context>
chip_gen: v7x
topology: tpu7x:2x2x1
jax: 0.10.0
libtpu: 0.0.40
codegen_flags: <defaults>
</compile_context>

<pallas_src>
import math

import jax
import jax.numpy as jnp
import numpy as np
from jax.experimental import pallas as pl
from jax.experimental.pallas import tpu as pltpu

L_IN = 300        # forced by fc(in_features=64*75): 300 -> 150 -> 75 after two pools
L_OUT = 75        # real per-sample length of every phase plane
L_PAD = 80        # padded segment length (80 * 8 = 640 = 5*128 -> lane extents % 128 == 0)
N_CLASSES = 5


# ----------------------------- in-kernel helpers -----------------------------
def _shift_r(v, edge_ref):
    """v[:, j] <- v[:, j-1] with per-sample left zero padding (Conv1d pad=1).

    edge_ref row 0 is a hoisted 0/1 mask that zeroes lanes at per-sample
    position q == 0 (kills the roll wrap-around and cross-sample leakage).
    """
    return pltpu.roll(v, 1, axis=1) * edge_ref[0:1, :]


def _shift_l(v, edge_ref):
    """v[:, j] <- v[:, j+1] with per-sample right zero padding.

    edge_ref row 1 zeroes lanes at per-sample position q == L_OUT-1.
    """
    return pltpu.roll(v, v.shape[1] - 1, axis=1) * edge_ref[1:2, :]


def _conv_pair(ze, zo, wf_ref, b_ref, edge_ref):
    """Conv1d(k=3,pad=1)+ReLU on a length-2L signal stored as two phase planes.

    ze[q] = z[2q], zo[q] = z[2q+1]  (each (C_in, N) f32).  Output phases:
      ye[q] = conv(z)[2q]   = W . [z[2q-1], z[2q],   z[2q+1]] = W . [shiftR(zo), ze, zo]
      yo[q] = conv(z)[2q+1] = W . [z[2q],   z[2q+1], z[2q+2]] = W . [ze, zo, shiftL(ze)]
    Each phase is one (C_out, 3*C_in) @ (3*C_in, N) bf16 MXU matmul, f32 acc.
    """
    zo_r = _shift_r(zo, edge_ref).astype(jnp.bfloat16)
    ze_l = _shift_l(ze, edge_ref).astype(jnp.bfloat16)
    ze_b = ze.astype(jnp.bfloat16)
    zo_b = zo.astype(jnp.bfloat16)
    w = wf_ref[...]
    b = b_ref[...]
    xse = jnp.concatenate([zo_r, ze_b, zo_b], axis=0)         # (3*C_in, N)
    xso = jnp.concatenate([ze_b, zo_b, ze_l], axis=0)
    ye = jnp.dot(w, xse, preferred_element_type=jnp.float32) + b
    yo = jnp.dot(w, xso, preferred_element_type=jnp.float32) + b
    return jnp.maximum(ye, 0.0), jnp.maximum(yo, 0.0)


def _fc(h, wtile_ref, seg_ref, bfc_ref):
    """Linear(64*75 -> 5) on h: (64, b_blk*L_PAD), per-sample 80-lane segments.

    Two-step contraction needing no transpose/relayout of h:
      P[n, j] = sum_c wtile[n, c, j] * h[c, j]   (5 VPU multiplies + sublane sums)
      logits  = P @ seg (+ bias)                  (ONE small bf16 MXU matmul)
    wtile has zeros on dead (padding) lanes, so they contribute nothing.
    """
    rows = []
    for cls in range(N_CLASSES):
        rows.append(jnp.sum(wtile_ref[cls] * h, axis=0, keepdims=True))   # (1, N)
    p = jnp.concatenate(rows, axis=0).astype(jnp.bfloat16)                # (5, N)
    return jnp.dot(p, seg_ref[...], preferred_element_type=jnp.float32) + bfc_ref[...]


# --------------------------------- kernel ------------------------------------
def net_kernel(x_ref, w1, b1, w2, b2, w3, b3, w4, b4, w5, b5,
               edge, wtile, seg, bfc, o_ref):
    xp = x_ref[0]                                 # (4, N) f32, input phase planes
    x0, x1, x2, x3 = xp[0:1], xp[1:2], xp[2:3], xp[3:4]
    x3r = _shift_r(x3, edge)                      # x[4q-1]
    x0l = _shift_l(x0, edge)                      # x[4q+4]

    wc1 = w1[...]                                 # (16, 3)
    bc1 = b1[...]                                 # (16, 1)

    def c1(a, b_, c):                             # conv1 (C_in=1) on the VPU
        return wc1[:, 0:1] * a + wc1[:, 1:2] * b_ + wc1[:, 2:3] * c + bc1

    y0 = c1(x3r, x0, x1)                          # conv1 output at t = 4q
    y1 = c1(x0, x1, x2)                           # t = 4q + 1
    y2 = c1(x1, x2, x3)                           # t = 4q + 2
    y3 = c1(x2, x3, x0l)                          # t = 4q + 3

    # ReLU + MaxPool1d(2,2): pooled length-150 signal as phase planes (mod 2).
    ze = jnp.maximum(jnp.maximum(y0, y1), 0.0)    # (16, N)   z[2q]
    zo = jnp.maximum(jnp.maximum(y2, y3), 0.0)    # (16, N)   z[2q+1]

    ze, zo = _conv_pair(ze, zo, w2, b2, edge)     # (32, N) each
    ze, zo = _conv_pair(ze, zo, w3, b3, edge)     # (32, N)
    ze, zo = _conv_pair(ze, zo, w4, b4, edge)     # (64, N)
    ze, zo = _conv_pair(ze, zo, w5, b5, edge)     # (64, N)

    h = jnp.maximum(ze, zo)                       # second MaxPool1d(2,2) -> (64, N)
    o_ref[0] = _fc(h, wtile, seg, bfc).astype(o_ref.dtype)    # (5, b_blk)


# ------------------------------ host-side prep --------------------------------
def _pick_block(batch):
    """Batch block size; batches >= 16 get >= 2 grid steps (v7x megacore)."""
    if batch >= 64:
        b_blk = 32
    elif batch >= 16:
        b_blk = min(32, 8 * math.ceil(batch / 16))
    else:
        b_blk = 8
    n_blk = math.ceil(batch / b_blk)
    return b_blk, n_blk


def _net_forward_impl(x, params):
    """x: (B, 1, 300) float32.  Returns (B, 5) float32 logits."""
    batch = x.shape[0]
    b_blk, n_blk = _pick_block(batch)
    b_pad = b_blk * n_blk
    n_lane = b_blk * L_PAD

    (w1, b1), (w2, b2), (w3, b3), (w4, b4), (w5, b5), (wfc, bfc) = params

    def fuse(w):   # (Cout, Cin, 3) -> (Cout, 3*Cin) bf16, column order k*Cin + c
        co, ci, k = w.shape
        return jnp.transpose(w, (0, 2, 1)).reshape(co, k * ci).astype(jnp.bfloat16)

    def colb(b):
        return b.reshape(-1, 1).astype(jnp.float32)

    # Hoisted 0/1 edge masks for the per-sample conv padding (same for every layer).
    lane = jnp.arange(n_lane)
    q = lane % L_PAD
    edge = jnp.stack([(q != 0), (q != L_OUT - 1)], axis=0).astype(jnp.float32)  # (2, N)

    # FC weight tiled per sample of the block, zero on dead (padding) lanes.
    wfc3 = wfc.reshape(N_CLASSES, 64, L_OUT).astype(jnp.float32)
    wfc3 = jnp.pad(wfc3, ((0, 0), (0, 0), (0, L_PAD - L_OUT)))        # (5, 64, 80)
    wtile = jnp.tile(wfc3, (1, 1, b_blk))                             # (5, 64, N)
    seg = (lane[:, None] // L_PAD ==
           jnp.arange(b_blk)[None, :]).astype(jnp.bfloat16)           # (N, b_blk)

    consts = [w1[:, 0, :].astype(jnp.float32), colb(b1),              # conv1 (VPU path)
              fuse(w2), colb(b2),
              fuse(w3), colb(b3),
              fuse(w4), colb(b4),
              fuse(w5), colb(b5),
              edge, wtile, seg, colb(bfc)]
    # NOTE: constants use a fixed index_map so Pallas DMAs them once; their total
    # footprint is only ~3.5 MB at b_blk=32, so default double-buffering is cheap.

    # Phase-split the input on the host: t = 4q + r; pad batch and segments.
    xf = x.astype(jnp.float32).reshape(batch, L_IN)
    xf = jnp.pad(xf, ((0, b_pad - batch), (0, 0)))
    xph = jnp.transpose(xf.reshape(b_pad, L_OUT, 4), (0, 2, 1))       # (b_pad, 4, 75)
    xph = jnp.pad(xph, ((0, 0), (0, 0), (0, L_PAD - L_OUT)))          # (b_pad, 4, 80)
    xblk = jnp.transpose(xph.reshape(n_blk, b_blk, 4, L_PAD),
                         (0, 2, 1, 3)).reshape(n_blk, 4, n_lane)      # lane = s*80 + q

    def const_spec(a):
        nd = a.ndim
        return pl.BlockSpec(a.shape, lambda i, _nd=nd: (0,) * _nd)

    out = pl.pallas_call(
        net_kernel,
        out_shape=jax.ShapeDtypeStruct((n_blk, N_CLASSES, b_blk), jnp.float32),
        grid=(n_blk,),
        in_specs=[pl.BlockSpec((1, 4, n_lane), lambda i: (i, 0, 0))]
                 + [const_spec(a) for a in consts],
        out_specs=pl.BlockSpec((1, N_CLASSES, b_blk), lambda i: (i, 0, 0)),
        compiler_params=pltpu.CompilerParams(
            dimension_semantics=("parallel",),
            vmem_limit_bytes=32 * 1024 * 1024),   # safe on v5e/v6e/v7x
    )(xblk, *consts)

    # (n_blk, 5, b_blk) -> (B, 5); sample index = blk * b_blk + within-block index.
    logits = jnp.transpose(out, (0, 2, 1)).reshape(b_pad, N_CLASSES)
    return logits[:batch]


net_forward = jax.jit(_net_forward_impl)


# ------------------------------ params & reference ----------------------------
def init_params(key):
    def conv_init(k, cout, cin, ks=3):
        kw, kb = jax.random.split(k)
        bound = 1.0 / math.sqrt(cin * ks)
        w = jax.random.uniform(kw, (cout, cin, ks), jnp.float32, -bound, bound)
        b = jax.random.uniform(kb, (cout,), jnp.float32, -bound, bound)
        return w, b

    keys = jax.random.split(key, 6)
    p = [conv_init(keys[0], 16, 1),
         conv_init(keys[1], 32, 16),
         conv_init(keys[2], 32, 32),
         conv_init(keys[3], 64, 32),
         conv_init(keys[4], 64, 64)]
    kfw, kfb = jax.random.split(keys[5])
    bound = 1.0 / math.sqrt(64 * 75)
    wfc = jax.random.uniform(kfw, (N_CLASSES, 64 * 75), jnp.float32, -bound, bound)
    bfc = jax.random.uniform(kfb, (N_CLASSES,), jnp.float32, -bound, bound)
    p.append((wfc, bfc))
    return p


def ref_forward(x, params):
    """Pure-JAX reference mirroring the PyTorch forward exactly (f32)."""
    (w1, b1), (w2, b2), (w3, b3), (w4, b4), (w5, b5), (wfc, bfc) = params

    def conv(x, w, b):
        L = x.shape[2]
        xp = jnp.pad(x, ((0, 0), (0, 0), (1, 1)))
        y = sum(jnp.einsum('oc,bcl->bol', w[:, :, k], xp[:, :, k:k + L])
                for k in range(3))
        return y + b[None, :, None]

    def pool(x):
        B, C, L = x.shape
        return x.reshape(B, C, L // 2, 2).max(axis=-1)

    relu = lambda v: jnp.maximum(v, 0.0)
    h = pool(relu(conv(x, w1, b1)))
    h = relu(conv(h, w2, b2))
    h = relu(conv(h, w3, b3))
    h = relu(conv(h, w4, b4))
    h = pool(relu(conv(h, w5, b5)))
    h = h.reshape(h.shape[0], -1)
    return h @ wfc.T + bfc[None, :]


if __name__ == "__main__":
    key = jax.random.PRNGKey(0)
    kx, kp = jax.random.split(key)
    x = jax.random.normal(kx, (2, 1, L_IN), jnp.float32)   # (B, C=1, L=300)
    params = init_params(kp)

    out = jax.block_until_ready(net_forward(x, params))
    assert out.shape == (2, N_CLASSES)
    assert bool(jnp.all(jnp.isfinite(out)))

    ref = jax.block_until_ready(ref_forward(x, params))
    np.testing.assert_allclose(np.asarray(out), np.asarray(ref), rtol=5e-2, atol=5e-2)

    print("KERNEL_OK")
</pallas_src>

<mosaic_0001>
module attributes {stable_mosaic.version = 11 : i64} {
  func.func @net_kernel(%arg0: i32, %arg1: memref<1x4x640xf32, #tpu.memory_space<vmem>>, %arg2: memref<16x3xf32, #tpu.memory_space<vmem>>, %arg3: memref<16x1xf32, #tpu.memory_space<vmem>>, %arg4: memref<32x48xbf16, #tpu.memory_space<vmem>>, %arg5: memref<32x1xf32, #tpu.memory_space<vmem>>, %arg6: memref<32x96xbf16, #tpu.memory_space<vmem>>, %arg7: memref<32x1xf32, #tpu.memory_space<vmem>>, %arg8: memref<64x96xbf16, #tpu.memory_space<vmem>>, %arg9: memref<64x1xf32, #tpu.memory_space<vmem>>, %arg10: memref<64x192xbf16, #tpu.memory_space<vmem>>, %arg11: memref<64x1xf32, #tpu.memory_space<vmem>>, %arg12: memref<2x640xf32, #tpu.memory_space<vmem>>, %arg13: memref<5x64x640xf32, #tpu.memory_space<vmem>>, %arg14: memref<640x8xbf16, #tpu.memory_space<vmem>>, %arg15: memref<5x1xf32, #tpu.memory_space<vmem>>, %arg16: memref<1x5x8xf32, #tpu.memory_space<vmem>>) attributes {dimension_semantics = [#tpu.dimension_semantics<parallel>], iteration_bounds = array<i64: 1>, scalar_prefetch = 0 : i64, scratch_operands = 0 : i64, tpu.core_type = #tpu.core_type<tc>, window_params = [{transform_indices = @transform_0, window_bounds = array<i64: 1, 4, 640>}, {pipeline_mode = #tpu.pipeline_mode<synchronous>, transform_indices = @transform_1, window_bounds = array<i64: 16, 3>}, {pipeline_mode = #tpu.pipeline_mode<synchronous>, transform_indices = @transform_2, window_bounds = array<i64: 16, 1>}, {pipeline_mode = #tpu.pipeline_mode<synchronous>, transform_indices = @transform_3, window_bounds = array<i64: 32, 48>}, {pipeline_mode = #tpu.pipeline_mode<synchronous>, transform_indices = @transform_4, window_bounds = array<i64: 32, 1>}, {pipeline_mode = #tpu.pipeline_mode<synchronous>, transform_indices = @transform_5, window_bounds = array<i64: 32, 96>}, {pipeline_mode = #tpu.pipeline_mode<synchronous>, transform_indices = @transform_6, window_bounds = array<i64: 32, 1>}, {pipeline_mode = #tpu.pipeline_mode<synchronous>, transform_indices = @transform_7, window_bounds = array<i64: 64, 96>}, {pipeline_mode = #tpu.pipeline_mode<synchronous>, transform_indices = @transform_8, window_bounds = array<i64: 64, 1>}, {pipeline_mode = #tpu.pipeline_mode<synchronous>, transform_indices = @transform_9, window_bounds = array<i64: 64, 192>}, {pipeline_mode = #tpu.pipeline_mode<synchronous>, transform_indices = @transform_10, window_bounds = array<i64: 64, 1>}, {pipeline_mode = #tpu.pipeline_mode<synchronous>, transform_indices = @transform_11, window_bounds = array<i64: 2, 640>}, {pipeline_mode = #tpu.pipeline_mode<synchronous>, transform_indices = @transform_12, window_bounds = array<i64: 5, 64, 640>}, {pipeline_mode = #tpu.pipeline_mode<synchronous>, transform_indices = @transform_13, window_bounds = array<i64: 640, 8>}, {pipeline_mode = #tpu.pipeline_mode<synchronous>, transform_indices = @transform_14, window_bounds = array<i64: 5, 1>}, {transform_indices = @transform_15, window_bounds = array<i64: 1, 5, 8>}]} {
    %c0 = arith.constant 0 : index
    %c0_0 = arith.constant 0 : index
    %c0_1 = arith.constant 0 : index
    %0 = vector.load %arg1[%c0, %c0_0, %c0_1] : memref<1x4x640xf32, #tpu.memory_space<vmem>>, vector<1x4x640xf32>
    %1 = vector.shape_cast %0 : vector<1x4x640xf32> to vector<4x640xf32>
    %2 = vector.extract_strided_slice %1 {offsets = [0, 0], sizes = [1, 640], strides = [1, 1]} : vector<4x640xf32> to vector<1x640xf32>
    %3 = vector.extract_strided_slice %1 {offsets = [1, 0], sizes = [1, 640], strides = [1, 1]} : vector<4x640xf32> to vector<1x640xf32>
    %4 = vector.extract_strided_slice %1 {offsets = [2, 0], sizes = [1, 640], strides = [1, 1]} : vector<4x640xf32> to vector<1x640xf32>
    %5 = vector.extract_strided_slice %1 {offsets = [3, 0], sizes = [1, 640], strides = [1, 1]} : vector<4x640xf32> to vector<1x640xf32>
    %c1_i32 = arith.constant 1 : i32
    %6 = tpu.dynamic_rotate %5 by %c1_i32 dim 1 : vector<1x640xf32>, i32 -> vector<1x640xf32>
    %c0_2 = arith.constant 0 : index
    %c0_3 = arith.constant 0 : index
    %7 = vector.load %arg12[%c0_2, %c0_3] : memref<2x640xf32, #tpu.memory_space<vmem>>, vector<1x640xf32>
    %8 = arith.mulf %6, %7 : vector<1x640xf32>
    %c639_i32 = arith.constant 639 : i32
    %9 = tpu.dynamic_rotate %2 by %c639_i32 dim 1 : vector<1x640xf32>, i32 -> vector<1x640xf32>
    %c1 = arith.constant 1 : index
    %c0_4 = arith.constant 0 : index
    %10 = vector.load %arg12[%c1, %c0_4] : memref<2x640xf32, #tpu.memory_space<vmem>>, vector<1x640xf32>
    %11 = arith.mulf %9, %10 : vector<1x640xf32>
    %c0_5 = arith.constant 0 : index
    %c0_6 = arith.constant 0 : index
    %12 = vector.load %arg2[%c0_5, %c0_6] : memref<16x3xf32, #tpu.memory_space<vmem>>, vector<16x3xf32>
    %c0_7 = arith.constant 0 : index
    %c0_8 = arith.constant 0 : index
    %13 = vector.load %arg3[%c0_7, %c0_8] : memref<16x1xf32, #tpu.memory_space<vmem>>, vector<16x1xf32>
    %14 = vector.extract_strided_slice %12 {offsets = [0, 0], sizes = [16, 1], strides = [1, 1]} : vector<16x3xf32> to vector<16x1xf32>
    %15 = vector.broadcast %14 : vector<16x1xf32> to vector<16x640xf32>
    %16 = vector.broadcast %8 : vector<1x640xf32> to vector<16x640xf32>
    %17 = arith.mulf %15, %16 : vector<16x640xf32>
    %18 = vector.extract_strided_slice %12 {offsets = [0, 1], sizes = [16, 1], strides = [1, 1]} : vector<16x3xf32> to vector<16x1xf32>
    %19 = vector.broadcast %18 : vector<16x1xf32> to vector<16x640xf32>
    %20 = vector.broadcast %2 : vector<1x640xf32> to vector<16x640xf32>
    %21 = arith.mulf %19, %20 : vector<16x640xf32>
    %22 = arith.addf %17, %21 : vector<16x640xf32>
    %23 = vector.extract_strided_slice %12 {offsets = [0, 2], sizes = [16, 1], strides = [1, 1]} : vector<16x3xf32> to vector<16x1xf32>
    %24 = vector.broadcast %23 : vector<16x1xf32> to vector<16x640xf32>
    %25 = vector.broadcast %3 : vector<1x640xf32> to vector<16x640xf32>
    %26 = arith.mulf %24, %25 : vector<16x640xf32>
    %27 = arith.addf %22, %26 : vector<16x640xf32>
    %28 = vector.broadcast %13 : vector<16x1xf32> to vector<16x640xf32>
    %29 = arith.addf %27, %28 : vector<16x640xf32>
    %30 = vector.extract_strided_slice %12 {offsets = [0, 0], sizes = [16, 1], strides = [1, 1]} : vector<16x3xf32> to vector<16x1xf32>
    %31 = vector.broadcast %30 : vector<16x1xf32> to vector<16x640xf32>
    %32 = vector.broadcast %2 : vector<1x640xf32> to vector<16x640xf32>
    %33 = arith.mulf %31, %32 : vector<16x640xf32>
    %34 = vector.extract_strided_slice %12 {offsets = [0, 1], sizes = [16, 1], strides = [1, 1]} : vector<16x3xf32> to vector<16x1xf32>
    %35 = vector.broadcast %34 : vector<16x1xf32> to vector<16x640xf32>
    %36 = vector.broadcast %3 : vector<1x640xf32> to vector<16x640xf32>
    %37 = arith.mulf %35, %36 : vector<16x640xf32>
    %38 = arith.addf %33, %37 : vector<16x640xf32>
    %39 = vector.extract_strided_slice %12 {offsets = [0, 2], sizes = [16, 1], strides = [1, 1]} : vector<16x3xf32> to vector<16x1xf32>
    %40 = vector.broadcast %39 : vector<16x1xf32> to vector<16x640xf32>
    %41 = vector.broadcast %4 : vector<1x640xf32> to vector<16x640xf32>
    %42 = arith.mulf %40, %41 : vector<16x640xf32>
    %43 = arith.addf %38, %42 : vector<16x640xf32>
    %44 = vector.broadcast %13 : vector<16x1xf32> to vector<16x640xf32>
    %45 = arith.addf %43, %44 : vector<16x640xf32>
    %46 = vector.extract_strided_slice %12 {offsets = [0, 0], sizes = [16, 1], strides = [1, 1]} : vector<16x3xf32> to vector<16x1xf32>
    %47 = vector.broadcast %46 : vector<16x1xf32> to vector<16x640xf32>
    %48 = vector.broadcast %3 : vector<1x640xf32> to vector<16x640xf32>
    %49 = arith.mulf %47, %48 : vector<16x640xf32>
    %50 = vector.extract_strided_slice %12 {offsets = [0, 1], sizes = [16, 1], strides = [1, 1]} : vector<16x3xf32> to vector<16x1xf32>
    %51 = vector.broadcast %50 : vector<16x1xf32> to vector<16x640xf32>
    %52 = vector.broadcast %4 : vector<1x640xf32> to vector<16x640xf32>
    %53 = arith.mulf %51, %52 : vector<16x640xf32>
    %54 = arith.addf %49, %53 : vector<16x640xf32>
    %55 = vector.extract_strided_slice %12 {offsets = [0, 2], sizes = [16, 1], strides = [1, 1]} : vector<16x3xf32> to vector<16x1xf32>
    %56 = vector.broadcast %55 : vector<16x1xf32> to vector<16x640xf32>
    %57 = vector.broadcast %5 : vector<1x640xf32> to vector<16x640xf32>
    %58 = arith.mulf %56, %57 : vector<16x640xf32>
    %59 = arith.addf %54, %58 : vector<16x640xf32>
    %60 = vector.broadcast %13 : vector<16x1xf32> to vector<16x640xf32>
    %61 = arith.addf %59, %60 : vector<16x640xf32>
    %62 = vector.extract_strided_slice %12 {offsets = [0, 0], sizes = [16, 1], strides = [1, 1]} : vector<16x3xf32> to vector<16x1xf32>
    %63 = vector.broadcast %62 : vector<16x1xf32> to vector<16x640xf32>
    %64 = vector.broadcast %4 : vector<1x640xf32> to vector<16x640xf32>
    %65 = arith.mulf %63, %64 : vector<16x640xf32>
    %66 = vector.extract_strided_slice %12 {offsets = [0, 1], sizes = [16, 1], strides = [1, 1]} : vector<16x3xf32> to vector<16x1xf32>
    %67 = vector.broadcast %66 : vector<16x1xf32> to vector<16x640xf32>
    %68 = vector.broadcast %5 : vector<1x640xf32> to vector<16x640xf32>
    %69 = arith.mulf %67, %68 : vector<16x640xf32>
    %70 = arith.addf %65, %69 : vector<16x640xf32>
    %71 = vector.extract_strided_slice %12 {offsets = [0, 2], sizes = [16, 1], strides = [1, 1]} : vector<16x3xf32> to vector<16x1xf32>
    %72 = vector.broadcast %71 : vector<16x1xf32> to vector<16x640xf32>
    %73 = vector.broadcast %11 : vector<1x640xf32> to vector<16x640xf32>
    %74 = arith.mulf %72, %73 : vector<16x640xf32>
    %75 = arith.addf %70, %74 : vector<16x640xf32>
    %76 = vector.broadcast %13 : vector<16x1xf32> to vector<16x640xf32>
    %77 = arith.addf %75, %76 : vector<16x640xf32>
    %78 = arith.maximumf %29, %45 : vector<16x640xf32>
    %cst = arith.constant 0.000000e+00 : f32
    %79 = vector.broadcast %cst : f32 to vector<16x640xf32>
    %80 = arith.maximumf %78, %79 : vector<16x640xf32>
    %81 = arith.maximumf %61, %77 : vector<16x640xf32>
    %cst_9 = arith.constant 0.000000e+00 : f32
    %82 = vector.broadcast %cst_9 : f32 to vector<16x640xf32>
    %83 = arith.maximumf %81, %82 : vector<16x640xf32>
    %c1_i32_10 = arith.constant 1 : i32
    %84 = tpu.dynamic_rotate %83 by %c1_i32_10 dim 1 : vector<16x640xf32>, i32 -> vector<16x640xf32>
    %c0_11 = arith.constant 0 : index
    %c0_12 = arith.constant 0 : index
    %85 = vector.load %arg12[%c0_11, %c0_12] : memref<2x640xf32, #tpu.memory_space<vmem>>, vector<1x640xf32>
    %86 = vector.broadcast %85 : vector<1x640xf32> to vector<16x640xf32>
    %87 = arith.mulf %84, %86 : vector<16x640xf32>
    %88 = arith.truncf %87 : vector<16x640xf32> to vector<16x640xbf16>
    %c639_i32_13 = arith.constant 639 : i32
    %89 = tpu.dynamic_rotate %80 by %c639_i32_13 dim 1 : vector<16x640xf32>, i32 -> vector<16x640xf32>
    %c1_14 = arith.constant 1 : index
    %c0_15 = arith.constant 0 : index
    %90 = vector.load %arg12[%c1_14, %c0_15] : memref<2x640xf32, #tpu.memory_space<vmem>>, vector<1x640xf32>
    %91 = vector.broadcast %90 : vector<1x640xf32> to vector<16x640xf32>
    %92 = arith.mulf %89, %91 : vector<16x640xf32>
    %93 = arith.truncf %92 : vector<16x640xf32> to vector<16x640xbf16>
    %94 = arith.truncf %80 : vector<16x640xf32> to vector<16x640xbf16>
    %95 = arith.truncf %83 : vector<16x640xf32> to vector<16x640xbf16>
    %c0_16 = arith.constant 0 : index
    %c0_17 = arith.constant 0 : index
    %96 = vector.load %arg4[%c0_16, %c0_17] : memref<32x48xbf16, #tpu.memory_space<vmem>>, vector<32x48xbf16>
    %c0_18 = arith.constant 0 : index
    %c0_19 = arith.constant 0 : index
    %97 = vector.load %arg5[%c0_18, %c0_19] : memref<32x1xf32, #tpu.memory_space<vmem>>, vector<32x1xf32>
    %98 = tpu.concatenate %88, %94, %95 in 0 : vector<16x640xbf16>, vector<16x640xbf16>, vector<16x640xbf16> -> vector<48x640xbf16>
    %99 = tpu.concatenate %94, %95, %93 in 0 : vector<16x640xbf16>, vector<16x640xbf16>, vector<16x640xbf16> -> vector<48x640xbf16>
    %cst_20 = arith.constant dense<0.000000e+00> : vector<32x640xf32>
    %100 = tpu.matmul %96, %98, %cst_20 {dimension_numbers = #tpu.dot_dimension_numbers<[1], [0], [0], [1], [0, 0, 1, 1], [], []>} : vector<32x48xbf16>, vector<48x640xbf16>, vector<32x640xf32> -> vector<32x640xf32>
    %101 = vector.broadcast %97 : vector<32x1xf32> to vector<32x640xf32>
    %102 = arith.addf %100, %101 : vector<32x640xf32>
    %cst_21 = arith.constant dense<0.000000e+00> : vector<32x640xf32>
    %103 = tpu.matmul %96, %99, %cst_21 {dimension_numbers = #tpu.dot_dimension_numbers<[1], [0], [0], [1], [0, 0, 1, 1], [], []>} : vector<32x48xbf16>, vector<48x640xbf16>, vector<32x640xf32> -> vector<32x640xf32>
    %104 = vector.broadcast %97 : vector<32x1xf32> to vector<32x640xf32>
    %105 = arith.addf %103, %104 : vector<32x640xf32>
    %cst_22 = arith.constant 0.000000e+00 : f32
    %106 = vector.broadcast %cst_22 : f32 to vector<32x640xf32>
    %107 = arith.maximumf %102, %106 : vector<32x640xf32>
    %cst_23 = arith.constant 0.000000e+00 : f32
    %108 = vector.broadcast %cst_23 : f32 to vector<32x640xf32>
    %109 = arith.maximumf %105, %108 : vector<32x640xf32>
    %c1_i32_24 = arith.constant 1 : i32
    %110 = tpu.dynamic_rotate %109 by %c1_i32_24 dim 1 : vector<32x640xf32>, i32 -> vector<32x640xf32>
    %c0_25 = arith.constant 0 : index
    %c0_26 = arith.constant 0 : index
    %111 = vector.load %arg12[%c0_25, %c0_26] : memref<2x640xf32, #tpu.memory_space<vmem>>, vector<1x640xf32>
    %112 = vector.broadcast %111 : vector<1x640xf32> to vector<32x640xf32>
    %113 = arith.mulf %110, %112 : vector<32x640xf32>
    %114 = arith.truncf %113 : vector<32x640xf32> to vector<32x640xbf16>
    %c639_i32_27 = arith.constant 639 : i32
    %115 = tpu.dynamic_rotate %107 by %c639_i32_27 dim 1 : vector<32x640xf32>, i32 -> vector<32x640xf32>
    %c1_28 = arith.constant 1 : index
    %c0_29 = arith.constant 0 : index
    %116 = vector.load %arg12[%c1_28, %c0_29] : memref<2x640xf32, #tpu.memory_space<vmem>>, vector<1x640xf32>
    %117 = vector.broadcast %116 : vector<1x640xf32> to vector<32x640xf32>
    %118 = arith.mulf %115, %117 : vector<32x640xf32>
    %119 = arith.truncf %118 : vector<32x640xf32> to vector<32x640xbf16>
    %120 = arith.truncf %107 : vector<32x640xf32> to vector<32x640xbf16>
    %121 = arith.truncf %109 : vector<32x640xf32> to vector<32x640xbf16>
    %c0_30 = arith.constant 0 : index
    %c0_31 = arith.constant 0 : index
    %122 = vector.load %arg6[%c0_30, %c0_31] : memref<32x96xbf16, #tpu.memory_space<vmem>>, vector<32x96xbf16>
    %c0_32 = arith.constant 0 : index
    %c0_33 = arith.constant 0 : index
    %123 = vector.load %arg7[%c0_32, %c0_33] : memref<32x1xf32, #tpu.memory_space<vmem>>, vector<32x1xf32>
    %124 = tpu.concatenate %114, %120, %121 in 0 : vector<32x640xbf16>, vector<32x640xbf16>, vector<32x640xbf16> -> vector<96x640xbf16>
    %125 = tpu.concatenate %120, %121, %119 in 0 : vector<32x640xbf16>, vector<32x640xbf16>, vector<32x640xbf16> -> vector<96x640xbf16>
    %cst_34 = arith.constant dense<0.000000e+00> : vector<32x640xf32>
    %126 = tpu.matmul %122, %124, %cst_34 {dimension_numbers = #tpu.dot_dimension_numbers<[1], [0], [0], [1], [0, 0, 1, 1], [], []>} : vector<32x96xbf16>, vector<96x640xbf16>, vector<32x640xf32> -> vector<32x640xf32>
    %127 = vector.broadcast %123 : vector<32x1xf32> to vector<32x640xf32>
    %128 = arith.addf %126, %127 : vector<32x640xf32>
    %cst_35 = arith.constant dense<0.000000e+00> : vector<32x640xf32>
    %129 = tpu.matmul %122, %125, %cst_35 {dimension_numbers = #tpu.dot_dimension_numbers<[1], [0], [0], [1], [0, 0, 1, 1], [], []>} : vector<32x96xbf16>, vector<96x640xbf16>, vector<32x640xf32> -> vector<32x640xf32>
    %130 = vector.broadcast %123 : vector<32x1xf32> to vector<32x640xf32>
    %131 = arith.addf %129, %130 : vector<32x640xf32>
    %cst_36 = arith.constant 0.000000e+00 : f32
    %132 = vector.broadcast %cst_36 : f32 to vector<32x640xf32>
    %133 = arith.maximumf %128, %132 : vector<32x640xf32>
    %cst_37 = arith.constant 0.000000e+00 : f32
    %134 = vector.broadcast %cst_37 : f32 to vector<32x640xf32>
    %135 = arith.maximumf %131, %134 : vector<32x640xf32>
    %c1_i32_38 = arith.constant 1 : i32
    %136 = tpu.dynamic_rotate %135 by %c1_i32_38 dim 1 : vector<32x640xf32>, i32 -> vector<32x640xf32>
    %c0_39 = arith.constant 0 : index
    %c0_40 = arith.constant 0 : index
    %137 = vector.load %arg12[%c0_39, %c0_40] : memref<2x640xf32, #tpu.memory_space<vmem>>, vector<1x640xf32>
    %138 = vector.broadcast %137 : vector<1x640xf32> to vector<32x640xf32>
    %139 = arith.mulf %136, %138 : vector<32x640xf32>
    %140 = arith.truncf %139 : vector<32x640xf32> to vector<32x640xbf16>
    %c639_i32_41 = arith.constant 639 : i32
    %141 = tpu.dynamic_rotate %133 by %c639_i32_41 dim 1 : vector<32x640xf32>, i32 -> vector<32x640xf32>
    %c1_42 = arith.constant 1 : index
    %c0_43 = arith.constant 0 : index
    %142 = vector.load %arg12[%c1_42, %c0_43] : memref<2x640xf32, #tpu.memory_space<vmem>>, vector<1x640xf32>
    %143 = vector.broadcast %142 : vector<1x640xf32> to vector<32x640xf32>
    %144 = arith.mulf %141, %143 : vector<32x640xf32>
    %145 = arith.truncf %144 : vector<32x640xf32> to vector<32x640xbf16>
    %146 = arith.truncf %133 : vector<32x640xf32> to vector<32x640xbf16>
    %147 = arith.truncf %135 : vector<32x640xf32> to vector<32x640xbf16>
    %c0_44 = arith.constant 0 : index
    %c0_45 = arith.constant 0 : index
    %148 = vector.load %arg8[%c0_44, %c0_45] : memref<64x96xbf16, #tpu.memory_space<vmem>>, vector<64x96xbf16>
    %c0_46 = arith.constant 0 : index
    %c0_47 = arith.constant 0 : index
    %149 = vector.load %arg9[%c0_46, %c0_47] : memref<64x1xf32, #tpu.memory_space<vmem>>, vector<64x1xf32>
    %150 = tpu.concatenate %140, %146, %147 in 0 : vector<32x640xbf16>, vector<32x640xbf16>, vector<32x640xbf16> -> vector<96x640xbf16>
    %151 = tpu.concatenate %146, %147, %145 in 0 : vector<32x640xbf16>, vector<32x640xbf16>, vector<32x640xbf16> -> vector<96x640xbf16>
    %cst_48 = arith.constant dense<0.000000e+00> : vector<64x640xf32>
    %152 = tpu.matmul %148, %150, %cst_48 {dimension_numbers = #tpu.dot_dimension_numbers<[1], [0], [0], [1], [0, 0, 1, 1], [], []>} : vector<64x96xbf16>, vector<96x640xbf16>, vector<64x640xf32> -> vector<64x640xf32>
    %153 = vector.broadcast %149 : vector<64x1xf32> to vector<64x640xf32>
    %154 = arith.addf %152, %153 : vector<64x640xf32>
    %cst_49 = arith.constant dense<0.000000e+00> : vector<64x640xf32>
    %155 = tpu.matmul %148, %151, %cst_49 {dimension_numbers = #tpu.dot_dimension_numbers<[1], [0], [0], [1], [0, 0, 1, 1], [], []>} : vector<64x96xbf16>, vector<96x640xbf16>, vector<64x640xf32> -> vector<64x640xf32>
    %156 = vector.broadcast %149 : vector<64x1xf32> to vector<64x640xf32>
    %157 = arith.addf %155, %156 : vector<64x640xf32>
    %cst_50 = arith.constant 0.000000e+00 : f32
    %158 = vector.broadcast %cst_50 : f32 to vector<64x640xf32>
    %159 = arith.maximumf %154, %158 : vector<64x640xf32>
    %cst_51 = arith.constant 0.000000e+00 : f32
    %160 = vector.broadcast %cst_51 : f32 to vector<64x640xf32>
    %161 = arith.maximumf %157, %160 : vector<64x640xf32>
    %c1_i32_52 = arith.constant 1 : i32
    %162 = tpu.dynamic_rotate %161 by %c1_i32_52 dim 1 : vector<64x640xf32>, i32 -> vector<64x640xf32>
    %c0_53 = arith.constant 0 : index
    %c0_54 = arith.constant 0 : index
    %163 = vector.load %arg12[%c0_53, %c0_54] : memref<2x640xf32, #tpu.memory_space<vmem>>, vector<1x640xf32>
    %164 = vector.broadcast %163 : vector<1x640xf32> to vector<64x640xf32>
    %165 = arith.mulf %162, %164 : vector<64x640xf32>
    %166 = arith.truncf %165 : vector<64x640xf32> to vector<64x640xbf16>
    %c639_i32_55 = arith.constant 639 : i32
    %167 = tpu.dynamic_rotate %159 by %c639_i32_55 dim 1 : vector<64x640xf32>, i32 -> vector<64x640xf32>
    %c1_56 = arith.constant 1 : index
    %c0_57 = arith.constant 0 : index
    %168 = vector.load %arg12[%c1_56, %c0_57] : memref<2x640xf32, #tpu.memory_space<vmem>>, vector<1x640xf32>
    %169 = vector.broadcast %168 : vector<1x640xf32> to vector<64x640xf32>
    %170 = arith.mulf %167, %169 : vector<64x640xf32>
    %171 = arith.truncf %170 : vector<64x640xf32> to vector<64x640xbf16>
    %172 = arith.truncf %159 : vector<64x640xf32> to vector<64x640xbf16>
    %173 = arith.truncf %161 : vector<64x640xf32> to vector<64x640xbf16>
    %c0_58 = arith.constant 0 : index
    %c0_59 = arith.constant 0 : index
    %174 = vector.load %arg10[%c0_58, %c0_59] : memref<64x192xbf16, #tpu.memory_space<vmem>>, vector<64x192xbf16>
    %c0_60 = arith.constant 0 : index
    %c0_61 = arith.constant 0 : index
    %175 = vector.load %arg11[%c0_60, %c0_61] : memref<64x1xf32, #tpu.memory_space<vmem>>, vector<64x1xf32>
    %176 = tpu.concatenate %166, %172, %173 in 0 : vector<64x640xbf16>, vector<64x640xbf16>, vector<64x640xbf16> -> vector<192x640xbf16>
    %177 = tpu.concatenate %172, %173, %171 in 0 : vector<64x640xbf16>, vector<64x640xbf16>, vector<64x640xbf16> -> vector<192x640xbf16>
    %cst_62 = arith.constant dense<0.000000e+00> : vector<64x640xf32>
    %178 = tpu.matmul %174, %176, %cst_62 {dimension_numbers = #tpu.dot_dimension_numbers<[1], [0], [0], [1], [0, 0, 1, 1], [], []>} : vector<64x192xbf16>, vector<192x640xbf16>, vector<64x640xf32> -> vector<64x640xf32>
    %179 = vector.broadcast %175 : vector<64x1xf32> to vector<64x640xf32>
    %180 = arith.addf %178, %179 : vector<64x640xf32>
    %cst_63 = arith.constant dense<0.000000e+00> : vector<64x640xf32>
    %181 = tpu.matmul %174, %177, %cst_63 {dimension_numbers = #tpu.dot_dimension_numbers<[1], [0], [0], [1], [0, 0, 1, 1], [], []>} : vector<64x192xbf16>, vector<192x640xbf16>, vector<64x640xf32> -> vector<64x640xf32>
    %182 = vector.broadcast %175 : vector<64x1xf32> to vector<64x640xf32>
    %183 = arith.addf %181, %182 : vector<64x640xf32>
    %cst_64 = arith.constant 0.000000e+00 : f32
    %184 = vector.broadcast %cst_64 : f32 to vector<64x640xf32>
    %185 = arith.maximumf %180, %184 : vector<64x640xf32>
    %cst_65 = arith.constant 0.000000e+00 : f32
    %186 = vector.broadcast %cst_65 : f32 to vector<64x640xf32>
    %187 = arith.maximumf %183, %186 : vector<64x640xf32>
    %188 = arith.maximumf %185, %187 : vector<64x640xf32>
    %c0_66 = arith.constant 0 : index
    %c0_67 = arith.constant 0 : index
    %c0_68 = arith.constant 0 : index
    %189 = vector.load %arg13[%c0_66, %c0_67, %c0_68] : memref<5x64x640xf32, #tpu.memory_space<vmem>>, vector<1x64x640xf32>
    %190 = vector.shape_cast %189 : vector<1x64x640xf32> to vector<64x640xf32>
    %191 = arith.mulf %190, %188 : vector<64x640xf32>
    %cst_69 = arith.constant dense<0.000000e+00> : vector<640xf32>
    %192 = vector.multi_reduction <add>, %191, %cst_69 [0] : vector<64x640xf32> to vector<640xf32>
    %193 = vector.shape_cast %192 : vector<640xf32> to vector<1x640xf32>
    %c1_70 = arith.constant 1 : index
    %c0_71 = arith.constant 0 : index
    %c0_72 = arith.constant 0 : index
    %194 = vector.load %arg13[%c1_70, %c0_71, %c0_72] : memref<5x64x640xf32, #tpu.memory_space<vmem>>, vector<1x64x640xf32>
    %195 = vector.shape_cast %194 : vector<1x64x640xf32> to vector<64x640xf32>
    %196 = arith.mulf %195, %188 : vector<64x640xf32>
    %cst_73 = arith.constant dense<0.000000e+00> : vector<640xf32>
    %197 = vector.multi_reduction <add>, %196, %cst_73 [0] : vector<64x640xf32> to vector<640xf32>
    %198 = vector.shape_cast %197 : vector<640xf32> to vector<1x640xf32>
    %c2 = arith.constant 2 : index
    %c0_74 = arith.constant 0 : index
    %c0_75 = arith.constant 0 : index
    %199 = vector.load %arg13[%c2, %c0_74, %c0_75] : memref<5x64x640xf32, #tpu.memory_space<vmem>>, vector<1x64x640xf32>
    %200 = vector.shape_cast %199 : vector<1x64x640xf32> to vector<64x640xf32>
    %201 = arith.mulf %200, %188 : vector<64x640xf32>
    %cst_76 = arith.constant dense<0.000000e+00> : vector<640xf32>
    %202 = vector.multi_reduction <add>, %201, %cst_76 [0] : vector<64x640xf32> to vector<640xf32>
    %203 = vector.shape_cast %202 : vector<640xf32> to vector<1x640xf32>
    %c3 = arith.constant 3 : index
    %c0_77 = arith.constant 0 : index
    %c0_78 = arith.constant 0 : index
    %204 = vector.load %arg13[%c3, %c0_77, %c0_78] : memref<5x64x640xf32, #tpu.memory_space<vmem>>, vector<1x64x640xf32>
    %205 = vector.shape_cast %204 : vector<1x64x640xf32> to vector<64x640xf32>
    %206 = arith.mulf %205, %188 : vector<64x640xf32>
    %cst_79 = arith.constant dense<0.000000e+00> : vector<640xf32>
    %207 = vector.multi_reduction <add>, %206, %cst_79 [0] : vector<64x640xf32> to vector<640xf32>
    %208 = vector.shape_cast %207 : vector<640xf32> to vector<1x640xf32>
    %c4 = arith.constant 4 : index
    %c0_80 = arith.constant 0 : index
    %c0_81 = arith.constant 0 : index
    %209 = vector.load %arg13[%c4, %c0_80, %c0_81] : memref<5x64x640xf32, #tpu.memory_space<vmem>>, vector<1x64x640xf32>
    %210 = vector.shape_cast %209 : vector<1x64x640xf32> to vector<64x640xf32>
    %211 = arith.mulf %210, %188 : vector<64x640xf32>
    %cst_82 = arith.constant dense<0.000000e+00> : vector<640xf32>
    %212 = vector.multi_reduction <add>, %211, %cst_82 [0] : vector<64x640xf32> to vector<640xf32>
    %213 = vector.shape_cast %212 : vector<640xf32> to vector<1x640xf32>
    %214 = tpu.concatenate %193, %198, %203, %208, %213 in 0 : vector<1x640xf32>, vector<1x640xf32>, vector<1x640xf32>, vector<1x640xf32>, vector<1x640xf32> -> vector<5x640xf32>
    %215 = arith.truncf %214 : vector<5x640xf32> to vector<5x640xbf16>
    %c0_83 = arith.constant 0 : index
    %c0_84 = arith.constant 0 : index
    %216 = vector.load %arg14[%c0_83, %c0_84] : memref<640x8xbf16, #tpu.memory_space<vmem>>, vector<640x8xbf16>
    %cst_85 = arith.constant dense<0.000000e+00> : vector<5x8xf32>
    %217 = tpu.matmul %215, %216, %cst_85 {dimension_numbers = #tpu.dot_dimension_numbers<[1], [0], [0], [1], [0, 0, 1, 1], [], []>} : vector<5x640xbf16>, vector<640x8xbf16>, vector<5x8xf32> -> vector<5x8xf32>
    %c0_86 = arith.constant 0 : index
    %c0_87 = arith.constant 0 : index
    %218 = vector.load %arg15[%c0_86, %c0_87] : memref<5x1xf32, #tpu.memory_space<vmem>>, vector<5x1xf32>
    %219 = vector.broadcast %218 : vector<5x1xf32> to vector<5x8xf32>
    %220 = arith.addf %217, %219 : vector<5x8xf32>
    %c0_88 = arith.constant 0 : index
    %c0_89 = arith.constant 0 : index
    %c0_90 = arith.constant 0 : index
    %221 = vector.load %arg16[%c0_88, %c0_89, %c0_90] : memref<1x5x8xf32, #tpu.memory_space<vmem>>, vector<1x5x8xf32>
    %222 = vector.shape_cast %221 : vector<1x5x8xf32> to vector<5x8xf32>
    %223 = vector.shape_cast %220 : vector<5x8xf32> to vector<1x5x8xf32>
    tpu.vector_store %arg16[%c0_88, %c0_89, %c0_90], %223 {strides = array<i32>} : memref<1x5x8xf32, #tpu.memory_space<vmem>>, vector<1x5x8xf32>,
    return
  }
  func.func @transform_0(%arg0: i32) -> (i32, i32, i32) {
    %c0_i32 = arith.constant 0 : i32
    %c0_i32_0 = arith.constant 0 : i32
    %c0_i32_1 = arith.constant 0 : i32
    return %arg0, %c0_i32, %c0_i32_0 : i32, i32, i32
  }
  func.func @transform_1(%arg0: i32) -> (i32, i32) {
    %c0_i32 = arith.constant 0 : i32
    %c0_i32_0 = arith.constant 0 : i32
    %c0_i32_1 = arith.constant 0 : i32
    return %c0_i32, %c0_i32_0 : i32, i32
  }
  func.func @transform_2(%arg0: i32) -> (i32, i32) {
    %c0_i32 = arith.constant 0 : i32
    %c0_i32_0 = arith.constant 0 : i32
    %c0_i32_1 = arith.constant 0 : i32
    return %c0_i32, %c0_i32_0 : i32, i32
  }
  func.func @transform_3(%arg0: i32) -> (i32, i32) {
    %c0_i32 = arith.constant 0 : i32
    %c0_i32_0 = arith.constant 0 : i32
    %c0_i32_1 = arith.constant 0 : i32
    return %c0_i32, %c0_i32_0 : i32, i32
  }
  func.func @transform_4(%arg0: i32) -> (i32, i32) {
    %c0_i32 = arith.constant 0 : i32
    %c0_i32_0 = arith.constant 0 : i32
    %c0_i32_1 = arith.constant 0 : i32
    return %c0_i32, %c0_i32_0 : i32, i32
  }
  func.func @transform_5(%arg0: i32) -> (i32, i32) {
    %c0_i32 = arith.constant 0 : i32
    %c0_i32_0 = arith.constant 0 : i32
    %c0_i32_1 = arith.constant 0 : i32
    return %c0_i32, %c0_i32_0 : i32, i32
  }
  func.func @transform_6(%arg0: i32) -> (i32, i32) {
    %c0_i32 = arith.constant 0 : i32
    %c0_i32_0 = arith.constant 0 : i32
    %c0_i32_1 = arith.constant 0 : i32
    return %c0_i32, %c0_i32_0 : i32, i32
  }
  func.func @transform_7(%arg0: i32) -> (i32, i32) {
    %c0_i32 = arith.constant 0 : i32
    %c0_i32_0 = arith.constant 0 : i32
    %c0_i32_1 = arith.constant 0 : i32
    return %c0_i32, %c0_i32_0 : i32, i32
  }
  func.func @transform_8(%arg0: i32) -> (i32, i32) {
    %c0_i32 = arith.constant 0 : i32
    %c0_i32_0 = arith.constant 0 : i32
    %c0_i32_1 = arith.constant 0 : i32
    return %c0_i32, %c0_i32_0 : i32, i32
  }
  func.func @transform_9(%arg0: i32) -> (i32, i32) {
    %c0_i32 = arith.constant 0 : i32
    %c0_i32_0 = arith.constant 0 : i32
    %c0_i32_1 = arith.constant 0 : i32
    return %c0_i32, %c0_i32_0 : i32, i32
  }
  func.func @transform_10(%arg0: i32) -> (i32, i32) {
    %c0_i32 = arith.constant 0 : i32
    %c0_i32_0 = arith.constant 0 : i32
    %c0_i32_1 = arith.constant 0 : i32
    return %c0_i32, %c0_i32_0 : i32, i32
  }
  func.func @transform_11(%arg0: i32) -> (i32, i32) {
    %c0_i32 = arith.constant 0 : i32
    %c0_i32_0 = arith.constant 0 : i32
    %c0_i32_1 = arith.constant 0 : i32
    return %c0_i32, %c0_i32_0 : i32, i32
  }
  func.func @transform_12(%arg0: i32) -> (i32, i32, i32) {
    %c0_i32 = arith.constant 0 : i32
    %c0_i32_0 = arith.constant 0 : i32
    %c0_i32_1 = arith.constant 0 : i32
    %c0_i32_2 = arith.constant 0 : i32
    return %c0_i32, %c0_i32_0, %c0_i32_1 : i32, i32, i32
  }
  func.func @transform_13(%arg0: i32) -> (i32, i32) {
    %c0_i32 = arith.constant 0 : i32
    %c0_i32_0 = arith.constant 0 : i32
    %c0_i32_1 = arith.constant 0 : i32
    return %c0_i32, %c0_i32_0 : i32, i32
  }
  func.func @transform_14(%arg0: i32) -> (i32, i32) {
    %c0_i32 = arith.constant 0 : i32
    %c0_i32_0 = arith.constant 0 : i32
    %c0_i32_1 = arith.constant 0 : i32
    return %c0_i32, %c0_i32_0 : i32, i32
  }
  func.func @transform_15(%arg0: i32) -> (i32, i32, i32) {
    %c0_i32 = arith.constant 0 : i32
    %c0_i32_0 = arith.constant 0 : i32
    %c0_i32_1 = arith.constant 0 : i32
    return %arg0, %c0_i32, %c0_i32_0 : i32, i32, i32
  }
}

</mosaic_0001>

<bundles_post_ra>
// kernel: tile.9
= control target key start
LH: loop header
LB: loop body
LE: loop exit
PB: predicated region body
PF: predicated region fallthrough
CT: control target
= control target key end

     0   :  { %vm4_vm0 = vcmask 1047556   ;;  %vm371_vm1 = vcmask 130048   ;;  %s6641_s22 = smov 112   ;;  %vm1251_vm2 = vcmask 261120   ;;  %s6642_s5 = smov 96   ;;  %vm375_vm3 = vcmask 523264   ;;  %s12490_s0 = inlined_call_operand.vmem [shape: f32[5,64,8,80], index: 0, kind: input, shape index: {}]   ;;  %s12491_s1 = inlined_call_operand.vmem [shape: f32[5,64,640], index: 1, kind: output, shape index: {}]  }
   0x1   :  { %v5327_v0 = vld [vmem:[%s12490_s0 + $0x283] ss:$8 sm:$0xf]   ;;  %vm378_vm4 = vcmask 1048448   ;;  %vm1255_vm5 = vcmask 392192   ;;  %s6643_s2 = smov 80  }
   0x2   :  { %v5328_v1 = vld [vmem:[%s12490_s0 + $0x283] ss:$8 sm:$0xf0]   ;;  %vm1258_vm6 = vcmask 1048320   ;;  %s6644_s28 = smov 64   ;;  %vm6_vm7 = vcmask 654336  }
   0x3   :  { %v408_v2 = vsel %vm4_vm0, %v5328_v1, %v5327_v0  ;;  %v5329_v3 = vld [vmem:[%s12490_s0 + $0x2c3] ss:$8 sm:$0xf]   ;;  %vm2138_vm8 = vcmask 1048192   ;;  %s6645_s26 = smov 48   ;;  %vm3017_vm9 = vcmask 1048064  }
   0x4   :  { %v5330_v4 = vld [vmem:[%s12490_s0 + $0x2c3] ss:$8 sm:$0xf0]   ;;  %s6646_s18 = smov 32   ;;  %vm3886_vm10 = vcmask 1047936   ;;  %s6647_s20 = smov 16  }
   0x5   :  { %v414_v5 = vsel %vm4_vm0, %v5330_v4, %v5329_v3  ;;  %v5315_v6 = vld [vmem:[%s12490_s0 + $0x83] ss:$8 sm:$0xf]   ;;  %vm4326_vm11 = vcmask 916736   ;;  %vm4766_vm12 = vcmask 785536  }
   0x6   :  { %v5316_v7 = vld [vmem:[%s12490_s0 + $0x83] ss:$8 sm:$0xf0]   ;;  %v416_v8 = vsel %vm371_vm1, %v414_v5, %v408_v2 }
   0x7   :  { %v364_v9 = vsel %vm4_vm0, %v5316_v7, %v5315_v6  ;;  %v5317_v10 = vld [vmem:[%s12490_s0 + $0xc3] ss:$8 sm:$0xf]   ;;  %417 = vrot.lane.b32.xlu1 %v416_v8, %s6641_s22 }
   0x8   :  { %v5318_v11 = vld [vmem:[%s12490_s0 + $0xc3] ss:$8 sm:$0xf0]  }
   0x9   :  { %v370_v12 = vsel %vm4_vm0, %v5318_v11, %v5317_v10  ;;  %v5333_v13 = vld [vmem:[%s12490_s0 + $0x383] ss:$8 sm:$0xf]  }
   0xa   :  { %v5334_v14 = vld [vmem:[%s12490_s0 + $0x383] ss:$8 sm:$0xf0]   ;;  %v372_v15 = vsel %vm371_vm1, %v370_v12, %v364_v9 }
   0xb   :  { %v430_v16 = vsel %vm4_vm0, %v5334_v14, %v5333_v13  ;;  %v5335_v17 = vld [vmem:[%s12490_s0 + $0x3c3] ss:$8 sm:$0xf]   ;;  %373 = vrot.lane.b32.xlu0 %v372_v15, %s6641_s22 }
   0xc   :  { %v5336_v18 = vld [vmem:[%s12490_s0 + $0x3c3] ss:$8 sm:$0xf0]  }
   0xd   :  { %v436_v19 = vsel %vm4_vm0, %v5336_v18, %v5335_v17  ;;  %v5321_v20 = vld [vmem:[%s12490_s0 + $0x183] ss:$8 sm:$0xf]  }
   0xe   :  { %v5322_v21 = vld [vmem:[%s12490_s0 + $0x183] ss:$8 sm:$0xf0]   ;;  %v438_v22 = vsel %vm371_vm1, %v436_v19, %v430_v16 }
   0xf   :  { %v386_v23 = vsel %vm4_vm0, %v5322_v21, %v5321_v20  ;;  %v5323_v24 = vld [vmem:[%s12490_s0 + $0x1c3] ss:$8 sm:$0xf]   ;;  %439 = vrot.lane.b32.xlu1 %v438_v22, %s6641_s22 }
  0x10   :  { %v5324_v25 = vld [vmem:[%s12490_s0 + $0x1c3] ss:$8 sm:$0xf0]  }
  0x11   :  { %v392_v26 = vsel %vm4_vm0, %v5324_v25, %v5323_v24  ;;  %v5345_v27 = vld [vmem:[%s12490_s0 + $0x583] ss:$8 sm:$0xf]  }
  0x12   :  { %v5346_v28 = vld [vmem:[%s12490_s0 + $0x583] ss:$8 sm:$0xf0]   ;;  %v394_v29 = vsel %vm371_vm1, %v392_v26, %v386_v23 }
  0x13   :  { %v474_v30 = vsel %vm4_vm0, %v5346_v28, %v5345_v27  ;;  %v5347_v31 = vld [vmem:[%s12490_s0 + $0x5c3] ss:$8 sm:$0xf]   ;;  %395 = vrot.lane.b32.xlu0 %v394_v29, %s6641_s22 }
  0x14   :  { %v5348_v32 = vld [vmem:[%s12490_s0 + $0x5c3] ss:$8 sm:$0xf0]  }
  0x15   :  { %v480_v33 = vsel %vm4_vm0, %v5348_v32, %v5347_v31  ;;  %v5339_v34 = vld [vmem:[%s12490_s0 + $0x483] ss:$8 sm:$0xf]  }
  0x16   :  { %v5340_v35 = vld [vmem:[%s12490_s0 + $0x483] ss:$8 sm:$0xf0]   ;;  %v482_v36 = vsel %vm371_vm1, %v480_v33, %v474_v30 }
  0x17   :  { %v452_v37 = vsel %vm4_vm0, %v5340_v35, %v5339_v34  ;;  %v5341_v38 = vld [vmem:[%s12490_s0 + $0x4c3] ss:$8 sm:$0xf]   ;;  %483 = vrot.lane.b32.xlu1 %v482_v36, %s6641_s22 }
  0x18   :  { %v5342_v39 = vld [vmem:[%s12490_s0 + $0x4c3] ss:$8 sm:$0xf0]  }
  0x19   :  { %v458_v40 = vsel %vm4_vm0, %v5342_v39, %v5341_v38  ;;  %v5357_v41 = vld [vmem:[%s12490_s0 + $0x783] ss:$8 sm:$0xf]  }
  0x1a   :  { %v5358_v42 = vld [vmem:[%s12490_s0 + $0x783] ss:$8 sm:$0xf0]   ;;  %v460_v43 = vsel %vm371_vm1, %v458_v40, %v452_v37 }
  0x1b   :  { %v518_v44 = vsel %vm4_vm0, %v5358_v42, %v5357_v41  ;;  %v5359_v45 = vld [vmem:[%s12490_s0 + $0x7c3] ss:$8 sm:$0xf]   ;;  %461 = vrot.lane.b32.xlu0 %v460_v43, %s6641_s22 }
  0x1c   :  { %v5360_v46 = vld [vmem:[%s12490_s0 + $0x7c3] ss:$8 sm:$0xf0]  }
  0x1d   :  { %v524_v47 = vsel %vm4_vm0, %v5360_v46, %v5359_v45  ;;  %v5351_v48 = vld [vmem:[%s12490_s0 + $0x683] ss:$8 sm:$0xf]  }
  0x1e   :  { %v5352_v49 = vld [vmem:[%s12490_s0 + $0x683] ss:$8 sm:$0xf0]   ;;  %v526_v50 = vsel %vm371_vm1, %v524_v47, %v518_v44 }
  0x1f   :  { %v496_v51 = vsel %vm4_vm0, %v5352_v49, %v5351_v48  ;;  %v5353_v52 = vld [vmem:[%s12490_s0 + $0x6c3] ss:$8 sm:$0xf]   ;;  %527 = vrot.lane.b32.xlu1 %v526_v50, %s6641_s22 }
  0x20   :  { %v5354_v53 = vld [vmem:[%s12490_s0 + $0x6c3] ss:$8 sm:$0xf0]  }
  0x21   :  { %v502_v54 = vsel %vm4_vm0, %v5354_v53, %v5353_v52  ;;  %v5369_v55 = vld [vmem:[%s12490_s0 + $0x983] ss:$8 sm:$0xf]  }
  0x22   :  { %v5370_v56 = vld [vmem:[%s12490_s0 + $0x983] ss:$8 sm:$0xf0]   ;;  %v504_v57 = vsel %vm371_vm1, %v502_v54, %v496_v51 }
  0x23   :  { %v562_v58 = vsel %vm4_vm0, %v5370_v56, %v5369_v55  ;;  %v5371_v59 = vld [vmem:[%s12490_s0 + $0x9c3] ss:$8 sm:$0xf]   ;;  %505 = vrot.lane.b32.xlu0 %v504_v57, %s6641_s22 }
  0x24   :  { %v5372_v60 = vld [vmem:[%s12490_s0 + $0x9c3] ss:$8 sm:$0xf0]  }
  0x25   :  { %v568_v61 = vsel %vm4_vm0, %v5372_v60, %v5371_v59  ;;  %v5363_v62 = vld [vmem:[%s12490_s0 + $0x883] ss:$8 sm:$0xf]  }
  0x26   :  { %v5364_v63 = vld [vmem:[%s12490_s0 + $0x883] ss:$8 sm:$0xf0]   ;;  %v570_v0 = vsel %vm371_vm1, %v568_v61, %v562_v58 }
  0x27   :  { %v540_v1 = vsel %vm4_vm0, %v5364_v63, %v5363_v62  ;;  %v5365_v2 = vld [vmem:[%s12490_s0 + $0x8c3] ss:$8 sm:$0xf]   ;;  %571 = vrot.lane.b32.xlu1 %v570_v0, %s6641_s22 }
  0x28   :  { %v5366_v3 = vld [vmem:[%s12490_s0 + $0x8c3] ss:$8 sm:$0xf0]  }
  0x29   :  { %v546_v4 = vsel %vm4_vm0, %v5366_v3, %v5365_v2  ;;  %v5381_v5 = vld [vmem:[%s12490_s0 + $0x1c3] ss:$8 sm:$0xf]  }
  0x2a   :  { %v5382_v6 = vld [vmem:[%s12490_s0 + $0x1c3] ss:$8 sm:$0xf0]   ;;  %v548_v7 = vsel %vm371_vm1, %v546_v4, %v540_v1 }
  0x2b   :  { %v606_v8 = vsel %vm4_vm0, %v5382_v6, %v5381_v5  ;;  %v5383_v9 = vld [vmem:[%s12490_s0 + $0x103] ss:$8 sm:$0xf]   ;;  %549 = vrot.lane.b32.xlu0 %v548_v7, %s6641_s22 }
  0x2c   :  { %v5384_v10 = vld [vmem:[%s12490_s0 + $0x103] ss:$8 sm:$0xf0]  }
  0x2d   :  { %v612_v11 = vsel %vm4_vm0, %v5384_v10, %v5383_v9  ;;  %v5375_v12 = vld [vmem:[%s12490_s0 + $0xc3] ss:$8 sm:$0xf]  }
  0x2e   :  { %v5376_v13 = vld [vmem:[%s12490_s0 + $0xc3] ss:$8 sm:$0xf0]   ;;  %v614_v14 = vsel %vm371_vm1, %v612_v11, %v606_v8 }
  0x2f   :  { %v584_v15 = vsel %vm4_vm0, %v5376_v13, %v5375_v12  ;;  %v5377_v16 = vld [vmem:[%s12490_s0 + $0x3] ss:$8 sm:$0xf]   ;;  %615 = vrot.lane.b32.xlu1 %v614_v14, %s6641_s22 }
  0x30   :  { %v5378_v17 = vld [vmem:[%s12490_s0 + $0x3] ss:$8 sm:$0xf0]  }
  0x31   :  { %v590_v18 = vsel %vm4_vm0, %v5378_v17, %v5377_v16  ;;  %v5393_v19 = vld [vmem:[%s12490_s0 + $0x3c3] ss:$8 sm:$0xf]  }
  0x32   :  { %v5394_v20 = vld [vmem:[%s12490_s0 + $0x3c3] ss:$8 sm:$0xf0]   ;;  %v592_v21 = vsel %vm371_vm1, %v590_v18, %v584_v15 }
  0x33   :  { %v650_v22 = vsel %vm4_vm0, %v5394_v20, %v5393_v19  ;;  %v5395_v23 = vld [vmem:[%s12490_s0 + $0x303] ss:$8 sm:$0xf]   ;;  %593 = vrot.lane.b32.xlu0 %v592_v21, %s6641_s22 }
  0x34   :  { %v5396_v24 = vld [vmem:[%s12490_s0 + $0x303] ss:$8 sm:$0xf0]  }
  0x35   :  { %v656_v25 = vsel %vm4_vm0, %v5396_v24, %v5395_v23  ;;  %v5387_v26 = vld [vmem:[%s12490_s0 + $0x2c3] ss:$8 sm:$0xf]  }
  0x36   :  { %v5388_v27 = vld [vmem:[%s12490_s0 + $0x2c3] ss:$8 sm:$0xf0]   ;;  %v658_v28 = vsel %vm371_vm1, %v656_v25, %v650_v22 }
  0x37   :  { %v628_v29 = vsel %vm4_vm0, %v5388_v27, %v5387_v26  ;;  %v5389_v30 = vld [vmem:[%s12490_s0 + $0x203] ss:$8 sm:$0xf]   ;;  %659 = vrot.lane.b32.xlu1 %v658_v28, %s6641_s22 }
  0x38   :  { %v5390_v31 = vld [vmem:[%s12490_s0 + $0x203] ss:$8 sm:$0xf0]  }
  0x39   :  { %v634_v32 = vsel %vm4_vm0, %v5390_v31, %v5389_v30  ;;  %v5405_v33 = vld [vmem:[%s12490_s0 + $0x5c3] ss:$8 sm:$0xf]  }
  0x3a   :  { %v5406_v34 = vld [vmem:[%s12490_s0 + $0x5c3] ss:$8 sm:$0xf0]   ;;  %v636_v35 = vsel %vm371_vm1, %v634_v32, %v628_v29 }
  0x3b   :  { %v694_v36 = vsel %vm4_vm0, %v5406_v34, %v5405_v33  ;;  %v5407_v37 = vld [vmem:[%s12490_s0 + $0x503] ss:$8 sm:$0xf]   ;;  %637 = vrot.lane.b32.xlu0 %v636_v35, %s6641_s22 }
  0x3c   :  { %v5408_v38 = vld [vmem:[%s12490_s0 + $0x503] ss:$8 sm:$0xf0]  }
  0x3d   :  { %v700_v39 = vsel %vm4_vm0, %v5408_v38, %v5407_v37  ;;  %v5399_v40 = vld [vmem:[%s12490_s0 + $0x4c3] ss:$8 sm:$0xf]  }
  0x3e   :  { %v5400_v41 = vld [vmem:[%s12490_s0 + $0x4c3] ss:$8 sm:$0xf0]   ;;  %v702_v42 = vsel %vm371_vm1, %v700_v39, %v694_v36 }
  0x3f   :  { %v672_v43 = vsel %vm4_vm0, %v5400_v41, %v5399_v40  ;;  %v5401_v44 = vld [vmem:[%s12490_s0 + $0x403] ss:$8 sm:$0xf]   ;;  %703 = vrot.lane.b32.xlu1 %v702_v42, %s6641_s22 }
  0x40   :  { %v5402_v45 = vld [vmem:[%s12490_s0 + $0x403] ss:$8 sm:$0xf0]  }
  0x41   :  { %v678_v46 = vsel %vm4_vm0, %v5402_v45, %v5401_v44  ;;  %v5417_v47 = vld [vmem:[%s12490_s0 + $0x7c3] ss:$8 sm:$0xf]  }
  0x42   :  { %v5418_v48 = vld [vmem:[%s12490_s0 + $0x7c3] ss:$8 sm:$0xf0]   ;;  %v680_v49 = vsel %vm371_vm1, %v678_v46, %v672_v43 }
  0x43   :  { %v738_v50 = vsel %vm4_vm0, %v5418_v48, %v5417_v47  ;;  %v5419_v51 = vld [vmem:[%s12490_s0 + $0x703] ss:$8 sm:$0xf]   ;;  %681 = vrot.lane.b32.xlu0 %v680_v49, %s6641_s22 }
  0x44   :  { %v5420_v52 = vld [vmem:[%s12490_s0 + $0x703] ss:$8 sm:$0xf0]  }
  0x45   :  { %v744_v53 = vsel %vm4_vm0, %v5420_v52, %v5419_v51  ;;  %v5411_v54 = vld [vmem:[%s12490_s0 + $0x6c3] ss:$8 sm:$0xf]  }
  0x46   :  { %v5412_v55 = vld [vmem:[%s12490_s0 + $0x6c3] ss:$8 sm:$0xf0]   ;;  %v746_v56 = vsel %vm371_vm1, %v744_v53, %v738_v50 }
  0x47   :  { %v716_v57 = vsel %vm4_vm0, %v5412_v55, %v5411_v54  ;;  %v5413_v58 = vld [vmem:[%s12490_s0 + $0x603] ss:$8 sm:$0xf]   ;;  %747 = vrot.lane.b32.xlu1 %v746_v56, %s6641_s22 }
  0x48   :  { %v5414_v59 = vld [vmem:[%s12490_s0 + $0x603] ss:$8 sm:$0xf0]  }
  0x49   :  { %v722_v60 = vsel %vm4_vm0, %v5414_v59, %v5413_v58  ;;  %v5429_v61 = vld [vmem:[%s12490_s0 + $0x9c3] ss:$8 sm:$0xf]  }
  0x4a   :  { %v5430_v62 = vld [vmem:[%s12490_s0 + $0x9c3] ss:$8 sm:$0xf0]   ;;  %v724_v63 = vsel %vm371_vm1, %v722_v60, %v716_v57 }
  0x4b   :  { %v782_v0 = vsel %vm4_vm0, %v5430_v62, %v5429_v61  ;;  %v5431_v1 = vld [vmem:[%s12490_s0 + $0x903] ss:$8 sm:$0xf]   ;;  %725 = vrot.lane.b32.xlu0 %v724_v63, %s6641_s22 }
  0x4c   :  { %v5432_v2 = vld [vmem:[%s12490_s0 + $0x903] ss:$8 sm:$0xf0]  }
  0x4d   :  { %v788_v3 = vsel %vm4_vm0, %v5432_v2, %v5431_v1  ;;  %v5423_v4 = vld [vmem:[%s12490_s0 + $0x8c3] ss:$8 sm:$0xf]  }
  0x4e   :  { %v5424_v5 = vld [vmem:[%s12490_s0 + $0x8c3] ss:$8 sm:$0xf0]   ;;  %v790_v6 = vsel %vm371_vm1, %v788_v3, %v782_v0 }
  0x4f   :  { %v760_v7 = vsel %vm4_vm0, %v5424_v5, %v5423_v4  ;;  %v5425_v8 = vld [vmem:[%s12490_s0 + $0x803] ss:$8 sm:$0xf]   ;;  %791 = vrot.lane.b32.xlu1 %v790_v6, %s6641_s22 }
  0x50   :  { %v5426_v9 = vld [vmem:[%s12490_s0 + $0x803] ss:$8 sm:$0xf0]  }
  0x51   :  { %v766_v10 = vsel %vm4_vm0, %v5426_v9, %v5425_v8  ;;  %v5441_v11 = vld [vmem:[%s12490_s0 + $0x103] ss:$8 sm:$0xf]  }
  0x52   :  { %v5442_v12 = vld [vmem:[%s12490_s0 + $0x103] ss:$8 sm:$0xf0]   ;;  %v768_v13 = vsel %vm371_vm1, %v766_v10, %v760_v7 }
  0x53   :  { %v826_v14 = vsel %vm4_vm0, %v5442_v12, %v5441_v11  ;;  %v5443_v15 = vld [vmem:[%s12490_s0 + $0x143] ss:$8 sm:$0xf]   ;;  %769 = vrot.lane.b32.xlu0 %v768_v13, %s6641_s22 }
  0x54   :  { %v5444_v16 = vld [vmem:[%s12490_s0 + $0x143] ss:$8 sm:$0xf0]  }
  0x55   :  { %v832_v17 = vsel %vm4_vm0, %v5444_v16, %v5443_v15  ;;  %v5435_v18 = vld [vmem:[%s12490_s0 + $0x3] ss:$8 sm:$0xf]  }
  0x56   :  { %v5436_v19 = vld [vmem:[%s12490_s0 + $0x3] ss:$8 sm:$0xf0]   ;;  %v834_v20 = vsel %vm371_vm1, %v832_v17, %v826_v14 }
  0x57   :  { %v804_v21 = vsel %vm4_vm0, %v5436_v19, %v5435_v18  ;;  %v5437_v22 = vld [vmem:[%s12490_s0 + $0x43] ss:$8 sm:$0xf]   ;;  %835 = vrot.lane.b32.xlu1 %v834_v20, %s6641_s22 }
  0x58   :  { %v5438_v23 = vld [vmem:[%s12490_s0 + $0x43] ss:$8 sm:$0xf0]  }
  0x59   :  { %v810_v24 = vsel %vm4_vm0, %v5438_v23, %v5437_v22  ;;  %v5453_v25 = vld [vmem:[%s12490_s0 + $0x303] ss:$8 sm:$0xf]  }
  0x5a   :  { %v5454_v26 = vld [vmem:[%s12490_s0 + $0x303] ss:$8 sm:$0xf0]   ;;  %v812_v27 = vsel %vm371_vm1, %v810_v24, %v804_v21 }
  0x5b   :  { %v870_v28 = vsel %vm4_vm0, %v5454_v26, %v5453_v25  ;;  %v5455_v29 = vld [vmem:[%s12490_s0 + $0x343] ss:$8 sm:$0xf]   ;;  %813 = vrot.lane.b32.xlu0 %v812_v27, %s6641_s22 }
  0x5c   :  { %v5456_v30 = vld [vmem:[%s12490_s0 + $0x343] ss:$8 sm:$0xf0]  }
  0x5d   :  { %v876_v31 = vsel %vm4_vm0, %v5456_v30, %v5455_v29  ;;  %v5447_v32 = vld [vmem:[%s12490_s0 + $0x203] ss:$8 sm:$0xf]  }
  0x5e   :  { %v5448_v33 = vld [vmem:[%s12490_s0 + $0x203] ss:$8 sm:$0xf0]   ;;  %v878_v34 = vsel %vm371_vm1, %v876_v31, %v870_v28 }
  0x5f   :  { %v848_v35 = vsel %vm4_vm0, %v5448_v33, %v5447_v32  ;;  %v5449_v36 = vld [vmem:[%s12490_s0 + $0x243] ss:$8 sm:$0xf]   ;;  %879 = vrot.lane.b32.xlu1 %v878_v34, %s6641_s22 }
  0x60   :  { %v5450_v37 = vld [vmem:[%s12490_s0 + $0x243] ss:$8 sm:$0xf0]  }
  0x61   :  { %v854_v38 = vsel %vm4_vm0, %v5450_v37, %v5449_v36  ;;  %v5465_v39 = vld [vmem:[%s12490_s0 + $0x503] ss:$8 sm:$0xf]  }
  0x62   :  { %v5466_v40 = vld [vmem:[%s12490_s0 + $0x503] ss:$8 sm:$0xf0]   ;;  %v856_v41 = vsel %vm371_vm1, %v854_v38, %v848_v35 }
  0x63   :  { %v914_v42 = vsel %vm4_vm0, %v5466_v40, %v5465_v39  ;;  %v5467_v43 = vld [vmem:[%s12490_s0 + $0x543] ss:$8 sm:$0xf]   ;;  %857 = vrot.lane.b32.xlu0 %v856_v41, %s6641_s22 }
  0x64   :  { %v5468_v44 = vld [vmem:[%s12490_s0 + $0x543] ss:$8 sm:$0xf0]  }
  0x65   :  { %v920_v45 = vsel %vm4_vm0, %v5468_v44, %v5467_v43  ;;  %v5459_v46 = vld [vmem:[%s12490_s0 + $0x403] ss:$8 sm:$0xf]  }
  0x66   :  { %v5460_v47 = vld [vmem:[%s12490_s0 + $0x403] ss:$8 sm:$0xf0]   ;;  %v922_v48 = vsel %vm371_vm1, %v920_v45, %v914_v42 }
  0x67   :  { %v892_v49 = vsel %vm4_vm0, %v5460_v47, %v5459_v46  ;;  %v5461_v50 = vld [vmem:[%s12490_s0 + $0x443] ss:$8 sm:$0xf]   ;;  %923 = vrot.lane.b32.xlu1 %v922_v48, %s6641_s22 }
  0x68   :  { %v5462_v51 = vld [vmem:[%s12490_s0 + $0x443] ss:$8 sm:$0xf0]  }
  0x69   :  { %v898_v52 = vsel %vm4_vm0, %v5462_v51, %v5461_v50  ;;  %v5477_v53 = vld [vmem:[%s12490_s0 + $0x703] ss:$8 sm:$0xf]  }
  0x6a   :  { %v5478_v54 = vld [vmem:[%s12490_s0 + $0x703] ss:$8 sm:$0xf0]   ;;  %v900_v55 = vsel %vm371_vm1, %v898_v52, %v892_v49 }
  0x6b   :  { %v958_v56 = vsel %vm4_vm0, %v5478_v54, %v5477_v53  ;;  %v5479_v57 = vld [vmem:[%s12490_s0 + $0x743] ss:$8 sm:$0xf]   ;;  %901 = vrot.lane.b32.xlu0 %v900_v55, %s6641_s22 }
  0x6c   :  { %v5480_v58 = vld [vmem:[%s12490_s0 + $0x743] ss:$8 sm:$0xf0]  }
  0x6d   :  { %v964_v59 = vsel %vm4_vm0, %v5480_v58, %v5479_v57  ;;  %v5471_v60 = vld [vmem:[%s12490_s0 + $0x603] ss:$8 sm:$0xf]  }
  0x6e   :  { %v5472_v61 = vld [vmem:[%s12490_s0 + $0x603] ss:$8 sm:$0xf0]   ;;  %v966_v62 = vsel %vm371_vm1, %v964_v59, %v958_v56 }
  0x6f   :  { %v936_v63 = vsel %vm4_vm0, %v5472_v61, %v5471_v60  ;;  %v5473_v0 = vld [vmem:[%s12490_s0 + $0x643] ss:$8 sm:$0xf]   ;;  %967 = vrot.lane.b32.xlu1 %v966_v62, %s6641_s22 }
  0x70   :  { %v5474_v1 = vld [vmem:[%s12490_s0 + $0x643] ss:$8 sm:$0xf0]  }
  0x71   :  { %v942_v2 = vsel %vm4_vm0, %v5474_v1, %v5473_v0  ;;  %v5489_v3 = vld [vmem:[%s12490_s0 + $0x903] ss:$8 sm:$0xf]  }
  0x72   :  { %v5490_v4 = vld [vmem:[%s12490_s0 + $0x903] ss:$8 sm:$0xf0]   ;;  %v944_v5 = vsel %vm371_vm1, %v942_v2, %v936_v63 }
  0x73   :  { %v1002_v6 = vsel %vm4_vm0, %v5490_v4, %v5489_v3  ;;  %v5491_v7 = vld [vmem:[%s12490_s0 + $0x943] ss:$8 sm:$0xf]   ;;  %945 = vrot.lane.b32.xlu0 %v944_v5, %s6641_s22 }
  0x74   :  { %v5492_v8 = vld [vmem:[%s12490_s0 + $0x943] ss:$8 sm:$0xf0]  }
  0x75   :  { %v1008_v9 = vsel %vm4_vm0, %v5492_v8, %v5491_v7  ;;  %v5483_v10 = vld [vmem:[%s12490_s0 + $0x803] ss:$8 sm:$0xf]  }
  0x76   :  { %v5484_v11 = vld [vmem:[%s12490_s0 + $0x803] ss:$8 sm:$0xf0]   ;;  %v1010_v12 = vsel %vm371_vm1, %v1008_v9, %v1002_v6 }
  0x77   :  { %v980_v13 = vsel %vm4_vm0, %v5484_v11, %v5483_v10  ;;  %v5485_v14 = vld [vmem:[%s12490_s0 + $0x843] ss:$8 sm:$0xf]   ;;  %1011 = vrot.lane.b32.xlu1 %v1010_v12, %s6641_s22 }
  0x78   :  { %v5486_v15 = vld [vmem:[%s12490_s0 + $0x843] ss:$8 sm:$0xf0]  }
  0x79   :  { %v986_v16 = vsel %vm4_vm0, %v5486_v15, %v5485_v14  ;;  %v5501_v17 = vld [vmem:[%s12490_s0 + $0x143] ss:$8 sm:$0xf]  }
  0x7a   :  { %v5502_v18 = vld [vmem:[%s12490_s0 + $0x143] ss:$8 sm:$0xf0]   ;;  %v988_v19 = vsel %vm371_vm1, %v986_v16, %v980_v13 }
  0x7b   :  { %v1046_v20 = vsel %vm4_vm0, %v5502_v18, %v5501_v17  ;;  %v5503_v21 = vld [vmem:[%s12490_s0 + $0x183] ss:$8 sm:$0xf]   ;;  %989 = vrot.lane.b32.xlu0 %v988_v19, %s6641_s22 }
  0x7c   :  { %v5504_v22 = vld [vmem:[%s12490_s0 + $0x183] ss:$8 sm:$0xf0]  }
  0x7d   :  { %v1052_v23 = vsel %vm4_vm0, %v5504_v22, %v5503_v21  ;;  %v5495_v24 = vld [vmem:[%s12490_s0 + $0x43] ss:$8 sm:$0xf]  }
  0x7e   :  { %v5496_v25 = vld [vmem:[%s12490_s0 + $0x43] ss:$8 sm:$0xf0]   ;;  %v1054_v26 = vsel %vm371_vm1, %v1052_v23, %v1046_v20  ;;  %v5561_v23 = vld [vmem:[%s12490_s0 + $0x106] ss:$8 sm:$0xf]  }
  0x7f   :  { %v1024_v27 = vsel %vm4_vm0, %v5496_v25, %v5495_v24  ;;  %v5497_v28 = vld [vmem:[%s12490_s0 + $0x83] ss:$8 sm:$0xf]   ;;  %1055 = vrot.lane.b32.xlu1 %v1054_v26, %s6641_s22  ;;  %v5562_v24 = vld [vmem:[%s12490_s0 + $0x106] ss:$8 sm:$0xf0]  }
  0x80   :  { %v5498_v29 = vld [vmem:[%s12490_s0 + $0x83] ss:$8 sm:$0xf0]   ;;  %v1266_v26 = vsel %vm4_vm0, %v5562_v24, %v5561_v23  ;;  %v5604_v23 = vld [vmem:[%s12490_s0 + $0x806] ss:$8 sm:$0xf0]  }
  0x81   :  { %v1030_v30 = vsel %vm4_vm0, %v5498_v29, %v5497_v28  ;;  %v5513_v31 = vld [vmem:[%s12490_s0 + $0x343] ss:$8 sm:$0xf]   ;;  %v5564_v28 = vld [vmem:[%s12490_s0 + $0x146] ss:$8 sm:$0xf0]  }
  0x82   :  { %v5514_v32 = vld [vmem:[%s12490_s0 + $0x343] ss:$8 sm:$0xf0]   ;;  %v1032_v33 = vsel %vm371_vm1, %v1030_v30, %v1024_v27  ;;  %v5563_v27 = vld [vmem:[%s12490_s0 + $0x146] ss:$8 sm:$0xf]  }
  0x83   :  { %v1090_v34 = vsel %vm4_vm0, %v5514_v32, %v5513_v31  ;;  %v5515_v35 = vld [vmem:[%s12490_s0 + $0x383] ss:$8 sm:$0xf]   ;;  %1033 = vrot.lane.b32.xlu0 %v1032_v33, %s6641_s22  ;;  %v1272_v29 = vsel %vm4_vm0, %v5564_v28, %v5563_v27  ;;  %v5555_v30 = vld [vmem:[%s12490_s0 + $0x6] ss:$8 sm:$0xf]  }
  0x84   :  { %v5516_v36 = vld [vmem:[%s12490_s0 + $0x383] ss:$8 sm:$0xf0]   ;;  %v5556_v31 = vld [vmem:[%s12490_s0 + $0x6] ss:$8 sm:$0xf0]   ;;  %v1274_v32 = vsel %vm1251_vm2, %v1272_v29, %v1266_v26 }
  0x85   :  { %v1096_v37 = vsel %vm4_vm0, %v5516_v36, %v5515_v35  ;;  %v5507_v38 = vld [vmem:[%s12490_s0 + $0x243] ss:$8 sm:$0xf]   ;;  %v1244_v33 = vsel %vm4_vm0, %v5556_v31, %v5555_v30  ;;  %v5558_v35 = vld [vmem:[%s12490_s0 + $0x46] ss:$8 sm:$0xf0]  }
  0x86   :  { %v5508_v39 = vld [vmem:[%s12490_s0 + $0x243] ss:$8 sm:$0xf0]   ;;  %v1098_v40 = vsel %vm371_vm1, %v1096_v37, %v1090_v34  ;;  %v5557_v34 = vld [vmem:[%s12490_s0 + $0x46] ss:$8 sm:$0xf]  }
  0x87   :  { %v1068_v41 = vsel %vm4_vm0, %v5508_v39, %v5507_v38  ;;  %v5509_v42 = vld [vmem:[%s12490_s0 + $0x283] ss:$8 sm:$0xf]   ;;  %1099 = vrot.lane.b32.xlu1 %v1098_v40, %s6641_s22  ;;  %v1250_v36 = vsel %vm4_vm0, %v5558_v35, %v5557_v34  ;;  %v5573_v37 = vld [vmem:[%s12490_s0 + $0x306] ss:$8 sm:$0xf]  }
  0x88   :  { %v5510_v43 = vld [vmem:[%s12490_s0 + $0x283] ss:$8 sm:$0xf0]   ;;  %v5574_v38 = vld [vmem:[%s12490_s0 + $0x306] ss:$8 sm:$0xf0]   ;;  %v1252_v39 = vsel %vm1251_vm2, %v1250_v36, %v1244_v33 }
  0x89   :  { %v1074_v44 = vsel %vm4_vm0, %v5510_v43, %v5509_v42  ;;  %v5525_v45 = vld [vmem:[%s12490_s0 + $0x543] ss:$8 sm:$0xf]   ;;  %v1310_v40 = vsel %vm4_vm0, %v5574_v38, %v5573_v37  ;;  %v5576_v42 = vld [vmem:[%s12490_s0 + $0x346] ss:$8 sm:$0xf0]  }
  0x8a   :  { %v5526_v46 = vld [vmem:[%s12490_s0 + $0x543] ss:$8 sm:$0xf0]   ;;  %v1076_v47 = vsel %vm371_vm1, %v1074_v44, %v1068_v41  ;;  %v5575_v41 = vld [vmem:[%s12490_s0 + $0x346] ss:$8 sm:$0xf]  }
  0x8b   :  { %v1134_v48 = vsel %vm4_vm0, %v5526_v46, %v5525_v45  ;;  %v5527_v49 = vld [vmem:[%s12490_s0 + $0x583] ss:$8 sm:$0xf]   ;;  %1077 = vrot.lane.b32.xlu0 %v1076_v47, %s6641_s22  ;;  %v1316_v43 = vsel %vm4_vm0, %v5576_v42, %v5575_v41  ;;  %v5567_v44 = vld [vmem:[%s12490_s0 + $0x206] ss:$8 sm:$0xf]  }
  0x8c   :  { %v5528_v50 = vld [vmem:[%s12490_s0 + $0x583] ss:$8 sm:$0xf0]   ;;  %v5568_v45 = vld [vmem:[%s12490_s0 + $0x206] ss:$8 sm:$0xf0]   ;;  %v1318_v46 = vsel %vm1251_vm2, %v1316_v43, %v1310_v40 }
  0x8d   :  { %v1140_v51 = vsel %vm4_vm0, %v5528_v50, %v5527_v49  ;;  %v5519_v52 = vld [vmem:[%s12490_s0 + $0x443] ss:$8 sm:$0xf]   ;;  %v1288_v47 = vsel %vm4_vm0, %v5568_v45, %v5567_v44  ;;  %v5570_v49 = vld [vmem:[%s12490_s0 + $0x246] ss:$8 sm:$0xf0]  }
  0x8e   :  { %v5520_v53 = vld [vmem:[%s12490_s0 + $0x443] ss:$8 sm:$0xf0]   ;;  %v1142_v54 = vsel %vm371_vm1, %v1140_v51, %v1134_v48  ;;  %v5569_v48 = vld [vmem:[%s12490_s0 + $0x246] ss:$8 sm:$0xf]  }
  0x8f   :  { %v1112_v55 = vsel %vm4_vm0, %v5520_v53, %v5519_v52  ;;  %v5521_v56 = vld [vmem:[%s12490_s0 + $0x483] ss:$8 sm:$0xf]   ;;  %1143 = vrot.lane.b32.xlu1 %v1142_v54, %s6641_s22  ;;  %v1294_v50 = vsel %vm4_vm0, %v5570_v49, %v5569_v48  ;;  %v5585_v51 = vld [vmem:[%s12490_s0 + $0x506] ss:$8 sm:$0xf]  }
  0x90   :  { %v5522_v57 = vld [vmem:[%s12490_s0 + $0x483] ss:$8 sm:$0xf0]   ;;  %v5586_v52 = vld [vmem:[%s12490_s0 + $0x506] ss:$8 sm:$0xf0]   ;;  %v1296_v53 = vsel %vm1251_vm2, %v1294_v50, %v1288_v47 }
  0x91   :  { %v1118_v58 = vsel %vm4_vm0, %v5522_v57, %v5521_v56  ;;  %v5537_v59 = vld [vmem:[%s12490_s0 + $0x743] ss:$8 sm:$0xf]   ;;  %v1354_v54 = vsel %vm4_vm0, %v5586_v52, %v5585_v51  ;;  %v5588_v56 = vld [vmem:[%s12490_s0 + $0x546] ss:$8 sm:$0xf0]  }
  0x92   :  { %v5538_v60 = vld [vmem:[%s12490_s0 + $0x743] ss:$8 sm:$0xf0]   ;;  %v1120_v61 = vsel %vm371_vm1, %v1118_v58, %v1112_v55  ;;  %v5587_v55 = vld [vmem:[%s12490_s0 + $0x546] ss:$8 sm:$0xf]  }
  0x93   :  { %v1178_v62 = vsel %vm4_vm0, %v5538_v60, %v5537_v59  ;;  %v5539_v63 = vld [vmem:[%s12490_s0 + $0x783] ss:$8 sm:$0xf]   ;;  %1121 = vrot.lane.b32.xlu0 %v1120_v61, %s6641_s22  ;;  %v1360_v57 = vsel %vm4_vm0, %v5588_v56, %v5587_v55  ;;  %v5579_v58 = vld [vmem:[%s12490_s0 + $0x406] ss:$8 sm:$0xf]  }
  0x94   :  { %v5540_v0 = vld [vmem:[%s12490_s0 + $0x783] ss:$8 sm:$0xf0]   ;;  %v5580_v59 = vld [vmem:[%s12490_s0 + $0x406] ss:$8 sm:$0xf0]   ;;  %v1362_v60 = vsel %vm1251_vm2, %v1360_v57, %v1354_v54 }
  0x95   :  { %v1184_v1 = vsel %vm4_vm0, %v5540_v0, %v5539_v63  ;;  %v5531_v2 = vld [vmem:[%s12490_s0 + $0x643] ss:$8 sm:$0xf]   ;;  %v1332_v61 = vsel %vm4_vm0, %v5580_v59, %v5579_v58  ;;  %v5582_v63 = vld [vmem:[%s12490_s0 + $0x446] ss:$8 sm:$0xf0]  }
  0x96   :  { %v5532_v3 = vld [vmem:[%s12490_s0 + $0x643] ss:$8 sm:$0xf0]   ;;  %v1186_v4 = vsel %vm371_vm1, %v1184_v1, %v1178_v62  ;;  %v5581_v62 = vld [vmem:[%s12490_s0 + $0x446] ss:$8 sm:$0xf]  }
  0x97   :  { %v1156_v5 = vsel %vm4_vm0, %v5532_v3, %v5531_v2  ;;  %v5533_v6 = vld [vmem:[%s12490_s0 + $0x683] ss:$8 sm:$0xf]   ;;  %1187 = vrot.lane.b32.xlu1 %v1186_v4, %s6641_s22  ;;  %v1338_v0 = vsel %vm4_vm0, %v5582_v63, %v5581_v62  ;;  %v5597_v1 = vld [vmem:[%s12490_s0 + $0x706] ss:$8 sm:$0xf]  }
  0x98   :  { %v5534_v7 = vld [vmem:[%s12490_s0 + $0x683] ss:$8 sm:$0xf0]   ;;  %v5598_v2 = vld [vmem:[%s12490_s0 + $0x706] ss:$8 sm:$0xf0]   ;;  %v1340_v3 = vsel %vm1251_vm2, %v1338_v0, %v1332_v61 }
  0x99   :  { %v1162_v8 = vsel %vm4_vm0, %v5534_v7, %v5533_v6  ;;  %v5549_v9 = vld [vmem:[%s12490_s0 + $0x943] ss:$8 sm:$0xf]   ;;  %v1398_v4 = vsel %vm4_vm0, %v5598_v2, %v5597_v1  ;;  %v5600_v6 = vld [vmem:[%s12490_s0 + $0x746] ss:$8 sm:$0xf0]  }
  0x9a   :  { %v5550_v10 = vld [vmem:[%s12490_s0 + $0x943] ss:$8 sm:$0xf0]   ;;  %v1164_v11 = vsel %vm371_vm1, %v1162_v8, %v1156_v5  ;;  %v5599_v5 = vld [vmem:[%s12490_s0 + $0x746] ss:$8 sm:$0xf]  }
  0x9b   :  { %v1222_v12 = vsel %vm4_vm0, %v5550_v10, %v5549_v9  ;;  %v5551_v13 = vld [vmem:[%s12490_s0 + $0x983] ss:$8 sm:$0xf]   ;;  %1165 = vrot.lane.b32.xlu0 %v1164_v11, %s6641_s22  ;;  %v1404_v7 = vsel %vm4_vm0, %v5600_v6, %v5599_v5  ;;  %v5591_v8 = vld [vmem:[%s12490_s0 + $0x606] ss:$8 sm:$0xf]  }
  0x9c   :  { %v5552_v14 = vld [vmem:[%s12490_s0 + $0x983] ss:$8 sm:$0xf0]   ;;  %v5592_v9 = vld [vmem:[%s12490_s0 + $0x606] ss:$8 sm:$0xf0]   ;;  %v1406_v10 = vsel %vm1251_vm2, %v1404_v7, %v1398_v4 }
  0x9d   :  { %v1228_v15 = vsel %vm4_vm0, %v5552_v14, %v5551_v13  ;;  %v5543_v16 = vld [vmem:[%s12490_s0 + $0x843] ss:$8 sm:$0xf]   ;;  %v1376_v11 = vsel %vm4_vm0, %v5592_v9, %v5591_v8  ;;  %v5594_v13 = vld [vmem:[%s12490_s0 + $0x646] ss:$8 sm:$0xf0]  }
  0x9e   :  { %v5544_v17 = vld [vmem:[%s12490_s0 + $0x843] ss:$8 sm:$0xf0]   ;;  %v1230_v18 = vsel %vm371_vm1, %v1228_v15, %v1222_v12  ;;  %v5593_v12 = vld [vmem:[%s12490_s0 + $0x646] ss:$8 sm:$0xf]  }
  0x9f   :  { %v1200_v19 = vsel %vm4_vm0, %v5544_v17, %v5543_v16  ;;  %v5545_v20 = vld [vmem:[%s12490_s0 + $0x883] ss:$8 sm:$0xf]   ;;  %1231 = vrot.lane.b32.xlu1 %v1230_v18, %s6641_s22  ;;  %v1382_v14 = vsel %vm4_vm0, %v5594_v13, %v5593_v12  ;;  %v5609_v15 = vld [vmem:[%s12490_s0 + $0x906] ss:$8 sm:$0xf]  }
  0xa0   :  { %v5546_v21 = vld [vmem:[%s12490_s0 + $0x883] ss:$8 sm:$0xf0]   ;;  %v5610_v16 = vld [vmem:[%s12490_s0 + $0x906] ss:$8 sm:$0xf0]   ;;  %v1384_v17 = vsel %vm1251_vm2, %v1382_v14, %v1376_v11 }
  0xa1   :  { %v1206_v22 = vsel %vm4_vm0, %v5546_v21, %v5545_v20  ;;  %v1442_v18 = vsel %vm4_vm0, %v5610_v16, %v5609_v15  ;;  %v5612_v20 = vld [vmem:[%s12490_s0 + $0x946] ss:$8 sm:$0xf0]  }
  0xa2   :  { %v1208_v25 = vsel %vm371_vm1, %v1206_v22, %v1200_v19  ;;  %v5611_v19 = vld [vmem:[%s12490_s0 + $0x946] ss:$8 sm:$0xf]  }
  0xa3   :  { %1209 = vrot.lane.b32.xlu0 %v1208_v25, %s6641_s22  ;;  %1275 = vrot.lane.b32.xlu1 %v1274_v32, %s6642_s5  ;;  %v1448_v21 = vsel %vm4_vm0, %v5612_v20, %v5611_v19  ;;  %v5603_v22 = vld [vmem:[%s12490_s0 + $0x806] ss:$8 sm:$0xf]  }
  0xa4   :  { %v1450_v24 = vsel %vm1251_vm2, %v1448_v21, %v1442_v18  ;;  %v1420_v25 = vsel %vm4_vm0, %v5604_v23, %v5603_v22  ;;  %v5605_v26 = vld [vmem:[%s12490_s0 + $0x846] ss:$8 sm:$0xf]  }
  0xa5   :  { %v5606_v27 = vld [vmem:[%s12490_s0 + $0x846] ss:$8 sm:$0xf0]  }
  0xa6   :  { %v1426_v28 = vsel %vm4_vm0, %v5606_v27, %v5605_v26  ;;  %v5621_v29 = vld [vmem:[%s12490_s0 + $0x146] ss:$8 sm:$0xf]  }
  0xa7   :  { %1253 = vrot.lane.b32.xlu0 %v1252_v39, %s6642_s5  ;;  %1319 = vrot.lane.b32.xlu1 %v1318_v46, %s6642_s5  ;;  %v5622_v30 = vld [vmem:[%s12490_s0 + $0x146] ss:$8 sm:$0xf0]   ;;  %v1428_v31 = vsel %vm1251_vm2, %v1426_v28, %v1420_v25  ;;  %v418_v25 = vpop.permute.xlu1 %417  }
  0xa8   :  { %v1486_v32 = vsel %vm4_vm0, %v5622_v30, %v5621_v29  ;;  %v5623_v33 = vld [vmem:[%s12490_s0 + $0x186] ss:$8 sm:$0xf]   ;;  %5331 = vst.msk [vmem:[%s12491_s1 + $0x1a0] sm:$0xff] %vm375_vm3, %v418_v25  }
  0xa9   :  { %v5624_v34 = vld [vmem:[%s12490_s0 + $0x186] ss:$8 sm:$0xf0]   ;;  %5332 = vst.msk [vmem:[%s12491_s1 + $0x1c0] sm:$0xff] %vm378_vm4, %v418_v25  }
  0xaa   :  { %v1492_v35 = vsel %vm4_vm0, %v5624_v34, %v5623_v33  ;;  %v5615_v36 = vld [vmem:[%s12490_s0 + $0x46] ss:$8 sm:$0xf]  }
  0xab   :  { %1297 = vrot.lane.b32.xlu0 %v1296_v53, %s6642_s5  ;;  %1363 = vrot.lane.b32.xlu1 %v1362_v60, %s6642_s5  ;;  %v5616_v37 = vld [vmem:[%s12490_s0 + $0x46] ss:$8 sm:$0xf0]   ;;  %v1494_v38 = vsel %vm1251_vm2, %v1492_v35, %v1486_v32  ;;  %v374_v32 = vpop.permute.xlu0 %373  }
  0xac   :  { %v1464_v39 = vsel %vm4_vm0, %v5616_v37, %v5615_v36  ;;  %v5617_v40 = vld [vmem:[%s12490_s0 + $0x86] ss:$8 sm:$0xf]   ;;  %5319 = vst.msk [vmem:[%s12491_s1 + $0x60] sm:$0xff] %vm375_vm3, %v374_v32  }
  0xad   :  { %v5618_v41 = vld [vmem:[%s12490_s0 + $0x86] ss:$8 sm:$0xf0]   ;;  %5320 = vst.msk [vmem:[%s12491_s1 + $0x80] sm:$0xff] %vm378_vm4, %v374_v32  }
  0xae   :  { %v1470_v42 = vsel %vm4_vm0, %v5618_v41, %v5617_v40  ;;  %v5633_v43 = vld [vmem:[%s12490_s0 + $0x346] ss:$8 sm:$0xf]   ;;  %v440_v41 = vpop.permute.xlu1 %439  }
  0xaf   :  { %1341 = vrot.lane.b32.xlu0 %v1340_v3, %s6642_s5  ;;  %1407 = vrot.lane.b32.xlu1 %v1406_v10, %s6642_s5  ;;  %v5634_v44 = vld [vmem:[%s12490_s0 + $0x346] ss:$8 sm:$0xf0]   ;;  %v1472_v45 = vsel %vm1251_vm2, %v1470_v42, %v1464_v39  ;;  %5337 = vst.msk [vmem:[%s12491_s1 + $0x240] sm:$0xff] %vm375_vm3, %v440_v41  }
  0xb0   :  { %v1530_v46 = vsel %vm4_vm0, %v5634_v44, %v5633_v43  ;;  %v5635_v47 = vld [vmem:[%s12490_s0 + $0x386] ss:$8 sm:$0xf]   ;;  %5338 = vst.msk [vmem:[%s12491_s1 + $0x260] sm:$0xff] %vm378_vm4, %v440_v41  }
  0xb1   :  { %v5636_v48 = vld [vmem:[%s12490_s0 + $0x386] ss:$8 sm:$0xf0]  }
  0xb2   :  { %v1536_v49 = vsel %vm4_vm0, %v5636_v48, %v5635_v47  ;;  %v5627_v50 = vld [vmem:[%s12490_s0 + $0x246] ss:$8 sm:$0xf]   ;;  %v396_v48 = vpop.permute.xlu0 %395  }
  0xb3   :  { %1385 = vrot.lane.b32.xlu0 %v1384_v17, %s6642_s5  ;;  %1451 = vrot.lane.b32.xlu1 %v1450_v24, %s6642_s5  ;;  %v5628_v51 = vld [vmem:[%s12490_s0 + $0x246] ss:$8 sm:$0xf0]   ;;  %v1538_v52 = vsel %vm1251_vm2, %v1536_v49, %v1530_v46  ;;  %5325 = vst.msk [vmem:[%s12491_s1 + $0x100] sm:$0xff] %vm375_vm3, %v396_v48  }
  0xb4   :  { %v1508_v53 = vsel %vm4_vm0, %v5628_v51, %v5627_v50  ;;  %v5629_v54 = vld [vmem:[%s12490_s0 + $0x286] ss:$8 sm:$0xf]   ;;  %5326 = vst.msk [vmem:[%s12491_s1 + $0x120] sm:$0xff] %vm378_vm4, %v396_v48  }
  0xb5   :  { %v5630_v55 = vld [vmem:[%s12490_s0 + $0x286] ss:$8 sm:$0xf0]  }
  0xb6   :  { %v1514_v56 = vsel %vm4_vm0, %v5630_v55, %v5629_v54  ;;  %v5645_v57 = vld [vmem:[%s12490_s0 + $0x546] ss:$8 sm:$0xf]  }
  0xb7   :  { %1429 = vrot.lane.b32.xlu0 %v1428_v31, %s6642_s5  ;;  %1495 = vrot.lane.b32.xlu1 %v1494_v38, %s6642_s5  ;;  %v5646_v58 = vld [vmem:[%s12490_s0 + $0x546] ss:$8 sm:$0xf0]   ;;  %v1516_v59 = vsel %vm1251_vm2, %v1514_v56, %v1508_v53 }
  0xb8   :  { %v1574_v60 = vsel %vm4_vm0, %v5646_v58, %v5645_v57  ;;  %v5647_v61 = vld [vmem:[%s12490_s0 + $0x586] ss:$8 sm:$0xf]   ;;  %v484_v57 = vpop.permute.xlu1 %483  }
  0xb9   :  { %v5648_v62 = vld [vmem:[%s12490_s0 + $0x586] ss:$8 sm:$0xf0]   ;;  %5349 = vst.msk [vmem:[%s12491_s1 + $0x380] sm:$0xff] %vm375_vm3, %v484_v57  }
  0xba   :  { %v1580_v63 = vsel %vm4_vm0, %v5648_v62, %v5647_v61  ;;  %v5639_v0 = vld [vmem:[%s12490_s0 + $0x446] ss:$8 sm:$0xf]   ;;  %5350 = vst.msk [vmem:[%s12491_s1 + $0x3a0] sm:$0xff] %vm378_vm4, %v484_v57  }
  0xbb   :  { %1473 = vrot.lane.b32.xlu0 %v1472_v45, %s6642_s5  ;;  %1539 = vrot.lane.b32.xlu1 %v1538_v52, %s6642_s5  ;;  %v5640_v1 = vld [vmem:[%s12490_s0 + $0x446] ss:$8 sm:$0xf0]   ;;  %v1582_v2 = vsel %vm1251_vm2, %v1580_v63, %v1574_v60 }
  0xbc   :  { %v1552_v3 = vsel %vm4_vm0, %v5640_v1, %v5639_v0  ;;  %v5641_v4 = vld [vmem:[%s12490_s0 + $0x486] ss:$8 sm:$0xf]   ;;  %v462_v0 = vpop.permute.xlu0 %461  }
  0xbd   :  { %v5642_v5 = vld [vmem:[%s12490_s0 + $0x486] ss:$8 sm:$0xf0]   ;;  %5343 = vst.msk [vmem:[%s12491_s1 + $0x2e0] sm:$0xff] %vm375_vm3, %v462_v0  }
  0xbe   :  { %v1558_v6 = vsel %vm4_vm0, %v5642_v5, %v5641_v4  ;;  %v5657_v7 = vld [vmem:[%s12490_s0 + $0x746] ss:$8 sm:$0xf]   ;;  %5344 = vst.msk [vmem:[%s12491_s1 + $0x300] sm:$0xff] %vm378_vm4, %v462_v0  }
  0xbf   :  { %1517 = vrot.lane.b32.xlu0 %v1516_v59, %s6642_s5  ;;  %1583 = vrot.lane.b32.xlu1 %v1582_v2, %s6642_s5  ;;  %v5658_v8 = vld [vmem:[%s12490_s0 + $0x746] ss:$8 sm:$0xf0]   ;;  %v1560_v9 = vsel %vm1251_vm2, %v1558_v6, %v1552_v3 }
  0xc0   :  { %v1618_v10 = vsel %vm4_vm0, %v5658_v8, %v5657_v7  ;;  %v5659_v11 = vld [vmem:[%s12490_s0 + $0x786] ss:$8 sm:$0xf]  }
  0xc1   :  { %v5660_v12 = vld [vmem:[%s12490_s0 + $0x786] ss:$8 sm:$0xf0]  }
  0xc2   :  { %v1624_v13 = vsel %vm4_vm0, %v5660_v12, %v5659_v11  ;;  %v5651_v14 = vld [vmem:[%s12490_s0 + $0x646] ss:$8 sm:$0xf]  }
  0xc3   :  { %1561 = vrot.lane.b32.xlu0 %v1560_v9, %s6642_s5  ;;  %v5652_v15 = vld [vmem:[%s12490_s0 + $0x646] ss:$8 sm:$0xf0]   ;;  %v1626_v16 = vsel %vm1251_vm2, %v1624_v13, %v1618_v10  ;;  %v528_v9 = vpop.permute.xlu1 %527  }
  0xc4   :  { %v1596_v17 = vsel %vm4_vm0, %v5652_v15, %v5651_v14  ;;  %v5653_v18 = vld [vmem:[%s12490_s0 + $0x686] ss:$8 sm:$0xf]   ;;  %1627 = vrot.lane.b32.xlu1 %v1626_v16, %s6642_s5  ;;  %5361 = vst.msk [vmem:[%s12491_s1 + $0x4c0] sm:$0xff] %vm375_vm3, %v528_v9   ;;  %v506_v16 = vpop.permute.xlu0 %505  }
  0xc5   :  { %v5654_v19 = vld [vmem:[%s12490_s0 + $0x686] ss:$8 sm:$0xf0]   ;;  %5362 = vst.msk [vmem:[%s12491_s1 + $0x4e0] sm:$0xff] %vm378_vm4, %v528_v9   ;;  %5356 = vst.msk [vmem:[%s12491_s1 + $0x440] sm:$0xff] %vm378_vm4, %v506_v16  }
  0xc6   :  { %v1602_v20 = vsel %vm4_vm0, %v5654_v19, %v5653_v18  ;;  %v5669_v21 = vld [vmem:[%s12490_s0 + $0x946] ss:$8 sm:$0xf]   ;;  %5355 = vst.msk [vmem:[%s12491_s1 + $0x420] sm:$0xff] %vm375_vm3, %v506_v16  }
  0xc7   :  { %v1604_v22 = vsel %vm1251_vm2, %v1602_v20, %v1596_v17  ;;  %v5670_v23 = vld [vmem:[%s12490_s0 + $0x946] ss:$8 sm:$0xf0]   ;;  %v572_v25 = vpop.permute.xlu1 %571  }
  0xc8   :  { %v5671_v24 = vld [vmem:[%s12490_s0 + $0x986] ss:$8 sm:$0xf]   ;;  %1605 = vrot.lane.b32.xlu0 %v1604_v22, %s6642_s5  ;;  %v1662_v26 = vsel %vm4_vm0, %v5670_v23, %v5669_v21  ;;  %5373 = vst.msk [vmem:[%s12491_s1 + $0x600] sm:$0xff] %vm375_vm3, %v572_v25   ;;  %v550_v32 = vpop.permute.xlu0 %549  }
  0xc9   :  { %v5672_v27 = vld [vmem:[%s12490_s0 + $0x986] ss:$8 sm:$0xf0]   ;;  %5374 = vst.msk [vmem:[%s12491_s1 + $0x620] sm:$0xff] %vm378_vm4, %v572_v25   ;;  %5368 = vst.msk [vmem:[%s12491_s1 + $0x580] sm:$0xff] %vm378_vm4, %v550_v32  }
  0xca   :  { %v5663_v28 = vld [vmem:[%s12490_s0 + $0x846] ss:$8 sm:$0xf]   ;;  %v1668_v29 = vsel %vm4_vm0, %v5672_v27, %v5671_v24  ;;  %5367 = vst.msk [vmem:[%s12491_s1 + $0x560] sm:$0xff] %vm375_vm3, %v550_v32  }
  0xcb   :  { %v5664_v30 = vld [vmem:[%s12490_s0 + $0x846] ss:$8 sm:$0xf0]   ;;  %v1670_v33 = vsel %vm1251_vm2, %v1668_v29, %v1662_v26  ;;  %v616_v41 = vpop.permute.xlu1 %615  }
  0xcc   :  { %v5665_v31 = vld [vmem:[%s12490_s0 + $0x886] ss:$8 sm:$0xf]   ;;  %v1640_v34 = vsel %vm4_vm0, %v5664_v30, %v5663_v28  ;;  %1671 = vrot.lane.b32.xlu1 %v1670_v33, %s6642_s5  ;;  %5385 = vst.msk [vmem:[%s12491_s1 + $0x128] sm:$0xff] %vm375_vm3, %v616_v41   ;;  %v594_v48 = vpop.permute.xlu0 %593  }
  0xcd   :  { %v5666_v35 = vld [vmem:[%s12490_s0 + $0x886] ss:$8 sm:$0xf0]   ;;  %5386 = vst.msk [vmem:[%s12491_s1 + $0xa8] sm:$0xff] %vm378_vm4, %v616_v41   ;;  %5380 = vst.msk [vmem:[%s12491_s1 + $0x8] sm:$0xff] %vm378_vm4, %v594_v48  }
  0xce   :  { %v5681_v36 = vld [vmem:[%s12490_s0 + $0x186] ss:$8 sm:$0xf]   ;;  %v1646_v37 = vsel %vm4_vm0, %v5666_v35, %v5665_v31  ;;  %5379 = vst.msk [vmem:[%s12491_s1 + $0x88] sm:$0xff] %vm375_vm3, %v594_v48  }
  0xcf   :  { %v5682_v38 = vld [vmem:[%s12490_s0 + $0x186] ss:$8 sm:$0xf0]   ;;  %v1648_v40 = vsel %vm1251_vm2, %v1646_v37, %v1640_v34  ;;  %v660_v57 = vpop.permute.xlu1 %659  }
  0xd0   :  { %v5683_v39 = vld [vmem:[%s12490_s0 + $0x1c6] ss:$8 sm:$0xf]   ;;  %v1706_v42 = vsel %vm4_vm0, %v5682_v38, %v5681_v36  ;;  %1649 = vrot.lane.b32.xlu0 %v1648_v40, %s6642_s5  ;;  %5397 = vst.msk [vmem:[%s12491_s1 + $0x268] sm:$0xff] %vm375_vm3, %v660_v57   ;;  %v638_v0 = vpop.permute.xlu0 %637  }
  0xd1   :  { %v5684_v43 = vld [vmem:[%s12490_s0 + $0x1c6] ss:$8 sm:$0xf0]   ;;  %5398 = vst.msk [vmem:[%s12491_s1 + $0x1e8] sm:$0xff] %vm378_vm4, %v660_v57   ;;  %5392 = vst.msk [vmem:[%s12491_s1 + $0x148] sm:$0xff] %vm378_vm4, %v638_v0  }
  0xd2   :  { %v5675_v44 = vld [vmem:[%s12490_s0 + $0x86] ss:$8 sm:$0xf]   ;;  %v1712_v45 = vsel %vm4_vm0, %v5684_v43, %v5683_v39  ;;  %5391 = vst.msk [vmem:[%s12491_s1 + $0x1c8] sm:$0xff] %vm375_vm3, %v638_v0  }
  0xd3   :  { %v5676_v46 = vld [vmem:[%s12490_s0 + $0x86] ss:$8 sm:$0xf0]   ;;  %v1714_v49 = vsel %vm1251_vm2, %v1712_v45, %v1706_v42  ;;  %v704_v9 = vpop.permute.xlu1 %703  }
  0xd4   :  { %v5677_v47 = vld [vmem:[%s12490_s0 + $0xc6] ss:$8 sm:$0xf]   ;;  %v1684_v50 = vsel %vm4_vm0, %v5676_v46, %v5675_v44  ;;  %1715 = vrot.lane.b32.xlu1 %v1714_v49, %s6642_s5  ;;  %5409 = vst.msk [vmem:[%s12491_s1 + $0x3a8] sm:$0xff] %vm375_vm3, %v704_v9   ;;  %v682_v16 = vpop.permute.xlu0 %681  }
  0xd5   :  { %v5678_v51 = vld [vmem:[%s12490_s0 + $0xc6] ss:$8 sm:$0xf0]   ;;  %5410 = vst.msk [vmem:[%s12491_s1 + $0x328] sm:$0xff] %vm378_vm4, %v704_v9   ;;  %5404 = vst.msk [vmem:[%s12491_s1 + $0x288] sm:$0xff] %vm378_vm4, %v682_v16  }
  0xd6   :  { %v5693_v52 = vld [vmem:[%s12490_s0 + $0x386] ss:$8 sm:$0xf]   ;;  %v1690_v53 = vsel %vm4_vm0, %v5678_v51, %v5677_v47  ;;  %5403 = vst.msk [vmem:[%s12491_s1 + $0x308] sm:$0xff] %vm375_vm3, %v682_v16  }
  0xd7   :  { %v5694_v54 = vld [vmem:[%s12490_s0 + $0x386] ss:$8 sm:$0xf0]   ;;  %v1692_v56 = vsel %vm1251_vm2, %v1690_v53, %v1684_v50  ;;  %v748_v25 = vpop.permute.xlu1 %747  }
  0xd8   :  { %v5695_v55 = vld [vmem:[%s12490_s0 + $0x3c6] ss:$8 sm:$0xf]   ;;  %v1750_v58 = vsel %vm4_vm0, %v5694_v54, %v5693_v52  ;;  %1693 = vrot.lane.b32.xlu0 %v1692_v56, %s6642_s5  ;;  %5421 = vst.msk [vmem:[%s12491_s1 + $0x4e8] sm:$0xff] %vm375_vm3, %v748_v25   ;;  %v726_v32 = vpop.permute.xlu0 %725  }
  0xd9   :  { %v5696_v59 = vld [vmem:[%s12490_s0 + $0x3c6] ss:$8 sm:$0xf0]   ;;  %5422 = vst.msk [vmem:[%s12491_s1 + $0x468] sm:$0xff] %vm378_vm4, %v748_v25   ;;  %5416 = vst.msk [vmem:[%s12491_s1 + $0x3c8] sm:$0xff] %vm378_vm4, %v726_v32  }
  0xda   :  { %v5687_v60 = vld [vmem:[%s12490_s0 + $0x286] ss:$8 sm:$0xf]   ;;  %v1756_v61 = vsel %vm4_vm0, %v5696_v59, %v5695_v55  ;;  %5415 = vst.msk [vmem:[%s12491_s1 + $0x448] sm:$0xff] %vm375_vm3, %v726_v32  }
  0xdb   :  { %v5688_v62 = vld [vmem:[%s12490_s0 + $0x286] ss:$8 sm:$0xf0]   ;;  %v1758_v1 = vsel %vm1251_vm2, %v1756_v61, %v1750_v58  ;;  %v792_v41 = vpop.permute.xlu1 %791  }
  0xdc   :  { %v5689_v63 = vld [vmem:[%s12490_s0 + $0x2c6] ss:$8 sm:$0xf]   ;;  %v1728_v2 = vsel %vm4_vm0, %v5688_v62, %v5687_v60  ;;  %1759 = vrot.lane.b32.xlu1 %v1758_v1, %s6642_s5  ;;  %5433 = vst.msk [vmem:[%s12491_s1 + $0x628] sm:$0xff] %vm375_vm3, %v792_v41   ;;  %v770_v48 = vpop.permute.xlu0 %769  }
  0xdd   :  { %v5690_v3 = vld [vmem:[%s12490_s0 + $0x2c6] ss:$8 sm:$0xf0]   ;;  %5434 = vst.msk [vmem:[%s12491_s1 + $0x5a8] sm:$0xff] %vm378_vm4, %v792_v41   ;;  %5428 = vst.msk [vmem:[%s12491_s1 + $0x508] sm:$0xff] %vm378_vm4, %v770_v48  }
  0xde   :  { %v5705_v4 = vld [vmem:[%s12490_s0 + $0x586] ss:$8 sm:$0xf]   ;;  %v1734_v5 = vsel %vm4_vm0, %v5690_v3, %v5689_v63  ;;  %5427 = vst.msk [vmem:[%s12491_s1 + $0x588] sm:$0xff] %vm375_vm3, %v770_v48  }
  0xdf   :  { %v5706_v6 = vld [vmem:[%s12490_s0 + $0x586] ss:$8 sm:$0xf0]   ;;  %v1736_v8 = vsel %vm1251_vm2, %v1734_v5, %v1728_v2  ;;  %v836_v57 = vpop.permute.xlu1 %835  }
  0xe0   :  { %v5707_v7 = vld [vmem:[%s12490_s0 + $0x5c6] ss:$8 sm:$0xf]   ;;  %v1794_v10 = vsel %vm4_vm0, %v5706_v6, %v5705_v4  ;;  %1737 = vrot.lane.b32.xlu0 %v1736_v8, %s6642_s5  ;;  %5445 = vst.msk [vmem:[%s12491_s1 + $0xb0] sm:$0xff] %vm375_vm3, %v836_v57   ;;  %v814_v0 = vpop.permute.xlu0 %813  }
  0xe1   :  { %v5708_v11 = vld [vmem:[%s12490_s0 + $0x5c6] ss:$8 sm:$0xf0]   ;;  %5446 = vst.msk [vmem:[%s12491_s1 + $0xd0] sm:$0xff] %vm378_vm4, %v836_v57   ;;  %5440 = vst.msk [vmem:[%s12491_s1 + $0x30] sm:$0xff] %vm378_vm4, %v814_v0  }
  0xe2   :  { %v5699_v12 = vld [vmem:[%s12490_s0 + $0x486] ss:$8 sm:$0xf]   ;;  %v1800_v13 = vsel %vm4_vm0, %v5708_v11, %v5707_v7  ;;  %5439 = vst.msk [vmem:[%s12491_s1 + $0x10] sm:$0xff] %vm375_vm3, %v814_v0  }
  0xe3   :  { %v5700_v14 = vld [vmem:[%s12490_s0 + $0x486] ss:$8 sm:$0xf0]   ;;  %v1802_v17 = vsel %vm1251_vm2, %v1800_v13, %v1794_v10  ;;  %v880_v9 = vpop.permute.xlu1 %879  }
  0xe4   :  { %v5701_v15 = vld [vmem:[%s12490_s0 + $0x4c6] ss:$8 sm:$0xf]   ;;  %v1772_v18 = vsel %vm4_vm0, %v5700_v14, %v5699_v12  ;;  %1803 = vrot.lane.b32.xlu1 %v1802_v17, %s6642_s5  ;;  %5457 = vst.msk [vmem:[%s12491_s1 + $0x1f0] sm:$0xff] %vm375_vm3, %v880_v9   ;;  %v858_v16 = vpop.permute.xlu0 %857  }
  0xe5   :  { %v5702_v19 = vld [vmem:[%s12490_s0 + $0x4c6] ss:$8 sm:$0xf0]   ;;  %5458 = vst.msk [vmem:[%s12491_s1 + $0x210] sm:$0xff] %vm378_vm4, %v880_v9   ;;  %5452 = vst.msk [vmem:[%s12491_s1 + $0x170] sm:$0xff] %vm378_vm4, %v858_v16  }
  0xe6   :  { %v5717_v20 = vld [vmem:[%s12490_s0 + $0x786] ss:$8 sm:$0xf]   ;;  %v1778_v21 = vsel %vm4_vm0, %v5702_v19, %v5701_v15  ;;  %5451 = vst.msk [vmem:[%s12491_s1 + $0x150] sm:$0xff] %vm375_vm3, %v858_v16  }
  0xe7   :  { %v5718_v22 = vld [vmem:[%s12490_s0 + $0x786] ss:$8 sm:$0xf0]   ;;  %v1780_v24 = vsel %vm1251_vm2, %v1778_v21, %v1772_v18  ;;  %v924_v25 = vpop.permute.xlu1 %923  }
  0xe8   :  { %v5719_v23 = vld [vmem:[%s12490_s0 + $0x7c6] ss:$8 sm:$0xf]   ;;  %v1838_v26 = vsel %vm4_vm0, %v5718_v22, %v5717_v20  ;;  %1781 = vrot.lane.b32.xlu0 %v1780_v24, %s6642_s5  ;;  %5469 = vst.msk [vmem:[%s12491_s1 + $0x330] sm:$0xff] %vm375_vm3, %v924_v25   ;;  %v902_v32 = vpop.permute.xlu0 %901  }
  0xe9   :  { %v5720_v27 = vld [vmem:[%s12490_s0 + $0x7c6] ss:$8 sm:$0xf0]   ;;  %5470 = vst.msk [vmem:[%s12491_s1 + $0x350] sm:$0xff] %vm378_vm4, %v924_v25   ;;  %5464 = vst.msk [vmem:[%s12491_s1 + $0x2b0] sm:$0xff] %vm378_vm4, %v902_v32  }
  0xea   :  { %v5711_v28 = vld [vmem:[%s12490_s0 + $0x686] ss:$8 sm:$0xf]   ;;  %v1844_v29 = vsel %vm4_vm0, %v5720_v27, %v5719_v23  ;;  %5463 = vst.msk [vmem:[%s12491_s1 + $0x290] sm:$0xff] %vm375_vm3, %v902_v32  }
  0xeb   :  { %v5712_v30 = vld [vmem:[%s12490_s0 + $0x686] ss:$8 sm:$0xf0]   ;;  %v1846_v33 = vsel %vm1251_vm2, %v1844_v29, %v1838_v26  ;;  %v968_v41 = vpop.permute.xlu1 %967  }
  0xec   :  { %v5713_v31 = vld [vmem:[%s12490_s0 + $0x6c6] ss:$8 sm:$0xf]   ;;  %v1816_v34 = vsel %vm4_vm0, %v5712_v30, %v5711_v28  ;;  %1847 = vrot.lane.b32.xlu1 %v1846_v33, %s6642_s5  ;;  %5481 = vst.msk [vmem:[%s12491_s1 + $0x470] sm:$0xff] %vm375_vm3, %v968_v41   ;;  %v946_v48 = vpop.permute.xlu0 %945  }
  0xed   :  { %v5714_v35 = vld [vmem:[%s12490_s0 + $0x6c6] ss:$8 sm:$0xf0]   ;;  %5482 = vst.msk [vmem:[%s12491_s1 + $0x490] sm:$0xff] %vm378_vm4, %v968_v41   ;;  %5476 = vst.msk [vmem:[%s12491_s1 + $0x3f0] sm:$0xff] %vm378_vm4, %v946_v48  }
  0xee   :  { %v5729_v36 = vld [vmem:[%s12490_s0 + $0x986] ss:$8 sm:$0xf]   ;;  %v1822_v37 = vsel %vm4_vm0, %v5714_v35, %v5713_v31  ;;  %5475 = vst.msk [vmem:[%s12491_s1 + $0x3d0] sm:$0xff] %vm375_vm3, %v946_v48  }
  0xef   :  { %v5730_v38 = vld [vmem:[%s12490_s0 + $0x986] ss:$8 sm:$0xf0]   ;;  %v1824_v40 = vsel %vm1251_vm2, %v1822_v37, %v1816_v34  ;;  %v1012_v57 = vpop.permute.xlu1 %1011  }
  0xf0   :  { %v5731_v39 = vld [vmem:[%s12490_s0 + $0x9c6] ss:$8 sm:$0xf]   ;;  %v1882_v42 = vsel %vm4_vm0, %v5730_v38, %v5729_v36  ;;  %1825 = vrot.lane.b32.xlu0 %v1824_v40, %s6642_s5  ;;  %5493 = vst.msk [vmem:[%s12491_s1 + $0x5b0] sm:$0xff] %vm375_vm3, %v1012_v57   ;;  %v990_v0 = vpop.permute.xlu0 %989  }
  0xf1   :  { %v5732_v43 = vld [vmem:[%s12490_s0 + $0x9c6] ss:$8 sm:$0xf0]   ;;  %5494 = vst.msk [vmem:[%s12491_s1 + $0x5d0] sm:$0xff] %vm378_vm4, %v1012_v57   ;;  %5488 = vst.msk [vmem:[%s12491_s1 + $0x530] sm:$0xff] %vm378_vm4, %v990_v0  }
  0xf2   :  { %v5723_v44 = vld [vmem:[%s12490_s0 + $0x886] ss:$8 sm:$0xf]   ;;  %v1888_v45 = vsel %vm4_vm0, %v5732_v43, %v5731_v39  ;;  %5487 = vst.msk [vmem:[%s12491_s1 + $0x510] sm:$0xff] %vm375_vm3, %v990_v0  }
  0xf3   :  { %v5724_v46 = vld [vmem:[%s12490_s0 + $0x886] ss:$8 sm:$0xf0]   ;;  %v1890_v49 = vsel %vm1251_vm2, %v1888_v45, %v1882_v42  ;;  %v1056_v9 = vpop.permute.xlu1 %1055  }
  0xf4   :  { %v5725_v47 = vld [vmem:[%s12490_s0 + $0x8c6] ss:$8 sm:$0xf]   ;;  %v1860_v50 = vsel %vm4_vm0, %v5724_v46, %v5723_v44  ;;  %1891 = vrot.lane.b32.xlu1 %v1890_v49, %s6642_s5  ;;  %5505 = vst.msk [vmem:[%s12491_s1 + $0xd8] sm:$0xff] %vm375_vm3, %v1056_v9  }
  0xf5   :  { %v5726_v51 = vld [vmem:[%s12490_s0 + $0x8c6] ss:$8 sm:$0xf0]   ;;  %5506 = vst.msk [vmem:[%s12491_s1 + $0xf8] sm:$0xff] %vm378_vm4, %v1056_v9   ;;  %v1034_v16 = vpop.permute.xlu0 %1033  }
  0xf6   :  { %v5741_v52 = vld [vmem:[%s12490_s0 + $0x1c6] ss:$8 sm:$0xf]   ;;  %v1866_v53 = vsel %vm4_vm0, %v5726_v51, %v5725_v47  ;;  %5499 = vst.msk [vmem:[%s12491_s1 + $0x38] sm:$0xff] %vm375_vm3, %v1034_v16  }
  0xf7   :  { %v5742_v54 = vld [vmem:[%s12490_s0 + $0x1c6] ss:$8 sm:$0xf0]   ;;  %v1868_v56 = vsel %vm1251_vm2, %v1866_v53, %v1860_v50  ;;  %5500 = vst.msk [vmem:[%s12491_s1 + $0x58] sm:$0xff] %vm378_vm4, %v1034_v16  }
  0xf8   :  { %v5743_v55 = vld [vmem:[%s12490_s0 + $0x106] ss:$8 sm:$0xf]   ;;  %v1926_v58 = vsel %vm4_vm0, %v5742_v54, %v5741_v52  ;;  %1869 = vrot.lane.b32.xlu0 %v1868_v56, %s6642_s5 }
  0xf9   :  { %v5744_v59 = vld [vmem:[%s12490_s0 + $0x106] ss:$8 sm:$0xf0]   ;;  %v1100_v25 = vpop.permute.xlu1 %1099  }
  0xfa   :  { %v5735_v60 = vld [vmem:[%s12490_s0 + $0xc6] ss:$8 sm:$0xf]   ;;  %v1932_v61 = vsel %vm4_vm0, %v5744_v59, %v5743_v55  ;;  %5517 = vst.msk [vmem:[%s12491_s1 + $0x218] sm:$0xff] %vm375_vm3, %v1100_v25  }
  0xfb   :  { %v5736_v62 = vld [vmem:[%s12490_s0 + $0xc6] ss:$8 sm:$0xf0]   ;;  %v1934_v1 = vsel %vm1251_vm2, %v1932_v61, %v1926_v58  ;;  %5518 = vst.msk [vmem:[%s12491_s1 + $0x238] sm:$0xff] %vm378_vm4, %v1100_v25  }
  0xfc   :  { %v5737_v63 = vld [vmem:[%s12490_s0 + $0x6] ss:$8 sm:$0xf]   ;;  %v1904_v2 = vsel %vm4_vm0, %v5736_v62, %v5735_v60  ;;  %1935 = vrot.lane.b32.xlu1 %v1934_v1, %s6642_s5 }
  0xfd   :  { %v5738_v3 = vld [vmem:[%s12490_s0 + $0x6] ss:$8 sm:$0xf0]   ;;  %v1078_v32 = vpop.permute.xlu0 %1077  }
  0xfe   :  { %v5753_v4 = vld [vmem:[%s12490_s0 + $0x3c6] ss:$8 sm:$0xf]   ;;  %v1910_v5 = vsel %vm4_vm0, %v5738_v3, %v5737_v63  ;;  %5511 = vst.msk [vmem:[%s12491_s1 + $0x178] sm:$0xff] %vm375_vm3, %v1078_v32  }
  0xff   :  { %v5754_v6 = vld [vmem:[%s12490_s0 + $0x3c6] ss:$8 sm:$0xf0]   ;;  %v1912_v8 = vsel %vm1251_vm2, %v1910_v5, %v1904_v2  ;;  %5512 = vst.msk [vmem:[%s12491_s1 + $0x198] sm:$0xff] %vm378_vm4, %v1078_v32  }
 0x100   :  { %v5755_v7 = vld [vmem:[%s12490_s0 + $0x306] ss:$8 sm:$0xf]   ;;  %v1970_v10 = vsel %vm4_vm0, %v5754_v6, %v5753_v4  ;;  %1913 = vrot.lane.b32.xlu0 %v1912_v8, %s6642_s5  ;;  %v5800_v4 = vld [vmem:[%s12490_s0 + $0x1c1] ss:$8 sm:$0xf]  }
 0x101   :  { %v5756_v11 = vld [vmem:[%s12490_s0 + $0x306] ss:$8 sm:$0xf0]   ;;  %v5801_v6 = vld [vmem:[%s12490_s0 + $0x1c1] ss:$8 sm:$0xf0]   ;;  %v1144_v41 = vpop.permute.xlu1 %1143  }
 0x102   :  { %v5747_v12 = vld [vmem:[%s12490_s0 + $0x2c6] ss:$8 sm:$0xf]   ;;  %v1976_v13 = vsel %vm4_vm0, %v5756_v11, %v5755_v7  ;;  %v5802_v7 = vld [vmem:[%s12490_s0 + $0x101] ss:$8 sm:$0xf]  }
 0x103   :  { %v5748_v14 = vld [vmem:[%s12490_s0 + $0x2c6] ss:$8 sm:$0xf0]   ;;  %v1978_v17 = vsel %vm1251_vm2, %v1976_v13, %v1970_v10  ;;  %v2145_v10 = vsel %vm4_vm0, %v5801_v6, %v5800_v4  ;;  %v5803_v11 = vld [vmem:[%s12490_s0 + $0x101] ss:$8 sm:$0xf0]  }
 0x104   :  { %v5749_v15 = vld [vmem:[%s12490_s0 + $0x206] ss:$8 sm:$0xf]   ;;  %v1948_v18 = vsel %vm4_vm0, %v5748_v14, %v5747_v12  ;;  %1979 = vrot.lane.b32.xlu1 %v1978_v17, %s6642_s5  ;;  %v5795_v12 = vld [vmem:[%s12490_s0 + $0xc1] ss:$8 sm:$0xf]   ;;  %v2151_v13 = vsel %vm4_vm0, %v5803_v11, %v5802_v7 }
 0x105   :  { %v5750_v19 = vld [vmem:[%s12490_s0 + $0x206] ss:$8 sm:$0xf0]   ;;  %v5796_v14 = vld [vmem:[%s12490_s0 + $0xc1] ss:$8 sm:$0xf0]   ;;  %v2153_v17 = vsel %vm1255_vm5, %v2151_v13, %v2145_v10  ;;  %v1122_v48 = vpop.permute.xlu0 %1121  }
 0x106   :  { %v5765_v20 = vld [vmem:[%s12490_s0 + $0x5c6] ss:$8 sm:$0xf]   ;;  %v1954_v21 = vsel %vm4_vm0, %v5750_v19, %v5749_v15  ;;  %v5797_v15 = vld [vmem:[%s12490_s0 + $0x1] ss:$8 sm:$0xf]  }
 0x107   :  { %v5766_v22 = vld [vmem:[%s12490_s0 + $0x5c6] ss:$8 sm:$0xf0]   ;;  %v1956_v24 = vsel %vm1251_vm2, %v1954_v21, %v1948_v18  ;;  %v2124_v18 = vsel %vm4_vm0, %v5796_v14, %v5795_v12  ;;  %v5798_v19 = vld [vmem:[%s12490_s0 + $0x1] ss:$8 sm:$0xf0]  }
 0x108   :  { %v5767_v23 = vld [vmem:[%s12490_s0 + $0x506] ss:$8 sm:$0xf]   ;;  %v2014_v26 = vsel %vm4_vm0, %v5766_v22, %v5765_v20  ;;  %1957 = vrot.lane.b32.xlu0 %v1956_v24, %s6642_s5  ;;  %v5812_v20 = vld [vmem:[%s12490_s0 + $0x3c1] ss:$8 sm:$0xf]   ;;  %v2130_v21 = vsel %vm4_vm0, %v5798_v19, %v5797_v15 }
 0x109   :  { %v5768_v27 = vld [vmem:[%s12490_s0 + $0x506] ss:$8 sm:$0xf0]   ;;  %v5813_v22 = vld [vmem:[%s12490_s0 + $0x3c1] ss:$8 sm:$0xf0]   ;;  %v2132_v24 = vsel %vm1255_vm5, %v2130_v21, %v2124_v18  ;;  %v1188_v57 = vpop.permute.xlu1 %1187  }
 0x10a   :  { %v5759_v28 = vld [vmem:[%s12490_s0 + $0x4c6] ss:$8 sm:$0xf]   ;;  %v2020_v29 = vsel %vm4_vm0, %v5768_v27, %v5767_v23  ;;  %v5814_v23 = vld [vmem:[%s12490_s0 + $0x301] ss:$8 sm:$0xf]  }
 0x10b   :  { %v5760_v30 = vld [vmem:[%s12490_s0 + $0x4c6] ss:$8 sm:$0xf0]   ;;  %v2022_v33 = vsel %vm1251_vm2, %v2020_v29, %v2014_v26  ;;  %v2189_v26 = vsel %vm4_vm0, %v5813_v22, %v5812_v20  ;;  %v5815_v27 = vld [vmem:[%s12490_s0 + $0x301] ss:$8 sm:$0xf0]  }
 0x10c   :  { %v5761_v31 = vld [vmem:[%s12490_s0 + $0x406] ss:$8 sm:$0xf]   ;;  %v1992_v34 = vsel %vm4_vm0, %v5760_v30, %v5759_v28  ;;  %2023 = vrot.lane.b32.xlu1 %v2022_v33, %s6642_s5  ;;  %v5806_v28 = vld [vmem:[%s12490_s0 + $0x2c1] ss:$8 sm:$0xf]   ;;  %v2195_v29 = vsel %vm4_vm0, %v5815_v27, %v5814_v23 }
 0x10d   :  { %v5762_v35 = vld [vmem:[%s12490_s0 + $0x406] ss:$8 sm:$0xf0]   ;;  %v5807_v30 = vld [vmem:[%s12490_s0 + $0x2c1] ss:$8 sm:$0xf0]   ;;  %v2197_v33 = vsel %vm1255_vm5, %v2195_v29, %v2189_v26  ;;  %v1166_v0 = vpop.permute.xlu0 %1165  }
 0x10e   :  { %v5777_v36 = vld [vmem:[%s12490_s0 + $0x7c6] ss:$8 sm:$0xf]   ;;  %v1998_v37 = vsel %vm4_vm0, %v5762_v35, %v5761_v31  ;;  %v5808_v31 = vld [vmem:[%s12490_s0 + $0x201] ss:$8 sm:$0xf]  }
 0x10f   :  { %v5778_v38 = vld [vmem:[%s12490_s0 + $0x7c6] ss:$8 sm:$0xf0]   ;;  %v2000_v40 = vsel %vm1251_vm2, %v1998_v37, %v1992_v34  ;;  %v2167_v34 = vsel %vm4_vm0, %v5807_v30, %v5806_v28  ;;  %v5809_v35 = vld [vmem:[%s12490_s0 + $0x201] ss:$8 sm:$0xf0]  }
 0x110   :  { %v5779_v39 = vld [vmem:[%s12490_s0 + $0x706] ss:$8 sm:$0xf]   ;;  %v2058_v42 = vsel %vm4_vm0, %v5778_v38, %v5777_v36  ;;  %2001 = vrot.lane.b32.xlu0 %v2000_v40, %s6642_s5  ;;  %v5824_v36 = vld [vmem:[%s12490_s0 + $0x5c1] ss:$8 sm:$0xf]   ;;  %v2173_v37 = vsel %vm4_vm0, %v5809_v35, %v5808_v31 }
 0x111   :  { %v5780_v43 = vld [vmem:[%s12490_s0 + $0x706] ss:$8 sm:$0xf0]   ;;  %v5825_v38 = vld [vmem:[%s12490_s0 + $0x5c1] ss:$8 sm:$0xf0]   ;;  %v2175_v40 = vsel %vm1255_vm5, %v2173_v37, %v2167_v34  ;;  %v1232_v9 = vpop.permute.xlu1 %1231  }
 0x112   :  { %v5771_v44 = vld [vmem:[%s12490_s0 + $0x6c6] ss:$8 sm:$0xf]   ;;  %v2064_v45 = vsel %vm4_vm0, %v5780_v43, %v5779_v39  ;;  %v5826_v39 = vld [vmem:[%s12490_s0 + $0x501] ss:$8 sm:$0xf]  }
 0x113   :  { %v5772_v46 = vld [vmem:[%s12490_s0 + $0x6c6] ss:$8 sm:$0xf0]   ;;  %v2066_v49 = vsel %vm1251_vm2, %v2064_v45, %v2058_v42  ;;  %v2233_v42 = vsel %vm4_vm0, %v5825_v38, %v5824_v36  ;;  %v5827_v43 = vld [vmem:[%s12490_s0 + $0x501] ss:$8 sm:$0xf0]  }
 0x114   :  { %v5773_v47 = vld [vmem:[%s12490_s0 + $0x606] ss:$8 sm:$0xf]   ;;  %v2036_v50 = vsel %vm4_vm0, %v5772_v46, %v5771_v44  ;;  %2067 = vrot.lane.b32.xlu1 %v2066_v49, %s6642_s5  ;;  %v5818_v44 = vld [vmem:[%s12490_s0 + $0x4c1] ss:$8 sm:$0xf]   ;;  %v2239_v45 = vsel %vm4_vm0, %v5827_v43, %v5826_v39 }
 0x115   :  { %v5774_v51 = vld [vmem:[%s12490_s0 + $0x606] ss:$8 sm:$0xf0]   ;;  %v5819_v46 = vld [vmem:[%s12490_s0 + $0x4c1] ss:$8 sm:$0xf0]   ;;  %v2241_v49 = vsel %vm1255_vm5, %v2239_v45, %v2233_v42  ;;  %v1210_v16 = vpop.permute.xlu0 %1209  }
 0x116   :  { %v5789_v52 = vld [vmem:[%s12490_s0 + $0x9c6] ss:$8 sm:$0xf]   ;;  %v2042_v53 = vsel %vm4_vm0, %v5774_v51, %v5773_v47  ;;  %v5820_v47 = vld [vmem:[%s12490_s0 + $0x401] ss:$8 sm:$0xf]  }
 0x117   :  { %v5790_v54 = vld [vmem:[%s12490_s0 + $0x9c6] ss:$8 sm:$0xf0]   ;;  %v2044_v56 = vsel %vm1251_vm2, %v2042_v53, %v2036_v50  ;;  %v2211_v50 = vsel %vm4_vm0, %v5819_v46, %v5818_v44  ;;  %v5821_v51 = vld [vmem:[%s12490_s0 + $0x401] ss:$8 sm:$0xf0]  }
 0x118   :  { %v5791_v55 = vld [vmem:[%s12490_s0 + $0x906] ss:$8 sm:$0xf]   ;;  %v2102_v58 = vsel %vm4_vm0, %v5790_v54, %v5789_v52  ;;  %2045 = vrot.lane.b32.xlu0 %v2044_v56, %s6642_s5  ;;  %v5836_v52 = vld [vmem:[%s12490_s0 + $0x7c1] ss:$8 sm:$0xf]   ;;  %v2217_v53 = vsel %vm4_vm0, %v5821_v51, %v5820_v47 }
 0x119   :  { %v5792_v59 = vld [vmem:[%s12490_s0 + $0x906] ss:$8 sm:$0xf0]   ;;  %v5837_v54 = vld [vmem:[%s12490_s0 + $0x7c1] ss:$8 sm:$0xf0]   ;;  %v2219_v56 = vsel %vm1255_vm5, %v2217_v53, %v2211_v50 }
 0x11a   :  { %v5783_v60 = vld [vmem:[%s12490_s0 + $0x8c6] ss:$8 sm:$0xf]   ;;  %v2108_v61 = vsel %vm4_vm0, %v5792_v59, %v5791_v55  ;;  %v5838_v55 = vld [vmem:[%s12490_s0 + $0x701] ss:$8 sm:$0xf]  }
 0x11b   :  { %v5784_v62 = vld [vmem:[%s12490_s0 + $0x8c6] ss:$8 sm:$0xf0]   ;;  %v2110_v1 = vsel %vm1251_vm2, %v2108_v61, %v2102_v58  ;;  %v2277_v58 = vsel %vm4_vm0, %v5837_v54, %v5836_v52  ;;  %v5839_v59 = vld [vmem:[%s12490_s0 + $0x701] ss:$8 sm:$0xf0]  }
 0x11c   :  { %v5785_v63 = vld [vmem:[%s12490_s0 + $0x806] ss:$8 sm:$0xf]   ;;  %v2080_v2 = vsel %vm4_vm0, %v5784_v62, %v5783_v60  ;;  %2111 = vrot.lane.b32.xlu1 %v2110_v1, %s6642_s5  ;;  %v5830_v60 = vld [vmem:[%s12490_s0 + $0x6c1] ss:$8 sm:$0xf]   ;;  %v2283_v61 = vsel %vm4_vm0, %v5839_v59, %v5838_v55 }
 0x11d   :  { %v5786_v3 = vld [vmem:[%s12490_s0 + $0x806] ss:$8 sm:$0xf0]   ;;  %v5831_v62 = vld [vmem:[%s12490_s0 + $0x6c1] ss:$8 sm:$0xf0]   ;;  %v2285_v1 = vsel %vm1255_vm5, %v2283_v61, %v2277_v58 }
 0x11e   :  { %v2086_v5 = vsel %vm4_vm0, %v5786_v3, %v5785_v63  ;;  %v5832_v63 = vld [vmem:[%s12490_s0 + $0x601] ss:$8 sm:$0xf]   ;;  %5529 = vst.msk [vmem:[%s12491_s1 + $0x358] sm:$0xff] %vm375_vm3, %v1144_v41   ;;  %5523 = vst.msk [vmem:[%s12491_s1 + $0x2b8] sm:$0xff] %vm375_vm3, %v1122_v48  }
 0x11f   :  { %v2088_v8 = vsel %vm1251_vm2, %v2086_v5, %v2080_v2  ;;  %v2255_v2 = vsel %vm4_vm0, %v5831_v62, %v5830_v60  ;;  %v5833_v3 = vld [vmem:[%s12490_s0 + $0x601] ss:$8 sm:$0xf0]   ;;  %5530 = vst.msk [vmem:[%s12491_s1 + $0x378] sm:$0xff] %vm378_vm4, %v1144_v41   ;;  %5524 = vst.msk [vmem:[%s12491_s1 + $0x2d8] sm:$0xff] %vm378_vm4, %v1122_v48  }
 0x120   :  { %2089 = vrot.lane.b32.xlu0 %v2088_v8, %s6642_s5  ;;  %2154 = vrot.lane.b32.xlu1 %v2153_v17, %s6643_s2  ;;  %v5848_v4 = vld [vmem:[%s12490_s0 + $0x9c1] ss:$8 sm:$0xf]   ;;  %v2261_v5 = vsel %vm4_vm0, %v5833_v3, %v5832_v63  ;;  %5541 = vst.msk [vmem:[%s12491_s1 + $0x498] sm:$0xff] %vm375_vm3, %v1188_v57  }
 0x121   :  { %v5849_v6 = vld [vmem:[%s12490_s0 + $0x9c1] ss:$8 sm:$0xf0]   ;;  %v2263_v8 = vsel %vm1255_vm5, %v2261_v5, %v2255_v2  ;;  %5542 = vst.msk [vmem:[%s12491_s1 + $0x4b8] sm:$0xff] %vm378_vm4, %v1188_v57   ;;  %5536 = vst.msk [vmem:[%s12491_s1 + $0x418] sm:$0xff] %vm378_vm4, %v1166_v0  }
 0x122   :  { %v5850_v7 = vld [vmem:[%s12490_s0 + $0x901] ss:$8 sm:$0xf]   ;;  %v2321_v10 = vsel %vm4_vm0, %v5849_v6, %v5848_v4  ;;  %5535 = vst.msk [vmem:[%s12491_s1 + $0x3f8] sm:$0xff] %vm375_vm3, %v1166_v0   ;;  %5553 = vst.msk [vmem:[%s12491_s1 + $0x5d8] sm:$0xff] %vm375_vm3, %v1232_v9  }
 0x123   :  { %v5851_v11 = vld [vmem:[%s12490_s0 + $0x901] ss:$8 sm:$0xf0]   ;;  %5554 = vst.msk [vmem:[%s12491_s1 + $0x5f8] sm:$0xff] %vm378_vm4, %v1232_v9   ;;  %5548 = vst.msk [vmem:[%s12491_s1 + $0x558] sm:$0xff] %vm378_vm4, %v1210_v16  }
 0x124   :  { %2133 = vrot.lane.b32.xlu0 %v2132_v24, %s6643_s2  ;;  %2198 = vrot.lane.b32.xlu1 %v2197_v33, %s6643_s2  ;;  %v5842_v12 = vld [vmem:[%s12490_s0 + $0x8c1] ss:$8 sm:$0xf]   ;;  %v2327_v13 = vsel %vm4_vm0, %v5851_v11, %v5850_v7  ;;  %5547 = vst.msk [vmem:[%s12491_s1 + $0x538] sm:$0xff] %vm375_vm3, %v1210_v16  }
 0x125   :  { %v5843_v14 = vld [vmem:[%s12490_s0 + $0x8c1] ss:$8 sm:$0xf0]   ;;  %v2329_v17 = vsel %vm1255_vm5, %v2327_v13, %v2321_v10 }
 0x126   :  { %v5844_v15 = vld [vmem:[%s12490_s0 + $0x801] ss:$8 sm:$0xf]   ;;  %v2299_v18 = vsel %vm4_vm0, %v5843_v14, %v5842_v12 }
 0x127   :  { %v5845_v19 = vld [vmem:[%s12490_s0 + $0x801] ss:$8 sm:$0xf0]  }
 0x128   :  { %2176 = vrot.lane.b32.xlu0 %v2175_v40, %s6643_s2  ;;  %2242 = vrot.lane.b32.xlu1 %v2241_v49, %s6643_s2  ;;  %v5860_v20 = vld [vmem:[%s12490_s0 + $0x101] ss:$8 sm:$0xf]   ;;  %v2305_v21 = vsel %vm4_vm0, %v5845_v19, %v5844_v15 }
 0x129   :  { %v5861_v22 = vld [vmem:[%s12490_s0 + $0x101] ss:$8 sm:$0xf0]   ;;  %v2307_v24 = vsel %vm1255_vm5, %v2305_v21, %v2299_v18 }
 0x12a   :  { %v5862_v23 = vld [vmem:[%s12490_s0 + $0x141] ss:$8 sm:$0xf]   ;;  %v2365_v26 = vsel %vm4_vm0, %v5861_v22, %v5860_v20 }
 0x12b   :  { %v5863_v27 = vld [vmem:[%s12490_s0 + $0x141] ss:$8 sm:$0xf0]  }
 0x12c   :  { %2220 = vrot.lane.b32.xlu0 %v2219_v56, %s6643_s2  ;;  %2286 = vrot.lane.b32.xlu1 %v2285_v1, %s6643_s2  ;;  %v5854_v28 = vld [vmem:[%s12490_s0 + $0x1] ss:$8 sm:$0xf]   ;;  %v2371_v29 = vsel %vm4_vm0, %v5863_v27, %v5862_v23 }
 0x12d   :  { %v5855_v30 = vld [vmem:[%s12490_s0 + $0x1] ss:$8 sm:$0xf0]   ;;  %v2373_v33 = vsel %vm1255_vm5, %v2371_v29, %v2365_v26 }
 0x12e   :  { %v5856_v31 = vld [vmem:[%s12490_s0 + $0x41] ss:$8 sm:$0xf]   ;;  %v2343_v34 = vsel %vm4_vm0, %v5855_v30, %v5854_v28 }
 0x12f   :  { %v5857_v35 = vld [vmem:[%s12490_s0 + $0x41] ss:$8 sm:$0xf0]  }
 0x130   :  { %2264 = vrot.lane.b32.xlu0 %v2263_v8, %s6643_s2  ;;  %2330 = vrot.lane.b32.xlu1 %v2329_v17, %s6643_s2  ;;  %v5872_v36 = vld [vmem:[%s12490_s0 + $0x301] ss:$8 sm:$0xf]   ;;  %v2349_v37 = vsel %vm4_vm0, %v5857_v35, %v5856_v31  ;;  %v1254_v31 = vpop.permute.xlu0 %1253  }
 0x131   :  { %v5873_v38 = vld [vmem:[%s12490_s0 + $0x301] ss:$8 sm:$0xf0]   ;;  %v2351_v40 = vsel %vm1255_vm5, %v2349_v37, %v2343_v34  ;;  %5559 = vst.msk [vmem:[%s12491_s1 + $0x20] sm:$0xff] %vm1255_vm5, %v1254_v31  }
 0x132   :  { %v5874_v39 = vld [vmem:[%s12490_s0 + $0x341] ss:$8 sm:$0xf]   ;;  %v2409_v42 = vsel %vm4_vm0, %v5873_v38, %v5872_v36  ;;  %5560 = vst.msk [vmem:[%s12491_s1 + $0x40] sm:$0xff] %vm1258_vm6, %v1254_v31  }
 0x133   :  { %v5875_v43 = vld [vmem:[%s12490_s0 + $0x341] ss:$8 sm:$0xf0]  }
 0x134   :  { %2308 = vrot.lane.b32.xlu0 %v2307_v24, %s6643_s2  ;;  %2374 = vrot.lane.b32.xlu1 %v2373_v33, %s6643_s2  ;;  %v5866_v44 = vld [vmem:[%s12490_s0 + $0x201] ss:$8 sm:$0xf]   ;;  %v2415_v45 = vsel %vm4_vm0, %v5875_v43, %v5874_v39  ;;  %v1276_v24 = vpop.permute.xlu1 %1275  }
 0x135   :  { %v5867_v46 = vld [vmem:[%s12490_s0 + $0x201] ss:$8 sm:$0xf0]   ;;  %v2417_v49 = vsel %vm1255_vm5, %v2415_v45, %v2409_v42  ;;  %5565 = vst.msk [vmem:[%s12491_s1 + $0xc0] sm:$0xff] %vm1255_vm5, %v1276_v24  }
 0x136   :  { %v5868_v47 = vld [vmem:[%s12490_s0 + $0x241] ss:$8 sm:$0xf]   ;;  %v2387_v50 = vsel %vm4_vm0, %v5867_v46, %v5866_v44  ;;  %5566 = vst.msk [vmem:[%s12491_s1 + $0xe0] sm:$0xff] %vm1258_vm6, %v1276_v24  }
 0x137   :  { %v5869_v51 = vld [vmem:[%s12490_s0 + $0x241] ss:$8 sm:$0xf0]  }
 0x138   :  { %2352 = vrot.lane.b32.xlu0 %v2351_v40, %s6643_s2  ;;  %v5884_v52 = vld [vmem:[%s12490_s0 + $0x501] ss:$8 sm:$0xf]   ;;  %2418 = vrot.lane.b32.xlu1 %v2417_v49, %s6643_s2  ;;  %v2393_v53 = vsel %vm4_vm0, %v5869_v51, %v5868_v47  ;;  %v1320_v40 = vpop.permute.xlu1 %1319   ;;  %v1298_v47 = vpop.permute.xlu0 %1297  }
 0x139   :  { %v5885_v54 = vld [vmem:[%s12490_s0 + $0x501] ss:$8 sm:$0xf0]   ;;  %v2395_v56 = vsel %vm1255_vm5, %v2393_v53, %v2387_v50  ;;  %5577 = vst.msk [vmem:[%s12491_s1 + $0x200] sm:$0xff] %vm1255_vm5, %v1320_v40   ;;  %5571 = vst.msk [vmem:[%s12491_s1 + $0x160] sm:$0xff] %vm1255_vm5, %v1298_v47  }
 0x13a   :  { %v5886_v55 = vld [vmem:[%s12490_s0 + $0x541] ss:$8 sm:$0xf]   ;;  %v2453_v58 = vsel %vm4_vm0, %v5885_v54, %v5884_v52  ;;  %5578 = vst.msk [vmem:[%s12491_s1 + $0x220] sm:$0xff] %vm1258_vm6, %v1320_v40   ;;  %5572 = vst.msk [vmem:[%s12491_s1 + $0x180] sm:$0xff] %vm1258_vm6, %v1298_v47  }
 0x13b   :  { %v5887_v59 = vld [vmem:[%s12490_s0 + $0x541] ss:$8 sm:$0xf0]  }
 0x13c   :  { %v5878_v60 = vld [vmem:[%s12490_s0 + $0x401] ss:$8 sm:$0xf]   ;;  %2396 = vrot.lane.b32.xlu0 %v2395_v56, %s6643_s2  ;;  %v2459_v61 = vsel %vm4_vm0, %v5887_v59, %v5886_v55  ;;  %v1364_v56 = vpop.permute.xlu1 %1363  }
 0x13d   :  { %v5879_v62 = vld [vmem:[%s12490_s0 + $0x401] ss:$8 sm:$0xf0]   ;;  %v2461_v1 = vsel %vm1255_vm5, %v2459_v61, %v2453_v58  ;;  %5589 = vst.msk [vmem:[%s12491_s1 + $0x340] sm:$0xff] %vm1255_vm5, %v1364_v56  }
 0x13e   :  { %v5880_v63 = vld [vmem:[%s12490_s0 + $0x441] ss:$8 sm:$0xf]   ;;  %v2431_v2 = vsel %vm4_vm0, %v5879_v62, %v5878_v60  ;;  %2462 = vrot.lane.b32.xlu1 %v2461_v1, %s6643_s2  ;;  %5590 = vst.msk [vmem:[%s12491_s1 + $0x360] sm:$0xff] %vm1258_vm6, %v1364_v56  }
 0x13f   :  { %v5881_v3 = vld [vmem:[%s12490_s0 + $0x441] ss:$8 sm:$0xf0]  }
 0x140   :  { %v5896_v4 = vld [vmem:[%s12490_s0 + $0x701] ss:$8 sm:$0xf]   ;;  %v2437_v5 = vsel %vm4_vm0, %v5881_v3, %v5880_v63  ;;  %v1342_v63 = vpop.permute.xlu0 %1341  }
 0x141   :  { %v5897_v6 = vld [vmem:[%s12490_s0 + $0x701] ss:$8 sm:$0xf0]   ;;  %v2439_v8 = vsel %vm1255_vm5, %v2437_v5, %v2431_v2  ;;  %5583 = vst.msk [vmem:[%s12491_s1 + $0x2a0] sm:$0xff] %vm1255_vm5, %v1342_v63  }
 0x142   :  { %v5898_v7 = vld [vmem:[%s12490_s0 + $0x741] ss:$8 sm:$0xf]   ;;  %v2497_v10 = vsel %vm4_vm0, %v5897_v6, %v5896_v4  ;;  %2440 = vrot.lane.b32.xlu0 %v2439_v8, %s6643_s2  ;;  %5584 = vst.msk [vmem:[%s12491_s1 + $0x2c0] sm:$0xff] %vm1258_vm6, %v1342_v63   ;;  %v1408_v8 = vpop.permute.xlu1 %1407  }
 0x143   :  { %v5899_v11 = vld [vmem:[%s12490_s0 + $0x741] ss:$8 sm:$0xf0]   ;;  %5601 = vst.msk [vmem:[%s12491_s1 + $0x480] sm:$0xff] %vm1255_vm5, %v1408_v8  }
 0x144   :  { %v5890_v12 = vld [vmem:[%s12490_s0 + $0x601] ss:$8 sm:$0xf]   ;;  %v2503_v13 = vsel %vm4_vm0, %v5899_v11, %v5898_v7  ;;  %5602 = vst.msk [vmem:[%s12491_s1 + $0x4a0] sm:$0xff] %vm1258_vm6, %v1408_v8  }
 0x145   :  { %v5891_v14 = vld [vmem:[%s12490_s0 + $0x601] ss:$8 sm:$0xf0]   ;;  %v2505_v17 = vsel %vm1255_vm5, %v2503_v13, %v2497_v10 }
 0x146   :  { %v5892_v15 = vld [vmem:[%s12490_s0 + $0x641] ss:$8 sm:$0xf]   ;;  %v2475_v18 = vsel %vm4_vm0, %v5891_v14, %v5890_v12  ;;  %2506 = vrot.lane.b32.xlu1 %v2505_v17, %s6643_s2  ;;  %v1452_v24 = vpop.permute.xlu1 %1451  }
 0x147   :  { %v5893_v19 = vld [vmem:[%s12490_s0 + $0x641] ss:$8 sm:$0xf0]   ;;  %5613 = vst.msk [vmem:[%s12491_s1 + $0x5c0] sm:$0xff] %vm1255_vm5, %v1452_v24  }
 0x148   :  { %v2481_v20 = vsel %vm4_vm0, %v5893_v19, %v5892_v15  ;;  %v5908_v21 = vld [vmem:[%s12490_s0 + $0x901] ss:$8 sm:$0xf]   ;;  %v1386_v15 = vpop.permute.xlu0 %1385   ;;  %5614 = vst.msk [vmem:[%s12491_s1 + $0x5e0] sm:$0xff] %vm1258_vm6, %v1452_v24  }
 0x149   :  { %v5909_v22 = vld [vmem:[%s12490_s0 + $0x901] ss:$8 sm:$0xf0]   ;;  %v2483_v23 = vsel %vm1255_vm5, %v2481_v20, %v2475_v18  ;;  %5595 = vst.msk [vmem:[%s12491_s1 + $0x3e0] sm:$0xff] %vm1255_vm5, %v1386_v15  }
 0x14a   :  { %v2541_v25 = vsel %vm4_vm0, %v5909_v22, %v5908_v21  ;;  %v5910_v26 = vld [vmem:[%s12490_s0 + $0x941] ss:$8 sm:$0xf]   ;;  %2484 = vrot.lane.b32.xlu0 %v2483_v23, %s6643_s2  ;;  %5596 = vst.msk [vmem:[%s12491_s1 + $0x400] sm:$0xff] %vm1258_vm6, %v1386_v15   ;;  %v1496_v40 = vpop.permute.xlu1 %1495  }
 0x14b   :  { %v5911_v27 = vld [vmem:[%s12490_s0 + $0x941] ss:$8 sm:$0xf0]   ;;  %5625 = vst.msk [vmem:[%s12491_s1 + $0xe8] sm:$0xff] %vm1255_vm5, %v1496_v40  }
 0x14c   :  { %v2547_v28 = vsel %vm4_vm0, %v5911_v27, %v5910_v26  ;;  %v5902_v29 = vld [vmem:[%s12490_s0 + $0x801] ss:$8 sm:$0xf]   ;;  %v1430_v31 = vpop.permute.xlu0 %1429   ;;  %5626 = vst.msk [vmem:[%s12491_s1 + $0x108] sm:$0xff] %vm1258_vm6, %v1496_v40  }
 0x14d   :  { %v5903_v30 = vld [vmem:[%s12490_s0 + $0x801] ss:$8 sm:$0xf0]   ;;  %v2549_v32 = vsel %vm1255_vm5, %v2547_v28, %v2541_v25  ;;  %5607 = vst.msk [vmem:[%s12491_s1 + $0x520] sm:$0xff] %vm1255_vm5, %v1430_v31  }
 0x14e   :  { %v2519_v33 = vsel %vm4_vm0, %v5903_v30, %v5902_v29  ;;  %v5904_v34 = vld [vmem:[%s12490_s0 + $0x841] ss:$8 sm:$0xf]   ;;  %2550 = vrot.lane.b32.xlu1 %v2549_v32, %s6643_s2  ;;  %5608 = vst.msk [vmem:[%s12491_s1 + $0x540] sm:$0xff] %vm1258_vm6, %v1430_v31   ;;  %v1540_v56 = vpop.permute.xlu1 %1539  }
 0x14f   :  { %v5905_v35 = vld [vmem:[%s12490_s0 + $0x841] ss:$8 sm:$0xf0]   ;;  %5637 = vst.msk [vmem:[%s12491_s1 + $0x228] sm:$0xff] %vm1255_vm5, %v1540_v56  }
 0x150   :  { %v2525_v36 = vsel %vm4_vm0, %v5905_v35, %v5904_v34  ;;  %v5920_v37 = vld [vmem:[%s12490_s0 + $0x141] ss:$8 sm:$0xf]   ;;  %v1474_v47 = vpop.permute.xlu0 %1473   ;;  %5638 = vst.msk [vmem:[%s12491_s1 + $0x248] sm:$0xff] %vm1258_vm6, %v1540_v56  }
 0x151   :  { %v5921_v38 = vld [vmem:[%s12490_s0 + $0x141] ss:$8 sm:$0xf0]   ;;  %v2527_v39 = vsel %vm1255_vm5, %v2525_v36, %v2519_v33  ;;  %5619 = vst.msk [vmem:[%s12491_s1 + $0x48] sm:$0xff] %vm1255_vm5, %v1474_v47  }
 0x152   :  { %v2585_v41 = vsel %vm4_vm0, %v5921_v38, %v5920_v37  ;;  %v5922_v42 = vld [vmem:[%s12490_s0 + $0x181] ss:$8 sm:$0xf]   ;;  %2528 = vrot.lane.b32.xlu0 %v2527_v39, %s6643_s2  ;;  %5620 = vst.msk [vmem:[%s12491_s1 + $0x68] sm:$0xff] %vm1258_vm6, %v1474_v47   ;;  %v1584_v8 = vpop.permute.xlu1 %1583  }
 0x153   :  { %v5923_v43 = vld [vmem:[%s12490_s0 + $0x181] ss:$8 sm:$0xf0]   ;;  %5649 = vst.msk [vmem:[%s12491_s1 + $0x368] sm:$0xff] %vm1255_vm5, %v1584_v8  }
 0x154   :  { %v2591_v44 = vsel %vm4_vm0, %v5923_v43, %v5922_v42  ;;  %v5914_v45 = vld [vmem:[%s12490_s0 + $0x41] ss:$8 sm:$0xf]   ;;  %v1518_v63 = vpop.permute.xlu0 %1517   ;;  %5650 = vst.msk [vmem:[%s12491_s1 + $0x388] sm:$0xff] %vm1258_vm6, %v1584_v8  }
 0x155   :  { %v5915_v46 = vld [vmem:[%s12490_s0 + $0x41] ss:$8 sm:$0xf0]   ;;  %v2593_v48 = vsel %vm1255_vm5, %v2591_v44, %v2585_v41  ;;  %5631 = vst.msk [vmem:[%s12491_s1 + $0x188] sm:$0xff] %vm1255_vm5, %v1518_v63  }
 0x156   :  { %v2563_v49 = vsel %vm4_vm0, %v5915_v46, %v5914_v45  ;;  %v5916_v50 = vld [vmem:[%s12490_s0 + $0x81] ss:$8 sm:$0xf]   ;;  %2594 = vrot.lane.b32.xlu1 %v2593_v48, %s6643_s2  ;;  %5632 = vst.msk [vmem:[%s12491_s1 + $0x1a8] sm:$0xff] %vm1258_vm6, %v1518_v63   ;;  %v1628_v24 = vpop.permute.xlu1 %1627  }
 0x157   :  { %v5917_v51 = vld [vmem:[%s12490_s0 + $0x81] ss:$8 sm:$0xf0]   ;;  %5661 = vst.msk [vmem:[%s12491_s1 + $0x4a8] sm:$0xff] %vm1255_vm5, %v1628_v24  }
 0x158   :  { %v2569_v52 = vsel %vm4_vm0, %v5917_v51, %v5916_v50  ;;  %v5932_v53 = vld [vmem:[%s12490_s0 + $0x341] ss:$8 sm:$0xf]   ;;  %v1562_v15 = vpop.permute.xlu0 %1561   ;;  %5662 = vst.msk [vmem:[%s12491_s1 + $0x4c8] sm:$0xff] %vm1258_vm6, %v1628_v24  }
 0x159   :  { %v5933_v54 = vld [vmem:[%s12490_s0 + $0x341] ss:$8 sm:$0xf0]   ;;  %v2571_v55 = vsel %vm1255_vm5, %v2569_v52, %v2563_v49  ;;  %5643 = vst.msk [vmem:[%s12491_s1 + $0x2c8] sm:$0xff] %vm1255_vm5, %v1562_v15  }
 0x15a   :  { %v2629_v57 = vsel %vm4_vm0, %v5933_v54, %v5932_v53  ;;  %v5934_v58 = vld [vmem:[%s12490_s0 + $0x381] ss:$8 sm:$0xf]   ;;  %2572 = vrot.lane.b32.xlu0 %v2571_v55, %s6643_s2  ;;  %5644 = vst.msk [vmem:[%s12491_s1 + $0x2e8] sm:$0xff] %vm1258_vm6, %v1562_v15  }
 0x15b   :  { %v5935_v59 = vld [vmem:[%s12490_s0 + $0x381] ss:$8 sm:$0xf0]  }
 0x15c   :  { %v2635_v60 = vsel %vm4_vm0, %v5935_v59, %v5934_v58  ;;  %v5926_v61 = vld [vmem:[%s12490_s0 + $0x241] ss:$8 sm:$0xf]   ;;  %v1606_v31 = vpop.permute.xlu0 %1605  }
 0x15d   :  { %v5927_v62 = vld [vmem:[%s12490_s0 + $0x241] ss:$8 sm:$0xf0]   ;;  %v2637_v0 = vsel %vm1255_vm5, %v2635_v60, %v2629_v57  ;;  %5655 = vst.msk [vmem:[%s12491_s1 + $0x408] sm:$0xff] %vm1255_vm5, %v1606_v31  }
 0x15e   :  { %v2607_v1 = vsel %vm4_vm0, %v5927_v62, %v5926_v61  ;;  %v5928_v2 = vld [vmem:[%s12490_s0 + $0x281] ss:$8 sm:$0xf]   ;;  %2638 = vrot.lane.b32.xlu1 %v2637_v0, %s6643_s2  ;;  %5656 = vst.msk [vmem:[%s12491_s1 + $0x428] sm:$0xff] %vm1258_vm6, %v1606_v31  }
 0x15f   :  { %v5929_v3 = vld [vmem:[%s12490_s0 + $0x281] ss:$8 sm:$0xf0]  }
 0x160   :  { %v2613_v4 = vsel %vm4_vm0, %v5929_v3, %v5928_v2  ;;  %v5944_v5 = vld [vmem:[%s12490_s0 + $0x541] ss:$8 sm:$0xf]  }
 0x161   :  { %v5945_v6 = vld [vmem:[%s12490_s0 + $0x541] ss:$8 sm:$0xf0]   ;;  %v2615_v7 = vsel %vm1255_vm5, %v2613_v4, %v2607_v1 }
 0x162   :  { %v2673_v9 = vsel %vm4_vm0, %v5945_v6, %v5944_v5  ;;  %v5946_v10 = vld [vmem:[%s12490_s0 + $0x581] ss:$8 sm:$0xf]   ;;  %2616 = vrot.lane.b32.xlu0 %v2615_v7, %s6643_s2 }
 0x163   :  { %v5947_v11 = vld [vmem:[%s12490_s0 + $0x581] ss:$8 sm:$0xf0]  }
 0x164   :  { %v2679_v12 = vsel %vm4_vm0, %v5947_v11, %v5946_v10  ;;  %v5938_v13 = vld [vmem:[%s12490_s0 + $0x441] ss:$8 sm:$0xf]  }
 0x165   :  { %v5939_v14 = vld [vmem:[%s12490_s0 + $0x441] ss:$8 sm:$0xf0]   ;;  %v2681_v16 = vsel %vm1255_vm5, %v2679_v12, %v2673_v9 }
 0x166   :  { %v2651_v17 = vsel %vm4_vm0, %v5939_v14, %v5938_v13  ;;  %v5940_v18 = vld [vmem:[%s12490_s0 + $0x481] ss:$8 sm:$0xf]   ;;  %2682 = vrot.lane.b32.xlu1 %v2681_v16, %s6643_s2 }
 0x167   :  { %v5941_v19 = vld [vmem:[%s12490_s0 + $0x481] ss:$8 sm:$0xf0]  }
 0x168   :  { %v2657_v20 = vsel %vm4_vm0, %v5941_v19, %v5940_v18  ;;  %v5956_v21 = vld [vmem:[%s12490_s0 + $0x741] ss:$8 sm:$0xf]  }
 0x169   :  { %v5957_v22 = vld [vmem:[%s12490_s0 + $0x741] ss:$8 sm:$0xf0]   ;;  %v2659_v23 = vsel %vm1255_vm5, %v2657_v20, %v2651_v17 }
 0x16a   :  { %v2717_v25 = vsel %vm4_vm0, %v5957_v22, %v5956_v21  ;;  %v5958_v26 = vld [vmem:[%s12490_s0 + $0x781] ss:$8 sm:$0xf]   ;;  %2660 = vrot.lane.b32.xlu0 %v2659_v23, %s6643_s2 }
 0x16b   :  { %v5959_v27 = vld [vmem:[%s12490_s0 + $0x781] ss:$8 sm:$0xf0]  }
 0x16c   :  { %v2723_v28 = vsel %vm4_vm0, %v5959_v27, %v5958_v26  ;;  %v5950_v29 = vld [vmem:[%s12490_s0 + $0x641] ss:$8 sm:$0xf]  }
 0x16d   :  { %v5951_v30 = vld [vmem:[%s12490_s0 + $0x641] ss:$8 sm:$0xf0]   ;;  %v2725_v32 = vsel %vm1255_vm5, %v2723_v28, %v2717_v25 }
 0x16e   :  { %v2695_v33 = vsel %vm4_vm0, %v5951_v30, %v5950_v29  ;;  %v5952_v34 = vld [vmem:[%s12490_s0 + $0x681] ss:$8 sm:$0xf]   ;;  %2726 = vrot.lane.b32.xlu1 %v2725_v32, %s6643_s2 }
 0x16f   :  { %v5953_v35 = vld [vmem:[%s12490_s0 + $0x681] ss:$8 sm:$0xf0]  }
 0x170   :  { %v2701_v36 = vsel %vm4_vm0, %v5953_v35, %v5952_v34  ;;  %v5968_v37 = vld [vmem:[%s12490_s0 + $0x941] ss:$8 sm:$0xf]  }
 0x171   :  { %v5969_v38 = vld [vmem:[%s12490_s0 + $0x941] ss:$8 sm:$0xf0]   ;;  %v2703_v39 = vsel %vm1255_vm5, %v2701_v36, %v2695_v33 }
 0x172   :  { %v2761_v41 = vsel %vm4_vm0, %v5969_v38, %v5968_v37  ;;  %v5970_v42 = vld [vmem:[%s12490_s0 + $0x981] ss:$8 sm:$0xf]   ;;  %2704 = vrot.lane.b32.xlu0 %v2703_v39, %s6643_s2 }
 0x173   :  { %v5971_v43 = vld [vmem:[%s12490_s0 + $0x981] ss:$8 sm:$0xf0]  }
 0x174   :  { %v2767_v44 = vsel %vm4_vm0, %v5971_v43, %v5970_v42  ;;  %v5962_v45 = vld [vmem:[%s12490_s0 + $0x841] ss:$8 sm:$0xf]   ;;  %v1672_v43 = vpop.permute.xlu1 %1671  }
 0x175   :  { %v5963_v46 = vld [vmem:[%s12490_s0 + $0x841] ss:$8 sm:$0xf0]   ;;  %v2769_v48 = vsel %vm1255_vm5, %v2767_v44, %v2761_v41  ;;  %5673 = vst.msk [vmem:[%s12491_s1 + $0x5e8] sm:$0xff] %vm1255_vm5, %v1672_v43  }
 0x176   :  { %v2739_v49 = vsel %vm4_vm0, %v5963_v46, %v5962_v45  ;;  %v5964_v50 = vld [vmem:[%s12490_s0 + $0x881] ss:$8 sm:$0xf]   ;;  %2770 = vrot.lane.b32.xlu1 %v2769_v48, %s6643_s2  ;;  %5674 = vst.msk [vmem:[%s12491_s1 + $0x608] sm:$0xff] %vm1258_vm6, %v1672_v43  }
 0x177   :  { %v5965_v51 = vld [vmem:[%s12490_s0 + $0x881] ss:$8 sm:$0xf0]  }
 0x178   :  { %v2745_v52 = vsel %vm4_vm0, %v5965_v51, %v5964_v50  ;;  %v5980_v53 = vld [vmem:[%s12490_s0 + $0x181] ss:$8 sm:$0xf]   ;;  %v1650_v51 = vpop.permute.xlu0 %1649  }
 0x179   :  { %v5981_v54 = vld [vmem:[%s12490_s0 + $0x181] ss:$8 sm:$0xf0]   ;;  %v2747_v55 = vsel %vm1255_vm5, %v2745_v52, %v2739_v49  ;;  %5667 = vst.msk [vmem:[%s12491_s1 + $0x548] sm:$0xff] %vm1255_vm5, %v1650_v51  }
 0x17a   :  { %v2805_v57 = vsel %vm4_vm0, %v5981_v54, %v5980_v53  ;;  %v5982_v58 = vld [vmem:[%s12490_s0 + $0x1c1] ss:$8 sm:$0xf]   ;;  %2748 = vrot.lane.b32.xlu0 %v2747_v55, %s6643_s2  ;;  %5668 = vst.msk [vmem:[%s12491_s1 + $0x568] sm:$0xff] %vm1258_vm6, %v1650_v51  }
 0x17b   :  { %v5983_v59 = vld [vmem:[%s12490_s0 + $0x1c1] ss:$8 sm:$0xf0]  }
 0x17c   :  { %v2811_v60 = vsel %vm4_vm0, %v5983_v59, %v5982_v58  ;;  %v5974_v61 = vld [vmem:[%s12490_s0 + $0x81] ss:$8 sm:$0xf]   ;;  %v1716_v59 = vpop.permute.xlu1 %1715  }
 0x17d   :  { %v5975_v62 = vld [vmem:[%s12490_s0 + $0x81] ss:$8 sm:$0xf0]   ;;  %v2813_v0 = vsel %vm1255_vm5, %v2811_v60, %v2805_v57  ;;  %5685 = vst.msk [vmem:[%s12491_s1 + $0x110] sm:$0xff] %vm1255_vm5, %v1716_v59  }
 0x17e   :  { %v2783_v1 = vsel %vm4_vm0, %v5975_v62, %v5974_v61  ;;  %v5976_v2 = vld [vmem:[%s12490_s0 + $0xc1] ss:$8 sm:$0xf]   ;;  %2814 = vrot.lane.b32.xlu1 %v2813_v0, %s6643_s2  ;;  %5686 = vst.msk [vmem:[%s12491_s1 + $0x130] sm:$0xff] %vm1258_vm6, %v1716_v59  }
 0x17f   :  { %v5977_v3 = vld [vmem:[%s12490_s0 + $0xc1] ss:$8 sm:$0xf0]  }
 0x180   :  { %v2789_v4 = vsel %vm4_vm0, %v5977_v3, %v5976_v2  ;;  %v5992_v5 = vld [vmem:[%s12490_s0 + $0x381] ss:$8 sm:$0xf]   ;;  %v1694_v3 = vpop.permute.xlu0 %1693  }
 0x181   :  { %v5993_v6 = vld [vmem:[%s12490_s0 + $0x381] ss:$8 sm:$0xf0]   ;;  %v2791_v7 = vsel %vm1255_vm5, %v2789_v4, %v2783_v1  ;;  %5679 = vst.msk [vmem:[%s12491_s1 + $0x70] sm:$0xff] %vm1255_vm5, %v1694_v3  }
 0x182   :  { %v2849_v9 = vsel %vm4_vm0, %v5993_v6, %v5992_v5  ;;  %v5994_v10 = vld [vmem:[%s12490_s0 + $0x3c1] ss:$8 sm:$0xf]   ;;  %2792 = vrot.lane.b32.xlu0 %v2791_v7, %s6643_s2  ;;  %v6040_v5 = vld [vmem:[%s12490_s0 + $0x144] ss:$8 sm:$0xf]  }
 0x183   :  { %v5995_v11 = vld [vmem:[%s12490_s0 + $0x3c1] ss:$8 sm:$0xf0]   ;;  %v6041_v6 = vld [vmem:[%s12490_s0 + $0x144] ss:$8 sm:$0xf0]  }
 0x184   :  { %v2855_v12 = vsel %vm4_vm0, %v5995_v11, %v5994_v10  ;;  %v5986_v13 = vld [vmem:[%s12490_s0 + $0x281] ss:$8 sm:$0xf]   ;;  %5680 = vst.msk [vmem:[%s12491_s1 + $0x90] sm:$0xff] %vm1258_vm6, %v1694_v3   ;;  %v3025_v8 = vsel %vm4_vm0, %v6041_v6, %v6040_v5  ;;  %v1760_v11 = vpop.permute.xlu1 %1759  }
 0x185   :  { %v5987_v14 = vld [vmem:[%s12490_s0 + $0x281] ss:$8 sm:$0xf0]   ;;  %v2857_v16 = vsel %vm1255_vm5, %v2855_v12, %v2849_v9  ;;  %v6042_v9 = vld [vmem:[%s12490_s0 + $0x184] ss:$8 sm:$0xf]  }
 0x186   :  { %v2827_v17 = vsel %vm4_vm0, %v5987_v14, %v5986_v13  ;;  %v5988_v18 = vld [vmem:[%s12490_s0 + $0x2c1] ss:$8 sm:$0xf]   ;;  %2858 = vrot.lane.b32.xlu1 %v2857_v16, %s6643_s2  ;;  %v6043_v10 = vld [vmem:[%s12490_s0 + $0x184] ss:$8 sm:$0xf0]  }
 0x187   :  { %v5989_v19 = vld [vmem:[%s12490_s0 + $0x2c1] ss:$8 sm:$0xf0]   ;;  %v3031_v12 = vsel %vm4_vm0, %v6043_v10, %v6042_v9  ;;  %v6034_v13 = vld [vmem:[%s12490_s0 + $0x44] ss:$8 sm:$0xf]  }
 0x188   :  { %v2833_v20 = vsel %vm4_vm0, %v5989_v19, %v5988_v18  ;;  %v6004_v21 = vld [vmem:[%s12490_s0 + $0x581] ss:$8 sm:$0xf]   ;;  %v6035_v14 = vld [vmem:[%s12490_s0 + $0x44] ss:$8 sm:$0xf0]   ;;  %v3033_v15 = vsel %vm375_vm3, %v3031_v12, %v3025_v8  ;;  %v1738_v19 = vpop.permute.xlu0 %1737  }
 0x189   :  { %v6005_v22 = vld [vmem:[%s12490_s0 + $0x581] ss:$8 sm:$0xf0]   ;;  %v2835_v23 = vsel %vm1255_vm5, %v2833_v20, %v2827_v17  ;;  %5697 = vst.msk [vmem:[%s12491_s1 + $0x250] sm:$0xff] %vm1255_vm5, %v1760_v11   ;;  %v3003_v16 = vsel %vm4_vm0, %v6035_v14, %v6034_v13  ;;  %5691 = vst.msk [vmem:[%s12491_s1 + $0x1b0] sm:$0xff] %vm1255_vm5, %v1738_v19  }
 0x18a   :  { %v2893_v25 = vsel %vm4_vm0, %v6005_v22, %v6004_v21  ;;  %v6006_v26 = vld [vmem:[%s12490_s0 + $0x5c1] ss:$8 sm:$0xf]   ;;  %2836 = vrot.lane.b32.xlu0 %v2835_v23, %s6643_s2  ;;  %5698 = vst.msk [vmem:[%s12491_s1 + $0x270] sm:$0xff] %vm1258_vm6, %v1760_v11   ;;  %5692 = vst.msk [vmem:[%s12491_s1 + $0x1d0] sm:$0xff] %vm1258_vm6, %v1738_v19  }
 0x18b   :  { %v6007_v27 = vld [vmem:[%s12490_s0 + $0x5c1] ss:$8 sm:$0xf0]   ;;  %v6036_v17 = vld [vmem:[%s12490_s0 + $0x84] ss:$8 sm:$0xf]  }
 0x18c   :  { %v2899_v28 = vsel %vm4_vm0, %v6007_v27, %v6006_v26  ;;  %v5998_v29 = vld [vmem:[%s12490_s0 + $0x481] ss:$8 sm:$0xf]   ;;  %v6037_v18 = vld [vmem:[%s12490_s0 + $0x84] ss:$8 sm:$0xf0]   ;;  %v1804_v27 = vpop.permute.xlu1 %1803  }
 0x18d   :  { %v5999_v30 = vld [vmem:[%s12490_s0 + $0x481] ss:$8 sm:$0xf0]   ;;  %v2901_v32 = vsel %vm1255_vm5, %v2899_v28, %v2893_v25  ;;  %v3009_v20 = vsel %vm4_vm0, %v6037_v18, %v6036_v17  ;;  %v6052_v21 = vld [vmem:[%s12490_s0 + $0x344] ss:$8 sm:$0xf]  }
 0x18e   :  { %v2871_v33 = vsel %vm4_vm0, %v5999_v30, %v5998_v29  ;;  %v6000_v34 = vld [vmem:[%s12490_s0 + $0x4c1] ss:$8 sm:$0xf]   ;;  %2902 = vrot.lane.b32.xlu1 %v2901_v32, %s6643_s2  ;;  %v6053_v22 = vld [vmem:[%s12490_s0 + $0x344] ss:$8 sm:$0xf0]   ;;  %v3011_v23 = vsel %vm375_vm3, %v3009_v20, %v3003_v16 }
 0x18f   :  { %v6001_v35 = vld [vmem:[%s12490_s0 + $0x4c1] ss:$8 sm:$0xf0]   ;;  %v3069_v24 = vsel %vm4_vm0, %v6053_v22, %v6052_v21  ;;  %v6054_v25 = vld [vmem:[%s12490_s0 + $0x384] ss:$8 sm:$0xf]  }
 0x190   :  { %v2877_v36 = vsel %vm4_vm0, %v6001_v35, %v6000_v34  ;;  %v6016_v37 = vld [vmem:[%s12490_s0 + $0x781] ss:$8 sm:$0xf]   ;;  %v6055_v26 = vld [vmem:[%s12490_s0 + $0x384] ss:$8 sm:$0xf0]   ;;  %v1782_v35 = vpop.permute.xlu0 %1781   ;;  %v1848_v43 = vpop.permute.xlu1 %1847  }
 0x191   :  { %v6017_v38 = vld [vmem:[%s12490_s0 + $0x781] ss:$8 sm:$0xf0]   ;;  %v2879_v39 = vsel %vm1255_vm5, %v2877_v36, %v2871_v33  ;;  %v3075_v28 = vsel %vm4_vm0, %v6055_v26, %v6054_v25  ;;  %v6046_v29 = vld [vmem:[%s12490_s0 + $0x244] ss:$8 sm:$0xf]  }
 0x192   :  { %v2937_v40 = vsel %vm4_vm0, %v6017_v38, %v6016_v37  ;;  %v6018_v41 = vld [vmem:[%s12490_s0 + $0x7c1] ss:$8 sm:$0xf]   ;;  %2880 = vrot.lane.b32.xlu0 %v2879_v39, %s6643_s2  ;;  %v6047_v30 = vld [vmem:[%s12490_s0 + $0x244] ss:$8 sm:$0xf0]   ;;  %v3077_v31 = vsel %vm375_vm3, %v3075_v28, %v3069_v24 }
 0x193   :  { %v6019_v42 = vld [vmem:[%s12490_s0 + $0x7c1] ss:$8 sm:$0xf0]   ;;  %5709 = vst.msk [vmem:[%s12491_s1 + $0x390] sm:$0xff] %vm1255_vm5, %v1804_v27   ;;  %v3047_v32 = vsel %vm4_vm0, %v6047_v30, %v6046_v29  ;;  %5703 = vst.msk [vmem:[%s12491_s1 + $0x2f0] sm:$0xff] %vm1255_vm5, %v1782_v35  }
 0x194   :  { %v2943_v44 = vsel %vm4_vm0, %v6019_v42, %v6018_v41  ;;  %v6010_v45 = vld [vmem:[%s12490_s0 + $0x681] ss:$8 sm:$0xf]   ;;  %5710 = vst.msk [vmem:[%s12491_s1 + $0x3b0] sm:$0xff] %vm1258_vm6, %v1804_v27   ;;  %5704 = vst.msk [vmem:[%s12491_s1 + $0x310] sm:$0xff] %vm1258_vm6, %v1782_v35   ;;  %v1826_v51 = vpop.permute.xlu0 %1825   ;;  %v1892_v59 = vpop.permute.xlu1 %1891  }
 0x195   :  { %v6011_v46 = vld [vmem:[%s12490_s0 + $0x681] ss:$8 sm:$0xf0]   ;;  %v2945_v47 = vsel %vm1255_vm5, %v2943_v44, %v2937_v40  ;;  %v6048_v33 = vld [vmem:[%s12490_s0 + $0x284] ss:$8 sm:$0xf]  }
 0x196   :  { %v2915_v48 = vsel %vm4_vm0, %v6011_v46, %v6010_v45  ;;  %v6012_v49 = vld [vmem:[%s12490_s0 + $0x6c1] ss:$8 sm:$0xf]   ;;  %2946 = vrot.lane.b32.xlu1 %v2945_v47, %s6643_s2  ;;  %v6049_v34 = vld [vmem:[%s12490_s0 + $0x284] ss:$8 sm:$0xf0]  }
 0x197   :  { %v6013_v50 = vld [vmem:[%s12490_s0 + $0x6c1] ss:$8 sm:$0xf0]   ;;  %v3053_v36 = vsel %vm4_vm0, %v6049_v34, %v6048_v33  ;;  %v6064_v37 = vld [vmem:[%s12490_s0 + $0x544] ss:$8 sm:$0xf]  }
 0x198   :  { %v2921_v52 = vsel %vm4_vm0, %v6013_v50, %v6012_v49  ;;  %v6028_v53 = vld [vmem:[%s12490_s0 + $0x981] ss:$8 sm:$0xf]   ;;  %v6065_v38 = vld [vmem:[%s12490_s0 + $0x544] ss:$8 sm:$0xf0]   ;;  %v3055_v39 = vsel %vm375_vm3, %v3053_v36, %v3047_v32  ;;  %v1870_v3 = vpop.permute.xlu0 %1869   ;;  %v1936_v11 = vpop.permute.xlu1 %1935  }
 0x199   :  { %v6029_v54 = vld [vmem:[%s12490_s0 + $0x981] ss:$8 sm:$0xf0]   ;;  %v2923_v55 = vsel %vm1255_vm5, %v2921_v52, %v2915_v48  ;;  %v3113_v40 = vsel %vm4_vm0, %v6065_v38, %v6064_v37  ;;  %v6066_v41 = vld [vmem:[%s12490_s0 + $0x584] ss:$8 sm:$0xf]  }
 0x19a   :  { %v2981_v56 = vsel %vm4_vm0, %v6029_v54, %v6028_v53  ;;  %v6030_v57 = vld [vmem:[%s12490_s0 + $0x9c1] ss:$8 sm:$0xf]   ;;  %2924 = vrot.lane.b32.xlu0 %v2923_v55, %s6643_s2  ;;  %v6067_v42 = vld [vmem:[%s12490_s0 + $0x584] ss:$8 sm:$0xf0]  }
 0x19b   :  { %v6031_v58 = vld [vmem:[%s12490_s0 + $0x9c1] ss:$8 sm:$0xf0]   ;;  %v3119_v44 = vsel %vm4_vm0, %v6067_v42, %v6066_v41  ;;  %v6058_v45 = vld [vmem:[%s12490_s0 + $0x444] ss:$8 sm:$0xf]  }
 0x19c   :  { %v2987_v60 = vsel %vm4_vm0, %v6031_v58, %v6030_v57  ;;  %v6022_v61 = vld [vmem:[%s12490_s0 + $0x881] ss:$8 sm:$0xf]   ;;  %v6059_v46 = vld [vmem:[%s12490_s0 + $0x444] ss:$8 sm:$0xf0]   ;;  %v3121_v47 = vsel %vm375_vm3, %v3119_v44, %v3113_v40  ;;  %v1914_v19 = vpop.permute.xlu0 %1913   ;;  %v1980_v27 = vpop.permute.xlu1 %1979  }
 0x19d   :  { %v6023_v62 = vld [vmem:[%s12490_s0 + $0x881] ss:$8 sm:$0xf0]   ;;  %v2989_v63 = vsel %vm1255_vm5, %v2987_v60, %v2981_v56  ;;  %5721 = vst.msk [vmem:[%s12491_s1 + $0x4d0] sm:$0xff] %vm1255_vm5, %v1848_v43   ;;  %v3091_v48 = vsel %vm4_vm0, %v6059_v46, %v6058_v45  ;;  %5715 = vst.msk [vmem:[%s12491_s1 + $0x430] sm:$0xff] %vm1255_vm5, %v1826_v51  }
 0x19e   :  { %v2959_v0 = vsel %vm4_vm0, %v6023_v62, %v6022_v61  ;;  %v6024_v1 = vld [vmem:[%s12490_s0 + $0x8c1] ss:$8 sm:$0xf]   ;;  %2990 = vrot.lane.b32.xlu1 %v2989_v63, %s6643_s2  ;;  %5722 = vst.msk [vmem:[%s12491_s1 + $0x4f0] sm:$0xff] %vm1258_vm6, %v1848_v43   ;;  %5716 = vst.msk [vmem:[%s12491_s1 + $0x450] sm:$0xff] %vm1258_vm6, %v1826_v51  }
 0x19f   :  { %v6025_v2 = vld [vmem:[%s12490_s0 + $0x8c1] ss:$8 sm:$0xf0]   ;;  %v6060_v49 = vld [vmem:[%s12490_s0 + $0x484] ss:$8 sm:$0xf]  }
 0x1a0   :  { %v2965_v4 = vsel %vm4_vm0, %v6025_v2, %v6024_v1  ;;  %v6061_v50 = vld [vmem:[%s12490_s0 + $0x484] ss:$8 sm:$0xf0]   ;;  %5733 = vst.msk [vmem:[%s12491_s1 + $0x610] sm:$0xff] %vm1255_vm5, %v1892_v59   ;;  %5727 = vst.msk [vmem:[%s12491_s1 + $0x570] sm:$0xff] %vm1255_vm5, %v1870_v3   ;;  %v1958_v35 = vpop.permute.xlu0 %1957   ;;  %v2024_v43 = vpop.permute.xlu1 %2023  }
 0x1a1   :  { %v2967_v7 = vsel %vm1255_vm5, %v2965_v4, %v2959_v0  ;;  %v3097_v52 = vsel %vm4_vm0, %v6061_v50, %v6060_v49  ;;  %v6076_v53 = vld [vmem:[%s12490_s0 + $0x744] ss:$8 sm:$0xf]   ;;  %5734 = vst.msk [vmem:[%s12491_s1 + $0x630] sm:$0xff] %vm1258_vm6, %v1892_v59   ;;  %5728 = vst.msk [vmem:[%s12491_s1 + $0x590] sm:$0xff] %vm1258_vm6, %v1870_v3  }
 0x1a2   :  { %2968 = vrot.lane.b32.xlu0 %v2967_v7, %s6643_s2  ;;  %3034 = vrot.lane.b32.xlu1 %v3033_v15, %s6644_s28  ;;  %v6077_v54 = vld [vmem:[%s12490_s0 + $0x744] ss:$8 sm:$0xf0]   ;;  %v3099_v55 = vsel %vm375_vm3, %v3097_v52, %v3091_v48  ;;  %5745 = vst.msk [vmem:[%s12491_s1 + $0x138] sm:$0xff] %vm1255_vm5, %v1936_v11  }
 0x1a3   :  { %v3157_v56 = vsel %vm4_vm0, %v6077_v54, %v6076_v53  ;;  %v6078_v57 = vld [vmem:[%s12490_s0 + $0x784] ss:$8 sm:$0xf]   ;;  %5746 = vst.msk [vmem:[%s12491_s1 + $0xb8] sm:$0xff] %vm1258_vm6, %v1936_v11   ;;  %5740 = vst.msk [vmem:[%s12491_s1 + $0x18] sm:$0xff] %vm1258_vm6, %v1914_v19  }
 0x1a4   :  { %v6079_v58 = vld [vmem:[%s12490_s0 + $0x784] ss:$8 sm:$0xf0]   ;;  %5739 = vst.msk [vmem:[%s12491_s1 + $0x98] sm:$0xff] %vm1255_vm5, %v1914_v19   ;;  %5757 = vst.msk [vmem:[%s12491_s1 + $0x278] sm:$0xff] %vm1255_vm5, %v1980_v27   ;;  %v2002_v51 = vpop.permute.xlu0 %2001   ;;  %v2068_v59 = vpop.permute.xlu1 %2067  }
 0x1a5   :  { %v3163_v60 = vsel %vm4_vm0, %v6079_v58, %v6078_v57  ;;  %v6070_v61 = vld [vmem:[%s12490_s0 + $0x644] ss:$8 sm:$0xf]   ;;  %5758 = vst.msk [vmem:[%s12491_s1 + $0x1f8] sm:$0xff] %vm1258_vm6, %v1980_v27   ;;  %5752 = vst.msk [vmem:[%s12491_s1 + $0x158] sm:$0xff] %vm1258_vm6, %v1958_v35  }
 0x1a6   :  { %3012 = vrot.lane.b32.xlu0 %v3011_v23, %s6644_s28  ;;  %3078 = vrot.lane.b32.xlu1 %v3077_v31, %s6644_s28  ;;  %v6071_v62 = vld [vmem:[%s12490_s0 + $0x644] ss:$8 sm:$0xf0]   ;;  %v3165_v63 = vsel %vm375_vm3, %v3163_v60, %v3157_v56  ;;  %5751 = vst.msk [vmem:[%s12491_s1 + $0x1d8] sm:$0xff] %vm1255_vm5, %v1958_v35  }
 0x1a7   :  { %v3135_v0 = vsel %vm4_vm0, %v6071_v62, %v6070_v61  ;;  %v6072_v1 = vld [vmem:[%s12490_s0 + $0x684] ss:$8 sm:$0xf]   ;;  %5769 = vst.msk [vmem:[%s12491_s1 + $0x3b8] sm:$0xff] %vm1255_vm5, %v2024_v43   ;;  %5763 = vst.msk [vmem:[%s12491_s1 + $0x318] sm:$0xff] %vm1255_vm5, %v2002_v51  }
 0x1a8   :  { %v6073_v2 = vld [vmem:[%s12490_s0 + $0x684] ss:$8 sm:$0xf0]   ;;  %5770 = vst.msk [vmem:[%s12491_s1 + $0x338] sm:$0xff] %vm1258_vm6, %v2024_v43   ;;  %5764 = vst.msk [vmem:[%s12491_s1 + $0x298] sm:$0xff] %vm1258_vm6, %v2002_v51   ;;  %v2046_v3 = vpop.permute.xlu0 %2045   ;;  %v2112_v11 = vpop.permute.xlu1 %2111  }
 0x1a9   :  { %v3141_v4 = vsel %vm4_vm0, %v6073_v2, %v6072_v1  ;;  %v6088_v5 = vld [vmem:[%s12490_s0 + $0x944] ss:$8 sm:$0xf]   ;;  %5781 = vst.msk [vmem:[%s12491_s1 + $0x4f8] sm:$0xff] %vm1255_vm5, %v2068_v59   ;;  %5775 = vst.msk [vmem:[%s12491_s1 + $0x458] sm:$0xff] %vm1255_vm5, %v2046_v3  }
 0x1aa   :  { %3056 = vrot.lane.b32.xlu0 %v3055_v39, %s6644_s28  ;;  %3122 = vrot.lane.b32.xlu1 %v3121_v47, %s6644_s28  ;;  %v6089_v6 = vld [vmem:[%s12490_s0 + $0x944] ss:$8 sm:$0xf0]   ;;  %v3143_v7 = vsel %vm375_vm3, %v3141_v4, %v3135_v0  ;;  %5782 = vst.msk [vmem:[%s12491_s1 + $0x478] sm:$0xff] %vm1258_vm6, %v2068_v59  }
 0x1ab   :  { %v3201_v8 = vsel %vm4_vm0, %v6089_v6, %v6088_v5  ;;  %v6090_v9 = vld [vmem:[%s12490_s0 + $0x984] ss:$8 sm:$0xf]   ;;  %5776 = vst.msk [vmem:[%s12491_s1 + $0x3d8] sm:$0xff] %vm1258_vm6, %v2046_v3   ;;  %5794 = vst.msk [vmem:[%s12491_s1 + $0x5b8] sm:$0xff] %vm1258_vm6, %v2112_v11  }
 0x1ac   :  { %v6091_v10 = vld [vmem:[%s12490_s0 + $0x984] ss:$8 sm:$0xf0]   ;;  %5793 = vst.msk [vmem:[%s12491_s1 + $0x638] sm:$0xff] %vm1255_vm5, %v2112_v11   ;;  %v2090_v19 = vpop.permute.xlu0 %2089  }
 0x1ad   :  { %v3207_v12 = vsel %vm4_vm0, %v6091_v10, %v6090_v9  ;;  %v6082_v13 = vld [vmem:[%s12490_s0 + $0x844] ss:$8 sm:$0xf]   ;;  %5787 = vst.msk [vmem:[%s12491_s1 + $0x598] sm:$0xff] %vm1255_vm5, %v2090_v19  }
 0x1ae   :  { %3100 = vrot.lane.b32.xlu0 %v3099_v55, %s6644_s28  ;;  %3166 = vrot.lane.b32.xlu1 %v3165_v63, %s6644_s28  ;;  %v6083_v14 = vld [vmem:[%s12490_s0 + $0x844] ss:$8 sm:$0xf0]   ;;  %v3209_v15 = vsel %vm375_vm3, %v3207_v12, %v3201_v8  ;;  %5788 = vst.msk [vmem:[%s12491_s1 + $0x518] sm:$0xff] %vm1258_vm6, %v2090_v19  }
 0x1af   :  { %v3179_v16 = vsel %vm4_vm0, %v6083_v14, %v6082_v13  ;;  %v6084_v17 = vld [vmem:[%s12490_s0 + $0x884] ss:$8 sm:$0xf]   ;;  %v3_v27 = vld [vmem:[%s12490_s0] ss:$8 sm:$0xf0]  }
 0x1b0   :  { %v6085_v18 = vld [vmem:[%s12490_s0 + $0x884] ss:$8 sm:$0xf0]   ;;  %v5231_v43 = vld [vmem:[%s12490_s0 + $0x300] ss:$8 sm:$0xf]  }
 0x1b1   :  { %v3185_v20 = vsel %vm4_vm0, %v6085_v18, %v6084_v17  ;;  %v6100_v21 = vld [vmem:[%s12490_s0 + $0x184] ss:$8 sm:$0xf]  }
 0x1b2   :  { %3144 = vrot.lane.b32.xlu0 %v3143_v7, %s6644_s28  ;;  %3210 = vrot.lane.b32.xlu1 %v3209_v15, %s6644_s28  ;;  %v6101_v22 = vld [vmem:[%s12490_s0 + $0x184] ss:$8 sm:$0xf0]   ;;  %v3187_v23 = vsel %vm375_vm3, %v3185_v20, %v3179_v16 }
 0x1b3   :  { %v3245_v24 = vsel %vm4_vm0, %v6101_v22, %v6100_v21  ;;  %v6102_v25 = vld [vmem:[%s12490_s0 + $0x1c4] ss:$8 sm:$0xf]   ;;  %v5207_v21 = vld [vmem:[%s12490_s0 + $0x100] ss:$8 sm:$0xf]  }
 0x1b4   :  { %v6103_v26 = vld [vmem:[%s12490_s0 + $0x1c4] ss:$8 sm:$0xf0]  }
 0x1b5   :  { %v3251_v28 = vsel %vm4_vm0, %v6103_v26, %v6102_v25  ;;  %v6094_v29 = vld [vmem:[%s12490_s0 + $0x84] ss:$8 sm:$0xf]   ;;  %v2155_v25 = vpop.permute.xlu1 %2154  }
 0x1b6   :  { %3188 = vrot.lane.b32.xlu0 %v3187_v23, %s6644_s28  ;;  %v6095_v30 = vld [vmem:[%s12490_s0 + $0x84] ss:$8 sm:$0xf0]   ;;  %v3253_v31 = vsel %vm375_vm3, %v3251_v28, %v3245_v24  ;;  %v5208_v23 = vld [vmem:[%s12490_s0 + $0x100] ss:$8 sm:$0xf0]  }
 0x1b7   :  { %v3223_v32 = vsel %vm4_vm0, %v6095_v30, %v6094_v29  ;;  %v6096_v33 = vld [vmem:[%s12490_s0 + $0xc4] ss:$8 sm:$0xf]   ;;  %3254 = vrot.lane.b32.xlu1 %v3253_v31, %s6644_s28  ;;  %v2_v24 = vld [vmem:[%s12490_s0] ss:$8 sm:$0xf]   ;;  %v40_v26 = vsel %vm4_vm0, %v5208_v23, %v5207_v21 }
 0x1b8   :  { %v6097_v34 = vld [vmem:[%s12490_s0 + $0xc4] ss:$8 sm:$0xf0]   ;;  %5209 = vst.msk [vmem:[%s12491_s1 + $0xa0] sm:$0xff] %vm6_vm7, %v40_v26   ;;  %v5_v29 = vsel %vm4_vm0, %v3_v27, %v2_v24 }
 0x1b9   :  { %v3229_v36 = vsel %vm4_vm0, %v6097_v34, %v6096_v33  ;;  %v6112_v37 = vld [vmem:[%s12490_s0 + $0x384] ss:$8 sm:$0xf]   ;;  %5804 = vst.msk [vmem:[%s12491_s1 + $0x120] sm:$0xff] %vm1251_vm2, %v2155_v25  }
 0x1ba   :  { %v6113_v38 = vld [vmem:[%s12490_s0 + $0x384] ss:$8 sm:$0xf0]   ;;  %v3231_v39 = vsel %vm375_vm3, %v3229_v36, %v3223_v32  ;;  %5805 = vst.msk [vmem:[%s12491_s1 + $0xa0] sm:$0xff] %vm2138_vm8, %v2155_v25   ;;  %v2134_v32 = vpop.permute.xlu0 %2133  }
 0x1bb   :  { %v3289_v40 = vsel %vm4_vm0, %v6113_v38, %v6112_v37  ;;  %v6114_v41 = vld [vmem:[%s12490_s0 + $0x3c4] ss:$8 sm:$0xf]   ;;  %3232 = vrot.lane.b32.xlu0 %v3231_v39, %s6644_s28  ;;  %7 = vst.msk [vmem:[%s12491_s1] sm:$0xff] %vm6_vm7, %v5_v29  }
 0x1bc   :  { %v6115_v42 = vld [vmem:[%s12490_s0 + $0x3c4] ss:$8 sm:$0xf0]   ;;  %5799 = vst.msk [vmem:[%s12491_s1 + $0x80] sm:$0xff] %vm1251_vm2, %v2134_v32  }
 0x1bd   :  { %v3295_v44 = vsel %vm4_vm0, %v6115_v42, %v6114_v41  ;;  %v6106_v45 = vld [vmem:[%s12490_s0 + $0x284] ss:$8 sm:$0xf]   ;;  %2139 = vst.msk [vmem:[%s12491_s1] sm:$0xff] %vm2138_vm8, %v2134_v32   ;;  %v2199_v42 = vpop.permute.xlu1 %2198  }
 0x1be   :  { %v6107_v46 = vld [vmem:[%s12490_s0 + $0x284] ss:$8 sm:$0xf0]   ;;  %v3297_v47 = vsel %vm375_vm3, %v3295_v44, %v3289_v40  ;;  %5816 = vst.msk [vmem:[%s12491_s1 + $0x260] sm:$0xff] %vm1251_vm2, %v2199_v42  }
 0x1bf   :  { %v3267_v48 = vsel %vm4_vm0, %v6107_v46, %v6106_v45  ;;  %v6108_v49 = vld [vmem:[%s12490_s0 + $0x2c4] ss:$8 sm:$0xf]   ;;  %3298 = vrot.lane.b32.xlu1 %v3297_v47, %s6644_s28  ;;  %v5232_v45 = vld [vmem:[%s12490_s0 + $0x300] ss:$8 sm:$0xf0]  }
 0x1c0   :  { %v6109_v50 = vld [vmem:[%s12490_s0 + $0x2c4] ss:$8 sm:$0xf0]   ;;  %v5219_v46 = vld [vmem:[%s12490_s0 + $0x200] ss:$8 sm:$0xf]  }
 0x1c1   :  { %v3273_v52 = vsel %vm4_vm0, %v6109_v50, %v6108_v49  ;;  %v6124_v53 = vld [vmem:[%s12490_s0 + $0x584] ss:$8 sm:$0xf]   ;;  %v2177_v49 = vpop.permute.xlu0 %2176   ;;  %v5220_v50 = vld [vmem:[%s12490_s0 + $0x200] ss:$8 sm:$0xf0]  }
 0x1c2   :  { %v6125_v54 = vld [vmem:[%s12490_s0 + $0x584] ss:$8 sm:$0xf0]   ;;  %v3275_v55 = vsel %vm375_vm3, %v3273_v52, %v3267_v48  ;;  %v112_v48 = vsel %vm4_vm0, %v5232_v45, %v5231_v43  ;;  %v76_v52 = vsel %vm4_vm0, %v5220_v50, %v5219_v46  ;;  %5810 = vst.msk [vmem:[%s12491_s1 + $0x1c0] sm:$0xff] %vm1251_vm2, %v2177_v49  }
 0x1c3   :  { %v3333_v56 = vsel %vm4_vm0, %v6125_v54, %v6124_v53  ;;  %v6126_v57 = vld [vmem:[%s12490_s0 + $0x5c4] ss:$8 sm:$0xf]   ;;  %3276 = vrot.lane.b32.xlu0 %v3275_v55, %s6644_s28  ;;  %5233 = vst.msk [vmem:[%s12491_s1 + $0x1e0] sm:$0xff] %vm6_vm7, %v112_v48   ;;  %5221 = vst.msk [vmem:[%s12491_s1 + $0x140] sm:$0xff] %vm6_vm7, %v76_v52  }
 0x1c4   :  { %v6127_v58 = vld [vmem:[%s12490_s0 + $0x5c4] ss:$8 sm:$0xf0]   ;;  %5817 = vst.msk [vmem:[%s12491_s1 + $0x1e0] sm:$0xff] %vm2138_vm8, %v2199_v42   ;;  %5811 = vst.msk [vmem:[%s12491_s1 + $0x140] sm:$0xff] %vm2138_vm8, %v2177_v49  }
 0x1c5   :  { %v3339_v60 = vsel %vm4_vm0, %v6127_v58, %v6126_v57  ;;  %v6118_v61 = vld [vmem:[%s12490_s0 + $0x484] ss:$8 sm:$0xf]   ;;  %v2243_v58 = vpop.permute.xlu1 %2242   ;;  %v5279_v24 = vld [vmem:[%s12490_s0 + $0x700] ss:$8 sm:$0xf]  }
 0x1c6   :  { %v6119_v62 = vld [vmem:[%s12490_s0 + $0x484] ss:$8 sm:$0xf0]   ;;  %v3341_v63 = vsel %vm375_vm3, %v3339_v60, %v3333_v56  ;;  %5828 = vst.msk [vmem:[%s12491_s1 + $0x3a0] sm:$0xff] %vm1251_vm2, %v2243_v58  }
 0x1c7   :  { %v3311_v0 = vsel %vm4_vm0, %v6119_v62, %v6118_v61  ;;  %v6120_v1 = vld [vmem:[%s12490_s0 + $0x4c4] ss:$8 sm:$0xf]   ;;  %3342 = vrot.lane.b32.xlu1 %v3341_v63, %s6644_s28  ;;  %v5280_v27 = vld [vmem:[%s12490_s0 + $0x700] ss:$8 sm:$0xf0]  }
 0x1c8   :  { %v6121_v2 = vld [vmem:[%s12490_s0 + $0x4c4] ss:$8 sm:$0xf0]   ;;  %v5304_v50 = vld [vmem:[%s12490_s0 + $0x900] ss:$8 sm:$0xf0]  }
 0x1c9   :  { %v3317_v4 = vsel %vm4_vm0, %v6121_v2, %v6120_v1  ;;  %v6136_v5 = vld [vmem:[%s12490_s0 + $0x784] ss:$8 sm:$0xf]   ;;  %v5255_v1 = vld [vmem:[%s12490_s0 + $0x500] ss:$8 sm:$0xf]   ;;  %v2221_v2 = vpop.permute.xlu0 %2220  }
 0x1ca   :  { %v6137_v6 = vld [vmem:[%s12490_s0 + $0x784] ss:$8 sm:$0xf0]   ;;  %v3319_v7 = vsel %vm375_vm3, %v3317_v4, %v3311_v0  ;;  %v5256_v4 = vld [vmem:[%s12490_s0 + $0x500] ss:$8 sm:$0xf0]  }
 0x1cb   :  { %v3377_v8 = vsel %vm4_vm0, %v6137_v6, %v6136_v5  ;;  %v6138_v9 = vld [vmem:[%s12490_s0 + $0x7c4] ss:$8 sm:$0xf]   ;;  %3320 = vrot.lane.b32.xlu0 %v3319_v7, %s6644_s28  ;;  %v5243_v5 = vld [vmem:[%s12490_s0 + $0x400] ss:$8 sm:$0xf]   ;;  %v184_v7 = vsel %vm4_vm0, %v5256_v4, %v5255_v1 }
 0x1cc   :  { %v6139_v10 = vld [vmem:[%s12490_s0 + $0x7c4] ss:$8 sm:$0xf0]   ;;  %5822 = vst.msk [vmem:[%s12491_s1 + $0x300] sm:$0xff] %vm1251_vm2, %v2221_v2  }
 0x1cd   :  { %v3383_v12 = vsel %vm4_vm0, %v6139_v10, %v6138_v9  ;;  %v6130_v13 = vld [vmem:[%s12490_s0 + $0x684] ss:$8 sm:$0xf]   ;;  %v2287_v10 = vpop.permute.xlu1 %2286   ;;  %5257 = vst.msk [vmem:[%s12491_s1 + $0x320] sm:$0xff] %vm6_vm7, %v184_v7  }
 0x1ce   :  { %v6131_v14 = vld [vmem:[%s12490_s0 + $0x684] ss:$8 sm:$0xf0]   ;;  %v3385_v15 = vsel %vm375_vm3, %v3383_v12, %v3377_v8  ;;  %v5244_v8 = vld [vmem:[%s12490_s0 + $0x400] ss:$8 sm:$0xf0]  }
 0x1cf   :  { %v3355_v16 = vsel %vm4_vm0, %v6131_v14, %v6130_v13  ;;  %v6132_v17 = vld [vmem:[%s12490_s0 + $0x6c4] ss:$8 sm:$0xf]   ;;  %3386 = vrot.lane.b32.xlu1 %v3385_v15, %s6644_s28  ;;  %v148_v11 = vsel %vm4_vm0, %v5244_v8, %v5243_v5  ;;  %5840 = vst.msk [vmem:[%s12491_s1 + $0x4e0] sm:$0xff] %vm1251_vm2, %v2287_v10  }
 0x1d0   :  { %v6133_v18 = vld [vmem:[%s12490_s0 + $0x6c4] ss:$8 sm:$0xf0]   ;;  %5829 = vst.msk [vmem:[%s12491_s1 + $0x320] sm:$0xff] %vm2138_vm8, %v2243_v58  }
 0x1d1   :  { %v3361_v20 = vsel %vm4_vm0, %v6133_v18, %v6132_v17  ;;  %v6148_v28 = vld [vmem:[%s12490_s0 + $0x984] ss:$8 sm:$0xf]   ;;  %5245 = vst.msk [vmem:[%s12491_s1 + $0x280] sm:$0xff] %vm6_vm7, %v148_v11   ;;  %v2265_v17 = vpop.permute.xlu0 %2264   ;;  %v2331_v25 = vpop.permute.xlu1 %2330  }
 0x1d2   :  { %v3363_v22 = vsel %vm375_vm3, %v3361_v20, %v3355_v16  ;;  %v6149_v30 = vld [vmem:[%s12490_s0 + $0x984] ss:$8 sm:$0xf0]   ;;  %5823 = vst.msk [vmem:[%s12491_s1 + $0x280] sm:$0xff] %vm2138_vm8, %v2221_v2  }
 0x1d3   :  { %3364 = vrot.lane.b32.xlu0 %v3363_v22, %s6644_s28  ;;  %v6150_v31 = vld [vmem:[%s12490_s0 + $0x9c4] ss:$8 sm:$0xf]   ;;  %v3421_v33 = vsel %vm4_vm0, %v6149_v30, %v6148_v28  ;;  %5834 = vst.msk [vmem:[%s12491_s1 + $0x440] sm:$0xff] %vm1251_vm2, %v2265_v17   ;;  %5852 = vst.msk [vmem:[%s12491_s1 + $0x620] sm:$0xff] %vm1251_vm2, %v2331_v25   ;;  %v256_v30 = vsel %vm4_vm0, %v5280_v27, %v5279_v24 }
 0x1d4   :  { %v6151_v34 = vld [vmem:[%s12490_s0 + $0x9c4] ss:$8 sm:$0xf0]   ;;  %v5267_v28 = vld [vmem:[%s12490_s0 + $0x600] ss:$8 sm:$0xf]  }
 0x1d5   :  { %v6142_v35 = vld [vmem:[%s12490_s0 + $0x884] ss:$8 sm:$0xf]   ;;  %v3427_v36 = vsel %vm4_vm0, %v6151_v34, %v6150_v31  ;;  %v5268_v31 = vld [vmem:[%s12490_s0 + $0x600] ss:$8 sm:$0xf0]  }
 0x1d6   :  { %v6143_v37 = vld [vmem:[%s12490_s0 + $0x884] ss:$8 sm:$0xf0]   ;;  %v3429_v39 = vsel %vm375_vm3, %v3427_v36, %v3421_v33  ;;  %v2309_v33 = vpop.permute.xlu0 %2308   ;;  %5281 = vst.msk [vmem:[%s12491_s1 + $0x460] sm:$0xff] %vm6_vm7, %v256_v30   ;;  %v220_v34 = vsel %vm4_vm0, %v5268_v31, %v5267_v28 }
 0x1d7   :  { %v6144_v38 = vld [vmem:[%s12490_s0 + $0x8c4] ss:$8 sm:$0xf]   ;;  %v3399_v40 = vsel %vm4_vm0, %v6143_v37, %v6142_v35  ;;  %3430 = vrot.lane.b32.xlu1 %v3429_v39, %s6644_s28  ;;  %5846 = vst.msk [vmem:[%s12491_s1 + $0x580] sm:$0xff] %vm1251_vm2, %v2309_v33  }
 0x1d8   :  { %v6145_v41 = vld [vmem:[%s12490_s0 + $0x8c4] ss:$8 sm:$0xf0]   ;;  %5841 = vst.msk [vmem:[%s12491_s1 + $0x460] sm:$0xff] %vm2138_vm8, %v2287_v10  }
 0x1d9   :  { %v3405_v44 = vsel %vm4_vm0, %v6145_v41, %v6144_v38  ;;  %v6160_v51 = vld [vmem:[%s12490_s0 + $0x1c4] ss:$8 sm:$0xf]   ;;  %5269 = vst.msk [vmem:[%s12491_s1 + $0x3c0] sm:$0xff] %vm6_vm7, %v220_v34  }
 0x1da   :  { %v3407_v47 = vsel %vm375_vm3, %v3405_v44, %v3399_v40  ;;  %v6161_v53 = vld [vmem:[%s12490_s0 + $0x1c4] ss:$8 sm:$0xf0]   ;;  %v2375_v40 = vpop.permute.xlu1 %2374   ;;  %5835 = vst.msk [vmem:[%s12491_s1 + $0x3c0] sm:$0xff] %vm2138_vm8, %v2265_v17   ;;  %v2353_v48 = vpop.permute.xlu0 %2352  }
 0x1db   :  { %3408 = vrot.lane.b32.xlu0 %v3407_v47, %s6644_s28  ;;  %v6162_v54 = vld [vmem:[%s12490_s0 + $0x104] ss:$8 sm:$0xf]   ;;  %v3465_v55 = vsel %vm4_vm0, %v6161_v53, %v6160_v51  ;;  %5864 = vst.msk [vmem:[%s12491_s1 + $0xa8] sm:$0xff] %vm1251_vm2, %v2375_v40   ;;  %5858 = vst.msk [vmem:[%s12491_s1 + $0x8] sm:$0xff] %vm1251_vm2, %v2353_v48  }
 0x1dc   :  { %v6163_v56 = vld [vmem:[%s12490_s0 + $0x104] ss:$8 sm:$0xf0]   ;;  %v5303_v47 = vld [vmem:[%s12490_s0 + $0x900] ss:$8 sm:$0xf]  }
 0x1dd   :  { %v6154_v57 = vld [vmem:[%s12490_s0 + $0xc4] ss:$8 sm:$0xf]   ;;  %v3471_v59 = vsel %vm4_vm0, %v6163_v56, %v6162_v54  ;;  %v5291_v51 = vld [vmem:[%s12490_s0 + $0x800] ss:$8 sm:$0xf]   ;;  %v328_v53 = vsel %vm4_vm0, %v5304_v50, %v5303_v47 }
 0x1de   :  { %v6155_v60 = vld [vmem:[%s12490_s0 + $0xc4] ss:$8 sm:$0xf0]   ;;  %v3473_v62 = vsel %vm375_vm3, %v3471_v59, %v3465_v55  ;;  %v5292_v54 = vld [vmem:[%s12490_s0 + $0x800] ss:$8 sm:$0xf0]   ;;  %v9817_v56 = vpop.permute.xlu1 %2418  }
 0x1df   :  { %v6156_v61 = vld [vmem:[%s12490_s0 + $0x4] ss:$8 sm:$0xf]   ;;  %v3443_v63 = vsel %vm4_vm0, %v6155_v60, %v6154_v57  ;;  %3474 = vrot.lane.b32.xlu1 %v3473_v62, %s6644_s28  ;;  %5305 = vst.msk [vmem:[%s12491_s1 + $0x5a0] sm:$0xff] %vm6_vm7, %v328_v53   ;;  %v292_v57 = vsel %vm4_vm0, %v5292_v54, %v5291_v51 }
 0x1e0   :  { %v6157_v0 = vld [vmem:[%s12490_s0 + $0x4] ss:$8 sm:$0xf0]   ;;  %5876 = vst.msk [vmem:[%s12491_s1 + $0x1e8] sm:$0xff] %vm1251_vm2, %v9817_v56  }
 0x1e1   :  { %v3449_v3 = vsel %vm4_vm0, %v6157_v0, %v6156_v61  ;;  %v6172_v9 = vld [vmem:[%s12490_s0 + $0x3c4] ss:$8 sm:$0xf]   ;;  %5853 = vst.msk [vmem:[%s12491_s1 + $0x5a0] sm:$0xff] %vm2138_vm8, %v2331_v25  }
 0x1e2   :  { %v3451_v6 = vsel %vm375_vm3, %v3449_v3, %v3443_v63  ;;  %v6173_v12 = vld [vmem:[%s12490_s0 + $0x3c4] ss:$8 sm:$0xf0]   ;;  %5293 = vst.msk [vmem:[%s12491_s1 + $0x500] sm:$0xff] %vm6_vm7, %v292_v57   ;;  %v9851_v63 = vpop.permute.xlu0 %2396   ;;  %v9877_v7 = vpop.permute.xlu1 %2462  }
 0x1e3   :  { %3452 = vrot.lane.b32.xlu0 %v3451_v6, %s6644_s28  ;;  %v6174_v13 = vld [vmem:[%s12490_s0 + $0x304] ss:$8 sm:$0xf]   ;;  %v3509_v14 = vsel %vm4_vm0, %v6173_v12, %v6172_v9  ;;  %5847 = vst.msk [vmem:[%s12491_s1 + $0x500] sm:$0xff] %vm2138_vm8, %v2309_v33  }
 0x1e4   :  { %v6175_v15 = vld [vmem:[%s12490_s0 + $0x304] ss:$8 sm:$0xf0]   ;;  %5870 = vst.msk [vmem:[%s12491_s1 + $0x148] sm:$0xff] %vm1251_vm2, %v9851_v63   ;;  %5888 = vst.msk [vmem:[%s12491_s1 + $0x328] sm:$0xff] %vm1251_vm2, %v9877_v7  }
 0x1e5   :  { %v6166_v16 = vld [vmem:[%s12490_s0 + $0x2c4] ss:$8 sm:$0xf]   ;;  %v3515_v18 = vsel %vm4_vm0, %v6175_v15, %v6174_v13  ;;  %v5210_v6 = vld [vmem:[%s12490_s0 + $0x140] ss:$8 sm:$0xf]  }
 0x1e6   :  { %v6167_v19 = vld [vmem:[%s12490_s0 + $0x2c4] ss:$8 sm:$0xf0]   ;;  %v3517_v21 = vsel %vm375_vm3, %v3515_v18, %v3509_v14  ;;  %v5211_v9 = vld [vmem:[%s12490_s0 + $0x140] ss:$8 sm:$0xf0]   ;;  %v9900_v15 = vpop.permute.xlu0 %2440  }
 0x1e7   :  { %v6168_v20 = vld [vmem:[%s12490_s0 + $0x204] ss:$8 sm:$0xf]   ;;  %v3487_v22 = vsel %vm4_vm0, %v6167_v19, %v6166_v16  ;;  %3518 = vrot.lane.b32.xlu1 %v3517_v21, %s6644_s28  ;;  %v5198_v10 = vld [vmem:[%s12490_s0 + $0x40] ss:$8 sm:$0xf]   ;;  %v49_v12 = vsel %vm4_vm0, %v5211_v9, %v5210_v6 }
 0x1e8   :  { %v6169_v23 = vld [vmem:[%s12490_s0 + $0x204] ss:$8 sm:$0xf0]   ;;  %v5199_v13 = vld [vmem:[%s12490_s0 + $0x40] ss:$8 sm:$0xf0]  }
 0x1e9   :  { %v3493_v26 = vsel %vm4_vm0, %v6169_v23, %v6168_v20  ;;  %v6184_v32 = vld [vmem:[%s12490_s0 + $0x5c4] ss:$8 sm:$0xf]   ;;  %5212 = vst.msk [vmem:[%s12491_s1 + $0xc8] sm:$0xff] %vm6_vm7, %v49_v12   ;;  %v13_v16 = vsel %vm4_vm0, %v5199_v13, %v5198_v10 }
 0x1ea   :  { %v3495_v29 = vsel %vm375_vm3, %v3493_v26, %v3487_v22  ;;  %v6185_v35 = vld [vmem:[%s12490_s0 + $0x5c4] ss:$8 sm:$0xf0]   ;;  %5882 = vst.msk [vmem:[%s12491_s1 + $0x288] sm:$0xff] %vm1251_vm2, %v9900_v15   ;;  %v9934_v22 = vpop.permute.xlu1 %2506   ;;  %v9960_v30 = vpop.permute.xlu0 %2484  }
 0x1eb   :  { %3496 = vrot.lane.b32.xlu0 %v3495_v29, %s6644_s28  ;;  %v6186_v36 = vld [vmem:[%s12490_s0 + $0x504] ss:$8 sm:$0xf]   ;;  %v3553_v37 = vsel %vm4_vm0, %v6185_v35, %v6184_v32  ;;  %5865 = vst.msk [vmem:[%s12491_s1 + $0xc8] sm:$0xff] %vm2138_vm8, %v2375_v40  }
 0x1ec   :  { %v6187_v38 = vld [vmem:[%s12490_s0 + $0x504] ss:$8 sm:$0xf0]   ;;  %5200 = vst.msk [vmem:[%s12491_s1 + $0x28] sm:$0xff] %vm6_vm7, %v13_v16  }
 0x1ed   :  { %v6178_v39 = vld [vmem:[%s12490_s0 + $0x4c4] ss:$8 sm:$0xf]   ;;  %v3559_v41 = vsel %vm4_vm0, %v6187_v38, %v6186_v36  ;;  %5859 = vst.msk [vmem:[%s12491_s1 + $0x28] sm:$0xff] %vm2138_vm8, %v2353_v48  }
 0x1ee   :  { %v6179_v42 = vld [vmem:[%s12490_s0 + $0x4c4] ss:$8 sm:$0xf0]   ;;  %v3561_v44 = vsel %vm375_vm3, %v3559_v41, %v3553_v37  ;;  %5900 = vst.msk [vmem:[%s12491_s1 + $0x468] sm:$0xff] %vm1251_vm2, %v9934_v22   ;;  %5894 = vst.msk [vmem:[%s12491_s1 + $0x3c8] sm:$0xff] %vm1251_vm2, %v9960_v30   ;;  %v9983_v38 = vpop.permute.xlu1 %2550  }
 0x1ef   :  { %v6180_v43 = vld [vmem:[%s12490_s0 + $0x404] ss:$8 sm:$0xf]   ;;  %v3531_v45 = vsel %vm4_vm0, %v6179_v42, %v6178_v39  ;;  %3562 = vrot.lane.b32.xlu1 %v3561_v44, %s6644_s28  ;;  %v5234_v29 = vld [vmem:[%s12490_s0 + $0x340] ss:$8 sm:$0xf]  }
 0x1f0   :  { %v6181_v46 = vld [vmem:[%s12490_s0 + $0x404] ss:$8 sm:$0xf0]   ;;  %v5235_v32 = vld [vmem:[%s12490_s0 + $0x340] ss:$8 sm:$0xf0]  }
 0x1f1   :  { %v3537_v49 = vsel %vm4_vm0, %v6181_v46, %v6180_v43  ;;  %v6196_v55 = vld [vmem:[%s12490_s0 + $0x7c4] ss:$8 sm:$0xf]   ;;  %v5222_v33 = vld [vmem:[%s12490_s0 + $0x240] ss:$8 sm:$0xf]   ;;  %v121_v35 = vsel %vm4_vm0, %v5235_v32, %v5234_v29 }
 0x1f2   :  { %v3539_v52 = vsel %vm375_vm3, %v3537_v49, %v3531_v45  ;;  %v6197_v58 = vld [vmem:[%s12490_s0 + $0x7c4] ss:$8 sm:$0xf0]   ;;  %v5223_v36 = vld [vmem:[%s12490_s0 + $0x240] ss:$8 sm:$0xf0]   ;;  %v10018_v45 = vpop.permute.xlu0 %2528   ;;  %v10045_v53 = vpop.permute.xlu1 %2594  }
 0x1f3   :  { %3540 = vrot.lane.b32.xlu0 %v3539_v52, %s6644_s28  ;;  %v6198_v59 = vld [vmem:[%s12490_s0 + $0x704] ss:$8 sm:$0xf]   ;;  %v3597_v60 = vsel %vm4_vm0, %v6197_v58, %v6196_v55  ;;  %5236 = vst.msk [vmem:[%s12491_s1 + $0x208] sm:$0xff] %vm6_vm7, %v121_v35   ;;  %v85_v39 = vsel %vm4_vm0, %v5223_v36, %v5222_v33 }
 0x1f4   :  { %v6199_v61 = vld [vmem:[%s12490_s0 + $0x704] ss:$8 sm:$0xf0]   ;;  %5912 = vst.msk [vmem:[%s12491_s1 + $0x5a8] sm:$0xff] %vm1251_vm2, %v9983_v38   ;;  %5906 = vst.msk [vmem:[%s12491_s1 + $0x508] sm:$0xff] %vm1251_vm2, %v10018_v45  }
 0x1f5   :  { %v6190_v62 = vld [vmem:[%s12490_s0 + $0x6c4] ss:$8 sm:$0xf]   ;;  %v3603_v0 = vsel %vm4_vm0, %v6199_v61, %v6198_v59  ;;  %5877 = vst.msk [vmem:[%s12491_s1 + $0x208] sm:$0xff] %vm2138_vm8, %v9817_v56  }
 0x1f6   :  { %v6191_v1 = vld [vmem:[%s12490_s0 + $0x6c4] ss:$8 sm:$0xf0]   ;;  %v3605_v3 = vsel %vm375_vm3, %v3603_v0, %v3597_v60  ;;  %5224 = vst.msk [vmem:[%s12491_s1 + $0x168] sm:$0xff] %vm6_vm7, %v85_v39   ;;  %v10068_v61 = vpop.permute.xlu0 %2572  }
 0x1f7   :  { %v6192_v2 = vld [vmem:[%s12490_s0 + $0x604] ss:$8 sm:$0xf]   ;;  %v3575_v4 = vsel %vm4_vm0, %v6191_v1, %v6190_v62  ;;  %3606 = vrot.lane.b32.xlu1 %v3605_v3, %s6644_s28  ;;  %5871 = vst.msk [vmem:[%s12491_s1 + $0x168] sm:$0xff] %vm2138_vm8, %v9851_v63  }
 0x1f8   :  { %v6193_v5 = vld [vmem:[%s12490_s0 + $0x604] ss:$8 sm:$0xf0]   ;;  %v5258_v52 = vld [vmem:[%s12490_s0 + $0x540] ss:$8 sm:$0xf]  }
 0x1f9   :  { %v3581_v8 = vsel %vm4_vm0, %v6193_v5, %v6192_v2  ;;  %v6208_v14 = vld [vmem:[%s12490_s0 + $0x9c4] ss:$8 sm:$0xf]   ;;  %v5259_v55 = vld [vmem:[%s12490_s0 + $0x540] ss:$8 sm:$0xf0]  }
 0x1fa   :  { %v3583_v11 = vsel %vm375_vm3, %v3581_v8, %v3575_v4  ;;  %v6209_v17 = vld [vmem:[%s12490_s0 + $0x9c4] ss:$8 sm:$0xf0]   ;;  %v5246_v56 = vld [vmem:[%s12490_s0 + $0x440] ss:$8 sm:$0xf]   ;;  %v193_v58 = vsel %vm4_vm0, %v5259_v55, %v5258_v52  ;;  %v10103_v4 = vpop.permute.xlu1 %2638   ;;  %v10130_v12 = vpop.permute.xlu0 %2616  }
 0x1fb   :  { %3584 = vrot.lane.b32.xlu0 %v3583_v11, %s6644_s28  ;;  %v6210_v18 = vld [vmem:[%s12490_s0 + $0x904] ss:$8 sm:$0xf]   ;;  %v3641_v19 = vsel %vm4_vm0, %v6209_v17, %v6208_v14  ;;  %5924 = vst.msk [vmem:[%s12491_s1 + $0xd0] sm:$0xff] %vm1251_vm2, %v10045_v53   ;;  %5918 = vst.msk [vmem:[%s12491_s1 + $0x30] sm:$0xff] %vm1251_vm2, %v10068_v61  }
 0x1fc   :  { %v6211_v20 = vld [vmem:[%s12490_s0 + $0x904] ss:$8 sm:$0xf0]   ;;  %v5247_v59 = vld [vmem:[%s12490_s0 + $0x440] ss:$8 sm:$0xf0]  }
 0x1fd   :  { %v6202_v21 = vld [vmem:[%s12490_s0 + $0x8c4] ss:$8 sm:$0xf]   ;;  %v3647_v23 = vsel %vm4_vm0, %v6211_v20, %v6210_v18  ;;  %5260 = vst.msk [vmem:[%s12491_s1 + $0x348] sm:$0xff] %vm6_vm7, %v193_v58   ;;  %v157_v62 = vsel %vm4_vm0, %v5247_v59, %v5246_v56 }
 0x1fe   :  { %v6203_v24 = vld [vmem:[%s12490_s0 + $0x8c4] ss:$8 sm:$0xf0]   ;;  %v3649_v26 = vsel %vm375_vm3, %v3647_v23, %v3641_v19  ;;  %5889 = vst.msk [vmem:[%s12491_s1 + $0x348] sm:$0xff] %vm2138_vm8, %v9877_v7   ;;  %v10153_v20 = vpop.permute.xlu1 %2682  }
 0x1ff   :  { %v6204_v25 = vld [vmem:[%s12490_s0 + $0x804] ss:$8 sm:$0xf]   ;;  %v3619_v27 = vsel %vm4_vm0, %v6203_v24, %v6202_v21  ;;  %3650 = vrot.lane.b32.xlu1 %v3649_v26, %s6644_s28  ;;  %5248 = vst.msk [vmem:[%s12491_s1 + $0x2a8] sm:$0xff] %vm6_vm7, %v157_v62  }
 0x200   :  { %v6205_v28 = vld [vmem:[%s12490_s0 + $0x804] ss:$8 sm:$0xf0]   ;;  %5883 = vst.msk [vmem:[%s12491_s1 + $0x2a8] sm:$0xff] %vm2138_vm8, %v9900_v15  }
 0x201   :  { %v3625_v31 = vsel %vm4_vm0, %v6205_v28, %v6204_v25  ;;  %v6220_v37 = vld [vmem:[%s12490_s0 + $0x104] ss:$8 sm:$0xf]   ;;  %5936 = vst.msk [vmem:[%s12491_s1 + $0x210] sm:$0xff] %vm1251_vm2, %v10103_v4   ;;  %5930 = vst.msk [vmem:[%s12491_s1 + $0x170] sm:$0xff] %vm1251_vm2, %v10130_v12  }
 0x202   :  { %v3627_v34 = vsel %vm375_vm3, %v3625_v31, %v3619_v27  ;;  %v6221_v40 = vld [vmem:[%s12490_s0 + $0x104] ss:$8 sm:$0xf0]   ;;  %v5282_v11 = vld [vmem:[%s12490_s0 + $0x740] ss:$8 sm:$0xf]   ;;  %v10188_v27 = vpop.permute.xlu0 %2660   ;;  %v10215_v35 = vpop.permute.xlu1 %2726  }
 0x203   :  { %3628 = vrot.lane.b32.xlu0 %v3627_v34, %s6644_s28  ;;  %v6222_v41 = vld [vmem:[%s12490_s0 + $0x144] ss:$8 sm:$0xf]   ;;  %v3685_v42 = vsel %vm4_vm0, %v6221_v40, %v6220_v37  ;;  %v5283_v14 = vld [vmem:[%s12490_s0 + $0x740] ss:$8 sm:$0xf0]  }
 0x204   :  { %v6223_v43 = vld [vmem:[%s12490_s0 + $0x144] ss:$8 sm:$0xf0]   ;;  %v5270_v15 = vld [vmem:[%s12490_s0 + $0x640] ss:$8 sm:$0xf]   ;;  %v265_v17 = vsel %vm4_vm0, %v5283_v14, %v5282_v11 }
 0x205   :  { %v6214_v44 = vld [vmem:[%s12490_s0 + $0x4] ss:$8 sm:$0xf]   ;;  %v3691_v46 = vsel %vm4_vm0, %v6223_v43, %v6222_v41  ;;  %v5271_v18 = vld [vmem:[%s12490_s0 + $0x640] ss:$8 sm:$0xf0]  }
 0x206   :  { %v6215_v47 = vld [vmem:[%s12490_s0 + $0x4] ss:$8 sm:$0xf0]   ;;  %v3693_v49 = vsel %vm375_vm3, %v3691_v46, %v3685_v42  ;;  %5284 = vst.msk [vmem:[%s12491_s1 + $0x488] sm:$0xff] %vm6_vm7, %v265_v17   ;;  %v229_v21 = vsel %vm4_vm0, %v5271_v18, %v5270_v15 }
 0x207   :  { %v6216_v48 = vld [vmem:[%s12490_s0 + $0x44] ss:$8 sm:$0xf]   ;;  %v3663_v50 = vsel %vm4_vm0, %v6215_v47, %v6214_v44  ;;  %3694 = vrot.lane.b32.xlu1 %v3693_v49, %s6644_s28  ;;  %5948 = vst.msk [vmem:[%s12491_s1 + $0x350] sm:$0xff] %vm1251_vm2, %v10153_v20   ;;  %5942 = vst.msk [vmem:[%s12491_s1 + $0x2b0] sm:$0xff] %vm1251_vm2, %v10188_v27   ;;  %v10238_v44 = vpop.permute.xlu0 %2704  }
 0x208   :  { %v6217_v51 = vld [vmem:[%s12490_s0 + $0x44] ss:$8 sm:$0xf0]   ;;  %5901 = vst.msk [vmem:[%s12491_s1 + $0x488] sm:$0xff] %vm2138_vm8, %v9934_v22  }
 0x209   :  { %v3669_v54 = vsel %vm4_vm0, %v6217_v51, %v6216_v48  ;;  %v6232_v60 = vld [vmem:[%s12490_s0 + $0x304] ss:$8 sm:$0xf]   ;;  %5272 = vst.msk [vmem:[%s12491_s1 + $0x3e8] sm:$0xff] %vm6_vm7, %v229_v21   ;;  %v10273_v51 = vpop.permute.xlu1 %2770  }
 0x20a   :  { %v3671_v57 = vsel %vm375_vm3, %v3669_v54, %v3663_v50  ;;  %v6233_v63 = vld [vmem:[%s12490_s0 + $0x304] ss:$8 sm:$0xf0]   ;;  %5895 = vst.msk [vmem:[%s12491_s1 + $0x3e8] sm:$0xff] %vm2138_vm8, %v9960_v30  }
 0x20b   :  { %3672 = vrot.lane.b32.xlu0 %v3671_v57, %s6644_s28  ;;  %v6234_v0 = vld [vmem:[%s12490_s0 + $0x344] ss:$8 sm:$0xf]   ;;  %v3729_v1 = vsel %vm4_vm0, %v6233_v63, %v6232_v60  ;;  %v5306_v34 = vld [vmem:[%s12490_s0 + $0x940] ss:$8 sm:$0xf]   ;;  %v10300_v59 = vpop.permute.xlu0 %2748  }
 0x20c   :  { %v6235_v2 = vld [vmem:[%s12490_s0 + $0x344] ss:$8 sm:$0xf0]   ;;  %v5307_v37 = vld [vmem:[%s12490_s0 + $0x940] ss:$8 sm:$0xf0]  }
 0x20d   :  { %v6226_v3 = vld [vmem:[%s12490_s0 + $0x204] ss:$8 sm:$0xf]   ;;  %v3735_v5 = vsel %vm4_vm0, %v6235_v2, %v6234_v0  ;;  %v5294_v39 = vld [vmem:[%s12490_s0 + $0x840] ss:$8 sm:$0xf]   ;;  %v337_v41 = vsel %vm4_vm0, %v5307_v37, %v5306_v34 }
 0x20e   :  { %v6227_v6 = vld [vmem:[%s12490_s0 + $0x204] ss:$8 sm:$0xf0]   ;;  %v3737_v8 = vsel %vm375_vm3, %v3735_v5, %v3729_v1  ;;  %5960 = vst.msk [vmem:[%s12491_s1 + $0x490] sm:$0xff] %vm1251_vm2, %v10215_v35   ;;  %5954 = vst.msk [vmem:[%s12491_s1 + $0x3f0] sm:$0xff] %vm1251_vm2, %v10238_v44   ;;  %v10323_v5 = vpop.permute.xlu1 %2814  }
 0x20f   :  { %v6228_v7 = vld [vmem:[%s12490_s0 + $0x244] ss:$8 sm:$0xf]   ;;  %v3707_v9 = vsel %vm4_vm0, %v6227_v6, %v6226_v3  ;;  %3738 = vrot.lane.b32.xlu1 %v3737_v8, %s6644_s28  ;;  %v5295_v42 = vld [vmem:[%s12490_s0 + $0x840] ss:$8 sm:$0xf0]   ;;  %v10358_v11 = vpop.permute.xlu0 %2792  }
 0x210   :  { %v6229_v10 = vld [vmem:[%s12490_s0 + $0x244] ss:$8 sm:$0xf0]   ;;  %5308 = vst.msk [vmem:[%s12491_s1 + $0x5c8] sm:$0xff] %vm6_vm7, %v337_v41   ;;  %v301_v46 = vsel %vm4_vm0, %v5295_v42, %v5294_v39 }
 0x211   :  { %v3713_v13 = vsel %vm4_vm0, %v6229_v10, %v6228_v7  ;;  %v6244_v19 = vld [vmem:[%s12490_s0 + $0x504] ss:$8 sm:$0xf]   ;;  %5913 = vst.msk [vmem:[%s12491_s1 + $0x5c8] sm:$0xff] %vm2138_vm8, %v9983_v38  }
 0x212   :  { %v3715_v16 = vsel %vm375_vm3, %v3713_v13, %v3707_v9  ;;  %v6245_v23 = vld [vmem:[%s12490_s0 + $0x504] ss:$8 sm:$0xf0]   ;;  %5296 = vst.msk [vmem:[%s12491_s1 + $0x528] sm:$0xff] %vm6_vm7, %v301_v46  }
 0x213   :  { %3716 = vrot.lane.b32.xlu0 %v3715_v16, %s6644_s28  ;;  %v6246_v24 = vld [vmem:[%s12490_s0 + $0x544] ss:$8 sm:$0xf]   ;;  %v3773_v22 = vsel %vm4_vm0, %v6245_v23, %v6244_v19  ;;  %5907 = vst.msk [vmem:[%s12491_s1 + $0x528] sm:$0xff] %vm2138_vm8, %v10018_v45   ;;  %v10385_v19 = vpop.permute.xlu1 %2858  }
 0x214   :  { %v6247_v25 = vld [vmem:[%s12490_s0 + $0x544] ss:$8 sm:$0xf0]   ;;  %5972 = vst.msk [vmem:[%s12491_s1 + $0x5d0] sm:$0xff] %vm1251_vm2, %v10273_v51   ;;  %5966 = vst.msk [vmem:[%s12491_s1 + $0x530] sm:$0xff] %vm1251_vm2, %v10300_v59  }
 0x215   :  { %v6238_v26 = vld [vmem:[%s12490_s0 + $0x404] ss:$8 sm:$0xf]   ;;  %v3779_v28 = vsel %vm4_vm0, %v6247_v25, %v6246_v24  ;;  %v5213_v58 = vld [vmem:[%s12490_s0 + $0x180] ss:$8 sm:$0xf]  }
 0x216   :  { %v6239_v29 = vld [vmem:[%s12490_s0 + $0x404] ss:$8 sm:$0xf0]   ;;  %v3781_v31 = vsel %vm375_vm3, %v3779_v28, %v3773_v22  ;;  %v5214_v62 = vld [vmem:[%s12490_s0 + $0x180] ss:$8 sm:$0xf0]  }
 0x217   :  { %v6240_v30 = vld [vmem:[%s12490_s0 + $0x444] ss:$8 sm:$0xf]   ;;  %v3751_v32 = vsel %vm4_vm0, %v6239_v29, %v6238_v26  ;;  %3782 = vrot.lane.b32.xlu1 %v3781_v31, %s6644_s28  ;;  %v5201_v63 = vld [vmem:[%s12490_s0 + $0x80] ss:$8 sm:$0xf]   ;;  %v58_v1 = vsel %vm4_vm0, %v5214_v62, %v5213_v58  ;;  %v10408_v29 = vpop.permute.xlu0 %2836  }
 0x218   :  { %v6241_v33 = vld [vmem:[%s12490_s0 + $0x444] ss:$8 sm:$0xf0]   ;;  %v5202_v2 = vld [vmem:[%s12490_s0 + $0x80] ss:$8 sm:$0xf0]  }
 0x219   :  { %v3757_v36 = vsel %vm4_vm0, %v6241_v33, %v6240_v30  ;;  %v6256_v43 = vld [vmem:[%s12490_s0 + $0x704] ss:$8 sm:$0xf]   ;;  %5215 = vst.msk [vmem:[%s12491_s1 + $0xf0] sm:$0xff] %vm6_vm7, %v58_v1   ;;  %v22_v6 = vsel %vm4_vm0, %v5202_v2, %v5201_v63 }
 0x21a   :  { %v3759_v40 = vsel %vm375_vm3, %v3757_v36, %v3751_v32  ;;  %v6257_v47 = vld [vmem:[%s12490_s0 + $0x704] ss:$8 sm:$0xf0]   ;;  %5984 = vst.msk [vmem:[%s12491_s1 + $0xf8] sm:$0xff] %vm1251_vm2, %v10323_v5   ;;  %5978 = vst.msk [vmem:[%s12491_s1 + $0x58] sm:$0xff] %vm1251_vm2, %v10358_v11   ;;  %v10443_v36 = vpop.permute.xlu1 %2902  }
 0x21b   :  { %3760 = vrot.lane.b32.xlu0 %v3759_v40, %s6644_s28  ;;  %v6258_v48 = vld [vmem:[%s12490_s0 + $0x744] ss:$8 sm:$0xf]   ;;  %v3817_v38 = vsel %vm4_vm0, %v6257_v47, %v6256_v43  ;;  %5925 = vst.msk [vmem:[%s12491_s1 + $0xf0] sm:$0xff] %vm2138_vm8, %v10045_v53   ;;  %v10470_v43 = vpop.permute.xlu0 %2880  }
 0x21c   :  { %v6259_v49 = vld [vmem:[%s12490_s0 + $0x744] ss:$8 sm:$0xf0]   ;;  %5203 = vst.msk [vmem:[%s12491_s1 + $0x50] sm:$0xff] %vm6_vm7, %v22_v6  }
 0x21d   :  { %v6250_v50 = vld [vmem:[%s12490_s0 + $0x604] ss:$8 sm:$0xf]   ;;  %v3823_v45 = vsel %vm4_vm0, %v6259_v49, %v6258_v48  ;;  %5919 = vst.msk [vmem:[%s12491_s1 + $0x50] sm:$0xff] %vm2138_vm8, %v10068_v61  }
 0x21e   :  { %v6251_v52 = vld [vmem:[%s12490_s0 + $0x604] ss:$8 sm:$0xf0]   ;;  %v3825_v55 = vsel %vm375_vm3, %v3823_v45, %v3817_v38  ;;  %v5237_v18 = vld [vmem:[%s12490_s0 + $0x380] ss:$8 sm:$0xf]  }
 0x21f   :  { %v6252_v54 = vld [vmem:[%s12490_s0 + $0x644] ss:$8 sm:$0xf]   ;;  %v3795_v56 = vsel %vm4_vm0, %v6251_v52, %v6250_v50  ;;  %3826 = vrot.lane.b32.xlu1 %v3825_v55, %s6644_s28  ;;  %v5238_v23 = vld [vmem:[%s12490_s0 + $0x380] ss:$8 sm:$0xf0]   ;;  %v10505_v50 = vpop.permute.xlu1 %2946  }
 0x220   :  { %v6253_v57 = vld [vmem:[%s12490_s0 + $0x644] ss:$8 sm:$0xf0]   ;;  %v5225_v24 = vld [vmem:[%s12490_s0 + $0x280] ss:$8 sm:$0xf]   ;;  %v130_v25 = vsel %vm4_vm0, %v5238_v23, %v5237_v18 }
 0x221   :  { %v3801_v60 = vsel %vm4_vm0, %v6253_v57, %v6252_v54  ;;  %v6268_v3 = vld [vmem:[%s12490_s0 + $0x904] ss:$8 sm:$0xf]   ;;  %5996 = vst.msk [vmem:[%s12491_s1 + $0x238] sm:$0xff] %vm1251_vm2, %v10385_v19   ;;  %5990 = vst.msk [vmem:[%s12491_s1 + $0x198] sm:$0xff] %vm1251_vm2, %v10408_v29   ;;  %v10532_v57 = vpop.permute.xlu0 %2924  }
 0x222   :  { %v3803_v0 = vsel %vm375_vm3, %v3801_v60, %v3795_v56  ;;  %v6269_v7 = vld [vmem:[%s12490_s0 + $0x904] ss:$8 sm:$0xf0]   ;;  %v5226_v26 = vld [vmem:[%s12490_s0 + $0x280] ss:$8 sm:$0xf0]  }
 0x223   :  { %3804 = vrot.lane.b32.xlu0 %v3803_v0, %s6644_s28  ;;  %v6270_v8 = vld [vmem:[%s12490_s0 + $0x944] ss:$8 sm:$0xf]   ;;  %v3861_v53 = vsel %vm4_vm0, %v6269_v7, %v6268_v3  ;;  %v6277_v28 = vld [vmem:[%s12490_s0 + $0x107] ss:$8 sm:$0xf]   ;;  %v94_v30 = vsel %vm4_vm0, %v5226_v26, %v5225_v24  ;;  %v10567_v1 = vpop.permute.xlu1 %2990  }
 0x224   :  { %v6271_v9 = vld [vmem:[%s12490_s0 + $0x944] ss:$8 sm:$0xf0]   ;;  %5239 = vst.msk [vmem:[%s12491_s1 + $0x230] sm:$0xff] %vm6_vm7, %v130_v25   ;;  %5227 = vst.msk [vmem:[%s12491_s1 + $0x190] sm:$0xff] %vm6_vm7, %v94_v30  }
 0x225   :  { %v6262_v10 = vld [vmem:[%s12490_s0 + $0x804] ss:$8 sm:$0xf]   ;;  %v3867_v61 = vsel %vm4_vm0, %v6271_v9, %v6270_v8  ;;  %v6278_v31 = vld [vmem:[%s12490_s0 + $0x107] ss:$8 sm:$0xf0]  }
 0x226   :  { %v6263_v13 = vld [vmem:[%s12490_s0 + $0x804] ss:$8 sm:$0xf0]   ;;  %v3869_v15 = vsel %vm375_vm3, %v3867_v61, %v3861_v53  ;;  %v6274_v32 = vld [vmem:[%s12490_s0 + $0x7] ss:$8 sm:$0xf]   ;;  %v10594_v53 = vpop.permute.xlu0 %2968  }
 0x227   :  { %v6264_v14 = vld [vmem:[%s12490_s0 + $0x844] ss:$8 sm:$0xf]   ;;  %v3839_v16 = vsel %vm4_vm0, %v6263_v13, %v6262_v10  ;;  %3870 = vrot.lane.b32.xlu1 %v3869_v15, %s6644_s28  ;;  %5937 = vst.msk [vmem:[%s12491_s1 + $0x230] sm:$0xff] %vm2138_vm8, %v10103_v4   ;;  %v3894_v4 = vsel %vm4_vm0, %v6278_v31, %v6277_v28  ;;  %5931 = vst.msk [vmem:[%s12491_s1 + $0x190] sm:$0xff] %vm2138_vm8, %v10130_v12   ;;  %v3035_v15 = vpop.permute.xlu1 %3034  }
 0x228   :  { %v6265_v17 = vld [vmem:[%s12490_s0 + $0x844] ss:$8 sm:$0xf0]   ;;  %v6275_v33 = vld [vmem:[%s12490_s0 + $0x7] ss:$8 sm:$0xf0]  }
 0x229   :  { %v3845_v21 = vsel %vm4_vm0, %v6265_v17, %v6264_v14  ;;  %v5261_v34 = vld [vmem:[%s12490_s0 + $0x580] ss:$8 sm:$0xf]   ;;  %v3883_v12 = vsel %vm4_vm0, %v6275_v33, %v6274_v32  ;;  %6008 = vst.msk [vmem:[%s12491_s1 + $0x378] sm:$0xff] %vm1251_vm2, %v10443_v36   ;;  %6002 = vst.msk [vmem:[%s12491_s1 + $0x2d8] sm:$0xff] %vm1251_vm2, %v10470_v43  }
 0x22a   :  { %v3847_v22 = vsel %vm375_vm3, %v3845_v21, %v3839_v16  ;;  %v5262_v37 = vld [vmem:[%s12490_s0 + $0x580] ss:$8 sm:$0xf0]   ;;  %v6283_v42 = vld [vmem:[%s12490_s0 + $0x307] ss:$8 sm:$0xf]   ;;  %v3013_v24 = vpop.permute.xlu0 %3012  }
 0x22b   :  { %3848 = vrot.lane.b32.xlu0 %v3847_v22, %s6644_s28  ;;  %3895 = vrot.lane.b32.xlu1 %v3894_v4, %s6645_s26  ;;  %v5249_v39 = vld [vmem:[%s12490_s0 + $0x480] ss:$8 sm:$0xf]   ;;  %v202_v40 = vsel %vm4_vm0, %v5262_v37, %v5261_v34  ;;  %v6284_v47 = vld [vmem:[%s12490_s0 + $0x307] ss:$8 sm:$0xf0]   ;;  %v3079_v31 = vpop.permute.xlu1 %3078  }
 0x22c   :  { %v5250_v41 = vld [vmem:[%s12490_s0 + $0x480] ss:$8 sm:$0xf0]   ;;  %5263 = vst.msk [vmem:[%s12491_s1 + $0x370] sm:$0xff] %vm6_vm7, %v202_v40  }
 0x22d   :  { %v166_v46 = vsel %vm4_vm0, %v5250_v41, %v5249_v39  ;;  %v6280_v48 = vld [vmem:[%s12490_s0 + $0x207] ss:$8 sm:$0xf]   ;;  %5949 = vst.msk [vmem:[%s12491_s1 + $0x370] sm:$0xff] %vm2138_vm8, %v10153_v20   ;;  %v3916_v20 = vsel %vm4_vm0, %v6284_v47, %v6283_v42 }
 0x22e   :  { %5251 = vst.msk [vmem:[%s12491_s1 + $0x2d0] sm:$0xff] %vm6_vm7, %v166_v46   ;;  %v6281_v38 = vld [vmem:[%s12490_s0 + $0x207] ss:$8 sm:$0xf0]   ;;  %v3057_v37 = vpop.permute.xlu0 %3056  }
 0x22f   :  { %3884 = vrot.lane.b32.xlu0 %v3883_v12, %s6645_s26  ;;  %v5285_v49 = vld [vmem:[%s12490_s0 + $0x780] ss:$8 sm:$0xf]   ;;  %5943 = vst.msk [vmem:[%s12491_s1 + $0x2d0] sm:$0xff] %vm2138_vm8, %v10188_v27   ;;  %3917 = vrot.lane.b32.xlu1 %v3916_v20, %s6645_s26  ;;  %v3905_v27 = vsel %vm4_vm0, %v6281_v38, %v6280_v48  ;;  %v3123_v47 = vpop.permute.xlu1 %3122  }
 0x230   :  { %v5286_v45 = vld [vmem:[%s12490_s0 + $0x780] ss:$8 sm:$0xf0]   ;;  %6020 = vst.msk [vmem:[%s12491_s1 + $0x4b8] sm:$0xff] %vm1251_vm2, %v10505_v50   ;;  %6014 = vst.msk [vmem:[%s12491_s1 + $0x418] sm:$0xff] %vm1251_vm2, %v10532_v57  }
 0x231   :  { %v5273_v52 = vld [vmem:[%s12490_s0 + $0x680] ss:$8 sm:$0xf]   ;;  %v274_v54 = vsel %vm4_vm0, %v5286_v45, %v5285_v49  ;;  %v6289_v56 = vld [vmem:[%s12490_s0 + $0x507] ss:$8 sm:$0xf]  }
 0x232   :  { %v5274_v55 = vld [vmem:[%s12490_s0 + $0x680] ss:$8 sm:$0xf0]   ;;  %5287 = vst.msk [vmem:[%s12491_s1 + $0x4b0] sm:$0xff] %vm6_vm7, %v274_v54   ;;  %v3101_v45 = vpop.permute.xlu0 %3100  }
 0x233   :  { %3906 = vrot.lane.b32.xlu0 %v3905_v27, %s6645_s26  ;;  %v238_v58 = vsel %vm4_vm0, %v5274_v55, %v5273_v52  ;;  %v6290_v60 = vld [vmem:[%s12490_s0 + $0x507] ss:$8 sm:$0xf0]   ;;  %5961 = vst.msk [vmem:[%s12491_s1 + $0x4b0] sm:$0xff] %vm2138_vm8, %v10215_v35  }
 0x234   :  { %v6286_v62 = vld [vmem:[%s12490_s0 + $0x407] ss:$8 sm:$0xf]   ;;  %5275 = vst.msk [vmem:[%s12491_s1 + $0x410] sm:$0xff] %vm6_vm7, %v238_v58   ;;  %v3938_v35 = vsel %vm4_vm0, %v6290_v60, %v6289_v56  ;;  %v3167_v60 = vpop.permute.xlu1 %3166  }
 0x235   :  { %v6287_v63 = vld [vmem:[%s12490_s0 + $0x407] ss:$8 sm:$0xf0]   ;;  %v5309_v0 = vld [vmem:[%s12490_s0 + $0x980] ss:$8 sm:$0xf]   ;;  %3939 = vrot.lane.b32.xlu1 %v3938_v35, %s6645_s26 }
 0x236   :  { %5955 = vst.msk [vmem:[%s12491_s1 + $0x410] sm:$0xff] %vm2138_vm8, %v10238_v44   ;;  %v3927_v44 = vsel %vm4_vm0, %v6287_v63, %v6286_v62  ;;  %v5310_v2 = vld [vmem:[%s12490_s0 + $0x980] ss:$8 sm:$0xf0]  }
 0x237   :  { %v5297_v3 = vld [vmem:[%s12490_s0 + $0x880] ss:$8 sm:$0xf]   ;;  %6032 = vst.msk [vmem:[%s12491_s1 + $0x5f8] sm:$0xff] %vm1251_vm2, %v10567_v1   ;;  %v346_v6 = vsel %vm4_vm0, %v5310_v2, %v5309_v0  ;;  %3928 = vrot.lane.b32.xlu0 %v3927_v44, %s6645_s26  ;;  %6026 = vst.msk [vmem:[%s12491_s1 + $0x558] sm:$0xff] %vm1251_vm2, %v10594_v53   ;;  %v3145_v2 = vpop.permute.xlu0 %3144  }
 0x238   :  { %v5298_v7 = vld [vmem:[%s12490_s0 + $0x880] ss:$8 sm:$0xf0]   ;;  %v6295_v8 = vld [vmem:[%s12490_s0 + $0x707] ss:$8 sm:$0xf]  }
 0x239   :  { %5311 = vst.msk [vmem:[%s12491_s1 + $0x5f0] sm:$0xff] %vm6_vm7, %v346_v6   ;;  %v310_v9 = vsel %vm4_vm0, %v5298_v7, %v5297_v3  ;;  %v6296_v10 = vld [vmem:[%s12490_s0 + $0x707] ss:$8 sm:$0xf0]  }
 0x23a   :  { %v6292_v61 = vld [vmem:[%s12490_s0 + $0x607] ss:$8 sm:$0xf]   ;;  %5973 = vst.msk [vmem:[%s12491_s1 + $0x5f0] sm:$0xff] %vm2138_vm8, %v10273_v51   ;;  %v3960_v51 = vsel %vm4_vm0, %v6296_v10, %v6295_v8  ;;  %v3211_v10 = vpop.permute.xlu1 %3210  }
 0x23b   :  { %5299 = vst.msk [vmem:[%s12491_s1 + $0x550] sm:$0xff] %vm6_vm7, %v310_v9   ;;  %v6293_v13 = vld [vmem:[%s12490_s0 + $0x607] ss:$8 sm:$0xf0]   ;;  %3961 = vrot.lane.b32.xlu1 %v3960_v51, %s6645_s26 }
 0x23c   :  { %v5216_v14 = vld [vmem:[%s12490_s0 + $0x1c0] ss:$8 sm:$0xf]   ;;  %5967 = vst.msk [vmem:[%s12491_s1 + $0x550] sm:$0xff] %vm2138_vm8, %v10300_v59   ;;  %v3949_v59 = vsel %vm4_vm0, %v6293_v13, %v6292_v61 }
 0x23d   :  { %v5217_v16 = vld [vmem:[%s12490_s0 + $0x1c0] ss:$8 sm:$0xf0]   ;;  %6044 = vst.msk [vmem:[%s12491_s1 + $0xe0] sm:$0xff] %vm371_vm1, %v3035_v15   ;;  %3950 = vrot.lane.b32.xlu0 %v3949_v59, %s6645_s26  ;;  %6038 = vst.msk [vmem:[%s12491_s1 + $0x40] sm:$0xff] %vm371_vm1, %v3013_v24   ;;  %v3189_v59 = vpop.permute.xlu0 %3188  }
 0x23e   :  { %v5204_v17 = vld [vmem:[%s12490_s0 + $0xc0] ss:$8 sm:$0xf]   ;;  %6045 = vst.msk [vmem:[%s12491_s1 + $0x100] sm:$0xff] %vm3017_vm9, %v3035_v15   ;;  %v67_v18 = vsel %vm4_vm0, %v5217_v16, %v5216_v14  ;;  %6039 = vst.msk [vmem:[%s12491_s1 + $0x60] sm:$0xff] %vm3017_vm9, %v3013_v24   ;;  %v3255_v24 = vpop.permute.xlu1 %3254  }
 0x23f   :  { %v5205_v21 = vld [vmem:[%s12490_s0 + $0xc0] ss:$8 sm:$0xf0]   ;;  %v6301_v23 = vld [vmem:[%s12490_s0 + $0x907] ss:$8 sm:$0xf]  }
 0x240   :  { %5218 = vst.msk [vmem:[%s12491_s1 + $0x118] sm:$0xff] %vm6_vm7, %v67_v18   ;;  %v31_v22 = vsel %vm4_vm0, %v5205_v21, %v5204_v17  ;;  %v6302_v25 = vld [vmem:[%s12490_s0 + $0x907] ss:$8 sm:$0xf0]  }
 0x241   :  { %v6298_v26 = vld [vmem:[%s12490_s0 + $0x807] ss:$8 sm:$0xf]   ;;  %5985 = vst.msk [vmem:[%s12491_s1 + $0x118] sm:$0xff] %vm2138_vm8, %v10323_v5   ;;  %v3982_v5 = vsel %vm4_vm0, %v6302_v25, %v6301_v23 }
 0x242   :  { %5206 = vst.msk [vmem:[%s12491_s1 + $0x78] sm:$0xff] %vm6_vm7, %v31_v22   ;;  %v6299_v28 = vld [vmem:[%s12490_s0 + $0x807] ss:$8 sm:$0xf0]   ;;  %3983 = vrot.lane.b32.xlu1 %v3982_v5, %s6645_s26 }
 0x243   :  { %v5240_v30 = vld [vmem:[%s12490_s0 + $0x3c0] ss:$8 sm:$0xf]   ;;  %5979 = vst.msk [vmem:[%s12491_s1 + $0x78] sm:$0xff] %vm2138_vm8, %v10358_v11   ;;  %v3971_v11 = vsel %vm4_vm0, %v6299_v28, %v6298_v26  ;;  %v3233_v28 = vpop.permute.xlu0 %3232  }
 0x244   :  { %v5241_v32 = vld [vmem:[%s12490_s0 + $0x3c0] ss:$8 sm:$0xf0]   ;;  %6056 = vst.msk [vmem:[%s12491_s1 + $0x220] sm:$0xff] %vm371_vm1, %v3079_v31   ;;  %3972 = vrot.lane.b32.xlu0 %v3971_v11, %s6645_s26  ;;  %6050 = vst.msk [vmem:[%s12491_s1 + $0x180] sm:$0xff] %vm371_vm1, %v3057_v37  }
 0x245   :  { %v5228_v4 = vld [vmem:[%s12490_s0 + $0x2c0] ss:$8 sm:$0xf]   ;;  %6057 = vst.msk [vmem:[%s12491_s1 + $0x240] sm:$0xff] %vm3017_vm9, %v3079_v31   ;;  %v139_v33 = vsel %vm4_vm0, %v5241_v32, %v5240_v30  ;;  %6051 = vst.msk [vmem:[%s12491_s1 + $0x1a0] sm:$0xff] %vm3017_vm9, %v3057_v37   ;;  %v3299_v32 = vpop.permute.xlu1 %3298  }
 0x246   :  { %v5229_v34 = vld [vmem:[%s12490_s0 + $0x2c0] ss:$8 sm:$0xf0]   ;;  %v6307_v12 = vld [vmem:[%s12490_s0 + $0x147] ss:$8 sm:$0xf]  }
 0x247   :  { %5242 = vst.msk [vmem:[%s12491_s1 + $0x258] sm:$0xff] %vm6_vm7, %v139_v33   ;;  %v103_v39 = vsel %vm4_vm0, %v5229_v34, %v5228_v4  ;;  %v6308_v40 = vld [vmem:[%s12490_s0 + $0x147] ss:$8 sm:$0xf0]  }
 0x248   :  { %v6304_v41 = vld [vmem:[%s12490_s0 + $0x47] ss:$8 sm:$0xf]   ;;  %5997 = vst.msk [vmem:[%s12491_s1 + $0x258] sm:$0xff] %vm2138_vm8, %v10385_v19   ;;  %v4004_v19 = vsel %vm4_vm0, %v6308_v40, %v6307_v12  ;;  %v3277_v12 = vpop.permute.xlu0 %3276  }
 0x249   :  { %5230 = vst.msk [vmem:[%s12491_s1 + $0x1b8] sm:$0xff] %vm6_vm7, %v103_v39   ;;  %v6305_v42 = vld [vmem:[%s12490_s0 + $0x47] ss:$8 sm:$0xf0]   ;;  %4005 = vrot.lane.b32.xlu1 %v4004_v19, %s6645_s26 }
 0x24a   :  { %v5264_v46 = vld [vmem:[%s12490_s0 + $0x5c0] ss:$8 sm:$0xf]   ;;  %5991 = vst.msk [vmem:[%s12491_s1 + $0x1b8] sm:$0xff] %vm2138_vm8, %v10408_v29   ;;  %v3993_v29 = vsel %vm4_vm0, %v6305_v42, %v6304_v41  ;;  %v3343_v41 = vpop.permute.xlu1 %3342  }
 0x24b   :  { %v5265_v48 = vld [vmem:[%s12490_s0 + $0x5c0] ss:$8 sm:$0xf0]   ;;  %6068 = vst.msk [vmem:[%s12491_s1 + $0x360] sm:$0xff] %vm371_vm1, %v3123_v47   ;;  %3994 = vrot.lane.b32.xlu0 %v3993_v29, %s6645_s26  ;;  %6062 = vst.msk [vmem:[%s12491_s1 + $0x2c0] sm:$0xff] %vm371_vm1, %v3101_v45  }
 0x24c   :  { %v5252_v20 = vld [vmem:[%s12490_s0 + $0x4c0] ss:$8 sm:$0xf]   ;;  %6069 = vst.msk [vmem:[%s12491_s1 + $0x380] sm:$0xff] %vm3017_vm9, %v3123_v47   ;;  %v211_v38 = vsel %vm4_vm0, %v5265_v48, %v5264_v46  ;;  %6063 = vst.msk [vmem:[%s12491_s1 + $0x2e0] sm:$0xff] %vm3017_vm9, %v3101_v45   ;;  %v3321_v47 = vpop.permute.xlu0 %3320  }
 0x24d   :  { %v5253_v49 = vld [vmem:[%s12490_s0 + $0x4c0] ss:$8 sm:$0xf0]   ;;  %v6313_v27 = vld [vmem:[%s12490_s0 + $0x347] ss:$8 sm:$0xf]  }
 0x24e   :  { %5266 = vst.msk [vmem:[%s12491_s1 + $0x398] sm:$0xff] %vm6_vm7, %v211_v38   ;;  %v175_v52 = vsel %vm4_vm0, %v5253_v49, %v5252_v20  ;;  %v6314_v54 = vld [vmem:[%s12490_s0 + $0x347] ss:$8 sm:$0xf0]   ;;  %v3387_v38 = vpop.permute.xlu1 %3386  }
 0x24f   :  { %v6310_v55 = vld [vmem:[%s12490_s0 + $0x247] ss:$8 sm:$0xf]   ;;  %6009 = vst.msk [vmem:[%s12491_s1 + $0x398] sm:$0xff] %vm2138_vm8, %v10443_v36   ;;  %v4026_v36 = vsel %vm4_vm0, %v6314_v54, %v6313_v27 }
 0x250   :  { %5254 = vst.msk [vmem:[%s12491_s1 + $0x2f8] sm:$0xff] %vm6_vm7, %v175_v52   ;;  %v6311_v56 = vld [vmem:[%s12490_s0 + $0x247] ss:$8 sm:$0xf0]   ;;  %4027 = vrot.lane.b32.xlu1 %v4026_v36, %s6645_s26  ;;  %v3365_v52 = vpop.permute.xlu0 %3364  }
 0x251   :  { %v5288_v58 = vld [vmem:[%s12490_s0 + $0x7c0] ss:$8 sm:$0xf]   ;;  %6003 = vst.msk [vmem:[%s12491_s1 + $0x2f8] sm:$0xff] %vm2138_vm8, %v10470_v43   ;;  %v4015_v43 = vsel %vm4_vm0, %v6311_v56, %v6310_v55 }
 0x252   :  { %v5289_v62 = vld [vmem:[%s12490_s0 + $0x7c0] ss:$8 sm:$0xf0]   ;;  %6080 = vst.msk [vmem:[%s12491_s1 + $0x4a0] sm:$0xff] %vm371_vm1, %v3167_v60   ;;  %4016 = vrot.lane.b32.xlu0 %v4015_v43, %s6645_s26  ;;  %6074 = vst.msk [vmem:[%s12491_s1 + $0x400] sm:$0xff] %vm371_vm1, %v3145_v2  }
 0x253   :  { %v5276_v35 = vld [vmem:[%s12490_s0 + $0x6c0] ss:$8 sm:$0xf]   ;;  %6081 = vst.msk [vmem:[%s12491_s1 + $0x4c0] sm:$0xff] %vm3017_vm9, %v3167_v60   ;;  %v283_v63 = vsel %vm4_vm0, %v5289_v62, %v5288_v58  ;;  %6075 = vst.msk [vmem:[%s12491_s1 + $0x420] sm:$0xff] %vm3017_vm9, %v3145_v2  }
 0x254   :  { %v5277_v0 = vld [vmem:[%s12490_s0 + $0x6c0] ss:$8 sm:$0xf0]   ;;  %v6319_v44 = vld [vmem:[%s12490_s0 + $0x547] ss:$8 sm:$0xf]   ;;  %v3409_v2 = vpop.permute.xlu0 %3408  }
 0x255   :  { %5290 = vst.msk [vmem:[%s12491_s1 + $0x4d8] sm:$0xff] %vm6_vm7, %v283_v63   ;;  %v247_v3 = vsel %vm4_vm0, %v5277_v0, %v5276_v35  ;;  %v6320_v6 = vld [vmem:[%s12490_s0 + $0x547] ss:$8 sm:$0xf0]   ;;  %v3431_v35 = vpop.permute.xlu1 %3430  }
 0x256   :  { %v6316_v7 = vld [vmem:[%s12490_s0 + $0x447] ss:$8 sm:$0xf]   ;;  %6021 = vst.msk [vmem:[%s12491_s1 + $0x4d8] sm:$0xff] %vm2138_vm8, %v10505_v50   ;;  %v4048_v50 = vsel %vm4_vm0, %v6320_v6, %v6319_v44 }
 0x257   :  { %5278 = vst.msk [vmem:[%s12491_s1 + $0x438] sm:$0xff] %vm6_vm7, %v247_v3   ;;  %v6317_v8 = vld [vmem:[%s12490_s0 + $0x447] ss:$8 sm:$0xf0]   ;;  %4049 = vrot.lane.b32.xlu1 %v4048_v50, %s6645_s26 }
 0x258   :  { %v5312_v9 = vld [vmem:[%s12490_s0 + $0x9c0] ss:$8 sm:$0xf]   ;;  %6015 = vst.msk [vmem:[%s12491_s1 + $0x438] sm:$0xff] %vm2138_vm8, %v10532_v57   ;;  %v4037_v57 = vsel %vm4_vm0, %v6317_v8, %v6316_v7 }
 0x259   :  { %v5313_v61 = vld [vmem:[%s12490_s0 + $0x9c0] ss:$8 sm:$0xf0]   ;;  %6092 = vst.msk [vmem:[%s12491_s1 + $0x5e0] sm:$0xff] %vm371_vm1, %v3211_v10   ;;  %4038 = vrot.lane.b32.xlu0 %v4037_v57, %s6645_s26  ;;  %6086 = vst.msk [vmem:[%s12491_s1 + $0x540] sm:$0xff] %vm371_vm1, %v3189_v59  }
 0x25a   :  { %v5300_v51 = vld [vmem:[%s12490_s0 + $0x8c0] ss:$8 sm:$0xf]   ;;  %6093 = vst.msk [vmem:[%s12491_s1 + $0x600] sm:$0xff] %vm3017_vm9, %v3211_v10   ;;  %v355_v13 = vsel %vm4_vm0, %v5313_v61, %v5312_v9  ;;  %6087 = vst.msk [vmem:[%s12491_s1 + $0x560] sm:$0xff] %vm3017_vm9, %v3189_v59   ;;  %v3475_v10 = vpop.permute.xlu1 %3474  }
 0x25b   :  { %v5301_v14 = vld [vmem:[%s12490_s0 + $0x8c0] ss:$8 sm:$0xf0]   ;;  %v6325_v15 = vld [vmem:[%s12490_s0 + $0x747] ss:$8 sm:$0xf]  }
 0x25c   :  { %5314 = vst.msk [vmem:[%s12491_s1 + $0x618] sm:$0xff] %vm6_vm7, %v355_v13   ;;  %v319_v16 = vsel %vm4_vm0, %v5301_v14, %v5300_v51  ;;  %v6326_v17 = vld [vmem:[%s12490_s0 + $0x747] ss:$8 sm:$0xf0]   ;;  %v3453_v13 = vpop.permute.xlu0 %3452  }
 0x25d   :  { %v6322_v18 = vld [vmem:[%s12490_s0 + $0x647] ss:$8 sm:$0xf]   ;;  %6033 = vst.msk [vmem:[%s12491_s1 + $0x618] sm:$0xff] %vm2138_vm8, %v10567_v1   ;;  %v4070_v1 = vsel %vm4_vm0, %v6326_v17, %v6325_v15 }
 0x25e   :  { %5302 = vst.msk [vmem:[%s12491_s1 + $0x578] sm:$0xff] %vm6_vm7, %v319_v16   ;;  %v6323_v21 = vld [vmem:[%s12490_s0 + $0x647] ss:$8 sm:$0xf0]   ;;  %4071 = vrot.lane.b32.xlu1 %v4070_v1, %s6645_s26  ;;  %v3519_v1 = vpop.permute.xlu1 %3518  }
 0x25f   :  { %v6331_v23 = vld [vmem:[%s12490_s0 + $0x947] ss:$8 sm:$0xf]   ;;  %6027 = vst.msk [vmem:[%s12491_s1 + $0x578] sm:$0xff] %vm2138_vm8, %v10594_v53   ;;  %v4059_v53 = vsel %vm4_vm0, %v6323_v21, %v6322_v18 }
 0x260   :  { %v6332_v22 = vld [vmem:[%s12490_s0 + $0x947] ss:$8 sm:$0xf0]   ;;  %6104 = vst.msk [vmem:[%s12491_s1 + $0x108] sm:$0xff] %vm371_vm1, %v3255_v24   ;;  %4060 = vrot.lane.b32.xlu0 %v4059_v53, %s6645_s26  ;;  %6098 = vst.msk [vmem:[%s12491_s1 + $0x68] sm:$0xff] %vm371_vm1, %v3233_v28   ;;  %v3497_v53 = vpop.permute.xlu0 %3496  }
 0x261   :  { %v6328_v25 = vld [vmem:[%s12490_s0 + $0x847] ss:$8 sm:$0xf]   ;;  %6105 = vst.msk [vmem:[%s12491_s1 + $0x128] sm:$0xff] %vm3017_vm9, %v3255_v24   ;;  %v4092_v26 = vsel %vm4_vm0, %v6332_v22, %v6331_v23  ;;  %6099 = vst.msk [vmem:[%s12491_s1 + $0x88] sm:$0xff] %vm3017_vm9, %v3233_v28  }
 0x262   :  { %v6329_v5 = vld [vmem:[%s12490_s0 + $0x847] ss:$8 sm:$0xf0]   ;;  %4093 = vrot.lane.b32.xlu1 %v4092_v26, %s6645_s26  ;;  %6116 = vst.msk [vmem:[%s12491_s1 + $0x248] sm:$0xff] %vm371_vm1, %v3299_v32   ;;  %6110 = vst.msk [vmem:[%s12491_s1 + $0x1a8] sm:$0xff] %vm371_vm1, %v3277_v12  }
 0x263   :  { %v6337_v30 = vld [vmem:[%s12490_s0 + $0x187] ss:$8 sm:$0xf]   ;;  %v4081_v11 = vsel %vm4_vm0, %v6329_v5, %v6328_v25  ;;  %6117 = vst.msk [vmem:[%s12491_s1 + $0x268] sm:$0xff] %vm3017_vm9, %v3299_v32   ;;  %6111 = vst.msk [vmem:[%s12491_s1 + $0x1c8] sm:$0xff] %vm3017_vm9, %v3277_v12  }
 0x264   :  { %v6338_v31 = vld [vmem:[%s12490_s0 + $0x187] ss:$8 sm:$0xf0]   ;;  %4082 = vrot.lane.b32.xlu0 %v4081_v11, %s6645_s26  ;;  %6128 = vst.msk [vmem:[%s12491_s1 + $0x388] sm:$0xff] %vm371_vm1, %v3343_v41   ;;  %6122 = vst.msk [vmem:[%s12491_s1 + $0x2e8] sm:$0xff] %vm371_vm1, %v3321_v47  }
 0x265   :  { %v6334_v4 = vld [vmem:[%s12490_s0 + $0x87] ss:$8 sm:$0xf]   ;;  %v4114_v34 = vsel %vm4_vm0, %v6338_v31, %v6337_v30  ;;  %6129 = vst.msk [vmem:[%s12491_s1 + $0x3a8] sm:$0xff] %vm3017_vm9, %v3343_v41   ;;  %6123 = vst.msk [vmem:[%s12491_s1 + $0x308] sm:$0xff] %vm3017_vm9, %v3321_v47   ;;  %v3563_v31 = vpop.permute.xlu1 %3562  }
 0x266   :  { %v6335_v33 = vld [vmem:[%s12490_s0 + $0x87] ss:$8 sm:$0xf0]   ;;  %4115 = vrot.lane.b32.xlu1 %v4114_v34, %s6645_s26  ;;  %6140 = vst.msk [vmem:[%s12491_s1 + $0x4c8] sm:$0xff] %vm371_vm1, %v3387_v38   ;;  %6134 = vst.msk [vmem:[%s12491_s1 + $0x428] sm:$0xff] %vm371_vm1, %v3365_v52  }
 0x267   :  { %v6343_v37 = vld [vmem:[%s12490_s0 + $0x387] ss:$8 sm:$0xf]   ;;  %v4103_v40 = vsel %vm4_vm0, %v6335_v33, %v6334_v4  ;;  %6141 = vst.msk [vmem:[%s12491_s1 + $0x4e8] sm:$0xff] %vm3017_vm9, %v3387_v38   ;;  %6135 = vst.msk [vmem:[%s12491_s1 + $0x448] sm:$0xff] %vm3017_vm9, %v3365_v52   ;;  %v3541_v33 = vpop.permute.xlu0 %3540  }
 0x268   :  { %v6344_v39 = vld [vmem:[%s12490_s0 + $0x387] ss:$8 sm:$0xf0]   ;;  %4104 = vrot.lane.b32.xlu0 %v4103_v40, %s6645_s26  ;;  %6152 = vst.msk [vmem:[%s12491_s1 + $0x608] sm:$0xff] %vm371_vm1, %v3431_v35   ;;  %6146 = vst.msk [vmem:[%s12491_s1 + $0x568] sm:$0xff] %vm371_vm1, %v3409_v2  }
 0x269   :  { %v6340_v19 = vld [vmem:[%s12490_s0 + $0x287] ss:$8 sm:$0xf]   ;;  %v4136_v46 = vsel %vm4_vm0, %v6344_v39, %v6343_v37  ;;  %6153 = vst.msk [vmem:[%s12491_s1 + $0x628] sm:$0xff] %vm3017_vm9, %v3431_v35   ;;  %6147 = vst.msk [vmem:[%s12491_s1 + $0x588] sm:$0xff] %vm3017_vm9, %v3409_v2  }
 0x26a   :  { %v6341_v42 = vld [vmem:[%s12490_s0 + $0x287] ss:$8 sm:$0xf0]   ;;  %4137 = vrot.lane.b32.xlu1 %v4136_v46, %s6645_s26  ;;  %6164 = vst.msk [vmem:[%s12491_s1 + $0x130] sm:$0xff] %vm371_vm1, %v3475_v10   ;;  %6158 = vst.msk [vmem:[%s12491_s1 + $0x90] sm:$0xff] %vm371_vm1, %v3453_v13  }
 0x26b   :  { %v6349_v29 = vld [vmem:[%s12490_s0 + $0x587] ss:$8 sm:$0xf]   ;;  %v4125_v20 = vsel %vm4_vm0, %v6341_v42, %v6340_v19  ;;  %6165 = vst.msk [vmem:[%s12491_s1 + $0xb0] sm:$0xff] %vm3017_vm9, %v3475_v10   ;;  %6159 = vst.msk [vmem:[%s12491_s1 + $0x10] sm:$0xff] %vm3017_vm9, %v3453_v13   ;;  %v3607_v19 = vpop.permute.xlu1 %3606  }
 0x26c   :  { %v6350_v48 = vld [vmem:[%s12490_s0 + $0x587] ss:$8 sm:$0xf0]   ;;  %4126 = vrot.lane.b32.xlu0 %v4125_v20, %s6645_s26  ;;  %6176 = vst.msk [vmem:[%s12491_s1 + $0x270] sm:$0xff] %vm371_vm1, %v3519_v1   ;;  %6170 = vst.msk [vmem:[%s12491_s1 + $0x1d0] sm:$0xff] %vm371_vm1, %v3497_v53  }
 0x26d   :  { %v6346_v49 = vld [vmem:[%s12490_s0 + $0x487] ss:$8 sm:$0xf]   ;;  %v4158_v45 = vsel %vm4_vm0, %v6350_v48, %v6349_v29  ;;  %6177 = vst.msk [vmem:[%s12491_s1 + $0x1f0] sm:$0xff] %vm3017_vm9, %v3519_v1   ;;  %6171 = vst.msk [vmem:[%s12491_s1 + $0x150] sm:$0xff] %vm3017_vm9, %v3497_v53   ;;  %v3585_v29 = vpop.permute.xlu0 %3584  }
 0x26e   :  { %v6347_v27 = vld [vmem:[%s12490_s0 + $0x487] ss:$8 sm:$0xf0]   ;;  %4159 = vrot.lane.b32.xlu1 %v4158_v45, %s6645_s26  ;;  %6188 = vst.msk [vmem:[%s12491_s1 + $0x3b0] sm:$0xff] %vm371_vm1, %v3563_v31   ;;  %6182 = vst.msk [vmem:[%s12491_s1 + $0x310] sm:$0xff] %vm371_vm1, %v3541_v33  }
 0x26f   :  { %v6355_v54 = vld [vmem:[%s12490_s0 + $0x787] ss:$8 sm:$0xf]   ;;  %v4147_v36 = vsel %vm4_vm0, %v6347_v27, %v6346_v49  ;;  %6189 = vst.msk [vmem:[%s12491_s1 + $0x330] sm:$0xff] %vm3017_vm9, %v3563_v31   ;;  %6183 = vst.msk [vmem:[%s12491_s1 + $0x290] sm:$0xff] %vm3017_vm9, %v3541_v33  }
 0x270   :  { %v6356_v55 = vld [vmem:[%s12490_s0 + $0x787] ss:$8 sm:$0xf0]   ;;  %4148 = vrot.lane.b32.xlu0 %v4147_v36, %s6645_s26  ;;  %v6397_v40 = vld [vmem:[%s12490_s0 + $0x1c2] ss:$8 sm:$0xf]  }
 0x271   :  { %v6352_v56 = vld [vmem:[%s12490_s0 + $0x687] ss:$8 sm:$0xf]   ;;  %v4180_v60 = vsel %vm4_vm0, %v6356_v55, %v6355_v54  ;;  %v6398_v41 = vld [vmem:[%s12490_s0 + $0x1c2] ss:$8 sm:$0xf0]   ;;  %v3651_v52 = vpop.permute.xlu1 %3650  }
 0x272   :  { %v6353_v58 = vld [vmem:[%s12490_s0 + $0x687] ss:$8 sm:$0xf0]   ;;  %4181 = vrot.lane.b32.xlu1 %v4180_v60, %s6645_s26  ;;  %6200 = vst.msk [vmem:[%s12491_s1 + $0x4f0] sm:$0xff] %vm371_vm1, %v3607_v19   ;;  %v4334_v48 = vsel %vm4_vm0, %v6398_v41, %v6397_v40  ;;  %6194 = vst.msk [vmem:[%s12491_s1 + $0x450] sm:$0xff] %vm371_vm1, %v3585_v29  }
 0x273   :  { %v6361_v43 = vld [vmem:[%s12490_s0 + $0x987] ss:$8 sm:$0xf]   ;;  %v4169_v63 = vsel %vm4_vm0, %v6353_v58, %v6352_v56  ;;  %6201 = vst.msk [vmem:[%s12491_s1 + $0x470] sm:$0xff] %vm3017_vm9, %v3607_v19   ;;  %6195 = vst.msk [vmem:[%s12491_s1 + $0x3d0] sm:$0xff] %vm3017_vm9, %v3585_v29  }
 0x274   :  { %v6362_v62 = vld [vmem:[%s12490_s0 + $0x987] ss:$8 sm:$0xf0]   ;;  %4170 = vrot.lane.b32.xlu0 %v4169_v63, %s6645_s26  ;;  %v6394_v46 = vld [vmem:[%s12490_s0 + $0xc2] ss:$8 sm:$0xf]  }
 0x275   :  { %v6358_v0 = vld [vmem:[%s12490_s0 + $0x887] ss:$8 sm:$0xf]   ;;  %v4202_v3 = vsel %vm4_vm0, %v6362_v62, %v6361_v43  ;;  %v6395_v47 = vld [vmem:[%s12490_s0 + $0xc2] ss:$8 sm:$0xf0]   ;;  %v3629_v56 = vpop.permute.xlu0 %3628  }
 0x276   :  { %v6359_v44 = vld [vmem:[%s12490_s0 + $0x887] ss:$8 sm:$0xf0]   ;;  %4203 = vrot.lane.b32.xlu1 %v4202_v3, %s6645_s26  ;;  %v6403_v20 = vld [vmem:[%s12490_s0 + $0x3c2] ss:$8 sm:$0xf]   ;;  %v4323_v49 = vsel %vm4_vm0, %v6395_v47, %v6394_v46 }
 0x277   :  { %v6367_v6 = vld [vmem:[%s12490_s0 + $0x1c7] ss:$8 sm:$0xf]   ;;  %v4191_v50 = vsel %vm4_vm0, %v6359_v44, %v6358_v0  ;;  %v6404_v38 = vld [vmem:[%s12490_s0 + $0x3c2] ss:$8 sm:$0xf0]  }
 0x278   :  { %v6368_v7 = vld [vmem:[%s12490_s0 + $0x1c7] ss:$8 sm:$0xf0]   ;;  %4192 = vrot.lane.b32.xlu0 %v4191_v50, %s6645_s26  ;;  %v6400_v27 = vld [vmem:[%s12490_s0 + $0x2c2] ss:$8 sm:$0xf]   ;;  %v4356_v54 = vsel %vm4_vm0, %v6404_v38, %v6403_v20 }
 0x279   :  { %v6364_v8 = vld [vmem:[%s12490_s0 + $0xc7] ss:$8 sm:$0xf]   ;;  %v4224_v57 = vsel %vm4_vm0, %v6368_v7, %v6367_v6  ;;  %v6401_v45 = vld [vmem:[%s12490_s0 + $0x2c2] ss:$8 sm:$0xf0]   ;;  %v3695_v0 = vpop.permute.xlu1 %3694  }
 0x27a   :  { %v6365_v9 = vld [vmem:[%s12490_s0 + $0xc7] ss:$8 sm:$0xf0]   ;;  %4225 = vrot.lane.b32.xlu1 %v4224_v57, %s6645_s26  ;;  %6212 = vst.msk [vmem:[%s12491_s1 + $0x630] sm:$0xff] %vm371_vm1, %v3651_v52   ;;  %v4345_v58 = vsel %vm4_vm0, %v6401_v45, %v6400_v27  ;;  %6206 = vst.msk [vmem:[%s12491_s1 + $0x590] sm:$0xff] %vm371_vm1, %v3629_v56  }
 0x27b   :  { %v6373_v61 = vld [vmem:[%s12490_s0 + $0x3c7] ss:$8 sm:$0xf]   ;;  %v4213_v14 = vsel %vm4_vm0, %v6365_v9, %v6364_v8  ;;  %6213 = vst.msk [vmem:[%s12491_s1 + $0x5b0] sm:$0xff] %vm3017_vm9, %v3651_v52   ;;  %6207 = vst.msk [vmem:[%s12491_s1 + $0x510] sm:$0xff] %vm3017_vm9, %v3629_v56  }
 0x27c   :  { %v6374_v51 = vld [vmem:[%s12490_s0 + $0x3c7] ss:$8 sm:$0xf0]   ;;  %4214 = vrot.lane.b32.xlu0 %v4213_v14, %s6645_s26  ;;  %v6409_v55 = vld [vmem:[%s12490_s0 + $0x5c2] ss:$8 sm:$0xf]  }
 0x27d   :  { %v6370_v15 = vld [vmem:[%s12490_s0 + $0x2c7] ss:$8 sm:$0xf]   ;;  %v4246_v16 = vsel %vm4_vm0, %v6374_v51, %v6373_v61  ;;  %v6410_v36 = vld [vmem:[%s12490_s0 + $0x5c2] ss:$8 sm:$0xf0]   ;;  %v3673_v6 = vpop.permute.xlu0 %3672  }
 0x27e   :  { %v6371_v59 = vld [vmem:[%s12490_s0 + $0x2c7] ss:$8 sm:$0xf0]   ;;  %4247 = vrot.lane.b32.xlu1 %v4246_v16, %s6645_s26  ;;  %v6406_v60 = vld [vmem:[%s12490_s0 + $0x4c2] ss:$8 sm:$0xf]   ;;  %v4378_v62 = vsel %vm4_vm0, %v6410_v36, %v6409_v55 }
 0x27f   :  { %v6379_v17 = vld [vmem:[%s12490_s0 + $0x5c7] ss:$8 sm:$0xf]   ;;  %v4235_v21 = vsel %vm4_vm0, %v6371_v59, %v6370_v15  ;;  %v6407_v43 = vld [vmem:[%s12490_s0 + $0x4c2] ss:$8 sm:$0xf0]  }
 0x280   :  { %v6380_v18 = vld [vmem:[%s12490_s0 + $0x5c7] ss:$8 sm:$0xf0]   ;;  %4236 = vrot.lane.b32.xlu0 %v4235_v21, %s6645_s26  ;;  %v6415_v35 = vld [vmem:[%s12490_s0 + $0x7c2] ss:$8 sm:$0xf]   ;;  %v4367_v44 = vsel %vm4_vm0, %v6407_v43, %v6406_v60 }
 0x281   :  { %v6376_v23 = vld [vmem:[%s12490_s0 + $0x4c7] ss:$8 sm:$0xf]   ;;  %v4268_v22 = vsel %vm4_vm0, %v6380_v18, %v6379_v17  ;;  %v6416_v63 = vld [vmem:[%s12490_s0 + $0x7c2] ss:$8 sm:$0xf0]   ;;  %v3739_v61 = vpop.permute.xlu1 %3738  }
 0x282   :  { %v6377_v24 = vld [vmem:[%s12490_s0 + $0x4c7] ss:$8 sm:$0xf0]   ;;  %4269 = vrot.lane.b32.xlu1 %v4268_v22, %s6645_s26  ;;  %6224 = vst.msk [vmem:[%s12491_s1 + $0xb8] sm:$0xff] %vm371_vm1, %v3695_v0   ;;  %v4400_v7 = vsel %vm4_vm0, %v6416_v63, %v6415_v35  ;;  %6218 = vst.msk [vmem:[%s12491_s1 + $0x18] sm:$0xff] %vm371_vm1, %v3673_v6  }
 0x283   :  { %v6385_v25 = vld [vmem:[%s12490_s0 + $0x7c7] ss:$8 sm:$0xf]   ;;  %v4257_v5 = vsel %vm4_vm0, %v6377_v24, %v6376_v23  ;;  %6225 = vst.msk [vmem:[%s12491_s1 + $0xd8] sm:$0xff] %vm3017_vm9, %v3695_v0   ;;  %6219 = vst.msk [vmem:[%s12491_s1 + $0x38] sm:$0xff] %vm3017_vm9, %v3673_v6  }
 0x284   :  { %v6386_v26 = vld [vmem:[%s12490_s0 + $0x7c7] ss:$8 sm:$0xf0]   ;;  %4258 = vrot.lane.b32.xlu0 %v4257_v5, %s6645_s26  ;;  %v6412_v2 = vld [vmem:[%s12490_s0 + $0x6c2] ss:$8 sm:$0xf]  }
 0x285   :  { %v6382_v28 = vld [vmem:[%s12490_s0 + $0x6c7] ss:$8 sm:$0xf]   ;;  %v4290_v11 = vsel %vm4_vm0, %v6386_v26, %v6385_v25  ;;  %v6413_v3 = vld [vmem:[%s12490_s0 + $0x6c2] ss:$8 sm:$0xf0]   ;;  %v3717_v13 = vpop.permute.xlu0 %3716  }
 0x286   :  { %v6383_v30 = vld [vmem:[%s12490_s0 + $0x6c7] ss:$8 sm:$0xf0]   ;;  %4291 = vrot.lane.b32.xlu1 %v4290_v11, %s6645_s26  ;;  %v6421_v50 = vld [vmem:[%s12490_s0 + $0x9c2] ss:$8 sm:$0xf]   ;;  %v4389_v9 = vsel %vm4_vm0, %v6413_v3, %v6412_v2 }
 0x287   :  { %v6391_v32 = vld [vmem:[%s12490_s0 + $0x9c7] ss:$8 sm:$0xf]   ;;  %v4279_v34 = vsel %vm4_vm0, %v6383_v30, %v6382_v28  ;;  %v6422_v8 = vld [vmem:[%s12490_s0 + $0x9c2] ss:$8 sm:$0xf0]  }
 0x288   :  { %v6392_v4 = vld [vmem:[%s12490_s0 + $0x9c7] ss:$8 sm:$0xf0]   ;;  %4280 = vrot.lane.b32.xlu0 %v4279_v34, %s6645_s26  ;;  %v6418_v10 = vld [vmem:[%s12490_s0 + $0x8c2] ss:$8 sm:$0xf]   ;;  %v4422_v51 = vsel %vm4_vm0, %v6422_v8, %v6421_v50 }
 0x289   :  { %v6388_v12 = vld [vmem:[%s12490_s0 + $0x8c7] ss:$8 sm:$0xf]   ;;  %v4312_v39 = vsel %vm4_vm0, %v6392_v4, %v6391_v32  ;;  %v6419_v57 = vld [vmem:[%s12490_s0 + $0x8c2] ss:$8 sm:$0xf0]   ;;  %v3783_v1 = vpop.permute.xlu1 %3782  }
 0x28a   :  { %v6389_v37 = vld [vmem:[%s12490_s0 + $0x8c7] ss:$8 sm:$0xf0]   ;;  %4313 = vrot.lane.b32.xlu1 %v4312_v39, %s6645_s26  ;;  %6236 = vst.msk [vmem:[%s12491_s1 + $0x1f8] sm:$0xff] %vm371_vm1, %v3739_v61   ;;  %v4411_v59 = vsel %vm4_vm0, %v6419_v57, %v6418_v10  ;;  %6230 = vst.msk [vmem:[%s12491_s1 + $0x158] sm:$0xff] %vm371_vm1, %v3717_v13  }
 0x28b   :  { %v4301_v42 = vsel %vm4_vm0, %v6389_v37, %v6388_v12  ;;  %6237 = vst.msk [vmem:[%s12491_s1 + $0x218] sm:$0xff] %vm3017_vm9, %v3739_v61   ;;  %v6427_v14 = vld [vmem:[%s12490_s0 + $0x102] ss:$8 sm:$0xf]   ;;  %6231 = vst.msk [vmem:[%s12491_s1 + $0x178] sm:$0xff] %vm3017_vm9, %v3717_v13  }
 0x28c   :  { %4302 = vrot.lane.b32.xlu0 %v4301_v42, %s6645_s26  ;;  %v6428_v15 = vld [vmem:[%s12490_s0 + $0x102] ss:$8 sm:$0xf0]   ;;  %6248 = vst.msk [vmem:[%s12491_s1 + $0x338] sm:$0xff] %vm371_vm1, %v3783_v1  }
 0x28d   :  { %v6424_v16 = vld [vmem:[%s12490_s0 + $0x2] ss:$8 sm:$0xf]   ;;  %v4444_v18 = vsel %vm4_vm0, %v6428_v15, %v6427_v14  ;;  %6249 = vst.msk [vmem:[%s12491_s1 + $0x358] sm:$0xff] %vm3017_vm9, %v3783_v1   ;;  %v3761_v53 = vpop.permute.xlu0 %3760  }
 0x28e   :  { %4335 = vrot.lane.b32.xlu1 %v4334_v48, %s6646_s18  ;;  %v6425_v17 = vld [vmem:[%s12490_s0 + $0x2] ss:$8 sm:$0xf0]   ;;  %6242 = vst.msk [vmem:[%s12491_s1 + $0x298] sm:$0xff] %vm371_vm1, %v3761_v53  }
 0x28f   :  { %v6433_v21 = vld [vmem:[%s12490_s0 + $0x302] ss:$8 sm:$0xf]   ;;  %v4433_v24 = vsel %vm4_vm0, %v6425_v17, %v6424_v16  ;;  %6243 = vst.msk [vmem:[%s12491_s1 + $0x2b8] sm:$0xff] %vm3017_vm9, %v3761_v53  }
 0x290   :  { %4324 = vrot.lane.b32.xlu0 %v4323_v49, %s6646_s18  ;;  %v6434_v23 = vld [vmem:[%s12490_s0 + $0x302] ss:$8 sm:$0xf0]  }
 0x291   :  { %v6430_v22 = vld [vmem:[%s12490_s0 + $0x202] ss:$8 sm:$0xf]   ;;  %v4466_v26 = vsel %vm4_vm0, %v6434_v23, %v6433_v21  ;;  %v3827_v31 = vpop.permute.xlu1 %3826  }
 0x292   :  { %4357 = vrot.lane.b32.xlu1 %v4356_v54, %s6646_s18  ;;  %v6431_v25 = vld [vmem:[%s12490_s0 + $0x202] ss:$8 sm:$0xf0]   ;;  %6260 = vst.msk [vmem:[%s12491_s1 + $0x478] sm:$0xff] %vm371_vm1, %v3827_v31  }
 0x293   :  { %v6439_v5 = vld [vmem:[%s12490_s0 + $0x502] ss:$8 sm:$0xf]   ;;  %v4455_v30 = vsel %vm4_vm0, %v6431_v25, %v6430_v22  ;;  %6261 = vst.msk [vmem:[%s12491_s1 + $0x498] sm:$0xff] %vm3017_vm9, %v3827_v31  }
 0x294   :  { %4346 = vrot.lane.b32.xlu0 %v4345_v58, %s6646_s18  ;;  %v6440_v28 = vld [vmem:[%s12490_s0 + $0x502] ss:$8 sm:$0xf0]  }
 0x295   :  { %v6436_v11 = vld [vmem:[%s12490_s0 + $0x402] ss:$8 sm:$0xf]   ;;  %v4488_v4 = vsel %vm4_vm0, %v6440_v28, %v6439_v5  ;;  %v3805_v33 = vpop.permute.xlu0 %3804  }
 0x296   :  { %4379 = vrot.lane.b32.xlu1 %v4378_v62, %s6646_s18  ;;  %v6437_v32 = vld [vmem:[%s12490_s0 + $0x402] ss:$8 sm:$0xf0]   ;;  %6254 = vst.msk [vmem:[%s12491_s1 + $0x3d8] sm:$0xff] %vm371_vm1, %v3805_v33  }
 0x297   :  { %v6445_v34 = vld [vmem:[%s12490_s0 + $0x702] ss:$8 sm:$0xf]   ;;  %6255 = vst.msk [vmem:[%s12491_s1 + $0x3f8] sm:$0xff] %vm3017_vm9, %v3805_v33   ;;  %v4477_v37 = vsel %vm4_vm0, %v6437_v32, %v6436_v11 }
 0x298   :  { %4368 = vrot.lane.b32.xlu0 %v4367_v44, %s6646_s18  ;;  %v6446_v12 = vld [vmem:[%s12490_s0 + $0x702] ss:$8 sm:$0xf0]  }
 0x299   :  { %v6442_v39 = vld [vmem:[%s12490_s0 + $0x602] ss:$8 sm:$0xf]   ;;  %v4510_v41 = vsel %vm4_vm0, %v6446_v12, %v6445_v34  ;;  %v3871_v19 = vpop.permute.xlu1 %3870  }
 0x29a   :  { %4401 = vrot.lane.b32.xlu1 %v4400_v7, %s6646_s18  ;;  %v6443_v40 = vld [vmem:[%s12490_s0 + $0x602] ss:$8 sm:$0xf0]   ;;  %6272 = vst.msk [vmem:[%s12491_s1 + $0x5b8] sm:$0xff] %vm371_vm1, %v3871_v19  }
 0x29b   :  { %v6451_v42 = vld [vmem:[%s12490_s0 + $0x902] ss:$8 sm:$0xf]   ;;  %6273 = vst.msk [vmem:[%s12491_s1 + $0x5d8] sm:$0xff] %vm3017_vm9, %v3871_v19   ;;  %v4499_v47 = vsel %vm4_vm0, %v6443_v40, %v6442_v39 }
 0x29c   :  { %4390 = vrot.lane.b32.xlu0 %v4389_v9, %s6646_s18  ;;  %v6452_v46 = vld [vmem:[%s12490_s0 + $0x902] ss:$8 sm:$0xf0]  }
 0x29d   :  { %v3849_v29 = vpop.permute.xlu0 %3848   ;;  %v6448_v48 = vld [vmem:[%s12490_s0 + $0x802] ss:$8 sm:$0xf]   ;;  %v4532_v38 = vsel %vm4_vm0, %v6452_v46, %v6451_v42  ;;  %v3896_v49 = vpop.permute.xlu1 %3895  }
 0x29e   :  { %4423 = vrot.lane.b32.xlu1 %v4422_v51, %s6646_s18  ;;  %v6449_v20 = vld [vmem:[%s12490_s0 + $0x802] ss:$8 sm:$0xf0]   ;;  %6266 = vst.msk [vmem:[%s12491_s1 + $0x518] sm:$0xff] %vm371_vm1, %v3849_v29  }
 0x29f   :  { %6267 = vst.msk [vmem:[%s12491_s1 + $0x538] sm:$0xff] %vm3017_vm9, %v3849_v29   ;;  %v6457_v27 = vld [vmem:[%s12490_s0 + $0x142] ss:$8 sm:$0xf]   ;;  %v4521_v52 = vsel %vm4_vm0, %v6449_v20, %v6448_v48 }
 0x2a0   :  { %4412 = vrot.lane.b32.xlu0 %v4411_v59, %s6646_s18  ;;  %v6458_v45 = vld [vmem:[%s12490_s0 + $0x142] ss:$8 sm:$0xf0]   ;;  %6279 = vst.msk [vmem:[%s12491_s1 + $0xc0] sm:$0xff] %vm3886_vm10, %v3896_v49  }
 0x2a1   :  { %v3885_v54 = vpop.permute.xlu0 %3884   ;;  %v6454_v55 = vld [vmem:[%s12490_s0 + $0x42] ss:$8 sm:$0xf]   ;;  %v4554_v56 = vsel %vm4_vm0, %v6458_v45, %v6457_v27  ;;  %v3918_v58 = vpop.permute.xlu1 %3917  }
 0x2a2   :  { %4445 = vrot.lane.b32.xlu1 %v4444_v18, %s6646_s18  ;;  %v6455_v36 = vld [vmem:[%s12490_s0 + $0x42] ss:$8 sm:$0xf0]   ;;  %6276 = vst.msk [vmem:[%s12491_s1 + $0x20] sm:$0xff] %vm3886_vm10, %v3885_v54   ;;  %6285 = vst.msk [vmem:[%s12491_s1 + $0x200] sm:$0xff] %vm3886_vm10, %v3918_v58  }
 0x2a3   :  { %v6463_v60 = vld [vmem:[%s12490_s0 + $0x342] ss:$8 sm:$0xf]   ;;  %v4543_v62 = vsel %vm4_vm0, %v6455_v36, %v6454_v55 }
 0x2a4   :  { %4434 = vrot.lane.b32.xlu0 %v4433_v24, %s6646_s18  ;;  %v6464_v43 = vld [vmem:[%s12490_s0 + $0x342] ss:$8 sm:$0xf0]  }
 0x2a5   :  { %v3907_v35 = vpop.permute.xlu0 %3906   ;;  %v6460_v63 = vld [vmem:[%s12490_s0 + $0x242] ss:$8 sm:$0xf]   ;;  %v4576_v44 = vsel %vm4_vm0, %v6464_v43, %v6463_v60 }
 0x2a6   :  { %4467 = vrot.lane.b32.xlu1 %v4466_v26, %s6646_s18  ;;  %v6461_v0 = vld [vmem:[%s12490_s0 + $0x242] ss:$8 sm:$0xf0]   ;;  %6282 = vst.msk [vmem:[%s12491_s1 + $0x160] sm:$0xff] %vm3886_vm10, %v3907_v35  }
 0x2a7   :  { %v3940_v2 = vpop.permute.xlu1 %3939   ;;  %v6469_v3 = vld [vmem:[%s12490_s0 + $0x542] ss:$8 sm:$0xf]   ;;  %v4565_v7 = vsel %vm4_vm0, %v6461_v0, %v6460_v63 }
 0x2a8   :  { %4456 = vrot.lane.b32.xlu0 %v4455_v30, %s6646_s18  ;;  %v6470_v6 = vld [vmem:[%s12490_s0 + $0x542] ss:$8 sm:$0xf0]   ;;  %6291 = vst.msk [vmem:[%s12491_s1 + $0x340] sm:$0xff] %vm3886_vm10, %v3940_v2  }
 0x2a9   :  { %v3929_v50 = vpop.permute.xlu0 %3928   ;;  %v6466_v8 = vld [vmem:[%s12490_s0 + $0x442] ss:$8 sm:$0xf]   ;;  %v4598_v10 = vsel %vm4_vm0, %v6470_v6, %v6469_v3  ;;  %v6517_v3 = vld [vmem:[%s12490_s0 + $0x145] ss:$8 sm:$0xf]  }
 0x2aa   :  { %4489 = vrot.lane.b32.xlu1 %v4488_v4, %s6646_s18  ;;  %v6467_v9 = vld [vmem:[%s12490_s0 + $0x442] ss:$8 sm:$0xf0]   ;;  %6288 = vst.msk [vmem:[%s12491_s1 + $0x2a0] sm:$0xff] %vm3886_vm10, %v3929_v50  }
 0x2ab   :  { %v6475_v61 = vld [vmem:[%s12490_s0 + $0x742] ss:$8 sm:$0xf]   ;;  %v4587_v13 = vsel %vm4_vm0, %v6467_v9, %v6466_v8  ;;  %v6518_v6 = vld [vmem:[%s12490_s0 + $0x145] ss:$8 sm:$0xf0]  }
 0x2ac   :  { %4478 = vrot.lane.b32.xlu0 %v4477_v37, %s6646_s18  ;;  %v6476_v51 = vld [vmem:[%s12490_s0 + $0x742] ss:$8 sm:$0xf0]   ;;  %v6514_v8 = vld [vmem:[%s12490_s0 + $0x45] ss:$8 sm:$0xf]  }
 0x2ad   :  { %v3962_v57 = vpop.permute.xlu1 %3961   ;;  %v6472_v15 = vld [vmem:[%s12490_s0 + $0x642] ss:$8 sm:$0xf]   ;;  %v4620_v16 = vsel %vm4_vm0, %v6476_v51, %v6475_v61  ;;  %v6515_v9 = vld [vmem:[%s12490_s0 + $0x45] ss:$8 sm:$0xf0]  }
 0x2ae   :  { %4511 = vrot.lane.b32.xlu1 %v4510_v41, %s6646_s18  ;;  %6297 = vst.msk [vmem:[%s12491_s1 + $0x480] sm:$0xff] %vm3886_vm10, %v3962_v57   ;;  %v6473_v59 = vld [vmem:[%s12490_s0 + $0x642] ss:$8 sm:$0xf0]  }
 0x2af   :  { %v3951_v14 = vpop.permute.xlu0 %3950   ;;  %v6481_v18 = vld [vmem:[%s12490_s0 + $0x942] ss:$8 sm:$0xf]   ;;  %v4609_v21 = vsel %vm4_vm0, %v6473_v59, %v6472_v15  ;;  %v6523_v61 = vld [vmem:[%s12490_s0 + $0x345] ss:$8 sm:$0xf]  }
 0x2b0   :  { %4500 = vrot.lane.b32.xlu0 %v4499_v47, %s6646_s18  ;;  %6294 = vst.msk [vmem:[%s12491_s1 + $0x3e0] sm:$0xff] %vm3886_vm10, %v3951_v14   ;;  %v6482_v1 = vld [vmem:[%s12490_s0 + $0x942] ss:$8 sm:$0xf0]  }
 0x2b1   :  { %v6478_v24 = vld [vmem:[%s12490_s0 + $0x842] ss:$8 sm:$0xf]   ;;  %v4642_v22 = vsel %vm4_vm0, %v6482_v1, %v6481_v18  ;;  %v6524_v51 = vld [vmem:[%s12490_s0 + $0x345] ss:$8 sm:$0xf0]  }
 0x2b2   :  { %4533 = vrot.lane.b32.xlu1 %v4532_v38, %s6646_s18  ;;  %v6479_v53 = vld [vmem:[%s12490_s0 + $0x842] ss:$8 sm:$0xf0]   ;;  %v6520_v15 = vld [vmem:[%s12490_s0 + $0x245] ss:$8 sm:$0xf]  }
 0x2b3   :  { %v6487_v26 = vld [vmem:[%s12490_s0 + $0x182] ss:$8 sm:$0xf]   ;;  %v4631_v28 = vsel %vm4_vm0, %v6479_v53, %v6478_v24  ;;  %v6521_v59 = vld [vmem:[%s12490_s0 + $0x245] ss:$8 sm:$0xf0]  }
 0x2b4   :  { %4522 = vrot.lane.b32.xlu0 %v4521_v52, %s6646_s18  ;;  %v3984_v17 = vpop.permute.xlu1 %3983   ;;  %v6488_v5 = vld [vmem:[%s12490_s0 + $0x182] ss:$8 sm:$0xf0]   ;;  %v6529_v18 = vld [vmem:[%s12490_s0 + $0x545] ss:$8 sm:$0xf]  }
 0x2b5   :  { %6303 = vst.msk [vmem:[%s12491_s1 + $0x5c0] sm:$0xff] %vm3886_vm10, %v3984_v17   ;;  %v6484_v31 = vld [vmem:[%s12490_s0 + $0x82] ss:$8 sm:$0xf]   ;;  %v4664_v32 = vsel %vm4_vm0, %v6488_v5, %v6487_v26 }
 0x2b6   :  { %4555 = vrot.lane.b32.xlu1 %v4554_v56, %s6646_s18  ;;  %v3973_v23 = vpop.permute.xlu0 %3972   ;;  %v6485_v11 = vld [vmem:[%s12490_s0 + $0x82] ss:$8 sm:$0xf0]   ;;  %v6530_v1 = vld [vmem:[%s12490_s0 + $0x545] ss:$8 sm:$0xf0]  }
 0x2b7   :  { %6300 = vst.msk [vmem:[%s12491_s1 + $0x520] sm:$0xff] %vm3886_vm10, %v3973_v23   ;;  %v6493_v33 = vld [vmem:[%s12490_s0 + $0x382] ss:$8 sm:$0xf]   ;;  %v4653_v12 = vsel %vm4_vm0, %v6485_v11, %v6484_v31 }
 0x2b8   :  { %4544 = vrot.lane.b32.xlu0 %v4543_v62, %s6646_s18  ;;  %v6494_v34 = vld [vmem:[%s12490_s0 + $0x382] ss:$8 sm:$0xf0]   ;;  %v6526_v24 = vld [vmem:[%s12490_s0 + $0x445] ss:$8 sm:$0xf]  }
 0x2b9   :  { %v6490_v39 = vld [vmem:[%s12490_s0 + $0x282] ss:$8 sm:$0xf]   ;;  %v4686_v41 = vsel %vm4_vm0, %v6494_v34, %v6493_v33  ;;  %v6527_v53 = vld [vmem:[%s12490_s0 + $0x445] ss:$8 sm:$0xf0]  }
 0x2ba   :  { %4577 = vrot.lane.b32.xlu1 %v4576_v44, %s6646_s18  ;;  %v6491_v40 = vld [vmem:[%s12490_s0 + $0x282] ss:$8 sm:$0xf0]   ;;  %v6535_v26 = vld [vmem:[%s12490_s0 + $0x745] ss:$8 sm:$0xf]  }
 0x2bb   :  { %v4006_v25 = vpop.permute.xlu1 %4005   ;;  %v6499_v42 = vld [vmem:[%s12490_s0 + $0x582] ss:$8 sm:$0xf]   ;;  %v4675_v47 = vsel %vm4_vm0, %v6491_v40, %v6490_v39  ;;  %v6536_v5 = vld [vmem:[%s12490_s0 + $0x745] ss:$8 sm:$0xf0]  }
 0x2bc   :  { %4566 = vrot.lane.b32.xlu0 %v4565_v7, %s6646_s18  ;;  %6309 = vst.msk [vmem:[%s12491_s1 + $0xe8] sm:$0xff] %vm3886_vm10, %v4006_v25   ;;  %v6500_v46 = vld [vmem:[%s12490_s0 + $0x582] ss:$8 sm:$0xf0]  }
 0x2bd   :  { %v3995_v30 = vpop.permute.xlu0 %3994   ;;  %v6496_v48 = vld [vmem:[%s12490_s0 + $0x482] ss:$8 sm:$0xf]   ;;  %v4708_v38 = vsel %vm4_vm0, %v6500_v46, %v6499_v42  ;;  %v6532_v31 = vld [vmem:[%s12490_s0 + $0x645] ss:$8 sm:$0xf]  }
 0x2be   :  { %4599 = vrot.lane.b32.xlu1 %v4598_v10, %s6646_s18  ;;  %6306 = vst.msk [vmem:[%s12491_s1 + $0x48] sm:$0xff] %vm3886_vm10, %v3995_v30   ;;  %v6497_v20 = vld [vmem:[%s12490_s0 + $0x482] ss:$8 sm:$0xf0]   ;;  %v4774_v10 = vsel %vm4_vm0, %v6518_v6, %v6517_v3 }
 0x2bf   :  { %v6505_v27 = vld [vmem:[%s12490_s0 + $0x782] ss:$8 sm:$0xf]   ;;  %v4697_v52 = vsel %vm4_vm0, %v6497_v20, %v6496_v48  ;;  %v6533_v11 = vld [vmem:[%s12490_s0 + $0x645] ss:$8 sm:$0xf0]  }
 0x2c0   :  { %4588 = vrot.lane.b32.xlu0 %v4587_v13, %s6646_s18  ;;  %v6506_v45 = vld [vmem:[%s12490_s0 + $0x782] ss:$8 sm:$0xf0]   ;;  %v4763_v13 = vsel %vm4_vm0, %v6515_v9, %v6514_v8  ;;  %v6541_v33 = vld [vmem:[%s12490_s0 + $0x945] ss:$8 sm:$0xf]  }
 0x2c1   :  { %v6502_v55 = vld [vmem:[%s12490_s0 + $0x682] ss:$8 sm:$0xf]   ;;  %v4730_v56 = vsel %vm4_vm0, %v6506_v45, %v6505_v27  ;;  %v6542_v34 = vld [vmem:[%s12490_s0 + $0x945] ss:$8 sm:$0xf0]  }
 0x2c2   :  { %4621 = vrot.lane.b32.xlu1 %v4620_v16, %s6646_s18  ;;  %v4028_v4 = vpop.permute.xlu1 %4027   ;;  %v6503_v36 = vld [vmem:[%s12490_s0 + $0x682] ss:$8 sm:$0xf0]   ;;  %v4796_v16 = vsel %vm4_vm0, %v6524_v51, %v6523_v61  ;;  %v6538_v39 = vld [vmem:[%s12490_s0 + $0x845] ss:$8 sm:$0xf]  }
 0x2c3   :  { %6315 = vst.msk [vmem:[%s12491_s1 + $0x228] sm:$0xff] %vm3886_vm10, %v4028_v4   ;;  %v6511_v60 = vld [vmem:[%s12490_s0 + $0x982] ss:$8 sm:$0xf]   ;;  %v4719_v62 = vsel %vm4_vm0, %v6503_v36, %v6502_v55 }
 0x2c4   :  { %4610 = vrot.lane.b32.xlu0 %v4609_v21, %s6646_s18  ;;  %v4017_v37 = vpop.permute.xlu0 %4016   ;;  %v6512_v43 = vld [vmem:[%s12490_s0 + $0x982] ss:$8 sm:$0xf0]   ;;  %v4785_v21 = vsel %vm4_vm0, %v6521_v59, %v6520_v15  ;;  %v6539_v40 = vld [vmem:[%s12490_s0 + $0x845] ss:$8 sm:$0xf0]  }
 0x2c5   :  { %6312 = vst.msk [vmem:[%s12491_s1 + $0x188] sm:$0xff] %vm3886_vm10, %v4017_v37   ;;  %v6508_v63 = vld [vmem:[%s12490_s0 + $0x882] ss:$8 sm:$0xf]   ;;  %v4752_v44 = vsel %vm4_vm0, %v6512_v43, %v6511_v60 }
 0x2c6   :  { %4643 = vrot.lane.b32.xlu1 %v4642_v22, %s6646_s18  ;;  %v6509_v0 = vld [vmem:[%s12490_s0 + $0x882] ss:$8 sm:$0xf0]   ;;  %v4818_v22 = vsel %vm4_vm0, %v6530_v1, %v6529_v18  ;;  %v6547_v42 = vld [vmem:[%s12490_s0 + $0x185] ss:$8 sm:$0xf]  }
 0x2c7   :  { %v4741_v7 = vsel %vm4_vm0, %v6509_v0, %v6508_v63  ;;  %v6548_v46 = vld [vmem:[%s12490_s0 + $0x185] ss:$8 sm:$0xf0]  }
 0x2c8   :  { %4632 = vrot.lane.b32.xlu0 %v4631_v28, %s6646_s18  ;;  %v4807_v28 = vsel %vm4_vm0, %v6527_v53, %v6526_v24  ;;  %v6544_v48 = vld [vmem:[%s12490_s0 + $0x85] ss:$8 sm:$0xf]  }
 0x2c9   :  { %v4050_v19 = vpop.permute.xlu1 %4049   ;;  %v6545_v20 = vld [vmem:[%s12490_s0 + $0x85] ss:$8 sm:$0xf0]  }
 0x2ca   :  { %4665 = vrot.lane.b32.xlu1 %v4664_v32, %s6646_s18  ;;  %6321 = vst.msk [vmem:[%s12491_s1 + $0x368] sm:$0xff] %vm3886_vm10, %v4050_v19   ;;  %v4840_v32 = vsel %vm4_vm0, %v6536_v5, %v6535_v26  ;;  %v6553_v27 = vld [vmem:[%s12490_s0 + $0x385] ss:$8 sm:$0xf]  }
 0x2cb   :  { %v4039_v29 = vpop.permute.xlu0 %4038   ;;  %v6554_v45 = vld [vmem:[%s12490_s0 + $0x385] ss:$8 sm:$0xf0]  }
 0x2cc   :  { %4654 = vrot.lane.b32.xlu0 %v4653_v12, %s6646_s18  ;;  %6318 = vst.msk [vmem:[%s12491_s1 + $0x2c8] sm:$0xff] %vm3886_vm10, %v4039_v29   ;;  %v4829_v12 = vsel %vm4_vm0, %v6533_v11, %v6532_v31  ;;  %v6550_v55 = vld [vmem:[%s12490_s0 + $0x285] ss:$8 sm:$0xf]  }
 0x2cd   :  { %v6551_v36 = vld [vmem:[%s12490_s0 + $0x285] ss:$8 sm:$0xf0]  }
 0x2ce   :  { %4687 = vrot.lane.b32.xlu1 %v4686_v41, %s6646_s18  ;;  %v4862_v41 = vsel %vm4_vm0, %v6542_v34, %v6541_v33  ;;  %v6559_v60 = vld [vmem:[%s12490_s0 + $0x585] ss:$8 sm:$0xf]  }
 0x2cf   :  { %v6560_v43 = vld [vmem:[%s12490_s0 + $0x585] ss:$8 sm:$0xf0]  }
 0x2d0   :  { %4676 = vrot.lane.b32.xlu0 %v4675_v47, %s6646_s18  ;;  %v4072_v49 = vpop.permute.xlu1 %4071   ;;  %v4851_v47 = vsel %vm4_vm0, %v6539_v40, %v6538_v39  ;;  %v6556_v63 = vld [vmem:[%s12490_s0 + $0x485] ss:$8 sm:$0xf]  }
 0x2d1   :  { %6327 = vst.msk [vmem:[%s12491_s1 + $0x4a8] sm:$0xff] %vm3886_vm10, %v4072_v49   ;;  %v6557_v0 = vld [vmem:[%s12490_s0 + $0x485] ss:$8 sm:$0xf0]  }
 0x2d2   :  { %v4061_v54 = vpop.permute.xlu0 %4060   ;;  %4709 = vrot.lane.b32.xlu1 %v4708_v38, %s6646_s18  ;;  %v4884_v38 = vsel %vm4_vm0, %v6548_v46, %v6547_v42  ;;  %v6565_v3 = vld [vmem:[%s12490_s0 + $0x785] ss:$8 sm:$0xf]  }
 0x2d3   :  { %6324 = vst.msk [vmem:[%s12491_s1 + $0x408] sm:$0xff] %vm3886_vm10, %v4061_v54   ;;  %v6566_v6 = vld [vmem:[%s12490_s0 + $0x785] ss:$8 sm:$0xf0]  }
 0x2d4   :  { %4698 = vrot.lane.b32.xlu0 %v4697_v52, %s6646_s18  ;;  %v4094_v58 = vpop.permute.xlu1 %4093   ;;  %v4873_v52 = vsel %vm4_vm0, %v6545_v20, %v6544_v48  ;;  %v6562_v8 = vld [vmem:[%s12490_s0 + $0x685] ss:$8 sm:$0xf]  }
 0x2d5   :  { %6333 = vst.msk [vmem:[%s12491_s1 + $0x5e8] sm:$0xff] %vm3886_vm10, %v4094_v58   ;;  %v6563_v9 = vld [vmem:[%s12490_s0 + $0x685] ss:$8 sm:$0xf0]  }
 0x2d6   :  { %v4083_v35 = vpop.permute.xlu0 %4082   ;;  %4731 = vrot.lane.b32.xlu1 %v4730_v56, %s6646_s18  ;;  %v4906_v56 = vsel %vm4_vm0, %v6554_v45, %v6553_v27  ;;  %v6571_v61 = vld [vmem:[%s12490_s0 + $0x985] ss:$8 sm:$0xf]  }
 0x2d7   :  { %6330 = vst.msk [vmem:[%s12491_s1 + $0x548] sm:$0xff] %vm3886_vm10, %v4083_v35   ;;  %v6572_v51 = vld [vmem:[%s12490_s0 + $0x985] ss:$8 sm:$0xf0]  }
 0x2d8   :  { %4720 = vrot.lane.b32.xlu0 %v4719_v62, %s6646_s18  ;;  %v4116_v2 = vpop.permute.xlu1 %4115   ;;  %v4895_v62 = vsel %vm4_vm0, %v6551_v36, %v6550_v55  ;;  %v6568_v15 = vld [vmem:[%s12490_s0 + $0x885] ss:$8 sm:$0xf]  }
 0x2d9   :  { %6339 = vst.msk [vmem:[%s12491_s1 + $0x110] sm:$0xff] %vm3886_vm10, %v4116_v2   ;;  %v6569_v59 = vld [vmem:[%s12490_s0 + $0x885] ss:$8 sm:$0xf0]  }
 0x2da   :  { %v4105_v50 = vpop.permute.xlu0 %4104   ;;  %4753 = vrot.lane.b32.xlu1 %v4752_v44, %s6646_s18  ;;  %v4928_v44 = vsel %vm4_vm0, %v6560_v43, %v6559_v60  ;;  %v6577_v18 = vld [vmem:[%s12490_s0 + $0x1c5] ss:$8 sm:$0xf]  }
 0x2db   :  { %6336 = vst.msk [vmem:[%s12491_s1 + $0x70] sm:$0xff] %vm3886_vm10, %v4105_v50   ;;  %v6578_v1 = vld [vmem:[%s12490_s0 + $0x1c5] ss:$8 sm:$0xf0]  }
 0x2dc   :  { %4742 = vrot.lane.b32.xlu0 %v4741_v7, %s6646_s18  ;;  %v4138_v57 = vpop.permute.xlu1 %4137   ;;  %v4917_v7 = vsel %vm4_vm0, %v6557_v0, %v6556_v63  ;;  %v6574_v24 = vld [vmem:[%s12490_s0 + $0xc5] ss:$8 sm:$0xf]  }
 0x2dd   :  { %6345 = vst.msk [vmem:[%s12491_s1 + $0x250] sm:$0xff] %vm3886_vm10, %v4138_v57   ;;  %v6575_v53 = vld [vmem:[%s12490_s0 + $0xc5] ss:$8 sm:$0xf0]  }
 0x2de   :  { %v4127_v14 = vpop.permute.xlu0 %4126   ;;  %4775 = vrot.lane.b32.xlu1 %v4774_v10, %s6647_s20  ;;  %v4950_v10 = vsel %vm4_vm0, %v6566_v6, %v6565_v3  ;;  %v6583_v26 = vld [vmem:[%s12490_s0 + $0x3c5] ss:$8 sm:$0xf]  }
 0x2df   :  { %6342 = vst.msk [vmem:[%s12491_s1 + $0x1b0] sm:$0xff] %vm3886_vm10, %v4127_v14   ;;  %v6584_v5 = vld [vmem:[%s12490_s0 + $0x3c5] ss:$8 sm:$0xf0]  }
 0x2e0   :  { %4764 = vrot.lane.b32.xlu0 %v4763_v13, %s6647_s20  ;;  %v4160_v17 = vpop.permute.xlu1 %4159   ;;  %v4939_v13 = vsel %vm4_vm0, %v6563_v9, %v6562_v8  ;;  %v6580_v31 = vld [vmem:[%s12490_s0 + $0x2c5] ss:$8 sm:$0xf]  }
 0x2e1   :  { %6351 = vst.msk [vmem:[%s12491_s1 + $0x390] sm:$0xff] %vm3886_vm10, %v4160_v17   ;;  %v6581_v11 = vld [vmem:[%s12490_s0 + $0x2c5] ss:$8 sm:$0xf0]  }
 0x2e2   :  { %v4149_v23 = vpop.permute.xlu0 %4148   ;;  %4797 = vrot.lane.b32.xlu1 %v4796_v16, %s6647_s20  ;;  %v4972_v16 = vsel %vm4_vm0, %v6572_v51, %v6571_v61  ;;  %v6589_v33 = vld [vmem:[%s12490_s0 + $0x5c5] ss:$8 sm:$0xf]  }
 0x2e3   :  { %6348 = vst.msk [vmem:[%s12491_s1 + $0x2f0] sm:$0xff] %vm3886_vm10, %v4149_v23   ;;  %v6590_v34 = vld [vmem:[%s12490_s0 + $0x5c5] ss:$8 sm:$0xf0]  }
 0x2e4   :  { %4786 = vrot.lane.b32.xlu0 %v4785_v21, %s6647_s20  ;;  %v4182_v25 = vpop.permute.xlu1 %4181   ;;  %v4961_v21 = vsel %vm4_vm0, %v6569_v59, %v6568_v15  ;;  %v6586_v39 = vld [vmem:[%s12490_s0 + $0x4c5] ss:$8 sm:$0xf]  }
 0x2e5   :  { %6357 = vst.msk [vmem:[%s12491_s1 + $0x4d0] sm:$0xff] %vm3886_vm10, %v4182_v25   ;;  %v6587_v40 = vld [vmem:[%s12490_s0 + $0x4c5] ss:$8 sm:$0xf0]  }
 0x2e6   :  { %v4171_v30 = vpop.permute.xlu0 %4170   ;;  %4819 = vrot.lane.b32.xlu1 %v4818_v22, %s6647_s20  ;;  %v4994_v22 = vsel %vm4_vm0, %v6578_v1, %v6577_v18  ;;  %v6595_v42 = vld [vmem:[%s12490_s0 + $0x7c5] ss:$8 sm:$0xf]  }
 0x2e7   :  { %6354 = vst.msk [vmem:[%s12491_s1 + $0x430] sm:$0xff] %vm3886_vm10, %v4171_v30   ;;  %v6596_v46 = vld [vmem:[%s12490_s0 + $0x7c5] ss:$8 sm:$0xf0]  }
 0x2e8   :  { %4808 = vrot.lane.b32.xlu0 %v4807_v28, %s6647_s20  ;;  %v4204_v4 = vpop.permute.xlu1 %4203   ;;  %v4983_v28 = vsel %vm4_vm0, %v6575_v53, %v6574_v24  ;;  %v6592_v48 = vld [vmem:[%s12490_s0 + $0x6c5] ss:$8 sm:$0xf]  }
 0x2e9   :  { %6363 = vst.msk [vmem:[%s12491_s1 + $0x610] sm:$0xff] %vm3886_vm10, %v4204_v4   ;;  %v6593_v20 = vld [vmem:[%s12490_s0 + $0x6c5] ss:$8 sm:$0xf0]  }
 0x2ea   :  { %v4193_v37 = vpop.permute.xlu0 %4192   ;;  %4841 = vrot.lane.b32.xlu1 %v4840_v32, %s6647_s20  ;;  %v5016_v32 = vsel %vm4_vm0, %v6584_v5, %v6583_v26  ;;  %v6601_v27 = vld [vmem:[%s12490_s0 + $0x9c5] ss:$8 sm:$0xf]  }
 0x2eb   :  { %6360 = vst.msk [vmem:[%s12491_s1 + $0x570] sm:$0xff] %vm3886_vm10, %v4193_v37   ;;  %v6602_v45 = vld [vmem:[%s12490_s0 + $0x9c5] ss:$8 sm:$0xf0]  }
 0x2ec   :  { %4830 = vrot.lane.b32.xlu0 %v4829_v12, %s6647_s20  ;;  %v4226_v19 = vpop.permute.xlu1 %4225   ;;  %v5005_v12 = vsel %vm4_vm0, %v6581_v11, %v6580_v31  ;;  %v6598_v55 = vld [vmem:[%s12490_s0 + $0x8c5] ss:$8 sm:$0xf]  }
 0x2ed   :  { %6369 = vst.msk [vmem:[%s12491_s1 + $0x138] sm:$0xff] %vm3886_vm10, %v4226_v19   ;;  %v6599_v36 = vld [vmem:[%s12490_s0 + $0x8c5] ss:$8 sm:$0xf0]  }
 0x2ee   :  { %v4215_v29 = vpop.permute.xlu0 %4214   ;;  %4863 = vrot.lane.b32.xlu1 %v4862_v41, %s6647_s20  ;;  %v5038_v41 = vsel %vm4_vm0, %v6590_v34, %v6589_v33  ;;  %v6607_v60 = vld [vmem:[%s12490_s0 + $0x105] ss:$8 sm:$0xf]  }
 0x2ef   :  { %6366 = vst.msk [vmem:[%s12491_s1 + $0x98] sm:$0xff] %vm3886_vm10, %v4215_v29   ;;  %v6608_v43 = vld [vmem:[%s12490_s0 + $0x105] ss:$8 sm:$0xf0]  }
 0x2f0   :  { %4852 = vrot.lane.b32.xlu0 %v4851_v47, %s6647_s20  ;;  %v4248_v49 = vpop.permute.xlu1 %4247   ;;  %v5027_v47 = vsel %vm4_vm0, %v6587_v40, %v6586_v39  ;;  %v6604_v63 = vld [vmem:[%s12490_s0 + $0x5] ss:$8 sm:$0xf]  }
 0x2f1   :  { %6375 = vst.msk [vmem:[%s12491_s1 + $0x278] sm:$0xff] %vm3886_vm10, %v4248_v49   ;;  %v6605_v0 = vld [vmem:[%s12490_s0 + $0x5] ss:$8 sm:$0xf0]  }
 0x2f2   :  { %v4237_v54 = vpop.permute.xlu0 %4236   ;;  %4885 = vrot.lane.b32.xlu1 %v4884_v38, %s6647_s20  ;;  %v5060_v38 = vsel %vm4_vm0, %v6596_v46, %v6595_v42  ;;  %v6613_v3 = vld [vmem:[%s12490_s0 + $0x305] ss:$8 sm:$0xf]  }
 0x2f3   :  { %6372 = vst.msk [vmem:[%s12491_s1 + $0x1d8] sm:$0xff] %vm3886_vm10, %v4237_v54   ;;  %v6614_v6 = vld [vmem:[%s12490_s0 + $0x305] ss:$8 sm:$0xf0]  }
 0x2f4   :  { %4874 = vrot.lane.b32.xlu0 %v4873_v52, %s6647_s20  ;;  %v4270_v58 = vpop.permute.xlu1 %4269   ;;  %v5049_v52 = vsel %vm4_vm0, %v6593_v20, %v6592_v48  ;;  %v6610_v8 = vld [vmem:[%s12490_s0 + $0x205] ss:$8 sm:$0xf]  }
 0x2f5   :  { %6381 = vst.msk [vmem:[%s12491_s1 + $0x3b8] sm:$0xff] %vm3886_vm10, %v4270_v58   ;;  %v6611_v9 = vld [vmem:[%s12490_s0 + $0x205] ss:$8 sm:$0xf0]  }
 0x2f6   :  { %v4259_v35 = vpop.permute.xlu0 %4258   ;;  %4907 = vrot.lane.b32.xlu1 %v4906_v56, %s6647_s20  ;;  %v5082_v56 = vsel %vm4_vm0, %v6602_v45, %v6601_v27  ;;  %v6619_v61 = vld [vmem:[%s12490_s0 + $0x505] ss:$8 sm:$0xf]  }
 0x2f7   :  { %6378 = vst.msk [vmem:[%s12491_s1 + $0x318] sm:$0xff] %vm3886_vm10, %v4259_v35   ;;  %v6620_v51 = vld [vmem:[%s12490_s0 + $0x505] ss:$8 sm:$0xf0]  }
 0x2f8   :  { %4896 = vrot.lane.b32.xlu0 %v4895_v62, %s6647_s20  ;;  %v4292_v2 = vpop.permute.xlu1 %4291   ;;  %v5071_v62 = vsel %vm4_vm0, %v6599_v36, %v6598_v55  ;;  %v6616_v15 = vld [vmem:[%s12490_s0 + $0x405] ss:$8 sm:$0xf]  }
 0x2f9   :  { %6387 = vst.msk [vmem:[%s12491_s1 + $0x4f8] sm:$0xff] %vm3886_vm10, %v4292_v2   ;;  %v6617_v59 = vld [vmem:[%s12490_s0 + $0x405] ss:$8 sm:$0xf0]  }
 0x2fa   :  { %v4281_v50 = vpop.permute.xlu0 %4280   ;;  %4929 = vrot.lane.b32.xlu1 %v4928_v44, %s6647_s20  ;;  %v5104_v44 = vsel %vm4_vm0, %v6608_v43, %v6607_v60  ;;  %v6625_v18 = vld [vmem:[%s12490_s0 + $0x705] ss:$8 sm:$0xf]  }
 0x2fb   :  { %6384 = vst.msk [vmem:[%s12491_s1 + $0x458] sm:$0xff] %vm3886_vm10, %v4281_v50   ;;  %v6626_v1 = vld [vmem:[%s12490_s0 + $0x705] ss:$8 sm:$0xf0]  }
 0x2fc   :  { %4918 = vrot.lane.b32.xlu0 %v4917_v7, %s6647_s20  ;;  %v4314_v57 = vpop.permute.xlu1 %4313   ;;  %v5093_v7 = vsel %vm4_vm0, %v6605_v0, %v6604_v63  ;;  %v6622_v24 = vld [vmem:[%s12490_s0 + $0x605] ss:$8 sm:$0xf]  }
 0x2fd   :  { %6393 = vst.msk [vmem:[%s12491_s1 + $0x638] sm:$0xff] %vm3886_vm10, %v4314_v57   ;;  %v6623_v53 = vld [vmem:[%s12490_s0 + $0x605] ss:$8 sm:$0xf0]  }
 0x2fe   :  { %v4303_v14 = vpop.permute.xlu0 %4302   ;;  %4951 = vrot.lane.b32.xlu1 %v4950_v10, %s6647_s20  ;;  %v5126_v10 = vsel %vm4_vm0, %v6614_v6, %v6613_v3  ;;  %v6631_v26 = vld [vmem:[%s12490_s0 + $0x905] ss:$8 sm:$0xf]  }
 0x2ff   :  { %6390 = vst.msk [vmem:[%s12491_s1 + $0x598] sm:$0xff] %vm3886_vm10, %v4303_v14   ;;  %v6632_v5 = vld [vmem:[%s12490_s0 + $0x905] ss:$8 sm:$0xf0]  }
 0x300   :  { %4940 = vrot.lane.b32.xlu0 %v4939_v13, %s6647_s20  ;;  %v4336_v17 = vpop.permute.xlu1 %4335   ;;  %v5115_v13 = vsel %vm4_vm0, %v6611_v9, %v6610_v8  ;;  %v6628_v31 = vld [vmem:[%s12490_s0 + $0x805] ss:$8 sm:$0xf]  }
 0x301   :  { %6399 = vst.msk [vmem:[%s12491_s1 + $0x120] sm:$0xff] %vm4326_vm11, %v4336_v17   ;;  %v6629_v11 = vld [vmem:[%s12490_s0 + $0x805] ss:$8 sm:$0xf0]  }
 0x302   :  { %v4325_v23 = vpop.permute.xlu0 %4324   ;;  %4973 = vrot.lane.b32.xlu1 %v4972_v16, %s6647_s20  ;;  %v5148_v16 = vsel %vm4_vm0, %v6620_v51, %v6619_v61  ;;  %v5181_v33 = vsel %vm4_vm0, %v6629_v11, %v6628_v31 }
 0x303   :  { %6396 = vst.msk [vmem:[%s12491_s1 + $0x80] sm:$0xff] %vm4326_vm11, %v4325_v23  }
 0x304   :  { %4962 = vrot.lane.b32.xlu0 %v4961_v21, %s6647_s20  ;;  %v4358_v25 = vpop.permute.xlu1 %4357   ;;  %v5137_v21 = vsel %vm4_vm0, %v6617_v59, %v6616_v15 }
 0x305   :  { %6405 = vst.msk [vmem:[%s12491_s1 + $0x260] sm:$0xff] %vm4326_vm11, %v4358_v25  }
 0x306   :  { %v4347_v30 = vpop.permute.xlu0 %4346   ;;  %4995 = vrot.lane.b32.xlu1 %v4994_v22, %s6647_s20  ;;  %v5170_v22 = vsel %vm4_vm0, %v6626_v1, %v6625_v18 }
 0x307   :  { %6402 = vst.msk [vmem:[%s12491_s1 + $0x1c0] sm:$0xff] %vm4326_vm11, %v4347_v30  }
 0x308   :  { %4984 = vrot.lane.b32.xlu0 %v4983_v28, %s6647_s20  ;;  %v4380_v4 = vpop.permute.xlu1 %4379   ;;  %v5159_v28 = vsel %vm4_vm0, %v6623_v53, %v6622_v24 }
 0x309   :  { %6411 = vst.msk [vmem:[%s12491_s1 + $0x3a0] sm:$0xff] %vm4326_vm11, %v4380_v4  }
 0x30a   :  { %v4369_v37 = vpop.permute.xlu0 %4368   ;;  %5017 = vrot.lane.b32.xlu1 %v5016_v32, %s6647_s20  ;;  %v5192_v32 = vsel %vm4_vm0, %v6632_v5, %v6631_v26 }
 0x30b   :  { %6408 = vst.msk [vmem:[%s12491_s1 + $0x300] sm:$0xff] %vm4326_vm11, %v4369_v37  }
 0x30c   :  { %5006 = vrot.lane.b32.xlu0 %v5005_v12, %s6647_s20  ;;  %v4402_v19 = vpop.permute.xlu1 %4401  }
 0x30d   :  { %6417 = vst.msk [vmem:[%s12491_s1 + $0x4e0] sm:$0xff] %vm4326_vm11, %v4402_v19  }
 0x30e   :  { %v4391_v29 = vpop.permute.xlu0 %4390   ;;  %5039 = vrot.lane.b32.xlu1 %v5038_v41, %s6647_s20 }
 0x30f   :  { %6414 = vst.msk [vmem:[%s12491_s1 + $0x440] sm:$0xff] %vm4326_vm11, %v4391_v29  }
 0x310   :  { %5028 = vrot.lane.b32.xlu0 %v5027_v47, %s6647_s20  ;;  %v4424_v49 = vpop.permute.xlu1 %4423  }
 0x311   :  { %6423 = vst.msk [vmem:[%s12491_s1 + $0x620] sm:$0xff] %vm4326_vm11, %v4424_v49  }
 0x312   :  { %v4413_v54 = vpop.permute.xlu0 %4412   ;;  %5061 = vrot.lane.b32.xlu1 %v5060_v38, %s6647_s20 }
 0x313   :  { %6420 = vst.msk [vmem:[%s12491_s1 + $0x580] sm:$0xff] %vm4326_vm11, %v4413_v54  }
 0x314   :  { %5050 = vrot.lane.b32.xlu0 %v5049_v52, %s6647_s20  ;;  %v4446_v58 = vpop.permute.xlu1 %4445  }
 0x315   :  { %6429 = vst.msk [vmem:[%s12491_s1 + $0xa8] sm:$0xff] %vm4326_vm11, %v4446_v58  }
 0x316   :  { %v4435_v35 = vpop.permute.xlu0 %4434   ;;  %5083 = vrot.lane.b32.xlu1 %v5082_v56, %s6647_s20 }
 0x317   :  { %6426 = vst.msk [vmem:[%s12491_s1 + $0x8] sm:$0xff] %vm4326_vm11, %v4435_v35  }
 0x318   :  { %5072 = vrot.lane.b32.xlu0 %v5071_v62, %s6647_s20  ;;  %v4468_v2 = vpop.permute.xlu1 %4467  }
 0x319   :  { %6435 = vst.msk [vmem:[%s12491_s1 + $0x1e8] sm:$0xff] %vm4326_vm11, %v4468_v2  }
 0x31a   :  { %v4457_v50 = vpop.permute.xlu0 %4456   ;;  %5105 = vrot.lane.b32.xlu1 %v5104_v44, %s6647_s20 }
 0x31b   :  { %6432 = vst.msk [vmem:[%s12491_s1 + $0x148] sm:$0xff] %vm4326_vm11, %v4457_v50  }
 0x31c   :  { %5094 = vrot.lane.b32.xlu0 %v5093_v7, %s6647_s20  ;;  %v4490_v57 = vpop.permute.xlu1 %4489  }
 0x31d   :  { %6441 = vst.msk [vmem:[%s12491_s1 + $0x328] sm:$0xff] %vm4326_vm11, %v4490_v57  }
 0x31e   :  { %v4479_v14 = vpop.permute.xlu0 %4478   ;;  %5127 = vrot.lane.b32.xlu1 %v5126_v10, %s6647_s20 }
 0x31f   :  { %6438 = vst.msk [vmem:[%s12491_s1 + $0x288] sm:$0xff] %vm4326_vm11, %v4479_v14  }
 0x320   :  { %5116 = vrot.lane.b32.xlu0 %v5115_v13, %s6647_s20  ;;  %v4512_v17 = vpop.permute.xlu1 %4511  }
 0x321   :  { %6447 = vst.msk [vmem:[%s12491_s1 + $0x468] sm:$0xff] %vm4326_vm11, %v4512_v17  }
 0x322   :  { %v4501_v23 = vpop.permute.xlu0 %4500   ;;  %5149 = vrot.lane.b32.xlu1 %v5148_v16, %s6647_s20 }
 0x323   :  { %6444 = vst.msk [vmem:[%s12491_s1 + $0x3c8] sm:$0xff] %vm4326_vm11, %v4501_v23  }
 0x324   :  { %5138 = vrot.lane.b32.xlu0 %v5137_v21, %s6647_s20  ;;  %v4534_v25 = vpop.permute.xlu1 %4533  }
 0x325   :  { %6453 = vst.msk [vmem:[%s12491_s1 + $0x5a8] sm:$0xff] %vm4326_vm11, %v4534_v25  }
 0x326   :  { %v4523_v30 = vpop.permute.xlu0 %4522   ;;  %5171 = vrot.lane.b32.xlu1 %v5170_v22, %s6647_s20 }
 0x327   :  { %6450 = vst.msk [vmem:[%s12491_s1 + $0x508] sm:$0xff] %vm4326_vm11, %v4523_v30  }
 0x328   :  { %5160 = vrot.lane.b32.xlu0 %v5159_v28, %s6647_s20  ;;  %v4556_v4 = vpop.permute.xlu1 %4555  }
 0x329   :  { %6459 = vst.msk [vmem:[%s12491_s1 + $0xd0] sm:$0xff] %vm4326_vm11, %v4556_v4  }
 0x32a   :  { %v4545_v34 = vpop.permute.xlu0 %4544   ;;  %5193 = vrot.lane.b32.xlu1 %v5192_v32, %s6647_s20 }
 0x32b   :  { %6456 = vst.msk [vmem:[%s12491_s1 + $0x30] sm:$0xff] %vm4326_vm11, %v4545_v34  }
 0x32c   :  { %5182 = vrot.lane.b32.xlu0 %v5181_v33, %s6647_s20  ;;  %v4578_v12 = vpop.permute.xlu1 %4577  }
 0x32d   :  { %6465 = vst.msk [vmem:[%s12491_s1 + $0x210] sm:$0xff] %vm4326_vm11, %v4578_v12  }
 0x32e   :  { %v4567_v37 = vpop.permute.xlu0 %4566  }
 0x32f   :  { %6462 = vst.msk [vmem:[%s12491_s1 + $0x170] sm:$0xff] %vm4326_vm11, %v4567_v37  }
 0x330   :  { %v4600_v39 = vpop.permute.xlu1 %4599  }
 0x331   :  { %6471 = vst.msk [vmem:[%s12491_s1 + $0x350] sm:$0xff] %vm4326_vm11, %v4600_v39  }
 0x332   :  { %v4589_v40 = vpop.permute.xlu0 %4588  }
 0x333   :  { %6468 = vst.msk [vmem:[%s12491_s1 + $0x2b0] sm:$0xff] %vm4326_vm11, %v4589_v40  }
 0x334   :  { %v4622_v41 = vpop.permute.xlu1 %4621  }
 0x335   :  { %6477 = vst.msk [vmem:[%s12491_s1 + $0x490] sm:$0xff] %vm4326_vm11, %v4622_v41  }
 0x336   :  { %v4611_v19 = vpop.permute.xlu0 %4610  }
 0x337   :  { %6474 = vst.msk [vmem:[%s12491_s1 + $0x3f0] sm:$0xff] %vm4326_vm11, %v4611_v19  }
 0x338   :  { %v4644_v42 = vpop.permute.xlu1 %4643  }
 0x339   :  { %6483 = vst.msk [vmem:[%s12491_s1 + $0x5d0] sm:$0xff] %vm4326_vm11, %v4644_v42  }
 0x33a   :  { %v4633_v46 = vpop.permute.xlu0 %4632  }
 0x33b   :  { %6480 = vst.msk [vmem:[%s12491_s1 + $0x530] sm:$0xff] %vm4326_vm11, %v4633_v46  }
 0x33c   :  { %v4666_v47 = vpop.permute.xlu1 %4665  }
 0x33d   :  { %6489 = vst.msk [vmem:[%s12491_s1 + $0xf8] sm:$0xff] %vm4326_vm11, %v4666_v47  }
 0x33e   :  { %v4655_v29 = vpop.permute.xlu0 %4654  }
 0x33f   :  { %6486 = vst.msk [vmem:[%s12491_s1 + $0x58] sm:$0xff] %vm4326_vm11, %v4655_v29  }
 0x340   :  { %v4688_v48 = vpop.permute.xlu1 %4687  }
 0x341   :  { %6495 = vst.msk [vmem:[%s12491_s1 + $0x238] sm:$0xff] %vm4326_vm11, %v4688_v48  }
 0x342   :  { %v4677_v20 = vpop.permute.xlu0 %4676  }
 0x343   :  { %6492 = vst.msk [vmem:[%s12491_s1 + $0x198] sm:$0xff] %vm4326_vm11, %v4677_v20  }
 0x344   :  { %v4710_v38 = vpop.permute.xlu1 %4709  }
 0x345   :  { %6501 = vst.msk [vmem:[%s12491_s1 + $0x378] sm:$0xff] %vm4326_vm11, %v4710_v38  }
 0x346   :  { %v4699_v49 = vpop.permute.xlu0 %4698  }
 0x347   :  { %6498 = vst.msk [vmem:[%s12491_s1 + $0x2d8] sm:$0xff] %vm4326_vm11, %v4699_v49  }
 0x348   :  { %v4732_v27 = vpop.permute.xlu1 %4731  }
 0x349   :  { %6507 = vst.msk [vmem:[%s12491_s1 + $0x4b8] sm:$0xff] %vm4326_vm11, %v4732_v27  }
 0x34a   :  { %v4721_v45 = vpop.permute.xlu0 %4720  }
 0x34b   :  { %6504 = vst.msk [vmem:[%s12491_s1 + $0x418] sm:$0xff] %vm4326_vm11, %v4721_v45  }
 0x34c   :  { %v4754_v52 = vpop.permute.xlu1 %4753  }
 0x34d   :  { %6513 = vst.msk [vmem:[%s12491_s1 + $0x5f8] sm:$0xff] %vm4326_vm11, %v4754_v52  }
 0x34e   :  { %v4743_v54 = vpop.permute.xlu0 %4742  }
 0x34f   :  { %6510 = vst.msk [vmem:[%s12491_s1 + $0x558] sm:$0xff] %vm4326_vm11, %v4743_v54  }
 0x350   :  { %v4776_v55 = vpop.permute.xlu1 %4775  }
 0x351   :  { %6519 = vst.msk [vmem:[%s12491_s1 + $0xe0] sm:$0xff] %vm4766_vm12, %v4776_v55  }
 0x352   :  { %v4765_v36 = vpop.permute.xlu0 %4764  }
 0x353   :  { %6516 = vst.msk [vmem:[%s12491_s1 + $0x40] sm:$0xff] %vm4766_vm12, %v4765_v36  }
 0x354   :  { %v4798_v56 = vpop.permute.xlu1 %4797  }
 0x355   :  { %6525 = vst.msk [vmem:[%s12491_s1 + $0x220] sm:$0xff] %vm4766_vm12, %v4798_v56  }
 0x356   :  { %v4787_v58 = vpop.permute.xlu0 %4786  }
 0x357   :  { %6522 = vst.msk [vmem:[%s12491_s1 + $0x180] sm:$0xff] %vm4766_vm12, %v4787_v58  }
 0x358   :  { %v4820_v60 = vpop.permute.xlu1 %4819  }
 0x359   :  { %6531 = vst.msk [vmem:[%s12491_s1 + $0x360] sm:$0xff] %vm4766_vm12, %v4820_v60  }
 0x35a   :  { %v4809_v43 = vpop.permute.xlu0 %4808  }
 0x35b   :  { %6528 = vst.msk [vmem:[%s12491_s1 + $0x2c0] sm:$0xff] %vm4766_vm12, %v4809_v43  }
 0x35c   :  { %v4842_v62 = vpop.permute.xlu1 %4841  }
 0x35d   :  { %6537 = vst.msk [vmem:[%s12491_s1 + $0x4a0] sm:$0xff] %vm4766_vm12, %v4842_v62  }
 0x35e   :  { %v4831_v35 = vpop.permute.xlu0 %4830  }
 0x35f   :  { %6534 = vst.msk [vmem:[%s12491_s1 + $0x400] sm:$0xff] %vm4766_vm12, %v4831_v35  }
 0x360   :  { %v4864_v63 = vpop.permute.xlu1 %4863  }
 0x361   :  { %6543 = vst.msk [vmem:[%s12491_s1 + $0x5e0] sm:$0xff] %vm4766_vm12, %v4864_v63  }
 0x362   :  { %v4853_v0 = vpop.permute.xlu0 %4852  }
 0x363   :  { %6540 = vst.msk [vmem:[%s12491_s1 + $0x540] sm:$0xff] %vm4766_vm12, %v4853_v0  }
 0x364   :  { %v4886_v44 = vpop.permute.xlu1 %4885  }
 0x365   :  { %6549 = vst.msk [vmem:[%s12491_s1 + $0x108] sm:$0xff] %vm4766_vm12, %v4886_v44  }
 0x366   :  { %v4875_v2 = vpop.permute.xlu0 %4874  }
 0x367   :  { %6546 = vst.msk [vmem:[%s12491_s1 + $0x68] sm:$0xff] %vm4766_vm12, %v4875_v2  }
 0x368   :  { %v4908_v3 = vpop.permute.xlu1 %4907  }
 0x369   :  { %6555 = vst.msk [vmem:[%s12491_s1 + $0x248] sm:$0xff] %vm4766_vm12, %v4908_v3  }
 0x36a   :  { %v4897_v6 = vpop.permute.xlu0 %4896  }
 0x36b   :  { %6552 = vst.msk [vmem:[%s12491_s1 + $0x1a8] sm:$0xff] %vm4766_vm12, %v4897_v6  }
 0x36c   :  { %v4930_v7 = vpop.permute.xlu1 %4929  }
 0x36d   :  { %6561 = vst.msk [vmem:[%s12491_s1 + $0x388] sm:$0xff] %vm4766_vm12, %v4930_v7  }
 0x36e   :  { %v4919_v50 = vpop.permute.xlu0 %4918  }
 0x36f   :  { %6558 = vst.msk [vmem:[%s12491_s1 + $0x2e8] sm:$0xff] %vm4766_vm12, %v4919_v50  }
 0x370   :  { %v4952_v8 = vpop.permute.xlu1 %4951  }
 0x371   :  { %6567 = vst.msk [vmem:[%s12491_s1 + $0x4c8] sm:$0xff] %vm4766_vm12, %v4952_v8  }
 0x372   :  { %v4941_v9 = vpop.permute.xlu0 %4940  }
 0x373   :  { %6564 = vst.msk [vmem:[%s12491_s1 + $0x428] sm:$0xff] %vm4766_vm12, %v4941_v9  }
 0x374   :  { %v4974_v10 = vpop.permute.xlu1 %4973  }
 0x375   :  { %6573 = vst.msk [vmem:[%s12491_s1 + $0x608] sm:$0xff] %vm4766_vm12, %v4974_v10  }
 0x376   :  { %v4963_v57 = vpop.permute.xlu0 %4962  }
 0x377   :  { %6570 = vst.msk [vmem:[%s12491_s1 + $0x568] sm:$0xff] %vm4766_vm12, %v4963_v57  }
 0x378   :  { %v4996_v61 = vpop.permute.xlu1 %4995  }
 0x379   :  { %6579 = vst.msk [vmem:[%s12491_s1 + $0x130] sm:$0xff] %vm4766_vm12, %v4996_v61  }
 0x37a   :  { %v4985_v51 = vpop.permute.xlu0 %4984  }
 0x37b   :  { %6576 = vst.msk [vmem:[%s12491_s1 + $0x90] sm:$0xff] %vm4766_vm12, %v4985_v51  }
 0x37c   :  { %v5018_v13 = vpop.permute.xlu1 %5017  }
 0x37d   :  { %6585 = vst.msk [vmem:[%s12491_s1 + $0x270] sm:$0xff] %vm4766_vm12, %v5018_v13  }
 0x37e   :  { %v5007_v14 = vpop.permute.xlu0 %5006  }
 0x37f   :  { %6582 = vst.msk [vmem:[%s12491_s1 + $0x1d0] sm:$0xff] %vm4766_vm12, %v5007_v14  }
 0x380   :  { %v5040_v15 = vpop.permute.xlu1 %5039  }
 0x381   :  { %6591 = vst.msk [vmem:[%s12491_s1 + $0x3b0] sm:$0xff] %vm4766_vm12, %v5040_v15  }
 0x382   :  { %v5029_v59 = vpop.permute.xlu0 %5028  }
 0x383   :  { %6588 = vst.msk [vmem:[%s12491_s1 + $0x310] sm:$0xff] %vm4766_vm12, %v5029_v59  }
 0x384   :  { %v5062_v16 = vpop.permute.xlu1 %5061  }
 0x385   :  { %6597 = vst.msk [vmem:[%s12491_s1 + $0x4f0] sm:$0xff] %vm4766_vm12, %v5062_v16  }
 0x386   :  { %v5051_v17 = vpop.permute.xlu0 %5050  }
 0x387   :  { %6594 = vst.msk [vmem:[%s12491_s1 + $0x450] sm:$0xff] %vm4766_vm12, %v5051_v17  }
 0x388   :  { %v5084_v18 = vpop.permute.xlu1 %5083  }
 0x389   :  { %6603 = vst.msk [vmem:[%s12491_s1 + $0x630] sm:$0xff] %vm4766_vm12, %v5084_v18  }
 0x38a   :  { %v5073_v1 = vpop.permute.xlu0 %5072  }
 0x38b   :  { %6600 = vst.msk [vmem:[%s12491_s1 + $0x590] sm:$0xff] %vm4766_vm12, %v5073_v1  }
 0x38c   :  { %v5106_v21 = vpop.permute.xlu1 %5105  }
 0x38d   :  { %6609 = vst.msk [vmem:[%s12491_s1 + $0xb8] sm:$0xff] %vm4766_vm12, %v5106_v21  }
 0x38e   :  { %v5095_v23 = vpop.permute.xlu0 %5094  }
 0x38f   :  { %6606 = vst.msk [vmem:[%s12491_s1 + $0x18] sm:$0xff] %vm4766_vm12, %v5095_v23  }
 0x390   :  { %v5128_v24 = vpop.permute.xlu1 %5127  }
 0x391   :  { %6615 = vst.msk [vmem:[%s12491_s1 + $0x1f8] sm:$0xff] %vm4766_vm12, %v5128_v24  }
 0x392   :  { %v5117_v53 = vpop.permute.xlu0 %5116  }
 0x393   :  { %6612 = vst.msk [vmem:[%s12491_s1 + $0x158] sm:$0xff] %vm4766_vm12, %v5117_v53  }
 0x394   :  { %v5150_v22 = vpop.permute.xlu1 %5149  }
 0x395   :  { %6621 = vst.msk [vmem:[%s12491_s1 + $0x338] sm:$0xff] %vm4766_vm12, %v5150_v22  }
 0x396   :  { %v5139_v25 = vpop.permute.xlu0 %5138  }
 0x397   :  { %6618 = vst.msk [vmem:[%s12491_s1 + $0x298] sm:$0xff] %vm4766_vm12, %v5139_v25  }
 0x398   :  { %v5172_v26 = vpop.permute.xlu1 %5171  }
 0x399   :  { %6627 = vst.msk [vmem:[%s12491_s1 + $0x478] sm:$0xff] %vm4766_vm12, %v5172_v26  }
 0x39a   :  { %v5161_v5 = vpop.permute.xlu0 %5160  }
 0x39b   :  { %6624 = vst.msk [vmem:[%s12491_s1 + $0x3d8] sm:$0xff] %vm4766_vm12, %v5161_v5  }
 0x39c   :  { %v5194_v28 = vpop.permute.xlu1 %5193  }
 0x39d   :  { %6633 = vst.msk [vmem:[%s12491_s1 + $0x5b8] sm:$0xff] %vm4766_vm12, %v5194_v28  }
 0x39e   :  { %v5183_v30 = vpop.permute.xlu0 %5182  }
 0x39f   :  { %6630 = vst.msk [vmem:[%s12491_s1 + $0x518] sm:$0xff] %vm4766_vm12, %v5183_v30  }

// kernel: _net_forward_impl.1
= control target key start
LH: loop header
LB: loop body
LE: loop exit
PB: predicated region body
PF: predicated region fallthrough
CT: control target
= control target key end

     0   :  { %v57_v0 = vlaneseq  ;;  %v5406_v1 = vmov 2   ;;  %v5407_v2 = vmov 1   ;;  %v10447_v6 = vmov 0   ;;  %s5410_s16 = smov 1   ;;  %s10431_s1 = inlined_call_operand.vmem [shape: f32[16,3], index: 1, kind: input, shape index: {}]   ;;  %s10432_s0 = inlined_call_operand.vmem [shape: f32[1,4,640], index: 0, kind: input, shape index: {}]   ;;  %s10433_s2 = inlined_call_operand.vmem [shape: f32[16,1], index: 2, kind: input, shape index: {}]   ;;  %s10434_s11 = inlined_call_operand.vmem [shape: f32[2,640], index: 11, kind: input, shape index: {}]   ;;  %s10435_s3 = inlined_call_operand.vmem [shape: bf16[32,48], index: 3, kind: input, shape index: {}]   ;;  %s10436_s4 = inlined_call_operand.vmem [shape: f32[32,1], index: 4, kind: input, shape index: {}]   ;;  %s10437_s5 = inlined_call_operand.vmem [shape: bf16[32,96], index: 5, kind: input, shape index: {}]   ;;  %s10438_s6 = inlined_call_operand.vmem [shape: f32[32,1], index: 6, kind: input, shape index: {}]   ;;  %s10439_s7 = inlined_call_operand.vmem [shape: bf16[64,96], index: 7, kind: input, shape index: {}]   ;;  %s10440_s8 = inlined_call_operand.vmem [shape: f32[64,1], index: 8, kind: input, shape index: {}]   ;;  %s10441_s9 = inlined_call_operand.vmem [shape: bf16[64,192], index: 9, kind: input, shape index: {}]   ;;  %s10442_s10 = inlined_call_operand.vmem [shape: f32[64,1], index: 10, kind: input, shape index: {}]   ;;  %s10443_s14 = inlined_call_operand.vmem [shape: f32[5,1], index: 14, kind: input, shape index: {}]   ;;  %s10444_s13 = inlined_call_operand.vmem [shape: bf16[640,8], index: 13, kind: input, shape index: {}]   ;;  %s10445_s12 = inlined_call_operand.vmem [shape: f32[5,64,640], index: 12, kind: input, shape index: {}]   ;;  %s10446_s15 = inlined_call_operand.vmem [shape: f32[1,5,8], index: 15, kind: output, shape index: {}]  }
   0x1   :  { %5341 = vset.pattern.permute.xlu0 %v5406_v1  ;;  %5340 = vset.pattern.permute.xlu1 %v5407_v2  ;;  %v206_v3 = vld [vmem:[%s10431_s1] sm:$0xff]  ;;  %v207_v5 = vld [vmem:[%s10431_s1 + $0x8] sm:$0xff]  ;;  %v53_v13 = vld [vmem:[%s10432_s0 + $0x10] sm:$0xf]  ;;  %vm834_vm2 = vcmask 392192   ;;  %vm1429_vm3 = vcmask 785408  }
   0x2   :  { %299 = vperm.xlu0 %5341, %v206_v3   ;;  %251 = vperm.xlu1 %5340, %v206_v3   ;;  %v58_v4 = vshrl.u32 %v57_v0, 7  ;;  %v52_v11 = vld [vmem:[%s10432_s0 + $0x8] sm:$0xff]  ;;  %v51_v17 = vld [vmem:[%s10432_s0] sm:$0xff]  ;;  %s5409_s0 = smov 127   ;;  %v5605_v57 = vand.u32 127, %v57_v0  ;;  %vm3068_vm4 = vcmask 523264  }
   0x3   :  { %926 = vmatprep.mubr.bf16.mxu1 %v10447_v6  ;;  %873 = vmatprep.mubr.bf16.mxu0 %v10447_v6  ;;  %v208_v52 = vld [vmem:[%s10433_s2] sm:$0xff]  ;;  %v209_v53 = vld [vmem:[%s10433_s2 + $0x8] sm:$0xff]  ;;  %vm4352_vm5 = vcmask 1040384   ;;  %vm4358_vm6 = vcmask 1041408   ;;  %vm4364_vm7 = vcmask 1042432   ;;  %vm4370_vm8 = vcmask 1043456  }
   0x4   :  { %v5502_v7 = vsub.s32 1, %v58_v4  ;;  %v5504_v8 = vsub.s32 2, %v58_v4  ;;  %v5507_v9 = vsub.s32 4, %v58_v4  ;;  %v63_v10 = vsub.s32 7, %v58_v4 }
   0x5   :  { %v5512_v12 = vsub.s32 0, %v58_v4  ;;  %v5518_v15 = vsub.s32 3, %v58_v4  ;;  %v312_v21 = vsub.s32 5, %v58_v4  ;;  %v427_v25 = vsub.s32 6, %v58_v4 }
   0x6   :  { %5342 = vset.pattern.permute.xlu0 %v10447_v6  ;;  %255 = vperm.xlu1 %5340, %v207_v5   ;;  %v325_v14 = vrot.slane %v53_v13, %v5502_v7  ;;  %v440_v16 = vrot.slane %v53_v13, %v5504_v8  ;;  %v147_v18 = vrot.slane %v52_v11, %v5507_v9  ;;  %v100_v55 = vld [vmem:[%s10434_s11] ss:$2 sm:$0x1f]  ;;  %v4833_v56 = vld [vmem:[%s10434_s11 + $0x1] ss:$2 sm:$0x1f] }
   0x7   :  { %212 = vperm.xlu0 %5342, %v206_v3   ;;  %v64_v20 = vrot.slane %v51_v17, %v63_v10  ;;  %v143_v22 = vrot.slane %v52_v11, %v5512_v12  ;;  %v151_v23 = vrot.slane %v53_v13, %v5512_v12  ;;  %v139_v26 = vrot.slane %v51_v17, %v5507_v9 }
   0x8   :  { %v5526_v19 = vrot.slane %v325_v14, %v5502_v7  ;;  %v5531_v24 = vrot.slane %v440_v16, %v5504_v8  ;;  %v76_v28 = vrot.slane %v53_v13, %v5518_v15  ;;  %v60_v29 = vrot.slane %v51_v17, %v5518_v15 }
   0x9   :  { %v5535_v27 = vrot.slane %v64_v20, %v5518_v15  ;;  %v68_v30 = vrot.slane %v52_v11, %v5518_v15  ;;  %v72_v31 = vrot.slane %v52_v11, %v63_v10  ;;  %v317_v32 = vrot.slane %v52_v11, %v5502_v7 }
   0xa   :  { %5343 = vset.pattern.permute.xlu1 %v5406_v1  ;;  %v432_v33 = vrot.slane %v52_v11, %v5504_v8  ;;  %v5543_v34 = vrot.slane %v76_v28, %v5518_v15  ;;  %v5546_v35 = vrot.slane %v60_v29, %v5518_v15  ;;  %v321_v36 = vrot.slane %v52_v11, %v312_v21 }
   0xb   :  { %217 = vperm.xlu0 %5342, %v207_v5   ;;  %303 = vperm.xlu1 %5343, %v207_v5   ;;  %v436_v37 = vrot.slane %v52_v11, %v427_v25  ;;  %v5551_v38 = vrot.slane %v68_v30, %v5518_v15  ;;  %v5554_v39 = vrot.slane %v72_v31, %v5518_v15  ;;  %vm167_vm0 = vcmp.lt.s32.totalorder %v5605_v57, 127 }
   0xc   :  { %v5557_v40 = vrot.slane %v317_v32, %v5502_v7  ;;  %v5561_v41 = vrot.slane %v432_v33, %v5504_v8  ;;  %v5564_v42 = vrot.slane %v321_v36, %v5502_v7  ;;  %v313_v44 = vrot.slane %v51_v17, %v312_v21 }
   0xd   :  { %v5567_v43 = vrot.slane %v436_v37, %v5504_v8  ;;  %v428_v45 = vrot.slane %v51_v17, %v427_v25  ;;  %v309_v46 = vrot.slane %v51_v17, %v5502_v7  ;;  %v424_v47 = vrot.slane %v51_v17, %v5504_v8 }
   0xe   :  { %v5572_v48 = vrot.slane %v313_v44, %v5502_v7  ;;  %v135_v54 = vrot.slane %v51_v17, %v5512_v12  ;;  %v5608_v58 = vrot.slane %v100_v55, %v5507_v9  ;;  %v5611_v59 = vrot.slane %v4833_v56, %v5507_v9 }
   0xf   :  { %163 = vrot.lane.b32.xlu0 %v147_v18, %s5409_s0  ;;  %161 = vrot.lane.b32.xlu1 %v143_v22, %s5409_s0  ;;  %10654 = vst [vmem:[#allocation2_spill] sm:$0xff] %v5567_v43  ;;  %v5577_v49 = vrot.slane %v428_v45, %v5504_v8  ;;  %v5580_v50 = vrot.slane %v309_v46, %v5502_v7  ;;  %vm94_vm1 = vcmp.lt.s32.totalorder %v5605_v57, 1  ;;  %v5365_v57 = vld [vmem:[%s10444_s13 + $0x40] sm:$0xff]   ;;  %vm5412_vm9 = vmmov 0  }
  0x10   :  { %5344 = vset.pattern.permute.xlu1 %v10447_v6  ;;  %v5583_v51 = vrot.slane %v424_v47, %v5504_v8  ;;  %10655 = vst [vmem:[#allocation3_spill] sm:$0xff] %v5608_v58  ;;  %10656 = vst [vmem:[#allocation4_spill] sm:$0xff] %v5611_v59  ;;  %v5614_v60 = vrot.slane %v147_v18, %v5512_v12  ;;  %v5617_v61 = vrot.slane %v100_v55, %v5502_v7  ;;  %vm4827_vm10 = vcmask 61440  }
  0x11   :  { %v5620_v62 = vrot.slane %v100_v55, %v5504_v8  ;;  %v5623_v63 = vrot.slane %v4833_v56, %v5502_v7  ;;  %v5626_v0 = vrot.slane %v143_v22, %v5512_v12  ;;  %v5629_v1 = vrot.slane %v4833_v56, %v5504_v8 }
  0x12   :  { %10657 = vst [vmem:[#allocation5_spill] sm:$0xff] %v5614_v60  ;;  %v5632_v2 = vrot.slane %v151_v23, %v5512_v12  ;;  %v5635_v3 = vrot.slane %v100_v55, %v5518_v15  ;;  %v5638_v4 = vrot.slane %v139_v26, %v5512_v12  ;;  %v5641_v5 = vrot.slane %v135_v54, %v5512_v12 }
  0x13   :  { %165 = vrot.lane.b32.xlu1 %v151_v23, %s5409_s0  ;;  %159 = vrot.lane.b32.xlu0 %v139_v26, %s5409_s0  ;;  %10658 = vst [vmem:[#allocation6_spill] sm:$0xff] %v5620_v62  ;;  %10659 = vst [vmem:[#allocation7_spill] sm:$0xff] %v5623_v63  ;;  %v5644_v7 = vrot.slane %v4833_v56, %v5518_v15  ;;  %v5651_v8 = vrot.slane %v4833_v56, %v5512_v12 }
  0x14   :  { %10660 = vst [vmem:[#allocation8_spill] sm:$0xff] %v5626_v0  ;;  %10661 = vst [vmem:[#allocation9_spill] sm:$0xff] %v5629_v1  ;;  %v5660_v16 = vrot.slane %v100_v55, %v5512_v12 }
  0x15   :  { %10662 = vst [vmem:[#allocation10_spill] sm:$0xff] %v5632_v2  ;;  %10663 = vst [vmem:[#allocation11_spill] sm:$0xff] %v5635_v3 }
  0x16   :  { %10664 = vst [vmem:[#allocation12_spill] sm:$0xff] %v5641_v5  ;;  %10665 = vst [vmem:[#allocation13_spill] sm:$0xff] %v5644_v7 }
  0x17   :  { %373 = vperm.xlu1 %5344, %v208_v52   ;;  %378 = vperm.xlu0 %5342, %v209_v53   ;;  %10666 = vst [vmem:[#allocation14_spill] sm:$0xff] %v5651_v8  ;;  %10667 = vst [vmem:[#allocation15_spill] sm:$0xff] %v5660_v16 }
  0x1b   :  { %157 = vrot.lane.b32.xlu1 %v135_v54, %s5409_s0  ;;  %84 = vrot.lane.b32.xlu0 %v64_v20, %s5410_s16 }
  0x1f   :  { %90 = vrot.lane.b32.xlu0 %v76_v28, %s5410_s16  ;;  %82 = vrot.lane.b32.xlu1 %v60_v29, %s5410_s16 }
  0x23   :  { %86 = vrot.lane.b32.xlu1 %v68_v30, %s5410_s16 }
  0x27   :  { %88 = vrot.lane.b32.xlu1 %v72_v31, %s5410_s16 }
  0x81   :  { %v5646_v9 = vpop.permute.xlu0 %299  ;;  %v5648_v10 = vpop.permute.xlu1 %251 }
  0x82   :  { %v508_v11 = vmul.f32 %v5561_v41, %v5648_v10  ;;  %v548_v13 = vmul.f32 %v5551_v38, %v5646_v9  ;;  %v588_v14 = vmul.f32 %v5551_v38, %v5648_v10  ;;  %v509_v15 = vmul.f32 %v5567_v43, %v5648_v10 }
  0x83   :  { %v549_v17 = vmul.f32 %v5554_v39, %v5646_v9  ;;  %v589_v18 = vmul.f32 %v5554_v39, %v5648_v10  ;;  %v507_v20 = vmul.f32 %v5577_v49, %v5648_v10  ;;  %v547_v21 = vmul.f32 %v5535_v27, %v5646_v9 }
  0x84   :  { %v587_v22 = vmul.f32 %v5535_v27, %v5648_v10  ;;  %v510_v23 = vmul.f32 %v5531_v24, %v5648_v10  ;;  %v550_v25 = vmul.f32 %v5543_v34, %v5646_v9  ;;  %v590_v28 = vmul.f32 %v5543_v34, %v5648_v10 }
  0x85   :  { %v5679_v26 = vpop.permute.xlu1 %255  ;;  %v5685_v29 = vmul.f32 %v5583_v51, %v5648_v10  ;;  %v5689_v30 = vmul.f32 %v5546_v35, %v5646_v9  ;;  %v5693_v31 = vmul.f32 %v5546_v35, %v5648_v10 }
  0x86   :  { %v5695_v32 = vpop.permute.xlu0 %212  ;;  %v513_v33 = vmul.f32 %v5561_v41, %v5679_v26  ;;  %v593_v36 = vmul.f32 %v5551_v38, %v5679_v26  ;;  %v514_v37 = vmul.f32 %v5567_v43, %v5679_v26  ;;  %v594_v44 = vmul.f32 %v5554_v39, %v5679_v26 }
  0x87   :  { %10668 = vst [vmem:[#allocation16_spill] sm:$0xff] %v5685_v29  ;;  %10669 = vst [vmem:[#allocation17_spill] sm:$0xff] %v5689_v30  ;;  %v498_v45 = vmul.f32 %v5557_v40, %v5695_v32  ;;  %v578_v46 = vmul.f32 %v5561_v41, %v5695_v32  ;;  %v499_v47 = vmul.f32 %v5564_v42, %v5695_v32 }
  0x88   :  { %10670 = vst [vmem:[#allocation18_spill] sm:$0xff] %v5693_v31  ;;  %v579_v52 = vmul.f32 %v5567_v43, %v5695_v32  ;;  %v497_v53 = vmul.f32 %v5572_v48, %v5695_v32  ;;  %v577_v54 = vmul.f32 %v5577_v49, %v5695_v32  ;;  %v512_v55 = vmul.f32 %v5577_v49, %v5679_v26 }
  0x89   :  { %v592_v56 = vmul.f32 %v5535_v27, %v5679_v26  ;;  %v518_v6 = vadd.f32 %v508_v11, %v498_v45  ;;  %v598_v60 = vadd.f32 %v588_v14, %v578_v46  ;;  %v519_v2 = vadd.f32 %v509_v15, %v499_v47 }
  0x8a   :  { %v5721_v5 = vadd.f32 %v589_v18, %v579_v52  ;;  %v5723_v0 = vpop.permute.xlu0 %217  ;;  %v5725_v30 = vpop.permute.xlu1 %303  ;;  %v517_v31 = vadd.f32 %v507_v20, %v497_v53  ;;  %v5727_v29 = vadd.f32 %v587_v22, %v577_v54  ;;  %v500_v58 = vmul.f32 %v5526_v19, %v5695_v32 }
  0x8b   :  { %v580_v3 = vmul.f32 %v5531_v24, %v5695_v32  ;;  %v558_v62 = vadd.f32 %v548_v13, %v518_v6  ;;  %v503_v11 = vmul.f32 %v5557_v40, %v5723_v0  ;;  %v553_v14 = vmul.f32 %v5551_v38, %v5725_v30 }
  0x8c   :  { %v583_v15 = vmul.f32 %v5561_v41, %v5723_v0  ;;  %v559_v18 = vadd.f32 %v549_v17, %v519_v2  ;;  %v504_v20 = vmul.f32 %v5564_v42, %v5723_v0  ;;  %v554_v22 = vmul.f32 %v5554_v39, %v5725_v30 }
  0x8d   :  { %v584_v45 = vmul.f32 %v5567_v43, %v5723_v0  ;;  %v523_v6 = vadd.f32 %v513_v33, %v503_v11  ;;  %v557_v46 = vadd.f32 %v547_v21, %v517_v31  ;;  %v502_v47 = vmul.f32 %v5572_v48, %v5723_v0 }
  0x8e   :  { %v603_v13 = vadd.f32 %v593_v36, %v583_v15  ;;  %v164_v38 = vpop.permute.xlu0 %163  ;;  %v162_v52 = vpop.permute.xlu1 %161  ;;  %v524_v53 = vadd.f32 %v514_v37, %v504_v20  ;;  %v552_v2 = vmul.f32 %v5535_v27, %v5725_v30  ;;  %v582_v17 = vmul.f32 %v5577_v49, %v5723_v0 }
  0x8f   :  { %v604_v54 = vadd.f32 %v594_v44, %v584_v45  ;;  %v169_v39 = vsel %vm167_vm0, %v162_v52, %v164_v38  ;;  %v563_v43 = vadd.f32 %v553_v14, %v523_v6  ;;  %v522_v33 = vadd.f32 %v512_v55, %v502_v47 }
  0x90   :  { %v520_v36 = vadd.f32 %v510_v23, %v500_v58  ;;  %v203_v21 = vmul.f32 %v5629_v1, %v169_v39  ;;  %v564_v31 = vadd.f32 %v554_v22, %v524_v53  ;;  %v602_v11 = vadd.f32 %v592_v56, %v582_v17 }
  0x91   :  { %v5754_v15 = vadd.f32 %v590_v28, %v580_v3  ;;  %v5756_v37 = vadd.f32 %v552_v2, %v522_v33  ;;  %v505_v27 = vmul.f32 %v5526_v19, %v5723_v0  ;;  %v515_v20 = vmul.f32 %v5531_v24, %v5679_v26 }
  0x92   :  { %v5758_v44 = vadd.f32 %v550_v25, %v520_v36  ;;  %v617_v14 = vrot.slane %v203_v21, %v5512_v12  ;;  %v166_v55 = vpop.permute.xlu1 %165  ;;  %v160_v58 = vpop.permute.xlu0 %159  ;;  %v555_v23 = vmul.f32 %v5543_v34, %v5725_v30  ;;  %v585_v3 = vmul.f32 %v5531_v24, %v5723_v0 }
  0x93   :  { %v5771_v25 = vmul.f32 %v5638_v4, %v5648_v10  ;;  %v168_v28 = vsel %vm167_vm0, %v164_v38, %v166_v55  ;;  %v170_v56 = vsel %vm167_vm0, %v160_v58, %v162_v52  ;;  %v525_v22 = vadd.f32 %v515_v20, %v505_v27 }
  0x94   :  { %v595_v45 = vmul.f32 %v5543_v34, %v5679_v26  ;;  %v628_v6 = vmul.f32 %v617_v14, %v5646_v9  ;;  %v633_v47 = vmul.f32 %v617_v14, %v5725_v30  ;;  %v204_v53 = vmul.f32 %v5644_v7, %v168_v28 }
  0x95   :  { %v202_v2 = vmul.f32 %v5623_v63, %v170_v56  ;;  %v5784_v17 = vadd.f32 %v555_v23, %v525_v22  ;;  %v5790_v52 = vmul.f32 %v5580_v50, %v5723_v0  ;;  %v5794_v34 = vmul.f32 %v5583_v51, %v5679_v26 }
  0x96   :  { %v5786_v38 = vadd.f32 %v595_v45, %v585_v3  ;;  %v621_v39 = vrot.slane %v204_v53, %v5512_v12  ;;  %v5798_v36 = vpop.permute.xlu1 %373  ;;  %v5800_v21 = vpop.permute.xlu0 %378  ;;  %v638_v27 = vadd.f32 %v628_v6, %v598_v60  ;;  %v643_v20 = vadd.f32 %v633_v47, %v603_v13 }
  0x97   :  { %v613_v33 = vrot.slane %v202_v2, %v5512_v12  ;;  %v568_v14 = vadd.f32 %v558_v62, %v5798_v36  ;;  %v573_v23 = vadd.f32 %v563_v43, %v5800_v21  ;;  %v569_v3 = vadd.f32 %v559_v18, %v5798_v36 }
  0x98   :  { %v5807_v28 = vmul.f32 %v5546_v35, %v5725_v30  ;;  %v629_v56 = vmul.f32 %v621_v39, %v5646_v9  ;;  %v634_v22 = vmul.f32 %v621_v39, %v5725_v30  ;;  %v648_v60 = vadd.f32 %v638_v27, %v5798_v36 }
  0x99   :  { %v627_v45 = vmul.f32 %v613_v33, %v5646_v9  ;;  %v632_v53 = vmul.f32 %v613_v33, %v5725_v30  ;;  %v653_v62 = vadd.f32 %v643_v20, %v5800_v21  ;;  %v574_v43 = vadd.f32 %v564_v31, %v5800_v21 }
  0x9a   :  { %v567_v18 = vadd.f32 %v557_v46, %v5798_v36  ;;  %v158_v13 = vpop.permute.xlu1 %157  ;;  %v85_v6 = vpop.permute.xlu0 %84  ;;  %v639_v47 = vadd.f32 %v629_v56, %v5721_v5  ;;  %v644_v2 = vadd.f32 %v634_v22, %v604_v54  ;;  %v678_v27 = vmax.f32 %v568_v14, %v648_v60 }
  0x9b   :  { %v637_v7 = vadd.f32 %v627_v45, %v5727_v29  ;;  %v642_v39 = vadd.f32 %v632_v53, %v602_v11  ;;  %v171_v1 = vsel %vm167_vm0, %v158_v13, %v160_v58  ;;  %v172_v33 = vsel %vm167_vm0, %v166_v55, %v158_v13 }
  0x9c   :  { %v683_v20 = vmax.f32 %v573_v23, %v653_v62  ;;  %v201_v31 = vmul.f32 %v5651_v8, %v171_v1  ;;  %v205_v46 = vmul.f32 %v5611_v59, %v172_v33  ;;  %v649_v63 = vadd.f32 %v639_v47, %v5798_v36 }
  0x9d   :  { %v654_v5 = vadd.f32 %v644_v2, %v5800_v21  ;;  %v5827_v54 = vmax.f32 %v678_v27, 0.0  ;;  %v647_v11 = vadd.f32 %v637_v7, %v5798_v36  ;;  %v652_v58 = vadd.f32 %v642_v39, %v5800_v21 }
  0x9e   :  { %v5829_v29 = vmax.f32 %v683_v20, 0.0  ;;  %v609_v55 = vrot.slane %v201_v31, %v5512_v12  ;;  %v625_v14 = vrot.slane %v205_v46, %v5512_v12  ;;  %v91_v23 = vpop.permute.xlu0 %90  ;;  %v83_v1 = vpop.permute.xlu1 %82  ;;  %v679_v56 = vmax.f32 %v569_v3, %v649_v63 }
  0x9f   :  { %v684_v22 = vmax.f32 %v574_v43, %v654_v5  ;;  %704 = vrot.lane.b32.xlu0 %v5827_v54, %s5410_s16  ;;  %v98_v45 = vsel %vm94_vm1, %v83_v1, %v85_v6  ;;  %v99_v7 = vsel %vm94_vm1, %v91_v23, %v83_v1  ;;  %v677_v53 = vmax.f32 %v567_v18, %v647_v11  ;;  %v10671_v11 = vld [vmem:[#allocation6_spill] sm:$0xff] }
  0xa0   :  { %706 = vrot.lane.b32.xlu1 %v5829_v29, %s5410_s16  ;;  %v5844_v60 = vmul.f32 %v609_v55, %v5646_v9  ;;  %v630_v62 = vmul.f32 %v625_v14, %v5646_v9  ;;  %v631_v63 = vmul.f32 %v609_v55, %v5725_v30  ;;  %v572_v3 = vadd.f32 %v5756_v37, %v5800_v21 }
  0xa1   :  { %v127_v43 = vmul.f32 %v5660_v16, %v99_v7  ;;  %v128_v13 = vmul.f32 %v5617_v61, %v98_v45  ;;  %v5852_v47 = vmax.f32 %v679_v56, 0.0  ;;  %v5854_v2 = vmax.f32 %v684_v22, 0.0 }
  0xa2   :  { %v635_v18 = vmul.f32 %v625_v14, %v5725_v30  ;;  %v87_v39 = vpop.permute.xlu1 %86  ;;  %v682_v33 = vmax.f32 %v572_v3, %v652_v58  ;;  %v570_v27 = vadd.f32 %v5758_v44, %v5798_v36  ;;  %v640_v20 = vadd.f32 %v630_v62, %v5754_v15 }
  0xa3   :  { %v223_v31 = vrot.slane %v127_v43, %v5512_v12  ;;  %v227_v37 = vrot.slane %v128_v13, %v5512_v12  ;;  %708 = vrot.lane.b32.xlu0 %v5852_v47, %s5410_s16  ;;  %v97_v46 = vsel %vm94_vm1, %v85_v6, %v87_v39  ;;  %v5868_v5 = vmax.f32 %v677_v53, 0.0 }
  0xa4   :  { %710 = vrot.lane.b32.xlu1 %v5854_v2, %s5410_s16  ;;  %v129_v58 = vmul.f32 %v10671_v11, %v97_v46  ;;  %v5871_v44 = vmax.f32 %v682_v33, 0.0  ;;  %v650_v15 = vadd.f32 %v640_v20, %v5798_v36  ;;  %v575_v55 = vadd.f32 %v5784_v17, %v5800_v21 }
  0xa5   :  { %v5877_v14 = vmul.f32 %v223_v31, %v5695_v32  ;;  %v241_v1 = vmul.f32 %v227_v37, %v5695_v32  ;;  %v5881_v56 = vmul.f32 %v223_v31, %v5723_v0  ;;  %v246_v6 = vmul.f32 %v227_v37, %v5723_v0 }
  0xa6   :  { %v231_v22 = vrot.slane %v129_v58, %v5512_v12  ;;  %v89_v45 = vpop.permute.xlu1 %88  ;;  %v680_v7 = vmax.f32 %v570_v27, %v650_v15  ;;  %v645_v53 = vadd.f32 %v635_v18, %v5786_v38  ;;  %v521_v62 = vadd.f32 %v5794_v34, %v5790_v52  ;;  %v10672_v34 = vld [vmem:[#allocation11_spill] sm:$0xff] }
  0xa7   :  { %700 = vrot.lane.b32.xlu0 %v5868_v5, %s5410_s16  ;;  %v95_v17 = vsel %vm94_vm1, %v89_v45, %v91_v23  ;;  %v96_v3 = vsel %vm94_vm1, %v87_v39, %v89_v45  ;;  %v581_v43 = vmul.f32 %v5583_v51, %v5723_v0  ;;  %v10673_v18 = vld [vmem:[#allocation3_spill] sm:$0xff]  ;;  %v591_v39 = vmul.f32 %v5546_v35, %v5679_v26 }
  0xa8   :  { %702 = vrot.lane.b32.xlu1 %v5871_v44, %s5410_s16  ;;  %v5899_v38 = vmul.f32 %v231_v22, %v5695_v32  ;;  %v247_v52 = vmul.f32 %v231_v22, %v5723_v0  ;;  %v130_v13 = vmul.f32 %v10672_v34, %v96_v3  ;;  %v131_v33 = vmul.f32 %v10673_v18, %v95_v17  ;;  %v10674_v17 = vld [vmem:[#allocation16_spill] sm:$0xff] }
  0xa9   :  { %v690_v27 = vmax.f32 %v680_v7, 0.0  ;;  %v655_v20 = vadd.f32 %v645_v53, %v5800_v21  ;;  %v561_v23 = vadd.f32 %v5807_v28, %v521_v62  ;;  %v496_v46 = vmul.f32 %v5580_v50, %v5695_v32 }
  0xaa   :  { %v235_v31 = vrot.slane %v130_v13, %v5512_v12  ;;  %v239_v37 = vrot.slane %v131_v33, %v5512_v12  ;;  %v576_v58 = vmul.f32 %v5583_v51, %v5695_v32  ;;  %v601_v45 = vadd.f32 %v591_v39, %v581_v43  ;;  %v10675_v43 = vld [vmem:[#allocation18_spill] sm:$0xff] }
  0xab   :  { %712 = vrot.lane.b32.xlu0 %v690_v27, %s5410_s16  ;;  %v685_v15 = vmax.f32 %v575_v55, %v655_v20  ;;  %v571_v22 = vadd.f32 %v561_v23, %v5800_v21  ;;  %v284_v28 = vmul.f32 %v5638_v4, %v5679_v26  ;;  %v516_v3 = vadd.f32 %v10674_v17, %v496_v46 }
  0xac   :  { %v5919_v35 = vmul.f32 %v235_v31, %v5695_v32  ;;  %v5922_v12 = vmul.f32 %v239_v37, %v5695_v32  ;;  %v5925_v7 = vmul.f32 %v235_v31, %v5723_v0  ;;  %v5928_v53 = vmul.f32 %v239_v37, %v5723_v0  ;;  %v10676_v37 = vld [vmem:[#allocation17_spill] sm:$0xff] }
  0xad   :  { %v695_v62 = vmax.f32 %v685_v15, 0.0  ;;  %v641_v55 = vadd.f32 %v631_v63, %v601_v45  ;;  %v596_v13 = vadd.f32 %v10675_v43, %v576_v58  ;;  %v294_v33 = vadd.f32 %v284_v28, %v246_v6 }
  0xae   :  { %v357_v20 = vmul.f32 %v5572_v48, %v5725_v30  ;;  %v397_v23 = vmul.f32 %v5638_v4, %v5723_v0  ;;  %v407_v39 = vmul.f32 %v5572_v48, %v5679_v26  ;;  %v556_v46 = vadd.f32 %v10676_v37, %v516_v3 }
  0xaf   :  { %v5938_v31 = vpack.c.bf16 %v695_v62, %v690_v27  ;;  %714 = vrot.lane.b32.xlu1 %v695_v62, %s5410_s16  ;;  %v651_v63 = vadd.f32 %v641_v55, %v5800_v21  ;;  %v636_v58 = vadd.f32 %v5844_v60, %v596_v13  ;;  %v472_v45 = vmul.f32 %v5577_v49, %v5725_v30 }
  0xb0   :  { %v367_v6 = vadd.f32 %v357_v20, %v294_v33  ;;  %v417_v15 = vadd.f32 %v407_v39, %v397_v23  ;;  %v289_v28 = vadd.f32 %v5771_v25, %v241_v1  ;;  %v566_v43 = vadd.f32 %v556_v46, %v5798_v36  ;;  %v10677_v39 = vld [vmem:[#allocation8_spill] sm:$0xff] }
  0xb1   :  { %v681_v17 = vmax.f32 %v571_v22, %v651_v63  ;;  %v646_v27 = vadd.f32 %v636_v58, %v5798_v36  ;;  %v352_v62 = vmul.f32 %v5572_v48, %v5646_v9  ;;  %v392_v60 = vmul.f32 %v5638_v4, %v5695_v32 }
  0xb2   :  { %v387_v55 = vadd.f32 %v5800_v21, %v367_v6  ;;  %v482_v3 = vadd.f32 %v472_v45, %v417_v15  ;;  %v402_v13 = vmul.f32 %v5572_v48, %v5648_v10  ;;  %v467_v22 = vmul.f32 %v5577_v49, %v5646_v9 }
  0xb3   :  { %v5956_v33 = vmax.f32 %v681_v17, 0.0  ;;  %v676_v25 = vmax.f32 %v566_v43, %v646_v27  ;;  %v362_v1 = vadd.f32 %v352_v62, %v289_v28  ;;  %v285_v63 = vmul.f32 %v10677_v39, %v5679_v26 }
  0xb4   :  { %v492_v20 = vadd.f32 %v482_v3, %v5800_v21  ;;  %v412_v23 = vadd.f32 %v402_v13, %v392_v60  ;;  %v358_v37 = vmul.f32 %v5557_v40, %v5725_v30  ;;  %v398_v46 = vmul.f32 %v10677_v39, %v5723_v0 }
  0xb5   :  { %698 = vrot.lane.b32.xlu1 %v5956_v33, %s5410_s16  ;;  %v5967_v48 = vmax.f32 %v676_v25, 0.0  ;;  %v382_v4 = vadd.f32 %v5798_v36, %v362_v1  ;;  %v408_v49 = vmul.f32 %v5557_v40, %v5679_v26  ;;  %v295_v15 = vadd.f32 %v285_v63, %v247_v52  ;;  %v10678_v1 = vld [vmem:[#allocation12_spill] sm:$0xff] }
  0xb6   :  { %v662_v58 = vmax.f32 %v387_v55, %v492_v20  ;;  %v477_v6 = vadd.f32 %v467_v22, %v412_v23  ;;  %v473_v45 = vmul.f32 %v5561_v41, %v5725_v30  ;;  %v280_v17 = vmul.f32 %v10677_v39, %v5648_v10 }
  0xb7   :  { %696 = vrot.lane.b32.xlu0 %v5967_v48, %s5410_s16  ;;  %v418_v28 = vadd.f32 %v408_v49, %v398_v46  ;;  %v353_v43 = vmul.f32 %v5557_v40, %v5646_v9  ;;  %v393_v27 = vmul.f32 %v10677_v39, %v5695_v32  ;;  %v368_v55 = vadd.f32 %v358_v37, %v295_v15 }
  0xb8   :  { %v5984_v62 = vmax.f32 %v662_v58, 0.0  ;;  %v487_v52 = vadd.f32 %v477_v6, %v5798_v36  ;;  %v403_v3 = vmul.f32 %v5557_v40, %v5648_v10  ;;  %v290_v13 = vadd.f32 %v280_v17, %v5899_v38 }
  0xb9   :  { %v483_v60 = vadd.f32 %v473_v45, %v418_v28  ;;  %v468_v25 = vmul.f32 %v5561_v41, %v5646_v9  ;;  %v283_v22 = vmul.f32 %v10678_v1, %v5679_v26  ;;  %v388_v23 = vadd.f32 %v5800_v21, %v368_v55 }
  0xba   :  { %747 = vrot.lane.b32.xlu1 %v5984_v62, %s5409_s0  ;;  %v657_v20 = vmax.f32 %v382_v4, %v487_v52  ;;  %v413_v39 = vadd.f32 %v403_v3, %v393_v27  ;;  %v356_v63 = vmul.f32 %v5580_v50, %v5725_v30  ;;  %v363_v37 = vadd.f32 %v353_v43, %v290_v13 }
  0xbb   :  { %v493_v40 = vadd.f32 %v483_v60, %v5800_v21  ;;  %v293_v38 = vadd.f32 %v283_v22, %v5881_v56  ;;  %v396_v41 = vmul.f32 %v10678_v1, %v5723_v0  ;;  %v406_v4 = vmul.f32 %v5580_v50, %v5679_v26 }
  0xbc   :  { %v6003_v46 = vmax.f32 %v657_v20, 0.0  ;;  %v478_v49 = vadd.f32 %v468_v25, %v413_v39  ;;  %v471_v58 = vmul.f32 %v5583_v51, %v5725_v30  ;;  %v383_v15 = vadd.f32 %v5798_v36, %v363_v37  ;;  %v10679_v20 = vld [vmem:[#allocation10_spill] sm:$0xff] }
  0xbd   :  { %v663_v6 = vmax.f32 %v388_v23, %v493_v40  ;;  %v366_v45 = vadd.f32 %v356_v63, %v293_v38  ;;  %v278_v28 = vmul.f32 %v10678_v1, %v5648_v10  ;;  %v416_v17 = vadd.f32 %v406_v4, %v396_v41 }
  0xbe   :  { %745 = vrot.lane.b32.xlu0 %v6003_v46, %s5409_s0  ;;  %v488_v56 = vadd.f32 %v478_v49, %v5798_v36  ;;  %v351_v43 = vmul.f32 %v5580_v50, %v5646_v9  ;;  %v391_v27 = vmul.f32 %v10678_v1, %v5695_v32  ;;  %v401_v60 = vmul.f32 %v5580_v50, %v5648_v10 }
  0xbf   :  { %v6019_v52 = vmax.f32 %v663_v6, 0.0  ;;  %v386_v55 = vadd.f32 %v5800_v21, %v366_v45  ;;  %v288_v3 = vadd.f32 %v278_v28, %v5877_v14  ;;  %v481_v25 = vadd.f32 %v471_v58, %v416_v17 }
  0xc0   :  { %v658_v13 = vmax.f32 %v383_v15, %v488_v56  ;;  %v466_v22 = vmul.f32 %v5583_v51, %v5646_v9  ;;  %v287_v23 = vmul.f32 %v10679_v20, %v5679_v26  ;;  %v411_v39 = vadd.f32 %v401_v60, %v391_v27 }
  0xc1   :  { %751 = vrot.lane.b32.xlu1 %v6019_v52, %s5409_s0  ;;  %v361_v1 = vadd.f32 %v351_v43, %v288_v3  ;;  %v360_v63 = vmul.f32 %v5526_v19, %v5725_v30  ;;  %v400_v14 = vmul.f32 %v10679_v20, %v5723_v0  ;;  %v491_v40 = vadd.f32 %v481_v25, %v5800_v21 }
  0xc2   :  { %v668_v50 = vmax.f32 %v658_v13, 0.0  ;;  %v297_v37 = vadd.f32 %v287_v23, %v5928_v53  ;;  %v410_v51 = vmul.f32 %v5526_v19, %v5679_v26  ;;  %v476_v41 = vadd.f32 %v466_v22, %v411_v39  ;;  %v10680_v22 = vld [vmem:[#allocation5_spill] sm:$0xff] }
  0xc3   :  { %v381_v38 = vadd.f32 %v5798_v36, %v361_v1  ;;  %v475_v49 = vmul.f32 %v5531_v24, %v5725_v30  ;;  %v282_v4 = vmul.f32 %v10679_v20, %v5648_v10  ;;  %v661_v58 = vmax.f32 %v386_v55, %v491_v40 }
  0xc4   :  { %749 = vrot.lane.b32.xlu0 %v668_v50, %s5409_s0  ;;  %v370_v6 = vadd.f32 %v360_v63, %v297_v37  ;;  %v420_v15 = vadd.f32 %v410_v51, %v400_v14  ;;  %v355_v53 = vmul.f32 %v5526_v19, %v5646_v9  ;;  %v486_v45 = vadd.f32 %v476_v41, %v5798_v36  ;;  %v10681_v51 = vld [vmem:[#allocation2_spill] sm:$0xff] }
  0xc5   :  { %v292_v28 = vadd.f32 %v282_v4, %v5922_v12  ;;  %v395_v56 = vmul.f32 %v10679_v20, %v5695_v32  ;;  %v405_v17 = vmul.f32 %v5526_v19, %v5648_v10  ;;  %v671_v43 = vmax.f32 %v661_v58, 0.0 }
  0xc6   :  { %v390_v27 = vadd.f32 %v5800_v21, %v370_v6  ;;  %v485_v3 = vadd.f32 %v475_v49, %v420_v15  ;;  %v470_v55 = vmul.f32 %v5531_v24, %v5646_v9  ;;  %v656_v60 = vmax.f32 %v381_v38, %v486_v45 }
  0xc7   :  { %v365_v13 = vadd.f32 %v355_v53, %v292_v28  ;;  %v415_v25 = vadd.f32 %v405_v17, %v395_v56  ;;  %v286_v23 = vmul.f32 %v10680_v22, %v5679_v26  ;;  %743 = vrot.lane.b32.xlu1 %v671_v43, %s5409_s0  ;;  %v359_v19 = vmul.f32 %v5564_v42, %v5725_v30 }
  0xc8   :  { %v495_v12 = vadd.f32 %v485_v3, %v5800_v21  ;;  %v399_v20 = vmul.f32 %v10680_v22, %v5723_v0  ;;  %v409_v1 = vmul.f32 %v5564_v42, %v5679_v26  ;;  %v666_v24 = vmax.f32 %v656_v60, 0.0 }
  0xc9   :  { %v385_v39 = vadd.f32 %v5798_v36, %v365_v13  ;;  %v480_v63 = vadd.f32 %v470_v55, %v415_v25  ;;  %v296_v14 = vadd.f32 %v286_v23, %v5925_v7  ;;  %v474_v38 = vmul.f32 %v10681_v51, %v5725_v30 }
  0xca   :  { %v665_v40 = vmax.f32 %v390_v27, %v495_v12  ;;  %v419_v37 = vadd.f32 %v409_v1, %v399_v20  ;;  %v281_v41 = vmul.f32 %v10680_v22, %v5648_v10  ;;  %741 = vrot.lane.b32.xlu0 %v666_v24, %s5409_s0  ;;  %v354_v26 = vmul.f32 %v5564_v42, %v5646_v9 }
  0xcb   :  { %v490_v0 = vadd.f32 %v480_v63, %v5798_v36  ;;  %v369_v49 = vadd.f32 %v359_v19, %v296_v14  ;;  %v394_v4 = vmul.f32 %v10680_v22, %v5695_v32  ;;  %v404_v30 = vmul.f32 %v5564_v42, %v5648_v10 }
  0xcc   :  { %v675_v7 = vmax.f32 %v665_v40, 0.0  ;;  %v484_v58 = vadd.f32 %v474_v38, %v419_v37  ;;  %v291_v6 = vadd.f32 %v281_v41, %v5919_v35  ;;  %v469_v45 = vmul.f32 %v10681_v51, %v5646_v9 }
  0xcd   :  { %v660_v15 = vmax.f32 %v385_v39, %v490_v0  ;;  %v389_v53 = vadd.f32 %v5800_v21, %v369_v49  ;;  %v6085_v28 = vpack.c.bf16 %v6019_v52, %v668_v50  ;;  %v414_v17 = vadd.f32 %v404_v30, %v394_v4  ;;  %v6156_v4 = vld [vmem:[%s10435_s3] sm:$0xff]  }
  0xce   :  { %759 = vrot.lane.b32.xlu1 %v675_v7, %s5409_s0  ;;  %v494_v32 = vadd.f32 %v484_v58, %v5800_v21  ;;  %v364_v56 = vadd.f32 %v354_v26, %v291_v6  ;;  %v6091_v35 = vpack.c.bf16 %v5854_v2, %v5852_v47  ;;  %v6095_v10 = vpack.c.bf16 %v5829_v29, %v5827_v54 }
  0xcf   :  { %v670_v42 = vmax.f32 %v660_v15, 0.0  ;;  %v6099_v9 = vpack.c.bf16 %v5984_v62, %v6003_v46  ;;  %v479_v27 = vadd.f32 %v469_v45, %v414_v17  ;;  %v6102_v21 = vpack.c.bf16 %v671_v43, %v666_v24  ;;  %v801_v46 = vld [vmem:[%s10436_s4 + $0x8] sm:$0xff] }
  0xd0   :  { %v664_v52 = vmax.f32 %v389_v53, %v494_v32  ;;  %v384_v50 = vadd.f32 %v5798_v36, %v364_v56  ;;  %v6109_v47 = vpack.c.bf16 %v5871_v44, %v5868_v5  ;;  %v6113_v54 = vpack.c.bf16 %v5956_v33, %v5967_v48  ;;  %v800_v44 = vld [vmem:[%s10436_s4] sm:$0xff]  ;;  %v802_v33 = vld [vmem:[%s10436_s4 + $0x10] sm:$0xff] }
  0xd1   :  { %v6104_v3 = vpack.c.bf16 %v675_v7, %v670_v42  ;;  %757 = vrot.lane.b32.xlu0 %v670_v42, %s5409_s0  ;;  %v489_v2 = vadd.f32 %v479_v27, %v5798_v36  ;;  %v803_v36 = vld [vmem:[%s10436_s4 + $0x18] sm:$0xff]  ;;  %v10682_v42 = vmov 0  }
  0xd2   :  { %v674_v29 = vmax.f32 %v664_v52, 0.0 }
  0xd3   :  { %v659_v62 = vmax.f32 %v384_v50, %v489_v2 }
  0xd4   :  { %755 = vrot.lane.b32.xlu1 %v674_v29, %s5409_s0 }
  0xd5   :  { %v669_v43 = vmax.f32 %v659_v62, 0.0 }
  0xd7   :  { %753 = vrot.lane.b32.xlu0 %v669_v43, %s5409_s0  ;;  %v6121_v5 = vpack.c.bf16 %v674_v29, %v669_v43  ;;  %v6178_v29 = vld [vmem:[%s10435_s3 + $0x8] sm:$0xff]  }
  0xd8   :  { %811 = vperm.xlu1 %5344, %v801_v46  }
  0xdb   :  { %806 = vperm.xlu0 %5342, %v800_v44  }
  0xdc   :  { %821 = vperm.xlu1 %5344, %v803_v36   ;;  %v10683_v36 = vld [vmem:[#allocation7_spill] sm:$0xff] }
  0xdf   :  { %816 = vperm.xlu0 %5342, %v802_v33  }
 0x111   :  { %v705_v48 = vpop.permute.xlu0 %704 }
 0x112   :  { %v707_v55 = vpop.permute.xlu1 %706 }
 0x115   :  { %v709_v60 = vpop.permute.xlu0 %708 }
 0x116   :  { %v711_v13 = vpop.permute.xlu1 %710  ;;  %v718_v25 = vsel %vm94_vm1, %v705_v48, %v709_v60 }
 0x117   :  { %v719_v22 = vsel %vm94_vm1, %v707_v55, %v711_v13  ;;  %v729_v23 = vmul.f32 %v718_v25, %v10672_v34 }
 0x118   :  { %v734_v12 = vmul.f32 %v719_v22, %v10672_v34 }
 0x119   :  { %v701_v19 = vpop.permute.xlu0 %700 }
 0x11a   :  { %v703_v20 = vpop.permute.xlu1 %702  ;;  %v739_v1 = vpack.c.bf16 %v734_v12, %v729_v23  ;;  %v720_v24 = vsel %vm94_vm1, %v701_v19, %v705_v48 }
 0x11b   :  { %v721_v39 = vsel %vm94_vm1, %v703_v20, %v707_v55  ;;  %v728_v63 = vmul.f32 %v720_v24, %v10671_v11 }
 0x11c   :  { %894 = vmatprep.subr.bf16.mxu1 %v739_v1  ;;  %v733_v14 = vmul.f32 %v721_v39, %v10671_v11  ;;  %v10684_v1 = vld [vmem:[#allocation9_spill] sm:$0xff] }
 0x11d   :  { %v713_v40 = vpop.permute.xlu0 %712  ;;  %v10685_v39 = vld [vmem:[#allocation13_spill] sm:$0xff] }
 0x11e   :  { %v738_v37 = vpack.c.bf16 %v733_v14, %v728_v63  ;;  %v716_v51 = vsel %vm94_vm1, %v709_v60, %v713_v40 }
 0x11f   :  { %v730_v41 = vmul.f32 %v716_v51, %v10673_v18 }
 0x120   :  { %895 = vmatpush1.bf16.msra.mxu1 %v738_v37 }
 0x121   :  { %896 = vmatprep.subr.bf16.mxu1 %v6121_v5  ;;  %v715_v38 = vpop.permute.xlu1 %714 }
 0x122   :  { %v717_v0 = vsel %vm94_vm1, %v711_v13, %v715_v38 }
 0x123   :  { %v735_v49 = vmul.f32 %v717_v0, %v10673_v18 }
 0x124   :  { %897 = vmatpush1.bf16.msra.mxu1 %v6085_v28 }
 0x125   :  { %898 = vmatprep.subr.bf16.mxu1 %v6091_v35  ;;  %v740_v26 = vpack.c.bf16 %v735_v49, %v730_v41 }
 0x127   :  { %v699_v7 = vpop.permute.xlu1 %698 }
 0x128   :  { %899 = vmatpush1.bf16.msra.mxu1 %v6095_v10  ;;  %v725_v58 = vsel %vm94_vm1, %v715_v38, %v699_v7  ;;  %v723_v6 = vsel %vm94_vm1, %v699_v7, %v703_v20 }
 0x129   :  { %5221 = vmatprep.subr.bf16.mxu1 %v740_v26  ;;  %v697_v30 = vpop.permute.xlu0 %696  ;;  %v732_v15 = vmul.f32 %v723_v6, %v5617_v61  ;;  %v731_v53 = vmul.f32 %v725_v58, %v5660_v16 }
 0x12a   :  { %v724_v45 = vsel %vm94_vm1, %v713_v40, %v697_v30  ;;  %v722_v32 = vsel %vm94_vm1, %v697_v30, %v701_v19 }
 0x12b   :  { %4838 = vmatmul.mubr.msk.bf16.vlgmr.msra.gmra.mrb[0].mxu1 %vm834_vm2, %v6156_v4  ;;  %v727_v56 = vmul.f32 %v722_v32, %v5617_v61  ;;  %v726_v17 = vmul.f32 %v724_v45, %v5660_v16 }
 0x12c   :  { %5222 = vmatpush3.bf16.msra.mxu1 %v740_v26  ;;  %936 = vmatprep.mubr.bf16.mxu1 %v10682_v42  ;;  %v748_v27 = vpop.permute.xlu1 %747 }
 0x12d   :  { %5223 = vmatprep.subr.bf16.mxu1 %v6104_v3  ;;  %v737_v52 = vpack.c.bf16 %v732_v15, %v727_v56  ;;  %v736_v50 = vpack.c.bf16 %v731_v53, %v726_v17 }
 0x12f   :  { %841 = vmatprep.subr.bf16.mxu0 %v737_v52 }
 0x130   :  { %5224 = vmatpush3.bf16.msra.mxu1 %v6104_v3  ;;  %v746_v2 = vpop.permute.xlu0 %745  ;;  %842 = vmatpush1.bf16.msra.mxu0 %v736_v50 }
 0x131   :  { %5225 = vmatprep.subr.bf16.mxu1 %v5938_v31  ;;  %843 = vmatprep.subr.bf16.mxu0 %v6099_v9 }
 0x133   :  { %4839 = vmatmul.mubr.msk.bf16.gmra.mrb[4].mxu1 %vm834_vm2, %v6178_v29  ;;  %v752_v62 = vpop.permute.xlu1 %751 }
 0x134   :  { %5226 = vmatpush3.bf16.msra.mxu1 %v5938_v31  ;;  %5227 = vmatprep.mubr.msk.bf16.mxu1 %vm834_vm2, %v6156_v4  ;;  %v766_v43 = vsel %vm167_vm0, %v748_v27, %v752_v62 }
 0x135   :  { %844 = vmatpush1.bf16.msra.mxu0 %v6102_v21  ;;  %996 = vmatprep.subr.bf16.mxu1 %v6099_v9  ;;  %v777_v33 = vmul.f32 %v766_v43, %v10683_v36 }
 0x136   :  { %845 = vmatprep.subr.bf16.mxu0 %v6109_v47  ;;  %v750_v46 = vpop.permute.xlu0 %749 }
 0x137   :  { %v765_v44 = vsel %vm167_vm0, %v746_v2, %v750_v46 }
 0x138   :  { %v772_v48 = vmul.f32 %v765_v44, %v10683_v36 }
 0x139   :  { %846 = vmatpush1.bf16.msra.mxu0 %v6113_v54  ;;  %v744_v55 = vpop.permute.xlu1 %743 }
 0x13a   :  { %1049 = vmatprep.subr.bf16.mxu0 %v6121_v5  ;;  %v768_v9 = vsel %vm167_vm0, %v744_v55, %v748_v27  ;;  %v782_v25 = vpack.c.bf16 %v777_v33, %v772_v48 }
 0x13b   :  { %5228 = vmatmul.mubr.msk.bf16.vlgmr.msra.gmra.mrb[8].mxu1 %vm834_vm2, %v6178_v29  ;;  %v776_v5 = vmul.f32 %v768_v9, %v5651_v8 }
 0x13c   :  { %4836 = vmatmul.mubr.msk.bf16.vlgmr.msra.gmra.mrb[0].mxu0 %vm834_vm2, %v6156_v4  ;;  %997 = vmatpush1.bf16.msra.mxu1 %v6102_v21  ;;  %v742_v60 = vpop.permute.xlu0 %741 }
 0x13d   :  { %1050 = vmatpush1.bf16.msra.mxu0 %v6085_v28  ;;  %883 = vmatprep.mubr.bf16.mxu0 %v10682_v42  ;;  %v767_v13 = vsel %vm167_vm0, %v742_v60, %v746_v2 }
 0x13e   :  { %1051 = vmatprep.subr.bf16.mxu0 %v6091_v35  ;;  %998 = vmatprep.subr.bf16.mxu1 %v6109_v47  ;;  %v771_v22 = vmul.f32 %v767_v13, %v5651_v8 }
 0x13f   :  { %1028 = vmatprep.mubr.bf16.mxu1 %v10682_v42 }
 0x140   :  { %999 = vmatpush1.bf16.msra.mxu1 %v6113_v54  ;;  %v760_v28 = vpop.permute.xlu1 %759  ;;  %v781_v21 = vpack.c.bf16 %v776_v5, %v771_v22 }
 0x141   :  { %1052 = vmatpush1.bf16.msra.mxu0 %v6095_v10  ;;  %1000 = vmatprep.subr.bf16.mxu1 %v782_v25  ;;  %v770_v35 = vsel %vm167_vm0, %v760_v28, %v744_v55 }
 0x142   :  { %v780_v54 = vmul.f32 %v770_v35, %v5611_v59 }
 0x143   :  { %v758_v23 = vpop.permute.xlu0 %757 }
 0x144   :  { %4837 = vmatmul.mubr.msk.bf16.gmra.mrb[4].mxu0 %vm834_vm2, %v6178_v29  ;;  %1001 = vmatpush1.bf16.msra.mxu1 %v781_v21  ;;  %v769_v47 = vsel %vm167_vm0, %v758_v23, %v742_v60 }
 0x145   :  { %1081 = vmatprep.mubr.bf16.mxu0 %v10682_v42  ;;  %5231 = vmatprep.subr.bf16.mxu1 %v6104_v3  ;;  %v775_v10 = vmul.f32 %v769_v47, %v5611_v59 }
 0x146   :  { %v756_v12 = vpop.permute.xlu1 %755 }
 0x147   :  { %4842 = vmatmul.mubr.msk.bf16.vlgmr.msra.gmra.mrb[12].mxu1 %vm834_vm2, %v6156_v4  ;;  %v762_v19 = vsel %vm167_vm0, %v756_v12, %v760_v28  ;;  %v764_v20 = vsel %vm167_vm0, %v752_v62, %v756_v12  ;;  %v785_v40 = vpack.c.bf16 %v780_v54, %v775_v10 }
 0x148   :  { %5232 = vmatpush3.bf16.msra.mxu1 %v6104_v3  ;;  %1038 = vmatprep.mubr.bf16.mxu1 %v10682_v42  ;;  %v778_v24 = vmul.f32 %v764_v20, %v10684_v1  ;;  %v779_v63 = vmul.f32 %v762_v19, %v10685_v39 }
 0x149   :  { %5233 = vmatprep.subr.bf16.mxu1 %v5938_v31  ;;  %v754_v14 = vpop.permute.xlu0 %753 }
 0x14a   :  { %v761_v37 = vsel %vm167_vm0, %v754_v14, %v758_v23  ;;  %v763_v51 = vsel %vm167_vm0, %v750_v46, %v754_v14 }
 0x14b   :  { %v773_v3 = vmul.f32 %v763_v51, %v10684_v1  ;;  %v774_v38 = vmul.f32 %v761_v37, %v10685_v39 }
 0x14c   :  { %5234 = vmatpush3.bf16.msra.mxu1 %v5938_v31 }
 0x14d   :  { %5235 = vmatprep.subr.bf16.mxu1 %v785_v40  ;;  %v783_v41 = vpack.c.bf16 %v778_v24, %v773_v3  ;;  %v784_v0 = vpack.c.bf16 %v779_v63, %v774_v38 }
 0x14f   :  { %4843 = vmatmul.mubr.msk.bf16.gmra.mrb[16].mxu1 %vm834_vm2, %v6178_v29  ;;  %1053 = vmatprep.subr.bf16.mxu0 %v784_v0 }
 0x150   :  { %5236 = vmatpush3.bf16.msra.mxu1 %v785_v40  ;;  %5237 = vmatprep.mubr.msk.bf16.mxu1 %vm834_vm2, %v6156_v4 }
 0x151   :  { %1054 = vmatpush1.bf16.msra.mxu0 %v783_v41 }
 0x154   :  { %4844 = vmatmul.mubr.msk.bf16.vlgmr.msra.gmra.mrb[8].mxu0 %vm834_vm2, %v6156_v4 }
 0x155   :  { %1091 = vmatprep.mubr.bf16.mxu0 %v10682_v42 }
 0x157   :  { %5238 = vmatmul.mubr.msk.bf16.vlgmr.msra.gmra.mrb[20].mxu1 %vm834_vm2, %v6178_v29 }
 0x158   :  { %1521 = vmatprep.mubr.bf16.mxu1 %v10682_v42 }
 0x15a   :  { %v6274_v15 = vpop.permute.xlu0 %806 }
 0x15c   :  { %4845 = vmatmul.mubr.msk.bf16.gmra.mrb[12].mxu0 %vm834_vm2, %v6178_v29  ;;  %v6291_v29 = vpop.permute.xlu1 %811 }
 0x15d   :  { %1468 = vmatprep.mubr.bf16.mxu0 %v10682_v42 }
 0x15e   :  { %v6327_v19 = vpop.permute.xlu0 %816 }
 0x160   :  { %v6334_v40 = vpop.permute.xlu1 %821 }
 0x1fe   :  { %v6258_v31 = vpop.f32.mrb[0].mxu1 }
 0x1ff   :  { %v6260_v49 = vpop.f32.mrb[1].mxu1 }
 0x200   :  { %v6262_v26 = vpop.f32.mrb[2].mxu1 }
 0x201   :  { %v6264_v7 = vpop.f32.mrb[3].mxu1 }
 0x206   :  { %v6266_v4 = vpop.f32.mrb[4].mxu1 }
 0x207   :  { %v6268_v58 = vpop.f32.mrb[5].mxu1 }
 0x208   :  { %v6270_v6 = vpop.f32.mrb[6].mxu1 }
 0x209   :  { %v6272_v30 = vpop.f32.mrb[7].mxu1 }
 0x20e   :  { %v6276_v53 = vpop.f32.mrb[8].mxu1 }
 0x20f   :  { %v6278_v45 = vpop.f32.mrb[0].mxu0  ;;  %v6280_v32 = vpop.f32.mrb[9].mxu1 }
 0x210   :  { %v877_v56 = vpop.f32.mrb[1].mxu0  ;;  %v6282_v17 = vpop.f32.mrb[10].mxu1 }
 0x211   :  { %v6285_v52 = vadd.f32 %v877_v56, %v6274_v15  ;;  %v6287_v50 = vpop.f32.mrb[2].mxu0  ;;  %v6289_v27 = vpop.f32.mrb[11].mxu1 }
 0x212   :  { %v881_v2 = vpop.f32.mrb[3].mxu0 }
 0x213   :  { %v6294_v62 = vadd.f32 %v881_v2, %v6291_v29  ;;  %v10465_v46 = vmax.f32 %v6285_v52, 0.0 }
 0x215   :  { %v10464_v43 = vmax.f32 %v6294_v62, 0.0 }
 0x217   :  { %v6302_v44 = vpack.c.bf16 %v10464_v43, %v10465_v46  ;;  %v6304_v33 = vpop.f32.mrb[4].mxu0 }
 0x218   :  { %v6306_v48 = vpop.f32.mrb[5].mxu0 }
 0x219   :  { %v6308_v55 = vpop.f32.mrb[6].mxu0 }
 0x21a   :  { %v6310_v9 = vpop.f32.mrb[7].mxu0  ;;  %v1030_v5 = vpop.f32.mrb[12].mxu1 }
 0x21b   :  { %v1031_v60 = vadd.f32 %v1030_v5, %v6274_v15  ;;  %v1032_v13 = vpop.f32.mrb[13].mxu1 }
 0x21c   :  { %v6314_v25 = vadd.f32 %v1032_v13, %v6274_v15  ;;  %v1034_v22 = vpop.f32.mrb[14].mxu1 }
 0x21d   :  { %v6317_v28 = vadd.f32 %v1034_v22, %v6291_v29  ;;  %v1036_v21 = vpop.f32.mrb[15].mxu1  ;;  %v1171_v23 = vmax.f32 %v1031_v60, 0.0 }
 0x21e   :  { %v6320_v35 = vadd.f32 %v1036_v21, %v6291_v29  ;;  %v1172_v54 = vmax.f32 %v6314_v25, 0.0 }
 0x21f   :  { %v1176_v47 = vmax.f32 %v6317_v28, 0.0 }
 0x220   :  { %v10466_v10 = vmax.f32 %v6320_v35, 0.0 }
 0x221   :  { %v6325_v12 = vpack.c.bf16 %v1176_v47, %v1171_v23 }
 0x222   :  { %v6331_v20 = vpack.c.bf16 %v10466_v10, %v1172_v54  ;;  %v1040_v24 = vpop.f32.mrb[16].mxu1 }
 0x223   :  { %v1041_v63 = vadd.f32 %v1040_v24, %v6327_v19  ;;  %v1042_v14 = vpop.f32.mrb[17].mxu1 }
 0x224   :  { %v1043_v37 = vadd.f32 %v1042_v14, %v6327_v19  ;;  %v1044_v51 = vpop.f32.mrb[18].mxu1 }
 0x225   :  { %v1045_v3 = vadd.f32 %v1044_v51, %v6334_v40  ;;  %v1046_v38 = vpop.f32.mrb[19].mxu1  ;;  %v1181_v0 = vmax.f32 %v1041_v63, 0.0 }
 0x226   :  { %v1047_v41 = vadd.f32 %v1046_v38, %v6334_v40  ;;  %v1182_v5 = vmax.f32 %v1043_v37, 0.0 }
 0x227   :  { %v1186_v56 = vmax.f32 %v1045_v3, 0.0  ;;  %v1083_v2 = vpop.f32.mrb[8].mxu0 }
 0x228   :  { %v1187_v60 = vmax.f32 %v1047_v41, 0.0  ;;  %v1084_v13 = vadd.f32 %v1083_v2, %v6274_v15  ;;  %v1085_v25 = vpop.f32.mrb[9].mxu0 }
 0x229   :  { %v6340_v22 = vpack.c.bf16 %v1186_v56, %v1181_v0  ;;  %v1086_v28 = vadd.f32 %v1085_v25, %v6274_v15  ;;  %v1087_v21 = vpop.f32.mrb[10].mxu0 }
 0x22a   :  { %v6343_v24 = vpack.c.bf16 %v1187_v60, %v1182_v5  ;;  %v5239_v14 = vpop.f32.mrb[20].mxu1  ;;  %v1173_v51 = vmax.f32 %v1084_v13, 0.0  ;;  %v1088_v43 = vadd.f32 %v1087_v21, %v6291_v29  ;;  %v1089_v38 = vpop.f32.mrb[11].mxu0 }
 0x22b   :  { %v1145_v63 = vadd.f32 %v5239_v14, %v6327_v19  ;;  %v1136_v3 = vpop.f32.mrb[21].mxu1  ;;  %v1090_v37 = vadd.f32 %v1089_v38, %v6291_v29  ;;  %v1174_v59 = vmax.f32 %v1086_v28, 0.0 }
 0x22c   :  { %v1137_v41 = vadd.f32 %v1136_v3, %v6274_v15  ;;  %v5240_v2 = vpop.f32.mrb[22].mxu1  ;;  %v1178_v46 = vmax.f32 %v1088_v43, 0.0  ;;  %1207 = vrot.lane.b32.xlu0 %v1173_v51, %s5410_s16 }
 0x22d   :  { %v1148_v25 = vadd.f32 %v5240_v2, %v6334_v40  ;;  %v1139_v10 = vpop.f32.mrb[23].mxu1  ;;  %v1179_v1 = vmax.f32 %v1090_v37, 0.0  ;;  %v1185_v14 = vmax.f32 %v1145_v63, 0.0 }
 0x22e   :  { %v1140_v13 = vadd.f32 %v1139_v10, %v6291_v29  ;;  %v6352_v21 = vpack.c.bf16 %v1178_v46, %v1173_v51  ;;  %1209 = vrot.lane.b32.xlu1 %v1178_v46, %s5410_s16  ;;  %v1175_v8 = vmax.f32 %v1137_v41, 0.0 }
 0x22f   :  { %v1190_v39 = vmax.f32 %v1148_v25, 0.0  ;;  %v6355_v38 = vpack.c.bf16 %v1179_v1, %v1174_v59  ;;  %v1093_v3 = vpop.f32.mrb[12].mxu0 }
 0x230   :  { %v1180_v43 = vmax.f32 %v1140_v13, 0.0  ;;  %v1094_v36 = vadd.f32 %v1093_v3, %v6327_v19  ;;  %v1095_v42 = vpop.f32.mrb[13].mxu0  ;;  %1191 = vrot.lane.b32.xlu0 %v1171_v23, %s5410_s16 }
 0x231   :  { %v6359_v28 = vpack.c.bf16 %v1190_v39, %v1185_v14  ;;  %v1096_v10 = vadd.f32 %v1095_v42, %v6327_v19  ;;  %v1097_v51 = vpop.f32.mrb[14].mxu0  ;;  %v10687_v42 = vmax.f32 %v6320_v35, 0.0 }
 0x232   :  { %v6362_v37 = vpack.c.bf16 %v1180_v43, %v1175_v8  ;;  %v1098_v46 = vadd.f32 %v1097_v51, %v6334_v40  ;;  %v1099_v63 = vpop.f32.mrb[15].mxu0  ;;  %1193 = vrot.lane.b32.xlu1 %v1176_v47, %s5410_s16  ;;  %v1183_v2 = vmax.f32 %v1094_v36, 0.0  ;;  %v6390_v36 = vadd.f32 %v6258_v31, %v6274_v15 }
 0x233   :  { %10686 = vst [vmem:[#allocation16_spill] sm:$0xff] %v6359_v28  ;;  %v1100_v41 = vadd.f32 %v1099_v63, %v6334_v40  ;;  %v1184_v13 = vmax.f32 %v1096_v10, 0.0  ;;  %v10689_v31 = vmax.f32 %v6294_v62, 0.0  ;;  %v6434_v47 = vadd.f32 %v6266_v4, %v6327_v19  ;;  %v1398_v63 = vld [vmem:[%s10438_s6 + $0x18] sm:$0xff] }
 0x234   :  { %v1188_v25 = vmax.f32 %v1098_v46, 0.0  ;;  %1199 = vrot.lane.b32.xlu0 %v1172_v54, %s5410_s16  ;;  %v6442_v54 = vadd.f32 %v6270_v6, %v6334_v40  ;;  %v6451_v4 = vadd.f32 %v6304_v33, %v6327_v19  ;;  %v6459_v6 = vadd.f32 %v6308_v55, %v6334_v40 }
 0x235   :  { %v1189_v23 = vmax.f32 %v1100_v41, 0.0  ;;  %v6498_v10 = vadd.f32 %v6268_v58, %v6327_v19  ;;  %v6515_v58 = vadd.f32 %v6276_v53, %v6327_v19 }
 0x236   :  { %v6368_v3 = vpack.c.bf16 %v1188_v25, %v1183_v2  ;;  %1201 = vrot.lane.b32.xlu1 %v10687_v42, %s5410_s16  ;;  %v10489_v33 = vmax.f32 %v6451_v4, 0.0  ;;  %v10488_v55 = vmax.f32 %v6459_v6, 0.0 }
 0x237   :  { %v6373_v28 = vpack.c.bf16 %v1189_v23, %v1184_v13  ;;  %v10477_v46 = vmax.f32 %v6515_v58, 0.0 }
 0x238   :  { %1195 = vrot.lane.b32.xlu0 %v1181_v0, %s5410_s16  ;;  %v10481_v0 = vmax.f32 %v6434_v47, 0.0 }
 0x23a   :  { %1197 = vrot.lane.b32.xlu1 %v1186_v56, %s5410_s16  ;;  %v10480_v56 = vmax.f32 %v6442_v54, 0.0 }
 0x23c   :  { %1203 = vrot.lane.b32.xlu0 %v1182_v5, %s5410_s16  ;;  %v6466_v5 = vadd.f32 %v6260_v49, %v6274_v15  ;;  %v6483_v49 = vadd.f32 %v6280_v32, %v6274_v15  ;;  %v6506_v32 = vadd.f32 %v6272_v30, %v6334_v40  ;;  %v6523_v30 = vadd.f32 %v6282_v17, %v6334_v40  ;;  %v1395_v17 = vld [vmem:[%s10438_s6] sm:$0xff] }
 0x23e   :  { %1205 = vrot.lane.b32.xlu1 %v1187_v60, %s5410_s16  ;;  %v6474_v60 = vadd.f32 %v6264_v7, %v6291_v29  ;;  %v6491_v7 = vadd.f32 %v6289_v27, %v6291_v29  ;;  %v10482_v51 = vmax.f32 %v6506_v32, 0.0  ;;  %v10476_v53 = vmax.f32 %v6523_v30, 0.0 }
 0x240   :  { %1227 = vrot.lane.b32.xlu0 %v1185_v14, %s5410_s16  ;;  %v10487_v14 = vmax.f32 %v6466_v5, 0.0  ;;  %v10478_v27 = vmax.f32 %v6491_v7, 0.0 }
 0x242   :  { %1229 = vrot.lane.b32.xlu1 %v1190_v39, %s5410_s16  ;;  %v6403_v39 = vadd.f32 %v6278_v45, %v6274_v15  ;;  %v6419_v45 = vadd.f32 %v6306_v48, %v6327_v19  ;;  %v10479_v15 = vmax.f32 %v6483_v49, 0.0  ;;  %v1396_v19 = vld [vmem:[%s10438_s6 + $0x8] sm:$0xff] }
 0x244   :  { %1223 = vrot.lane.b32.xlu0 %v1175_v8, %s5410_s16  ;;  %v6395_v8 = vadd.f32 %v6262_v26, %v6291_v29  ;;  %v6411_v26 = vadd.f32 %v6287_v50, %v6291_v29  ;;  %v6427_v50 = vadd.f32 %v6310_v9, %v6334_v40  ;;  %v10491_v48 = vmax.f32 %v6419_v45, 0.0  ;;  %v1397_v40 = vld [vmem:[%s10438_s6 + $0x10] sm:$0xff] }
 0x245   :  { %v10483_v29 = vmax.f32 %v6498_v10, 0.0 }
 0x246   :  { %1225 = vrot.lane.b32.xlu1 %v1180_v43, %s5410_s16  ;;  %v10484_v35 = vmax.f32 %v6395_v8, 0.0  ;;  %v10492_v62 = vmax.f32 %v6411_v26, 0.0  ;;  %v10490_v9 = vmax.f32 %v6427_v50, 0.0  ;;  %v10486_v43 = vmax.f32 %v6474_v60, 0.0 }
 0x248   :  { %1215 = vrot.lane.b32.xlu0 %v1174_v59, %s5410_s16  ;;  %v10688_v59 = vmax.f32 %v6285_v52, 0.0  ;;  %v1151_v52 = vmax.f32 %v6403_v39, 0.0 }
 0x24a   :  { %1217 = vrot.lane.b32.xlu1 %v1179_v1, %s5410_s16  ;;  %v10485_v1 = vmax.f32 %v6390_v36, 0.0 }
 0x24c   :  { %1211 = vrot.lane.b32.xlu0 %v1183_v2, %s5410_s16 }
 0x24e   :  { %1213 = vrot.lane.b32.xlu1 %v1188_v25, %s5410_s16 }
 0x250   :  { %1219 = vrot.lane.b32.xlu0 %v1184_v13, %s5410_s16 }
 0x252   :  { %1221 = vrot.lane.b32.xlu1 %v1189_v23, %s5410_s16 }
 0x254   :  { %1289 = vrot.lane.b32.xlu0 %v10688_v59, %s5409_s0 }
 0x256   :  { %1291 = vrot.lane.b32.xlu1 %v10689_v31, %s5409_s0 }
 0x258   :  { %1297 = vrot.lane.b32.xlu0 %v10485_v1, %s5409_s0 }
 0x25a   :  { %1299 = vrot.lane.b32.xlu1 %v10484_v35, %s5409_s0 }
 0x25c   :  { %1281 = vrot.lane.b32.xlu0 %v1151_v52, %s5409_s0 }
 0x25e   :  { %1283 = vrot.lane.b32.xlu1 %v10492_v62, %s5409_s0 }
 0x260   :  { %1293 = vrot.lane.b32.xlu0 %v10491_v48, %s5409_s0 }
 0x262   :  { %1295 = vrot.lane.b32.xlu1 %v10490_v9, %s5409_s0 }
 0x264   :  { %1301 = vrot.lane.b32.xlu0 %v10481_v0, %s5409_s0 }
 0x266   :  { %1303 = vrot.lane.b32.xlu1 %v10480_v56, %s5409_s0 }
 0x268   :  { %1285 = vrot.lane.b32.xlu0 %v10489_v33, %s5409_s0 }
 0x26a   :  { %1287 = vrot.lane.b32.xlu1 %v10488_v55, %s5409_s0 }
 0x26c   :  { %1305 = vrot.lane.b32.xlu0 %v10487_v14, %s5409_s0 }
 0x26e   :  { %1307 = vrot.lane.b32.xlu1 %v10486_v43, %s5409_s0 }
 0x270   :  { %1313 = vrot.lane.b32.xlu0 %v10479_v15, %s5409_s0 }
 0x272   :  { %1315 = vrot.lane.b32.xlu1 %v10478_v27, %s5409_s0 }
 0x274   :  { %1309 = vrot.lane.b32.xlu0 %v10483_v29, %s5409_s0 }
 0x276   :  { %1311 = vrot.lane.b32.xlu1 %v10482_v51, %s5409_s0 }
 0x278   :  { %1317 = vrot.lane.b32.xlu0 %v10477_v46, %s5409_s0 }
 0x27a   :  { %1319 = vrot.lane.b32.xlu1 %v10476_v53, %s5409_s0 }
 0x27c   :  { %1401 = vperm.xlu0 %5342, %v1395_v17  }
 0x27e   :  { %1406 = vperm.xlu1 %5344, %v1396_v19  }
 0x280   :  { %1411 = vperm.xlu0 %5342, %v1397_v40  }
 0x282   :  { %1416 = vperm.xlu1 %5344, %v1398_v63  }
 0x29e   :  { %v1208_v41 = vpop.permute.xlu0 %1207 }
 0x2a0   :  { %v1210_v2 = vpop.permute.xlu1 %1209 }
 0x2a2   :  { %v1192_v25 = vpop.permute.xlu0 %1191 }
 0x2a4   :  { %v1194_v13 = vpop.permute.xlu1 %1193 }
 0x2a6   :  { %v1200_v23 = vpop.permute.xlu0 %1199 }
 0x2a7   :  { %v1243_v42 = vsel %vm94_vm1, %v1192_v25, %v1200_v23 }
 0x2a8   :  { %v1202_v59 = vpop.permute.xlu1 %1201  ;;  %v1252_v17 = vmul.f32 %v1243_v42, %v5617_v61 }
 0x2a9   :  { %v1244_v31 = vsel %vm94_vm1, %v1194_v13, %v1202_v59  ;;  %v1240_v35 = vsel %vm94_vm1, %v1202_v59, %v1210_v2 }
 0x2aa   :  { %v1257_v19 = vmul.f32 %v1244_v31, %v5617_v61  ;;  %v1196_v53 = vpop.permute.xlu0 %1195 }
 0x2ac   :  { %v1198_v46 = vpop.permute.xlu1 %1197  ;;  %v1272_v40 = vpack.c.bf16 %v1257_v19, %v1252_v17 }
 0x2ae   :  { %1436 = vmatprep.subr.bf16.mxu0 %v1272_v40  ;;  %v1204_v63 = vpop.permute.xlu0 %1203 }
 0x2af   :  { %v1245_v31 = vsel %vm94_vm1, %v1196_v53, %v1204_v63 }
 0x2b0   :  { %v1206_v27 = vpop.permute.xlu1 %1205  ;;  %v1262_v14 = vmul.f32 %v1245_v31, %v5617_v61 }
 0x2b1   :  { %v1246_v0 = vsel %vm94_vm1, %v1198_v46, %v1206_v27 }
 0x2b2   :  { %v6557_v15 = vpop.permute.xlu0 %1227  ;;  %v1267_v19 = vmul.f32 %v1246_v0, %v5617_v61 }
 0x2b3   :  { %v1249_v0 = vsel %vm94_vm1, %v6557_v15, %v1196_v53 }
 0x2b4   :  { %v6559_v56 = vpop.permute.xlu1 %1229  ;;  %v1277_v31 = vpack.c.bf16 %v1267_v19, %v1262_v14  ;;  %v1261_v9 = vmul.f32 %v1249_v0, %v5660_v16  ;;  %v10690_v19 = vmax.f32 %v6411_v26, 0.0  ;;  %v10692_v0 = vmax.f32 %v6427_v50, 0.0 }
 0x2b5   :  { %v1250_v40 = vsel %vm94_vm1, %v6559_v56, %v1198_v46  ;;  %v10694_v50 = vmax.f32 %v6459_v6, 0.0 }
 0x2b6   :  { %v6563_v51 = vpop.permute.xlu0 %1223  ;;  %v1266_v55 = vmul.f32 %v1250_v40, %v5660_v16 }
 0x2b7   :  { %v1247_v42 = vsel %vm94_vm1, %v6563_v51, %v1192_v25 }
 0x2b8   :  { %v1226_v17 = vpop.permute.xlu1 %1225  ;;  %v1251_v1 = vmul.f32 %v1247_v42, %v5660_v16  ;;  %v1258_v42 = vmul.f32 %v1240_v35, %v10671_v11 }
 0x2b9   :  { %v1248_v29 = vsel %vm94_vm1, %v1226_v17, %v1194_v13  ;;  %v1239_v13 = vsel %vm94_vm1, %v1200_v23, %v1208_v41  ;;  %v1276_v23 = vpack.c.bf16 %v1266_v55, %v1261_v9  ;;  %v6605_v9 = vpack.c.bf16 %v10690_v19, %v1151_v52 }
 0x2ba   :  { %v1256_v25 = vmul.f32 %v1248_v29, %v5660_v16  ;;  %v1216_v43 = vpop.permute.xlu0 %1215 }
 0x2bb   :  { %v1235_v46 = vsel %vm94_vm1, %v1208_v41, %v1216_v43  ;;  %v1253_v41 = vmul.f32 %v1239_v13, %v10671_v11 }
 0x2bc   :  { %v1271_v59 = vpack.c.bf16 %v1256_v25, %v1251_v1  ;;  %v1218_v33 = vpop.permute.xlu1 %1217  ;;  %v1254_v53 = vmul.f32 %v1235_v46, %v10672_v34 }
 0x2bd   :  { %v1236_v29 = vsel %vm94_vm1, %v1210_v2, %v1218_v33  ;;  %v1273_v25 = vpack.c.bf16 %v1258_v42, %v1253_v41  ;;  %v10696_v41 = vmax.f32 %v6474_v60, 0.0 }
 0x2be   :  { %v1259_v48 = vmul.f32 %v1236_v29, %v10672_v34  ;;  %1437 = vmatpush1.bf16.msra.mxu0 %v1271_v59  ;;  %v1212_v62 = vpop.permute.xlu0 %1211 }
 0x2bf   :  { %1438 = vmatprep.subr.bf16.mxu0 %v1277_v31 }
 0x2c0   :  { %v1214_v1 = vpop.permute.xlu1 %1213  ;;  %v1274_v40 = vpack.c.bf16 %v1259_v48, %v1254_v53  ;;  %v1241_v48 = vsel %vm94_vm1, %v1204_v63, %v1212_v62  ;;  %v10695_v53 = vmax.f32 %v6466_v5, 0.0  ;;  %v10697_v5 = vmax.f32 %v6390_v36, 0.0 }
 0x2c1   :  { %v1242_v35 = vsel %vm94_vm1, %v1206_v27, %v1214_v1  ;;  %v10691_v27 = vmax.f32 %v6419_v45, 0.0  ;;  %v10693_v45 = vmax.f32 %v6451_v4, 0.0  ;;  %v1231_v4 = vsel %vm94_vm1, %v1216_v43, %v6563_v51 }
 0x2c2   :  { %1439 = vmatpush1.bf16.msra.mxu0 %v1276_v23  ;;  %1489 = vmatprep.subr.bf16.mxu1 %v1274_v40  ;;  %v1220_v14 = vpop.permute.xlu0 %1219  ;;  %v1268_v13 = vmul.f32 %v1242_v35, %v10671_v11  ;;  %v6637_v23 = vpack.c.bf16 %v10696_v41, %v10695_v53  ;;  %v10700_v35 = vmax.f32 %v6506_v32, 0.0  ;;  %v1255_v36 = vmul.f32 %v1231_v4, %v10673_v18 }
 0x2c3   :  { %v1237_v2 = vsel %vm94_vm1, %v1212_v62, %v1220_v14  ;;  %1440 = vmatprep.subr.bf16.mxu0 %v6302_v44  ;;  %1490 = vmatpush1.bf16.msra.mxu1 %v1273_v25  ;;  %v6613_v46 = vpack.c.bf16 %v10692_v0, %v10691_v27  ;;  %v1263_v62 = vmul.f32 %v1241_v48, %v10671_v11  ;;  %v10699_v25 = vmax.f32 %v6498_v10, 0.0  ;;  %v6689_v27 = vld [vmem:[%s10437_s5] sm:$0xff]  }
 0x2c4   :  { %v1222_v55 = vpop.permute.xlu1 %1221  ;;  %v1264_v39 = vmul.f32 %v1237_v2, %v10672_v34  ;;  %v6629_v63 = vpack.c.bf16 %v10694_v50, %v10693_v45  ;;  %v10702_v32 = vmax.f32 %v6442_v54, 0.0  ;;  %v6715_v45 = vld [vmem:[%s10437_s5 + $0x8] sm:$0xff]  }
 0x2c5   :  { %v1238_v59 = vsel %vm94_vm1, %v1214_v1, %v1222_v55  ;;  %v1278_v31 = vpack.c.bf16 %v1268_v13, %v1263_v62  ;;  %v1232_v1 = vsel %vm94_vm1, %v1218_v33, %v1226_v17  ;;  %v10698_v33 = vmax.f32 %v6395_v8, 0.0 }
 0x2c6   :  { %v1269_v26 = vmul.f32 %v1238_v59, %v10672_v34  ;;  %v6620_v52 = vpop.permute.xlu0 %1289  ;;  %1441 = vmatpush1.bf16.msra.mxu0 %v6605_v9  ;;  %v1260_v17 = vmul.f32 %v1232_v1, %v10673_v18  ;;  %v6662_v2 = vpack.c.bf16 %v10700_v35, %v10699_v25  ;;  %v1234_v43 = vsel %vm94_vm1, %v1222_v55, %v6559_v56  ;;  %v10709_v1 = vld [vmem:[#allocation16_spill] sm:$0xff] }
 0x2c7   :  { %1442 = vmatprep.subr.bf16.mxu0 %v6613_v46  ;;  %v6655_v60 = vpack.c.bf16 %v10698_v33, %v10697_v5  ;;  %v1233_v8 = vsel %vm94_vm1, %v1220_v14, %v6557_v15  ;;  %v10701_v56 = vmax.f32 %v6434_v47, 0.0  ;;  %v1270_v48 = vmul.f32 %v1234_v43, %v10673_v18  ;;  %v10710_v5 = vld [vmem:[#allocation14_spill] sm:$0xff] }
 0x2c8   :  { %v6631_v42 = vpop.permute.xlu1 %1291  ;;  %v1279_v29 = vpack.c.bf16 %v1269_v26, %v1264_v39  ;;  %v1275_v55 = vpack.c.bf16 %v1260_v17, %v1255_v36  ;;  %v1265_v15 = vmul.f32 %v1233_v8, %v10673_v18  ;;  %v10703_v14 = vmov 0  }
 0x2c9   :  { %v6683_v19 = vpack.c.bf16 %v10702_v32, %v10701_v56  ;;  %v10704_v39 = vmax.f32 %v6483_v49, 0.0  ;;  %v10705_v26 = vmax.f32 %v6491_v7, 0.0  ;;  %v10706_v49 = vmax.f32 %v6515_v58, 0.0 }
 0x2ca   :  { %1491 = vmatprep.subr.bf16.mxu1 %v1279_v29  ;;  %v6641_v40 = vpop.permute.xlu0 %1297  ;;  %1443 = vmatpush1.bf16.msra.mxu0 %v6629_v63  ;;  %v1280_v54 = vpack.c.bf16 %v1270_v48, %v1265_v15  ;;  %v10707_v7 = vmax.f32 %v6523_v30, 0.0 }
 0x2cb   :  { %1444 = vmatprep.subr.bf16.mxu0 %v6331_v20  ;;  %1492 = vmatpush1.bf16.msra.mxu1 %v1278_v31  ;;  %v6710_v62 = vpack.c.bf16 %v10705_v26, %v10704_v39 }
 0x2cc   :  { %1493 = vmatprep.subr.bf16.mxu1 %v6637_v23  ;;  %v6649_v6 = vpop.permute.xlu1 %1299  ;;  %v6726_v29 = vpack.c.bf16 %v10707_v7, %v10706_v49 }
 0x2cd   :  { %v1330_v58 = vsel %vm167_vm0, %v6631_v42, %v6649_v6 }
 0x2ce   :  { %v6667_v51 = vpop.permute.xlu0 %1281  ;;  %1445 = vmatpush1.bf16.msra.mxu0 %v6325_v12 }
 0x2cf   :  { %1446 = vmatprep.subr.bf16.mxu0 %v6343_v24  ;;  %1494 = vmatpush1.bf16.msra.mxu1 %v6655_v60 }
 0x2d0   :  { %1495 = vmatprep.subr.bf16.mxu1 %v6662_v2  ;;  %v6677_v10 = vpop.permute.xlu1 %1283 }
 0x2d1   :  { %v1334_v41 = vsel %vm167_vm0, %v6677_v10, %v6631_v42  ;;  %v1333_v42 = vsel %vm167_vm0, %v6667_v51, %v6620_v52 }
 0x2d2   :  { %v6691_v0 = vpop.permute.xlu0 %1293  ;;  %1447 = vmatpush1.bf16.msra.mxu0 %v6340_v22  ;;  %v1346_v33 = vmul.f32 %v1334_v41, %v10710_v5 }
 0x2d3   :  { %1496 = vmatpush1.bf16.msra.mxu1 %v6683_v19  ;;  %5241 = vmatprep.subr.bf16.mxu0 %v1275_v55 }
 0x2d4   :  { %1497 = vmatprep.subr.bf16.mxu1 %v6355_v38  ;;  %v1296_v47 = vpop.permute.xlu1 %1295 }
 0x2d5   :  { %4850 = vmatmul.mubr.msk.bf16.vlgmr.msra.gmra.mrb[16].mxu0 %vm1429_vm3, %v6689_v27 }
 0x2d6   :  { %5242 = vmatpush3.bf16.msra.mxu0 %v1275_v55  ;;  %1478 = vmatprep.mubr.bf16.mxu0 %v10703_v14  ;;  %v6700_v13 = vpop.permute.xlu0 %1301 }
 0x2d7   :  { %1498 = vmatpush1.bf16.msra.mxu1 %v6352_v21  ;;  %5243 = vmatprep.subr.bf16.mxu0 %v1280_v54  ;;  %v1331_v17 = vsel %vm167_vm0, %v6691_v0, %v6700_v13 }
 0x2d8   :  { %1499 = vmatprep.subr.bf16.mxu1 %v6373_v28  ;;  %v6704_v59 = vpop.permute.xlu1 %1303 }
 0x2da   :  { %5244 = vmatpush3.bf16.msra.mxu0 %v1280_v54  ;;  %v6728_v31 = vpop.permute.xlu0 %1285 }
 0x2db   :  { %1500 = vmatpush1.bf16.msra.mxu1 %v6368_v3  ;;  %5245 = vmatprep.subr.bf16.mxu0 %v6710_v62  ;;  %v1335_v36 = vsel %vm167_vm0, %v6728_v31, %v6691_v0 }
 0x2dc   :  { %v6719_v50 = vpop.permute.xlu1 %1287  ;;  %1591 = vmatprep.subr.bf16.mxu1 %v6302_v44 }
 0x2dd   :  { %4851 = vmatmul.mubr.msk.bf16.gmra.mrb[20].mxu0 %vm1429_vm3, %v6715_v45  ;;  %v1336_v35 = vsel %vm167_vm0, %v6719_v50, %v1296_v47 }
 0x2de   :  { %4852 = vmatmul.mubr.msk.bf16.vlgmr.msra.gmra.mrb[24].mxu1 %vm1429_vm3, %v6689_v27  ;;  %5246 = vmatpush3.bf16.msra.mxu0 %v6710_v62  ;;  %v1306_v30 = vpop.permute.xlu0 %1305  ;;  %v1356_v56 = vmul.f32 %v1336_v35, %v10710_v5 }
 0x2df   :  { %5247 = vmatprep.subr.bf16.mxu0 %v6726_v29  ;;  %1592 = vmatpush1.bf16.msra.mxu1 %v6605_v9  ;;  %v1329_v9 = vsel %vm167_vm0, %v6620_v52, %v6641_v40 }
 0x2e0   :  { %1593 = vmatprep.subr.bf16.mxu1 %v6613_v46  ;;  %1531 = vmatprep.mubr.bf16.mxu1 %v10703_v14  ;;  %v1308_v44 = vpop.permute.xlu1 %1307  ;;  %v10708_v46 = vld [vmem:[#allocation7_spill] sm:$0xff] }
 0x2e1   :  { %5253 = vmatprep.mubr.msk.bf16.mxu0 %vm1429_vm3, %v6689_v27  ;;  %v1347_v53 = vmul.f32 %v1330_v58, %v10708_v46  ;;  %v1342_v4 = vmul.f32 %v1329_v9, %v10708_v46  ;;  %v1352_v43 = vmul.f32 %v1331_v17, %v10708_v46 }
 0x2e2   :  { %5248 = vmatpush3.bf16.msra.mxu0 %v6726_v29  ;;  %v1314_v25 = vpop.permute.xlu0 %1313 }
 0x2e3   :  { %5249 = vmatprep.subr.bf16.mxu0 %v6362_v37  ;;  %1594 = vmatpush1.bf16.msra.mxu1 %v6629_v63  ;;  %v1362_v52 = vpack.c.bf16 %v1347_v53, %v1342_v4 }
 0x2e4   :  { %1595 = vmatprep.subr.bf16.mxu1 %v6331_v20  ;;  %v1332_v20 = vsel %vm167_vm0, %v1296_v47, %v6704_v59  ;;  %v1316_v63 = vpop.permute.xlu1 %1315  ;;  %v10711_v47 = vld [vmem:[#allocation13_spill] sm:$0xff] }
 0x2e5   :  { %v1322_v0 = vsel %vm167_vm0, %v1308_v44, %v1316_v63 }
 0x2e6   :  { %4853 = vmatmul.mubr.msk.bf16.gmra.mrb[28].mxu1 %vm1429_vm3, %v6715_v45  ;;  %5250 = vmatpush3.bf16.msra.mxu0 %v6362_v37  ;;  %v1310_v48 = vpop.permute.xlu0 %1309  ;;  %v1349_v54 = vmul.f32 %v1322_v0, %v10711_v47 }
 0x2e7   :  { %5251 = vmatprep.subr.bf16.mxu0 %v10709_v1  ;;  %1596 = vmatpush1.bf16.msra.mxu1 %v6325_v12  ;;  %v1357_v12 = vmul.f32 %v1332_v20, %v10708_v46  ;;  %v1327_v58 = vsel %vm167_vm0, %v6700_v13, %v1310_v48 }
 0x2e8   :  { %1597 = vmatprep.subr.bf16.mxu1 %v6343_v24  ;;  %1623 = vmatprep.mubr.bf16.mxu1 %v10703_v14  ;;  %v1341_v24 = vmul.f32 %v1333_v42, %v10710_v5  ;;  %v1312_v32 = vpop.permute.xlu1 %1311 }
 0x2ea   :  { %5252 = vmatpush3.bf16.msra.mxu0 %v10709_v1  ;;  %v1361_v8 = vpack.c.bf16 %v1346_v33, %v1341_v24  ;;  %v1318_v39 = vpop.permute.xlu0 %1317 }
 0x2eb   :  { %1598 = vmatpush1.bf16.msra.mxu1 %v6340_v22  ;;  %1644 = vmatprep.subr.bf16.mxu0 %v6637_v23  ;;  %v1367_v22 = vpack.c.bf16 %v1357_v12, %v1352_v43  ;;  %v1351_v23 = vmul.f32 %v1335_v36, %v10710_v5  ;;  %v1323_v7 = vsel %vm167_vm0, %v1310_v48, %v1318_v39 }
 0x2ec   :  { %1599 = vmatprep.subr.bf16.mxu1 %v1362_v52  ;;  %v1320_v15 = vpop.permute.xlu1 %1319 }
 0x2ed   :  { %5254 = vmatmul.mubr.msk.bf16.vlgmr.msra.gmra.mrb[24].mxu0 %vm1429_vm3, %v6715_v45  ;;  %v1366_v55 = vpack.c.bf16 %v1356_v56, %v1351_v23  ;;  %v1324_v26 = vsel %vm167_vm0, %v1312_v32, %v1320_v15  ;;  %v1340_v13 = vsel %vm167_vm0, %v1320_v15, %v6719_v50 }
 0x2ee   :  { %1645 = vmatpush1.bf16.msra.mxu0 %v6655_v60  ;;  %1676 = vmatprep.mubr.bf16.mxu0 %v10703_v14  ;;  %v1321_v60 = vsel %vm167_vm0, %v1306_v30, %v1314_v25 }
 0x2ef   :  { %1600 = vmatpush1.bf16.msra.mxu1 %v1361_v8  ;;  %1646 = vmatprep.subr.bf16.mxu0 %v6662_v2  ;;  %v1326_v2 = vsel %vm167_vm0, %v6649_v6, %v1308_v44  ;;  %v10712_v6 = vld [vmem:[#allocation9_spill] sm:$0xff] }
 0x2f0   :  { %1601 = vmatprep.subr.bf16.mxu1 %v1367_v22  ;;  %v1348_v49 = vmul.f32 %v1326_v2, %v10712_v6  ;;  %v1353_v20 = vmul.f32 %v1327_v58, %v10712_v6 }
 0x2f2   :  { %1647 = vmatpush1.bf16.msra.mxu0 %v6683_v19  ;;  %v1344_v19 = vmul.f32 %v1321_v60, %v10711_v47 }
 0x2f3   :  { %1602 = vmatpush1.bf16.msra.mxu1 %v1366_v55  ;;  %1648 = vmatprep.subr.bf16.mxu0 %v6355_v38  ;;  %v1325_v38 = vsel %vm167_vm0, %v6641_v40, %v1306_v30  ;;  %v1359_v40 = vmul.f32 %v1324_v26, %v10711_v47  ;;  %v1354_v30 = vmul.f32 %v1323_v7, %v10711_v47 }
 0x2f4   :  { %5257 = vmatprep.subr.bf16.mxu1 %v6710_v62  ;;  %v1364_v44 = vpack.c.bf16 %v1349_v54, %v1344_v19 }
 0x2f5   :  { %v1369_v53 = vpack.c.bf16 %v1359_v40, %v1354_v30 }
 0x2f6   :  { %4856 = vmatmul.mubr.msk.bf16.vlgmr.msra.gmra.mrb[32].mxu1 %vm1429_vm3, %v6689_v27  ;;  %1649 = vmatpush1.bf16.msra.mxu0 %v6352_v21  ;;  %v1328_v21 = vsel %vm167_vm0, %v6704_v59, %v1312_v32 }
 0x2f7   :  { %1650 = vmatprep.subr.bf16.mxu0 %v6373_v28  ;;  %5258 = vmatpush3.bf16.msra.mxu1 %v6710_v62  ;;  %v1343_v28 = vmul.f32 %v1325_v38, %v10712_v6  ;;  %v1338_v62 = vsel %vm167_vm0, %v1316_v63, %v6677_v10  ;;  %v1358_v9 = vmul.f32 %v1328_v21, %v10712_v6  ;;  %v10713_v10 = vld [vmem:[#allocation4_spill] sm:$0xff] }
 0x2f8   :  { %5259 = vmatprep.subr.bf16.mxu1 %v6726_v29  ;;  %1633 = vmatprep.mubr.bf16.mxu1 %v10703_v14  ;;  %v1350_v41 = vmul.f32 %v1338_v62, %v10713_v10  ;;  %v1360_v4 = vmul.f32 %v1340_v13, %v10713_v10 }
 0x2f9   :  { %v1363_v59 = vpack.c.bf16 %v1348_v49, %v1343_v28  ;;  %v1368_v63 = vpack.c.bf16 %v1358_v9, %v1353_v20 }
 0x2fa   :  { %1651 = vmatpush1.bf16.msra.mxu0 %v6368_v3  ;;  %v1337_v3 = vsel %vm167_vm0, %v1314_v25, %v6667_v51  ;;  %v1339_v51 = vsel %vm167_vm0, %v1318_v39, %v6728_v31 }
 0x2fb   :  { %1652 = vmatprep.subr.bf16.mxu0 %v1364_v44  ;;  %5260 = vmatpush3.bf16.msra.mxu1 %v6726_v29  ;;  %v1345_v29 = vmul.f32 %v1337_v3, %v10713_v10  ;;  %v6911_v0 = vpop.permute.xlu0 %1401 }
 0x2fc   :  { %5261 = vmatprep.subr.bf16.mxu1 %v6362_v37 }
 0x2fd   :  { %v1365_v42 = vpack.c.bf16 %v1350_v41, %v1345_v29  ;;  %v6914_v54 = vpop.permute.xlu1 %1406 }
 0x2fe   :  { %4857 = vmatmul.mubr.msk.bf16.gmra.mrb[36].mxu1 %vm1429_vm3, %v6715_v45  ;;  %1653 = vmatpush1.bf16.msra.mxu0 %v1363_v59 }
 0x2ff   :  { %1654 = vmatprep.subr.bf16.mxu0 %v1369_v53  ;;  %5262 = vmatpush3.bf16.msra.mxu1 %v6362_v37  ;;  %v1355_v37 = vmul.f32 %v1339_v51, %v10713_v10  ;;  %v6923_v62 = vpop.permute.xlu0 %1411 }
 0x300   :  { %5263 = vmatprep.subr.bf16.mxu1 %v10709_v1  ;;  %5269 = vmatprep.mubr.msk.bf16.mxu1 %vm1429_vm3, %v6689_v27 }
 0x301   :  { %v1370_v50 = vpack.c.bf16 %v1360_v4, %v1355_v37  ;;  %v6929_v3 = vpop.permute.xlu1 %1416 }
 0x302   :  { %1655 = vmatpush1.bf16.msra.mxu0 %v1368_v63 }
 0x303   :  { %5264 = vmatpush3.bf16.msra.mxu1 %v10709_v1 }
 0x304   :  { %5265 = vmatprep.subr.bf16.mxu1 %v1365_v42 }
 0x305   :  { %4858 = vmatmul.mubr.msk.bf16.vlgmr.msra.gmra.mrb[28].mxu0 %vm1429_vm3, %v6689_v27 }
 0x306   :  { %1686 = vmatprep.mubr.bf16.mxu0 %v10703_v14 }
 0x307   :  { %5266 = vmatpush3.bf16.msra.mxu1 %v1365_v42 }
 0x308   :  { %5267 = vmatprep.subr.bf16.mxu1 %v1370_v50 }
 0x30b   :  { %5268 = vmatpush3.bf16.msra.mxu1 %v1370_v50 }
 0x30d   :  { %4859 = vmatmul.mubr.msk.bf16.gmra.mrb[32].mxu0 %vm1429_vm3, %v6715_v45 }
 0x30e   :  { %5270 = vmatmul.mubr.msk.bf16.vlgmr.msra.gmra.mrb[40].mxu1 %vm1429_vm3, %v6715_v45  ;;  %2106 = vmatprep.mubr.bf16.mxu0 %v10703_v14 }
 0x30f   :  { %2179 = vmatprep.mubr.bf16.mxu1 %v10703_v14 }
 0x3a8   :  { %v6871_v31 = vpop.f32.mrb[16].mxu0 }
 0x3a9   :  { %v6873_v1 = vpop.f32.mrb[17].mxu0 }
 0x3aa   :  { %v6875_v27 = vpop.f32.mrb[18].mxu0 }
 0x3ab   :  { %v6877_v33 = vpop.f32.mrb[19].mxu0 }
 0x3b0   :  { %v6879_v17 = vpop.f32.mrb[20].mxu0 }
 0x3b1   :  { %v6881_v25 = vpop.f32.mrb[21].mxu0  ;;  %v6883_v12 = vpop.f32.mrb[24].mxu1 }
 0x3b2   :  { %v6885_v35 = vpop.f32.mrb[22].mxu0  ;;  %v6887_v45 = vpop.f32.mrb[25].mxu1 }
 0x3b3   :  { %v6889_v52 = vpop.f32.mrb[23].mxu0  ;;  %v6891_v24 = vpop.f32.mrb[26].mxu1 }
 0x3b4   :  { %v6893_v43 = vpop.f32.mrb[27].mxu1 }
 0x3b9   :  { %v6895_v36 = vpop.f32.mrb[28].mxu1 }
 0x3ba   :  { %v6897_v8 = vpop.f32.mrb[29].mxu1 }
 0x3bb   :  { %v6899_v56 = vpop.f32.mrb[30].mxu1 }
 0x3bc   :  { %v6901_v32 = vpop.f32.mrb[31].mxu1 }
 0x3c0   :  { %v6903_v22 = vpop.f32.mrb[24].mxu0 }
 0x3c1   :  { %v6905_v23 = vpop.f32.mrb[25].mxu0 }
 0x3c2   :  { %v6907_v48 = vpop.f32.mrb[26].mxu0 }
 0x3c3   :  { %v6909_v55 = vpop.f32.mrb[27].mxu0 }
 0x3c9   :  { %v1625_v15 = vpop.f32.mrb[32].mxu1 }
 0x3ca   :  { %v1626_v60 = vadd.f32 %v1625_v15, %v6911_v0  ;;  %v1627_v2 = vpop.f32.mrb[33].mxu1 }
 0x3cb   :  { %v1628_v39 = vadd.f32 %v1627_v2, %v6911_v0  ;;  %v1629_v26 = vpop.f32.mrb[34].mxu1 }
 0x3cc   :  { %v1766_v38 = vmax.f32 %v1626_v60, 0.0  ;;  %v1630_v19 = vadd.f32 %v1629_v26, %v6914_v54  ;;  %v1631_v49 = vpop.f32.mrb[35].mxu1 }
 0x3cd   :  { %v1632_v7 = vadd.f32 %v1631_v49, %v6914_v54  ;;  %v1767_v40 = vmax.f32 %v1628_v39, 0.0 }
 0x3ce   :  { %v1771_v21 = vmax.f32 %v1630_v19, 0.0  ;;  %1786 = vrot.lane.b32.xlu0 %v1766_v38, %s5410_s16 }
 0x3cf   :  { %v1772_v44 = vmax.f32 %v1632_v7, 0.0 }
 0x3d0   :  { %v6920_v28 = vpack.c.bf16 %v1771_v21, %v1766_v38  ;;  %1788 = vrot.lane.b32.xlu1 %v1771_v21, %s5410_s16 }
 0x3d1   :  { %v6925_v58 = vpack.c.bf16 %v1772_v44, %v1767_v40  ;;  %v1635_v30 = vpop.f32.mrb[36].mxu1 }
 0x3d2   :  { %v1636_v59 = vadd.f32 %v1635_v30, %v6923_v62  ;;  %v1637_v9 = vpop.f32.mrb[37].mxu1  ;;  %1794 = vrot.lane.b32.xlu0 %v1767_v40, %s5410_s16 }
 0x3d3   :  { %v1638_v53 = vadd.f32 %v1637_v9, %v6923_v62  ;;  %v1639_v41 = vpop.f32.mrb[38].mxu1 }
 0x3d4   :  { %v1776_v20 = vmax.f32 %v1636_v59, 0.0  ;;  %v1640_v13 = vadd.f32 %v1639_v41, %v6929_v3  ;;  %v1641_v29 = vpop.f32.mrb[39].mxu1  ;;  %1796 = vrot.lane.b32.xlu1 %v1772_v44, %s5410_s16 }
 0x3d5   :  { %v1642_v63 = vadd.f32 %v1641_v29, %v6929_v3  ;;  %v1777_v4 = vmax.f32 %v1638_v53, 0.0 }
 0x3d6   :  { %v1781_v51 = vmax.f32 %v1640_v13, 0.0  ;;  %1790 = vrot.lane.b32.xlu0 %v1776_v20, %s5410_s16 }
 0x3d7   :  { %v1782_v42 = vmax.f32 %v1642_v63, 0.0 }
 0x3d8   :  { %v6936_v37 = vpack.c.bf16 %v1781_v51, %v1776_v20  ;;  %1792 = vrot.lane.b32.xlu1 %v1781_v51, %s5410_s16  ;;  %v1678_v50 = vpop.f32.mrb[28].mxu0 }
 0x3d9   :  { %v6939_v15 = vpack.c.bf16 %v1782_v42, %v1777_v4  ;;  %v1679_v60 = vadd.f32 %v1678_v50, %v6911_v0  ;;  %v1680_v2 = vpop.f32.mrb[29].mxu0 }
 0x3da   :  { %v1681_v39 = vadd.f32 %v1680_v2, %v6911_v0  ;;  %1798 = vrot.lane.b32.xlu0 %v1777_v4, %s5410_s16  ;;  %v1682_v26 = vpop.f32.mrb[30].mxu0 }
 0x3db   :  { %v1683_v38 = vadd.f32 %v1682_v26, %v6914_v54  ;;  %v1684_v19 = vpop.f32.mrb[31].mxu0  ;;  %v1768_v7 = vmax.f32 %v1679_v60, 0.0 }
 0x3dc   :  { %v1685_v49 = vadd.f32 %v1684_v19, %v6914_v54  ;;  %1800 = vrot.lane.b32.xlu1 %v1782_v42, %s5410_s16  ;;  %v1769_v40 = vmax.f32 %v1681_v39, 0.0 }
 0x3dd   :  { %v1773_v21 = vmax.f32 %v1683_v38, 0.0 }
 0x3de   :  { %v1774_v44 = vmax.f32 %v1685_v49, 0.0 }
 0x3df   :  { %v6947_v30 = vpack.c.bf16 %v1773_v21, %v1768_v7 }
 0x3e0   :  { %v6949_v59 = vpack.c.bf16 %v1774_v44, %v1769_v40  ;;  %v1688_v9 = vpop.f32.mrb[32].mxu0 }
 0x3e1   :  { %v1689_v53 = vadd.f32 %v1688_v9, %v6923_v62  ;;  %v1690_v41 = vpop.f32.mrb[33].mxu0  ;;  %v5271_v20 = vpop.f32.mrb[40].mxu1 }
 0x3e2   :  { %v1691_v13 = vadd.f32 %v1690_v41, %v6923_v62  ;;  %v1740_v29 = vadd.f32 %v5271_v20, %v6923_v62  ;;  %v1692_v63 = vpop.f32.mrb[34].mxu0  ;;  %v1731_v51 = vpop.f32.mrb[41].mxu1 }
 0x3e3   :  { %v1693_v4 = vadd.f32 %v1692_v63, %v6929_v3  ;;  %v1732_v42 = vadd.f32 %v1731_v51, %v6911_v0  ;;  %v1694_v50 = vpop.f32.mrb[35].mxu0  ;;  %v5272_v60 = vpop.f32.mrb[42].mxu1  ;;  %v1778_v38 = vmax.f32 %v1689_v53, 0.0  ;;  %v6978_v53 = vadd.f32 %v6873_v1, %v6911_v0 }
 0x3e4   :  { %v1695_v2 = vadd.f32 %v1694_v50, %v6929_v3  ;;  %v1743_v39 = vadd.f32 %v5272_v60, %v6929_v3  ;;  %v1734_v26 = vpop.f32.mrb[43].mxu1  ;;  %v1779_v41 = vmax.f32 %v1691_v13, 0.0  ;;  %v1780_v20 = vmax.f32 %v1740_v29, 0.0 }
 0x3e5   :  { %v1783_v19 = vmax.f32 %v1693_v4, 0.0  ;;  %v1770_v49 = vmax.f32 %v1732_v42, 0.0  ;;  %v1735_v9 = vadd.f32 %v1734_v26, %v6914_v54  ;;  %v6995_v1 = vadd.f32 %v6891_v24, %v6914_v54 }
 0x3e6   :  { %v1784_v6 = vmax.f32 %v1695_v2, 0.0  ;;  %v1785_v47 = vmax.f32 %v1743_v39, 0.0  ;;  %v7050_v42 = vadd.f32 %v6879_v17, %v6923_v62  ;;  %v7058_v2 = vadd.f32 %v6885_v35, %v6929_v3 }
 0x3e7   :  { %v6959_v10 = vpack.c.bf16 %v1783_v19, %v1778_v38  ;;  %v1775_v63 = vmax.f32 %v1735_v9, 0.0  ;;  %1818 = vrot.lane.b32.xlu0 %v1770_v49, %s5410_s16  ;;  %v7067_v17 = vadd.f32 %v6887_v45, %v6911_v0  ;;  %v7075_v35 = vadd.f32 %v6893_v43, %v6914_v54 }
 0x3e8   :  { %v6962_v51 = vpack.c.bf16 %v1784_v6, %v1779_v41  ;;  %v6964_v50 = vpack.c.bf16 %v1785_v47, %v1780_v20  ;;  %v10501_v39 = vmax.f32 %v7050_v42, 0.0  ;;  %v10500_v26 = vmax.f32 %v7058_v2, 0.0 }
 0x3e9   :  { %v6966_v60 = vpack.c.bf16 %v1775_v63, %v1770_v49  ;;  %1820 = vrot.lane.b32.xlu1 %v1775_v63, %s5410_s16  ;;  %v7083_v45 = vadd.f32 %v6905_v23, %v6911_v0  ;;  %v7091_v43 = vadd.f32 %v6909_v55, %v6914_v54  ;;  %v7098_v49 = vadd.f32 %v6897_v8, %v6923_v62  ;;  %v1998_v63 = vld [vmem:[%s10440_s8 + $0x20] sm:$0xff] }
 0x3ea   :  { %v7115_v8 = vadd.f32 %v6903_v22, %v6923_v62 }
 0x3eb   :  { %1802 = vrot.lane.b32.xlu0 %v1768_v7, %s5410_s16  ;;  %v6983_v7 = vadd.f32 %v6877_v33, %v6914_v54  ;;  %v10499_v23 = vmax.f32 %v7083_v45, 0.0  ;;  %v10498_v55 = vmax.f32 %v7091_v43, 0.0 }
 0x3ed   :  { %1804 = vrot.lane.b32.xlu1 %v1773_v21, %s5410_s16  ;;  %v10513_v21 = vmax.f32 %v6978_v53, 0.0 }
 0x3ef   :  { %1810 = vrot.lane.b32.xlu0 %v1769_v40, %s5410_s16  ;;  %v6989_v40 = vadd.f32 %v6883_v12, %v6911_v0  ;;  %v10510_v12 = vmax.f32 %v6995_v1, 0.0 }
 0x3f1   :  { %1812 = vrot.lane.b32.xlu1 %v1774_v44, %s5410_s16  ;;  %v10512_v44 = vmax.f32 %v6983_v7, 0.0  ;;  %v10511_v33 = vmax.f32 %v6989_v40, 0.0 }
 0x3f3   :  { %1806 = vrot.lane.b32.xlu0 %v1778_v38, %s5410_s16  ;;  %v1749_v38 = vmax.f32 %v7067_v17, 0.0  ;;  %v10716_v17 = vmax.f32 %v6983_v7, 0.0 }
 0x3f5   :  { %1808 = vrot.lane.b32.xlu1 %v1783_v19, %s5410_s16  ;;  %v10514_v19 = vmax.f32 %v7075_v35, 0.0 }
 0x3f7   :  { %1814 = vrot.lane.b32.xlu0 %v1779_v41, %s5410_s16  ;;  %v10497_v41 = vmax.f32 %v7115_v8, 0.0 }
 0x3f9   :  { %1816 = vrot.lane.b32.xlu1 %v1784_v6, %s5410_s16  ;;  %v7002_v6 = vadd.f32 %v6871_v31, %v6911_v0  ;;  %v7019_v31 = vadd.f32 %v6881_v25, %v6923_v62  ;;  %v7035_v25 = vadd.f32 %v6895_v36, %v6923_v62  ;;  %v7106_v0 = vadd.f32 %v6901_v32, %v6929_v3  ;;  %v1995_v62 = vld [vmem:[%s10440_s8 + $0x8] sm:$0xff] }
 0x3fa   :  { %v7123_v32 = vadd.f32 %v6907_v48, %v6929_v3  ;;  %v1994_v48 = vld [vmem:[%s10440_s8] sm:$0xff] }
 0x3fb   :  { %1822 = vrot.lane.b32.xlu0 %v1780_v20, %s5410_s16  ;;  %v10507_v24 = vmax.f32 %v7002_v6, 0.0  ;;  %v10505_v29 = vmax.f32 %v7019_v31, 0.0  ;;  %v10503_v36 = vmax.f32 %v7035_v25, 0.0  ;;  %v10508_v9 = vmax.f32 %v7106_v0, 0.0  ;;  %v1997_v20 = vld [vmem:[%s10440_s8 + $0x18] sm:$0xff] }
 0x3fc   :  { %v10496_v22 = vmax.f32 %v7123_v32, 0.0 }
 0x3fd   :  { %1824 = vrot.lane.b32.xlu1 %v1785_v47, %s5410_s16  ;;  %v7010_v47 = vadd.f32 %v6875_v27, %v6914_v54  ;;  %v7027_v27 = vadd.f32 %v6889_v52, %v6929_v3  ;;  %v7043_v52 = vadd.f32 %v6899_v56, %v6929_v3  ;;  %v10509_v54 = vmax.f32 %v7098_v49, 0.0  ;;  %v1996_v3 = vld [vmem:[%s10440_s8 + $0x10] sm:$0xff] }
 0x3ff   :  { %1884 = vrot.lane.b32.xlu0 %v10513_v21, %s5409_s0  ;;  %v10506_v13 = vmax.f32 %v7010_v47, 0.0  ;;  %v10504_v4 = vmax.f32 %v7027_v27, 0.0  ;;  %v10502_v56 = vmax.f32 %v7043_v52, 0.0  ;;  %v10722_v7 = vmax.f32 %v7010_v47, 0.0 }
 0x400   :  { %v10728_v47 = vmax.f32 %v7058_v2, 0.0 }
 0x401   :  { %1886 = vrot.lane.b32.xlu1 %v10512_v44, %s5409_s0 }
 0x403   :  { %1892 = vrot.lane.b32.xlu0 %v10511_v33, %s5409_s0 }
 0x405   :  { %1894 = vrot.lane.b32.xlu1 %v10510_v12, %s5409_s0 }
 0x407   :  { %1876 = vrot.lane.b32.xlu0 %v10507_v24, %s5409_s0 }
 0x409   :  { %1878 = vrot.lane.b32.xlu1 %v10506_v13, %s5409_s0 }
 0x40b   :  { %1888 = vrot.lane.b32.xlu0 %v10505_v29, %s5409_s0 }
 0x40d   :  { %1890 = vrot.lane.b32.xlu1 %v10504_v4, %s5409_s0 }
 0x40f   :  { %1896 = vrot.lane.b32.xlu0 %v10503_v36, %s5409_s0 }
 0x411   :  { %1898 = vrot.lane.b32.xlu1 %v10502_v56, %s5409_s0 }
 0x413   :  { %1880 = vrot.lane.b32.xlu0 %v10501_v39, %s5409_s0 }
 0x415   :  { %1882 = vrot.lane.b32.xlu1 %v10500_v26, %s5409_s0 }
 0x417   :  { %1900 = vrot.lane.b32.xlu0 %v1749_v38, %s5409_s0 }
 0x419   :  { %1902 = vrot.lane.b32.xlu1 %v10514_v19, %s5409_s0 }
 0x41b   :  { %1908 = vrot.lane.b32.xlu0 %v10499_v23, %s5409_s0 }
 0x41d   :  { %1910 = vrot.lane.b32.xlu1 %v10498_v55, %s5409_s0 }
 0x41f   :  { %1904 = vrot.lane.b32.xlu0 %v10509_v54, %s5409_s0 }
 0x421   :  { %1906 = vrot.lane.b32.xlu1 %v10508_v9, %s5409_s0 }
 0x423   :  { %1912 = vrot.lane.b32.xlu0 %v10497_v41, %s5409_s0 }
 0x425   :  { %1914 = vrot.lane.b32.xlu1 %v10496_v22, %s5409_s0  ;;  %v1999_v22 = vld [vmem:[%s10440_s8 + $0x28] sm:$0xff] }
 0x427   :  { %2004 = vperm.xlu0 %5342, %v1994_v48   ;;  %v2000_v48 = vld [vmem:[%s10440_s8 + $0x30] sm:$0xff] }
 0x429   :  { %2009 = vperm.xlu1 %5344, %v1995_v62   ;;  %v2001_v62 = vld [vmem:[%s10440_s8 + $0x38] sm:$0xff] }
 0x42b   :  { %2014 = vperm.xlu0 %5342, %v1996_v3  }
 0x42d   :  { %2019 = vperm.xlu1 %5344, %v1997_v20  }
 0x42f   :  { %2024 = vperm.xlu0 %5342, %v1998_v63  }
 0x431   :  { %2029 = vperm.xlu1 %5344, %v1999_v22  }
 0x433   :  { %2034 = vperm.xlu0 %5342, %v2000_v48  }
 0x435   :  { %2039 = vperm.xlu1 %5344, %v2001_v62  }
 0x440   :  { %v1787_v3 = vpop.permute.xlu0 %1786 }
 0x442   :  { %v1789_v41 = vpop.permute.xlu1 %1788 }
 0x444   :  { %v1795_v55 = vpop.permute.xlu0 %1794 }
 0x445   :  { %v1838_v20 = vsel %vm94_vm1, %v1787_v3, %v1795_v55 }
 0x446   :  { %v1797_v23 = vpop.permute.xlu1 %1796  ;;  %v1847_v26 = vmul.f32 %v1838_v20, %v5617_v61 }
 0x447   :  { %v1839_v63 = vsel %vm94_vm1, %v1789_v41, %v1797_v23 }
 0x448   :  { %v1852_v22 = vmul.f32 %v1839_v63, %v5617_v61  ;;  %v1791_v56 = vpop.permute.xlu0 %1790 }
 0x44a   :  { %v1867_v39 = vpack.c.bf16 %v1852_v22, %v1847_v26  ;;  %v1793_v36 = vpop.permute.xlu1 %1792 }
 0x44c   :  { %2074 = vmatprep.subr.bf16.mxu0 %v1867_v39  ;;  %v1799_v48 = vpop.permute.xlu0 %1798 }
 0x44d   :  { %v1840_v20 = vsel %vm94_vm1, %v1791_v56, %v1799_v48 }
 0x44e   :  { %v1801_v62 = vpop.permute.xlu1 %1800  ;;  %v1857_v54 = vmul.f32 %v1840_v20, %v5617_v61 }
 0x44f   :  { %v1841_v4 = vsel %vm94_vm1, %v1793_v36, %v1801_v62 }
 0x450   :  { %v1862_v39 = vmul.f32 %v1841_v4, %v5617_v61 }
 0x452   :  { %v1872_v33 = vpack.c.bf16 %v1862_v39, %v1857_v54 }
 0x459   :  { %v7171_v29 = vpop.permute.xlu0 %1818 }
 0x45a   :  { %v1842_v13 = vsel %vm94_vm1, %v7171_v29, %v1787_v3 }
 0x45b   :  { %v7178_v24 = vpop.permute.xlu1 %1820  ;;  %v1846_v63 = vmul.f32 %v1842_v13, %v5660_v16 }
 0x45c   :  { %v1843_v26 = vsel %vm94_vm1, %v7178_v24, %v1789_v41 }
 0x45d   :  { %v1851_v22 = vmul.f32 %v1843_v26, %v5660_v16  ;;  %v1803_v9 = vpop.permute.xlu0 %1802 }
 0x45e   :  { %v1834_v13 = vsel %vm94_vm1, %v1795_v55, %v1803_v9 }
 0x45f   :  { %v1866_v12 = vpack.c.bf16 %v1851_v22, %v1846_v63  ;;  %v1805_v3 = vpop.permute.xlu1 %1804  ;;  %v1848_v26 = vmul.f32 %v1834_v13, %v10671_v11 }
 0x460   :  { %v1835_v44 = vsel %vm94_vm1, %v1797_v23, %v1805_v3 }
 0x461   :  { %2075 = vmatpush1.bf16.msra.mxu0 %v1866_v12  ;;  %v7189_v21 = vpop.permute.xlu0 %1810  ;;  %v1853_v20 = vmul.f32 %v1835_v44, %v10671_v11 }
 0x462   :  { %v1830_v4 = vsel %vm94_vm1, %v1803_v9, %v7189_v21  ;;  %2076 = vmatprep.subr.bf16.mxu0 %v1872_v33 }
 0x463   :  { %v1813_v41 = vpop.permute.xlu1 %1812  ;;  %v1849_v39 = vmul.f32 %v1830_v4, %v10672_v34  ;;  %v1868_v19 = vpack.c.bf16 %v1853_v20, %v1848_v26 }
 0x464   :  { %v1831_v54 = vsel %vm94_vm1, %v1805_v3, %v1813_v41 }
 0x465   :  { %v1854_v12 = vmul.f32 %v1831_v54, %v10672_v34  ;;  %v1807_v23 = vpop.permute.xlu0 %1806 }
 0x466   :  { %v1836_v9 = vsel %vm94_vm1, %v1799_v48, %v1807_v23 }
 0x467   :  { %v1809_v63 = vpop.permute.xlu1 %1808  ;;  %v1869_v22 = vpack.c.bf16 %v1854_v12, %v1849_v39  ;;  %v1858_v39 = vmul.f32 %v1836_v9, %v10671_v11 }
 0x468   :  { %v1837_v33 = vsel %vm94_vm1, %v1801_v62, %v1809_v63 }
 0x469   :  { %2147 = vmatprep.subr.bf16.mxu1 %v1869_v22  ;;  %v1815_v55 = vpop.permute.xlu0 %1814  ;;  %v1863_v4 = vmul.f32 %v1837_v33, %v10671_v11 }
 0x46a   :  { %v1832_v44 = vsel %vm94_vm1, %v1807_v23, %v1815_v55  ;;  %2148 = vmatpush1.bf16.msra.mxu1 %v1868_v19  ;;  %v10714_v23 = vmax.f32 %v7075_v35, 0.0  ;;  %v10717_v35 = vmax.f32 %v6989_v40, 0.0 }
 0x46b   :  { %v1817_v3 = vpop.permute.xlu1 %1816  ;;  %v1859_v20 = vmul.f32 %v1832_v44, %v10672_v34  ;;  %v1873_v22 = vpack.c.bf16 %v1863_v4, %v1858_v39  ;;  %v10720_v39 = vmax.f32 %v7106_v0, 0.0 }
 0x46c   :  { %v1833_v13 = vsel %vm94_vm1, %v1809_v63, %v1817_v3  ;;  %v7222_v63 = vpack.c.bf16 %v10714_v23, %v1749_v38  ;;  %v10718_v38 = vmax.f32 %v6995_v1, 0.0  ;;  %v10723_v1 = vmax.f32 %v7019_v31, 0.0 }
 0x46d   :  { %v1864_v54 = vmul.f32 %v1833_v13, %v10672_v34  ;;  %v1823_v62 = vpop.permute.xlu0 %1822 }
 0x46e   :  { %v1844_v12 = vsel %vm94_vm1, %v1823_v62, %v1791_v56 }
 0x46f   :  { %v1825_v19 = vpop.permute.xlu1 %1824  ;;  %v1874_v26 = vpack.c.bf16 %v1864_v54, %v1859_v20  ;;  %v1856_v33 = vmul.f32 %v1844_v12, %v5660_v16  ;;  %v7237_v20 = vpack.c.bf16 %v10718_v38, %v10717_v35  ;;  %v10719_v54 = vmax.f32 %v7098_v49, 0.0 }
 0x470   :  { %v1845_v48 = vsel %vm94_vm1, %v1825_v19, %v1793_v36  ;;  %v10715_v36 = vmax.f32 %v6978_v53, 0.0  ;;  %v10721_v53 = vmax.f32 %v7002_v6, 0.0  ;;  %v10724_v49 = vmax.f32 %v7027_v27, 0.0 }
 0x471   :  { %v1861_v44 = vmul.f32 %v1845_v48, %v5660_v16  ;;  %2149 = vmatprep.subr.bf16.mxu1 %v1874_v26  ;;  %v7226_v9 = vpop.permute.xlu0 %1884  ;;  %v7243_v12 = vpack.c.bf16 %v10720_v39, %v10719_v54  ;;  %v10726_v48 = vmax.f32 %v7043_v52, 0.0  ;;  %v10727_v6 = vmax.f32 %v7050_v42, 0.0 }
 0x472   :  { %2150 = vmatpush1.bf16.msra.mxu1 %v1873_v22  ;;  %v1967_v13 = vpack.c.bf16 %v10716_v17, %v10715_v36  ;;  %v1966_v26 = vpack.c.bf16 %v10722_v7, %v10721_v53  ;;  %v1972_v0 = vpack.c.bf16 %v10724_v49, %v10723_v1  ;;  %v10725_v22 = vmax.f32 %v7035_v25, 0.0 }
 0x473   :  { %v1871_v56 = vpack.c.bf16 %v1861_v44, %v1856_v33  ;;  %2151 = vmatprep.subr.bf16.mxu1 %v7222_v63  ;;  %v1887_v4 = vpop.permute.xlu1 %1886  ;;  %v1971_v31 = vpack.c.bf16 %v10728_v47, %v10727_v6  ;;  %v1827_v25 = vsel %vm94_vm1, %v1813_v41, %v7178_v24  ;;  %v1826_v42 = vsel %vm94_vm1, %v7189_v21, %v7171_v29  ;;  %v7292_v24 = vld [vmem:[%s10439_s7] sm:$0xff]  }
 0x474   :  { %v7261_v23 = vpack.c.bf16 %v10726_v48, %v10725_v22  ;;  %v1855_v2 = vmul.f32 %v1827_v25, %v10673_v18  ;;  %v1829_v44 = vsel %vm94_vm1, %v1817_v3, %v1825_v19  ;;  %v1850_v41 = vmul.f32 %v1826_v42, %v10673_v18 }
 0x475   :  { %2077 = vmatpush1.bf16.msra.mxu0 %v1871_v56  ;;  %v7263_v33 = vpop.permute.xlu0 %1892  ;;  %v1828_v21 = vsel %vm94_vm1, %v1815_v55, %v1823_v62  ;;  %v1865_v29 = vmul.f32 %v1829_v44, %v10673_v18  ;;  %v7312_v62 = vld [vmem:[%s10439_s7 + $0x8] sm:$0xff]   ;;  %v10729_v38 = vmax.f32 %v7083_v45, 0.0  ;;  %v10730_v54 = vmax.f32 %v7091_v43, 0.0 }
 0x476   :  { %2078 = vmatprep.subr.bf16.mxu0 %v1967_v13  ;;  %2152 = vmatpush1.bf16.msra.mxu1 %v7237_v20  ;;  %v1870_v19 = vpack.c.bf16 %v1855_v2, %v1850_v41  ;;  %v1860_v36 = vmul.f32 %v1828_v21, %v10673_v18  ;;  %v1924_v53 = vsel %vm167_vm0, %v7226_v9, %v7263_v33  ;;  %v10731_v1 = vmax.f32 %v7115_v8, 0.0 }
 0x477   :  { %2153 = vmatprep.subr.bf16.mxu1 %v7243_v12  ;;  %v7251_v40 = vpop.permute.xlu1 %1894  ;;  %v1970_v39 = vpack.c.bf16 %v10730_v54, %v10729_v38  ;;  %v1937_v43 = vmul.f32 %v1924_v53, %v10708_v46  ;;  %v10732_v49 = vmax.f32 %v7123_v32, 0.0  ;;  %v10733_v38 = vld [vmem:[#allocation4_spill] sm:$0xff]  ;;  %v10734_v53 = vld [vmem:[#allocation13_spill] sm:$0xff] }
 0x478   :  { %v1875_v55 = vpack.c.bf16 %v1865_v29, %v1860_v36 }
 0x479   :  { %2079 = vmatpush1.bf16.msra.mxu0 %v1966_v26  ;;  %v7276_v52 = vpop.permute.xlu0 %1876 }
 0x47a   :  { %2080 = vmatprep.subr.bf16.mxu0 %v1972_v0  ;;  %2154 = vmatpush1.bf16.msra.mxu1 %v7261_v23 }
 0x47b   :  { %2155 = vmatprep.subr.bf16.mxu1 %v6949_v59  ;;  %v7271_v27 = vpop.permute.xlu1 %1878 }
 0x47d   :  { %2081 = vmatpush1.bf16.msra.mxu0 %v1971_v31  ;;  %v1889_v3 = vpop.permute.xlu0 %1888 }
 0x47e   :  { %2082 = vmatprep.subr.bf16.mxu0 %v6925_v58  ;;  %2156 = vmatpush1.bf16.msra.mxu1 %v6947_v30 }
 0x47f   :  { %2157 = vmatprep.subr.bf16.mxu1 %v6962_v51  ;;  %v1891_v56 = vpop.permute.xlu1 %1890 }
 0x481   :  { %2083 = vmatpush1.bf16.msra.mxu0 %v6920_v28  ;;  %v7318_v35 = vpop.permute.xlu0 %1896 }
 0x482   :  { %2084 = vmatprep.subr.bf16.mxu0 %v6939_v15  ;;  %2158 = vmatpush1.bf16.msra.mxu1 %v6959_v10 }
 0x483   :  { %2285 = vmatprep.subr.bf16.mxu1 %v1967_v13  ;;  %v7305_v17 = vpop.permute.xlu1 %1898  ;;  %v1925_v13 = vsel %vm167_vm0, %v1887_v4, %v7251_v40 }
 0x484   :  { %v1942_v7 = vmul.f32 %v1925_v13, %v10708_v46 }
 0x485   :  { %4870 = vmatmul.mubr.msk.bf16.vlgmr.msra.gmra.mrb[44].mxu1 %vm1429_vm3, %v7292_v24  ;;  %2085 = vmatpush1.bf16.msra.mxu0 %v6936_v37  ;;  %v7356_v48 = vpop.permute.xlu0 %1880 }
 0x486   :  { %5273 = vmatprep.subr.bf16.mxu0 %v1870_v19  ;;  %2286 = vmatpush1.bf16.msra.mxu1 %v1966_v26  ;;  %v1929_v26 = vsel %vm167_vm0, %v7271_v27, %v1887_v4  ;;  %v1928_v4 = vsel %vm167_vm0, %v7276_v52, %v7226_v9  ;;  %v1957_v32 = vpack.c.bf16 %v1942_v7, %v1937_v43  ;;  %v7367_v9 = vld [vmem:[%s10439_s7 + $0x10] sm:$0xff]   ;;  %v10735_v43 = vld [vmem:[#allocation9_spill] sm:$0xff] }
 0x487   :  { %2287 = vmatprep.subr.bf16.mxu1 %v1972_v0  ;;  %2189 = vmatprep.mubr.bf16.mxu1 %v10703_v14  ;;  %v7338_v45 = vpop.permute.xlu1 %1882  ;;  %v1975_v0 = vpack.c.bf16 %v10732_v49, %v10731_v1  ;;  %v1941_v22 = vmul.f32 %v1929_v26, %v10710_v5  ;;  %v1936_v6 = vmul.f32 %v1928_v4, %v10710_v5 }
 0x488   :  { %4866 = vmatmul.mubr.msk.bf16.vlgmr.msra.gmra.mrb[36].mxu0 %vm1429_vm3, %v7292_v24  ;;  %v1931_v8 = vsel %vm167_vm0, %v7338_v45, %v1891_v56 }
 0x489   :  { %5274 = vmatpush3.bf16.msra.mxu0 %v1870_v19  ;;  %2116 = vmatprep.mubr.bf16.mxu0 %v10703_v14  ;;  %v1956_v25 = vpack.c.bf16 %v1941_v22, %v1936_v6  ;;  %v1951_v42 = vmul.f32 %v1931_v8, %v10710_v5  ;;  %v1901_v21 = vpop.permute.xlu0 %1900 }
 0x48a   :  { %5275 = vmatprep.subr.bf16.mxu0 %v1875_v55  ;;  %2288 = vmatpush1.bf16.msra.mxu1 %v1971_v31  ;;  %v1930_v31 = vsel %vm167_vm0, %v7356_v48, %v1889_v3 }
 0x48b   :  { %2289 = vmatprep.subr.bf16.mxu1 %v6925_v58  ;;  %v1927_v58 = vsel %vm167_vm0, %v1891_v56, %v7305_v17  ;;  %v1946_v44 = vmul.f32 %v1930_v31, %v10710_v5  ;;  %v1903_v41 = vpop.permute.xlu1 %1902  ;;  %v7388_v56 = vld [vmem:[%s10439_s7 + $0x18] sm:$0xff]  }
 0x48d   :  { %4871 = vmatmul.mubr.msk.bf16.gmra.mrb[48].mxu1 %vm1429_vm3, %v7312_v62  ;;  %5276 = vmatpush3.bf16.msra.mxu0 %v1875_v55 }
 0x48e   :  { %5277 = vmatprep.subr.bf16.mxu0 %v1970_v39  ;;  %2290 = vmatpush1.bf16.msra.mxu1 %v6920_v28  ;;  %v1926_v28 = vsel %vm167_vm0, %v1889_v3, %v7318_v35  ;;  %v1909_v3 = vpop.permute.xlu0 %1908 }
 0x48f   :  { %2291 = vmatprep.subr.bf16.mxu1 %v6939_v15  ;;  %2199 = vmatprep.mubr.bf16.mxu1 %v10703_v14  ;;  %v1952_v15 = vmul.f32 %v1927_v58, %v10708_v46  ;;  %v1947_v47 = vmul.f32 %v1926_v28, %v10708_v46  ;;  %v1911_v29 = vpop.permute.xlu1 %1910  ;;  %v1932_v13 = vsel %vm167_vm0, %v1909_v3, %v7276_v52 }
 0x490   :  { %4867 = vmatmul.mubr.msk.bf16.gmra.mrb[40].mxu0 %vm1429_vm3, %v7312_v62  ;;  %v1940_v52 = vmul.f32 %v1932_v13, %v10733_v38 }
 0x491   :  { %5278 = vmatpush3.bf16.msra.mxu0 %v1970_v39  ;;  %2126 = vmatprep.mubr.bf16.mxu0 %v10703_v14  ;;  %v1962_v2 = vpack.c.bf16 %v1952_v15, %v1947_v47 }
 0x492   :  { %5279 = vmatprep.subr.bf16.mxu0 %v1975_v0  ;;  %2292 = vmatpush1.bf16.msra.mxu1 %v6936_v37  ;;  %v1961_v37 = vpack.c.bf16 %v1951_v42, %v1946_v44  ;;  %v1905_v36 = vpop.permute.xlu0 %1904 }
 0x493   :  { %2293 = vmatprep.subr.bf16.mxu1 %v1957_v32  ;;  %v1907_v19 = vpop.permute.xlu1 %1906 }
 0x494   :  { %v1923_v49 = vsel %vm167_vm0, %v7305_v17, %v1907_v19 }
 0x495   :  { %4872 = vmatmul.mubr.msk.bf16.gmra.mrb[52].mxu1 %vm1429_vm3, %v7367_v9  ;;  %5280 = vmatpush3.bf16.msra.mxu0 %v1975_v0 }
 0x496   :  { %5281 = vmatprep.subr.bf16.mxu0 %v6966_v60  ;;  %2294 = vmatpush1.bf16.msra.mxu1 %v1956_v25 }
 0x497   :  { %2295 = vmatprep.subr.bf16.mxu1 %v1962_v2  ;;  %2209 = vmatprep.mubr.bf16.mxu1 %v10703_v14  ;;  %v1915_v55 = vpop.permute.xlu1 %1914 }
 0x498   :  { %4868 = vmatmul.mubr.msk.bf16.gmra.mrb[44].mxu0 %vm1429_vm3, %v7367_v9 }
 0x499   :  { %5282 = vmatpush3.bf16.msra.mxu0 %v6966_v60  ;;  %2136 = vmatprep.mubr.bf16.mxu0 %v10703_v14 }
 0x49a   :  { %5283 = vmatprep.subr.bf16.mxu0 %v6964_v50  ;;  %2296 = vmatpush1.bf16.msra.mxu1 %v1961_v37 }
 0x49b   :  { %5293 = vmatprep.subr.bf16.mxu1 %v1970_v39 }
 0x49d   :  { %4873 = vmatmul.mubr.msk.bf16.gmra.mrb[56].mxu1 %vm1429_vm3, %v7388_v56  ;;  %5284 = vmatpush3.bf16.msra.mxu0 %v6964_v50 }
 0x49e   :  { %2358 = vmatprep.subr.bf16.mxu0 %v7222_v63  ;;  %2317 = vmatprep.mubr.bf16.mxu1 %v10703_v14  ;;  %v1933_v63 = vsel %vm167_vm0, %v1911_v29, %v7271_v27  ;;  %v1916_v27 = vsel %vm167_vm0, %v1901_v21, %v1909_v3 }
 0x49f   :  { %v1945_v54 = vmul.f32 %v1933_v63, %v10733_v38 }
 0x4a0   :  { %4869 = vmatmul.mubr.msk.bf16.gmra.mrb[48].mxu0 %vm1429_vm3, %v7388_v56 }
 0x4a1   :  { %5285 = vmatprep.mubr.msk.bf16.mxu0 %vm1429_vm3, %v7292_v24  ;;  %v1960_v58 = vpack.c.bf16 %v1945_v54, %v1940_v52 }
 0x4a5   :  { %4878 = vmatmul.mubr.msk.bf16.vlgmr.msra.gmra.mrb[60].mxu1 %vm1429_vm3, %v7292_v24 }
 0x4a6   :  { %5294 = vmatpush3.bf16.msra.mxu1 %v1970_v39  ;;  %2327 = vmatprep.mubr.bf16.mxu1 %v10703_v14  ;;  %v1913_v39 = vpop.permute.xlu0 %1912 }
 0x4a7   :  { %5295 = vmatprep.subr.bf16.mxu1 %v1975_v0  ;;  %v1918_v1 = vsel %vm167_vm0, %v1905_v36, %v1913_v39 }
 0x4a8   :  { %5286 = vmatmul.mubr.msk.bf16.vlgmr.msra.gmra.mrb[52].mxu0 %vm1429_vm3, %v7312_v62  ;;  %v1949_v28 = vmul.f32 %v1918_v1, %v10734_v53  ;;  %v7509_v25 = vpop.permute.xlu1 %2009 }
 0x4a9   :  { %2359 = vmatpush1.bf16.msra.mxu0 %v7237_v20  ;;  %5289 = vmatprep.mubr.msk.bf16.mxu0 %vm1429_vm3, %v7367_v9  ;;  %v1917_v20 = vsel %vm167_vm0, %v1903_v41, %v1911_v29 }
 0x4aa   :  { %2360 = vmatprep.subr.bf16.mxu0 %v7243_v12  ;;  %5296 = vmatpush3.bf16.msra.mxu1 %v1975_v0  ;;  %v1935_v12 = vsel %vm167_vm0, %v1915_v55, %v7338_v45  ;;  %v1944_v7 = vmul.f32 %v1917_v20, %v10734_v53  ;;  %v1939_v45 = vmul.f32 %v1916_v27, %v10734_v53  ;;  %v7503_v47 = vpop.permute.xlu0 %2004 }
 0x4ab   :  { %5297 = vmatprep.subr.bf16.mxu1 %v6966_v60  ;;  %v1955_v26 = vmul.f32 %v1935_v12, %v10733_v38 }
 0x4ac   :  { %v1959_v0 = vpack.c.bf16 %v1944_v7, %v1939_v45  ;;  %v7525_v29 = vpop.permute.xlu1 %2019 }
 0x4ad   :  { %2361 = vmatpush1.bf16.msra.mxu0 %v7261_v23  ;;  %4879 = vmatmul.mubr.msk.bf16.gmra.mrb[64].mxu1 %vm1429_vm3, %v7312_v62  ;;  %v1921_v23 = vsel %vm167_vm0, %v7251_v40, %v1903_v41  ;;  %v1920_v40 = vsel %vm167_vm0, %v7263_v33, %v1901_v21 }
 0x4ae   :  { %2362 = vmatprep.subr.bf16.mxu0 %v6949_v59  ;;  %5298 = vmatpush3.bf16.msra.mxu1 %v6966_v60  ;;  %v1934_v59 = vsel %vm167_vm0, %v1913_v39, %v7356_v48  ;;  %v1919_v60 = vsel %vm167_vm0, %v1907_v19, %v1915_v55  ;;  %v1943_v4 = vmul.f32 %v1921_v23, %v10735_v43  ;;  %v7517_v37 = vpop.permute.xlu0 %2014 }
 0x4af   :  { %5299 = vmatprep.subr.bf16.mxu1 %v6964_v50  ;;  %2337 = vmatprep.mubr.bf16.mxu1 %v10703_v14  ;;  %v1954_v33 = vmul.f32 %v1919_v60, %v10734_v53  ;;  %v1938_v22 = vmul.f32 %v1920_v40, %v10735_v43  ;;  %v1953_v48 = vmul.f32 %v1923_v49, %v10735_v43 }
 0x4b0   :  { %5290 = vmatmul.mubr.msk.bf16.gmra.mrb[56].mxu0 %vm1429_vm3, %v7388_v56  ;;  %v7537_v20 = vpop.permute.xlu1 %2029 }
 0x4b1   :  { %2363 = vmatpush1.bf16.msra.mxu0 %v6947_v30  ;;  %2390 = vmatprep.mubr.bf16.mxu0 %v10703_v14  ;;  %v1950_v30 = vmul.f32 %v1934_v59, %v10733_v38  ;;  %v1958_v17 = vpack.c.bf16 %v1943_v4, %v1938_v22  ;;  %v1964_v15 = vpack.c.bf16 %v1954_v33, %v1949_v28 }
 0x4b2   :  { %2364 = vmatprep.subr.bf16.mxu0 %v6962_v51  ;;  %5300 = vmatpush3.bf16.msra.mxu1 %v6964_v50  ;;  %v1922_v50 = vsel %vm167_vm0, %v7318_v35, %v1905_v36  ;;  %v7535_v55 = vpop.permute.xlu0 %2024 }
 0x4b3   :  { %5301 = vmatprep.subr.bf16.mxu1 %v1960_v58  ;;  %v1965_v51 = vpack.c.bf16 %v1955_v26, %v1950_v30 }
 0x4b4   :  { %v7567_v1 = vpop.permute.xlu1 %2039 }
 0x4b5   :  { %2365 = vmatpush1.bf16.msra.mxu0 %v6959_v10  ;;  %4880 = vmatmul.mubr.msk.bf16.gmra.mrb[68].mxu1 %vm1429_vm3, %v7367_v9  ;;  %v1948_v10 = vmul.f32 %v1922_v50, %v10735_v43 }
 0x4b6   :  { %2366 = vmatprep.subr.bf16.mxu0 %v1959_v0  ;;  %5302 = vmatpush3.bf16.msra.mxu1 %v1960_v58  ;;  %v7565_v45 = vpop.permute.xlu0 %2034 }
 0x4b7   :  { %5303 = vmatprep.subr.bf16.mxu1 %v1965_v51  ;;  %2347 = vmatprep.mubr.bf16.mxu1 %v10703_v14  ;;  %v1963_v8 = vpack.c.bf16 %v1953_v48, %v1948_v10 }
 0x4b9   :  { %2367 = vmatpush1.bf16.msra.mxu0 %v1958_v17 }
 0x4ba   :  { %2368 = vmatprep.subr.bf16.mxu0 %v1964_v15  ;;  %5304 = vmatpush3.bf16.msra.mxu1 %v1965_v51 }
 0x4bd   :  { %2369 = vmatpush1.bf16.msra.mxu0 %v1963_v8  ;;  %4881 = vmatmul.mubr.msk.bf16.gmra.mrb[72].mxu1 %vm1429_vm3, %v7388_v56 }
 0x4be   :  { %5305 = vmatprep.mubr.msk.bf16.mxu1 %vm1429_vm3, %v7292_v24 }
 0x4c0   :  { %4882 = vmatmul.mubr.msk.bf16.vlgmr.msra.gmra.mrb[60].mxu0 %vm1429_vm3, %v7292_v24 }
 0x4c1   :  { %2400 = vmatprep.mubr.bf16.mxu0 %v10703_v14 }
 0x4c5   :  { %5306 = vmatmul.mubr.msk.bf16.vlgmr.msra.gmra.mrb[76].mxu1 %vm1429_vm3, %v7312_v62 }
 0x4c6   :  { %5309 = vmatprep.mubr.msk.bf16.mxu1 %vm1429_vm3, %v7367_v9 }
 0x4c8   :  { %4883 = vmatmul.mubr.msk.bf16.gmra.mrb[64].mxu0 %vm1429_vm3, %v7312_v62 }
 0x4c9   :  { %2410 = vmatprep.mubr.bf16.mxu0 %v10703_v14 }
 0x4cd   :  { %5310 = vmatmul.mubr.msk.bf16.gmra.mrb[80].mxu1 %vm1429_vm3, %v7388_v56 }
 0x4d0   :  { %4884 = vmatmul.mubr.msk.bf16.gmra.mrb[68].mxu0 %vm1429_vm3, %v7367_v9 }
 0x4d1   :  { %2420 = vmatprep.mubr.bf16.mxu0 %v10703_v14 }
 0x4d8   :  { %4885 = vmatmul.mubr.msk.bf16.gmra.mrb[72].mxu0 %vm1429_vm3, %v7388_v56 }
 0x558   :  { %v7493_v24 = vpop.f32.mrb[44].mxu1 }
 0x559   :  { %v7495_v35 = vpop.f32.mrb[45].mxu1 }
 0x55a   :  { %10736 = vst [vmem:[#allocation18_spill] sm:$0xff] %v7495_v35  ;;  %v7497_v32 = vpop.f32.mrb[46].mxu1 }
 0x55b   :  { %v7499_v62 = vpop.f32.mrb[36].mxu0  ;;  %v7501_v6 = vpop.f32.mrb[47].mxu1 }
 0x55c   :  { %10737 = vst [vmem:[#allocation17_spill] sm:$0xff] %v7501_v6  ;;  %v7505_v31 = vpop.f32.mrb[37].mxu0 }
 0x55d   :  { %v7507_v9 = vpop.f32.mrb[38].mxu0 }
 0x55e   :  { %v7511_v42 = vpop.f32.mrb[39].mxu0 }
 0x560   :  { %v7513_v2 = vpop.f32.mrb[48].mxu1 }
 0x561   :  { %v7515_v44 = vpop.f32.mrb[49].mxu1 }
 0x562   :  { %10738 = vst [vmem:[#allocation8_spill] sm:$0xff] %v7515_v44  ;;  %v7519_v41 = vpop.f32.mrb[50].mxu1 }
 0x563   :  { %v7521_v56 = vpop.f32.mrb[40].mxu0  ;;  %v7523_v21 = vpop.f32.mrb[51].mxu1 }
 0x564   :  { %10739 = vst [vmem:[#allocation12_spill] sm:$0xff] %v7523_v21  ;;  %v7527_v3 = vpop.f32.mrb[41].mxu0 }
 0x565   :  { %v7529_v19 = vpop.f32.mrb[42].mxu0 }
 0x566   :  { %v7531_v36 = vpop.f32.mrb[43].mxu0 }
 0x568   :  { %v7533_v63 = vpop.f32.mrb[52].mxu1 }
 0x569   :  { %v2203_v13 = vpop.f32.mrb[53].mxu1 }
 0x56a   :  { %v7540_v54 = vadd.f32 %v2203_v13, %v7535_v55  ;;  %v7542_v39 = vpop.f32.mrb[54].mxu1 }
 0x56b   :  { %v7544_v12 = vpop.f32.mrb[44].mxu0  ;;  %v2207_v27 = vpop.f32.mrb[55].mxu1 }
 0x56c   :  { %10740 = vst [vmem:[#allocation10_spill] sm:$0xff] %v7540_v54  ;;  %v7547_v52 = vadd.f32 %v2207_v27, %v7537_v20  ;;  %v7549_v23 = vpop.f32.mrb[45].mxu0  ;;  %v10516_v59 = vmax.f32 %v7540_v54, 0.0 }
 0x56d   :  { %v7551_v7 = vpop.f32.mrb[46].mxu0 }
 0x56e   :  { %10741 = vst [vmem:[#allocation5_spill] sm:$0xff] %v7547_v52  ;;  %v10515_v60 = vmax.f32 %v7547_v52, 0.0  ;;  %v7555_v26 = vpop.f32.mrb[47].mxu0 }
 0x570   :  { %v7561_v58 = vpack.c.bf16 %v10515_v60, %v10516_v59  ;;  %v7563_v40 = vpop.f32.mrb[56].mxu1 }
 0x571   :  { %10743 = vst [vmem:[#allocation16_spill] sm:$0xff] %v7563_v40  ;;  %v2213_v4 = vpop.f32.mrb[57].mxu1 }
 0x572   :  { %10742 = vst [vmem:[#allocation2_spill] sm:$0xff] %v7561_v58  ;;  %v7570_v30 = vadd.f32 %v2213_v4, %v7565_v45  ;;  %v7572_v49 = vpop.f32.mrb[58].mxu1 }
 0x573   :  { %10745 = vst [vmem:[#allocation20_spill] sm:$0xff] %v7572_v49  ;;  %v7574_v33 = vpop.f32.mrb[48].mxu0  ;;  %v2217_v0 = vpop.f32.mrb[59].mxu1 }
 0x574   :  { %10744 = vst [vmem:[#allocation19_spill] sm:$0xff] %v7570_v30  ;;  %10746 = vst [vmem:[#allocation21_spill] sm:$0xff] %v7574_v33  ;;  %v7577_v22 = vadd.f32 %v2217_v0, %v7567_v1  ;;  %v7579_v51 = vpop.f32.mrb[49].mxu0  ;;  %v10522_v28 = vmax.f32 %v7570_v30, 0.0 }
 0x575   :  { %v7581_v50 = vpop.f32.mrb[50].mxu0 }
 0x576   :  { %10747 = vst [vmem:[#allocation22_spill] sm:$0xff] %v7577_v22  ;;  %10748 = vst [vmem:[#allocation23_spill] sm:$0xff] %v7581_v50  ;;  %v10521_v17 = vmax.f32 %v7577_v22, 0.0  ;;  %v7585_v48 = vpop.f32.mrb[51].mxu0 }
 0x577   :  { %10749 = vst [vmem:[#allocation24_spill] sm:$0xff] %v7585_v48 }
 0x578   :  { %v7591_v15 = vpack.c.bf16 %v10521_v17, %v10522_v28  ;;  %v2319_v10 = vpop.f32.mrb[60].mxu1 }
 0x579   :  { %v2320_v8 = vadd.f32 %v2319_v10, %v7503_v47  ;;  %v2321_v13 = vpop.f32.mrb[61].mxu1 }
 0x57a   :  { %10750 = vst [vmem:[#allocation25_spill] sm:$0xff] %v7591_v15  ;;  %v2322_v27 = vadd.f32 %v2321_v13, %v7503_v47  ;;  %v2323_v4 = vpop.f32.mrb[62].mxu1 }
 0x57b   :  { %v2536_v0 = vmax.f32 %v2320_v8, 0.0  ;;  %v2324_v60 = vadd.f32 %v2323_v4, %v7509_v25  ;;  %v7596_v59 = vpop.f32.mrb[52].mxu0  ;;  %v2325_v53 = vpop.f32.mrb[63].mxu1 }
 0x57c   :  { %10751 = vst [vmem:[#allocation26_spill] sm:$0xff] %v7596_v59  ;;  %v2326_v5 = vadd.f32 %v2325_v53, %v7509_v25  ;;  %v7599_v46 = vpop.f32.mrb[53].mxu0  ;;  %v2537_v10 = vmax.f32 %v2322_v27, 0.0 }
 0x57d   :  { %10752 = vst [vmem:[#allocation27_spill] sm:$0xff] %v7599_v46  ;;  %v2541_v38 = vmax.f32 %v2324_v60, 0.0  ;;  %2576 = vrot.lane.b32.xlu0 %v2536_v0, %s5410_s16  ;;  %v7602_v17 = vpop.f32.mrb[54].mxu0 }
 0x57e   :  { %10753 = vst [vmem:[#allocation28_spill] sm:$0xff] %v7602_v17  ;;  %v2542_v28 = vmax.f32 %v2326_v5, 0.0  ;;  %v7604_v43 = vpop.f32.mrb[55].mxu0 }
 0x57f   :  { %10754 = vst [vmem:[#allocation29_spill] sm:$0xff] %v7604_v43  ;;  %v7606_v13 = vpack.c.bf16 %v2541_v38, %v2536_v0  ;;  %2578 = vrot.lane.b32.xlu1 %v2541_v38, %s5410_s16 }
 0x580   :  { %v7609_v8 = vpack.c.bf16 %v2542_v28, %v2537_v10  ;;  %v2329_v4 = vpop.f32.mrb[64].mxu1 }
 0x581   :  { %10755 = vst [vmem:[#allocation30_spill] sm:$0xff] %v7606_v13  ;;  %v7612_v53 = vadd.f32 %v2329_v4, %v7517_v37  ;;  %v2331_v14 = vpop.f32.mrb[65].mxu1  ;;  %2592 = vrot.lane.b32.xlu0 %v2537_v10, %s5410_s16 }
 0x582   :  { %10756 = vst [vmem:[#allocation31_spill] sm:$0xff] %v7609_v8  ;;  %v7616_v60 = vadd.f32 %v2331_v14, %v7517_v37  ;;  %v2333_v27 = vpop.f32.mrb[66].mxu1 }
 0x583   :  { %v7619_v5 = vadd.f32 %v2333_v27, %v7525_v29  ;;  %v2335_v0 = vpop.f32.mrb[67].mxu1  ;;  %2594 = vrot.lane.b32.xlu1 %v2542_v28, %s5410_s16  ;;  %v7622_v38 = vpop.f32.mrb[56].mxu0  ;;  %v10535_v13 = vmax.f32 %v7612_v53, 0.0 }
 0x584   :  { %10757 = vst [vmem:[#allocation32_spill] sm:$0xff] %v7622_v38  ;;  %v7625_v15 = vadd.f32 %v2335_v0, %v7525_v29  ;;  %v7627_v4 = vpop.f32.mrb[57].mxu0  ;;  %v10538_v58 = vmax.f32 %v7616_v60, 0.0 }
 0x585   :  { %10758 = vst [vmem:[#allocation33_spill] sm:$0xff] %v7627_v4  ;;  %v10534_v10 = vmax.f32 %v7619_v5, 0.0  ;;  %v7631_v14 = vpop.f32.mrb[58].mxu0 }
 0x586   :  { %10759 = vst [vmem:[#allocation34_spill] sm:$0xff] %v7631_v14  ;;  %v10537_v27 = vmax.f32 %v7625_v15, 0.0  ;;  %v7635_v8 = vpop.f32.mrb[59].mxu0 }
 0x587   :  { %10760 = vst [vmem:[#allocation35_spill] sm:$0xff] %v7635_v8  ;;  %v7641_v28 = vpack.c.bf16 %v10534_v10, %v10535_v13 }
 0x588   :  { %v7647_v0 = vpack.c.bf16 %v10537_v27, %v10538_v58  ;;  %v2339_v16 = vpop.f32.mrb[68].mxu1 }
 0x589   :  { %10761 = vst [vmem:[#allocation36_spill] sm:$0xff] %v7641_v28  ;;  %v7650_v18 = vadd.f32 %v2339_v16, %v7535_v55  ;;  %v2341_v22 = vpop.f32.mrb[69].mxu1 }
 0x58a   :  { %10762 = vst [vmem:[#allocation37_spill] sm:$0xff] %v7647_v0  ;;  %v7653_v30 = vadd.f32 %v2341_v22, %v7535_v55  ;;  %v2343_v14 = vpop.f32.mrb[70].mxu1 }
 0x58b   :  { %v7656_v38 = vadd.f32 %v2343_v14, %v7537_v20  ;;  %v2345_v10 = vpop.f32.mrb[71].mxu1  ;;  %v10543_v28 = vmax.f32 %v7650_v18, 0.0 }
 0x58c   :  { %v7659_v13 = vadd.f32 %v2345_v10, %v7537_v20  ;;  %v10546_v58 = vmax.f32 %v7653_v30, 0.0 }
 0x58d   :  { %v10542_v27 = vmax.f32 %v7656_v38, 0.0 }
 0x58e   :  { %v10545_v16 = vmax.f32 %v7659_v13, 0.0 }
 0x58f   :  { %v7669_v22 = vpack.c.bf16 %v10542_v27, %v10543_v28 }
 0x590   :  { %v7675_v10 = vpack.c.bf16 %v10545_v16, %v10546_v58  ;;  %v2349_v14 = vpop.f32.mrb[72].mxu1 }
 0x591   :  { %10763 = vst [vmem:[#allocation38_spill] sm:$0xff] %v7669_v22  ;;  %v7678_v0 = vadd.f32 %v2349_v14, %v7565_v45  ;;  %v2351_v52 = vpop.f32.mrb[73].mxu1 }
 0x592   :  { %10764 = vst [vmem:[#allocation39_spill] sm:$0xff] %v7675_v10  ;;  %v7681_v54 = vadd.f32 %v2351_v52, %v7565_v45  ;;  %v2353_v8 = vpop.f32.mrb[74].mxu1 }
 0x593   :  { %v7684_v4 = vadd.f32 %v2353_v8, %v7567_v1  ;;  %v2392_v27 = vpop.f32.mrb[60].mxu0  ;;  %v2355_v28 = vpop.f32.mrb[75].mxu1  ;;  %v10551_v58 = vmax.f32 %v7678_v0, 0.0 }
 0x594   :  { %v2393_v22 = vadd.f32 %v2392_v27, %v7503_v47  ;;  %v7688_v17 = vadd.f32 %v2355_v28, %v7567_v1  ;;  %v2394_v16 = vpop.f32.mrb[61].mxu0  ;;  %v10553_v59 = vmax.f32 %v7681_v54, 0.0 }
 0x595   :  { %v10550_v14 = vmax.f32 %v7684_v4, 0.0  ;;  %v2395_v10 = vadd.f32 %v2394_v16, %v7503_v47  ;;  %v2396_v52 = vpop.f32.mrb[62].mxu0 }
 0x596   :  { %v2538_v21 = vmax.f32 %v2393_v22, 0.0  ;;  %v10552_v8 = vmax.f32 %v7688_v17, 0.0  ;;  %v2397_v34 = vadd.f32 %v2396_v52, %v7509_v25  ;;  %v2398_v44 = vpop.f32.mrb[63].mxu0 }
 0x597   :  { %v7700_v27 = vpack.c.bf16 %v10550_v14, %v10551_v58  ;;  %v2399_v28 = vadd.f32 %v2398_v44, %v7509_v25  ;;  %v2539_v52 = vmax.f32 %v2395_v10, 0.0 }
 0x598   :  { %v7707_v16 = vpack.c.bf16 %v10552_v8, %v10553_v59  ;;  %v2543_v22 = vmax.f32 %v2397_v34, 0.0  ;;  %2608 = vrot.lane.b32.xlu0 %v2538_v21, %s5410_s16  ;;  %v5307_v11 = vpop.f32.mrb[76].mxu1 }
 0x599   :  { %10765 = vst [vmem:[#allocation40_spill] sm:$0xff] %v7700_v27  ;;  %v2544_v43 = vmax.f32 %v2399_v28, 0.0  ;;  %v7711_v46 = vadd.f32 %v5307_v11, %v7517_v37  ;;  %v2465_v6 = vpop.f32.mrb[77].mxu1 }
 0x59a   :  { %10766 = vst [vmem:[#allocation41_spill] sm:$0xff] %v7707_v16  ;;  %v7713_v14 = vpack.c.bf16 %v2543_v22, %v2538_v21  ;;  %v7716_v44 = vadd.f32 %v2465_v6, %v7503_v47  ;;  %2610 = vrot.lane.b32.xlu1 %v2543_v22, %s5410_s16  ;;  %v5308_v58 = vpop.f32.mrb[78].mxu1 }
 0x59b   :  { %v7719_v8 = vpack.c.bf16 %v2544_v43, %v2539_v52  ;;  %v2402_v34 = vpop.f32.mrb[64].mxu0  ;;  %v7722_v59 = vadd.f32 %v5308_v58, %v7525_v29  ;;  %v2468_v10 = vpop.f32.mrb[79].mxu1  ;;  %v10559_v6 = vmax.f32 %v7711_v46, 0.0 }
 0x59c   :  { %10767 = vst [vmem:[#allocation42_spill] sm:$0xff] %v7713_v14  ;;  %v2403_v28 = vadd.f32 %v2402_v34, %v7517_v37  ;;  %v2404_v11 = vpop.f32.mrb[65].mxu0  ;;  %v7726_v27 = vadd.f32 %v2468_v10, %v7509_v25  ;;  %2624 = vrot.lane.b32.xlu0 %v2539_v52, %s5410_s16  ;;  %v10561_v16 = vmax.f32 %v7716_v44, 0.0 }
 0x59d   :  { %10768 = vst [vmem:[#allocation43_spill] sm:$0xff] %v7719_v8  ;;  %v10558_v21 = vmax.f32 %v7722_v59, 0.0  ;;  %v2405_v22 = vadd.f32 %v2404_v11, %v7517_v37  ;;  %v2406_v14 = vpop.f32.mrb[66].mxu0 }
 0x59e   :  { %v10560_v58 = vmax.f32 %v7726_v27, 0.0  ;;  %v2407_v8 = vadd.f32 %v2406_v14, %v7525_v29  ;;  %v2408_v34 = vpop.f32.mrb[67].mxu0  ;;  %2626 = vrot.lane.b32.xlu1 %v2544_v43, %s5410_s16  ;;  %v2548_v35 = vmax.f32 %v2403_v28, 0.0  ;;  %v10771_v14 = vmax.f32 %v7612_v53, 0.0 }
 0x59f   :  { %v7740_v52 = vpack.c.bf16 %v10558_v21, %v10559_v6  ;;  %v2409_v10 = vadd.f32 %v2408_v34, %v7525_v29  ;;  %v2549_v33 = vmax.f32 %v2405_v22, 0.0 }
 0x5a0   :  { %v7747_v11 = vpack.c.bf16 %v10560_v58, %v10561_v16  ;;  %v2553_v50 = vmax.f32 %v2407_v8, 0.0  ;;  %2580 = vrot.lane.b32.xlu0 %v10771_v14, %s5410_s16  ;;  %v5311_v43 = vpop.f32.mrb[80].mxu1  ;;  %v10773_v58 = vmax.f32 %v7619_v5, 0.0 }
 0x5a1   :  { %10769 = vst [vmem:[#allocation44_spill] sm:$0xff] %v7740_v52  ;;  %v2554_v49 = vmax.f32 %v2409_v10, 0.0  ;;  %v7753_v21 = vadd.f32 %v5311_v43, %v7565_v45  ;;  %v2481_v6 = vpop.f32.mrb[81].mxu1 }
 0x5a2   :  { %10770 = vst [vmem:[#allocation45_spill] sm:$0xff] %v7747_v11  ;;  %v7755_v34 = vpack.c.bf16 %v2553_v50, %v2548_v35  ;;  %v7758_v28 = vadd.f32 %v2481_v6, %v7535_v55  ;;  %2582 = vrot.lane.b32.xlu1 %v10773_v58, %s5410_s16  ;;  %v5312_v8 = vpop.f32.mrb[82].mxu1  ;;  %v10775_v6 = vmax.f32 %v7616_v60, 0.0 }
 0x5a3   :  { %v7763_v16 = vpack.c.bf16 %v2554_v49, %v2549_v33  ;;  %v2412_v53 = vpop.f32.mrb[68].mxu0  ;;  %v2493_v22 = vadd.f32 %v5312_v8, %v7567_v1  ;;  %v2484_v10 = vpop.f32.mrb[83].mxu1  ;;  %v2570_v11 = vmax.f32 %v7753_v21, 0.0 }
 0x5a4   :  { %10772 = vst [vmem:[#allocation46_spill] sm:$0xff] %v7755_v34  ;;  %v2413_v14 = vadd.f32 %v2412_v53, %v7535_v55  ;;  %v2414_v43 = vpop.f32.mrb[69].mxu0  ;;  %v2485_v52 = vadd.f32 %v2484_v10, %v7537_v20  ;;  %2596 = vrot.lane.b32.xlu0 %v10775_v6, %s5410_s16  ;;  %v10776_v53 = vmax.f32 %v7625_v15, 0.0 }
 0x5a5   :  { %10774 = vst [vmem:[#allocation47_spill] sm:$0xff] %v7763_v16  ;;  %v2575_v5 = vmax.f32 %v2493_v22, 0.0  ;;  %v2415_v58 = vadd.f32 %v2414_v43, %v7535_v55  ;;  %v2416_v34 = vpop.f32.mrb[70].mxu0  ;;  %v2560_v16 = vmax.f32 %v7758_v28, 0.0 }
 0x5a6   :  { %v2565_v40 = vmax.f32 %v2485_v52, 0.0  ;;  %v2417_v8 = vadd.f32 %v2416_v34, %v7537_v20  ;;  %v2418_v48 = vpop.f32.mrb[71].mxu0  ;;  %2598 = vrot.lane.b32.xlu1 %v10776_v53, %s5410_s16  ;;  %v2558_v6 = vmax.f32 %v2413_v14, 0.0 }
 0x5a7   :  { %v7778_v10 = vpack.c.bf16 %v2575_v5, %v2570_v11  ;;  %v2419_v60 = vadd.f32 %v2418_v48, %v7537_v20  ;;  %v2559_v43 = vmax.f32 %v2415_v58, 0.0 }
 0x5a8   :  { %v7781_v21 = vpack.c.bf16 %v2565_v40, %v2560_v16  ;;  %v2563_v22 = vmax.f32 %v2417_v8, 0.0  ;;  %2612 = vrot.lane.b32.xlu0 %v2548_v35, %s5410_s16 }
 0x5a9   :  { %10777 = vst [vmem:[#allocation48_spill] sm:$0xff] %v7778_v10  ;;  %v2564_v28 = vmax.f32 %v2419_v60, 0.0 }
 0x5aa   :  { %10778 = vst [vmem:[#allocation49_spill] sm:$0xff] %v7781_v21  ;;  %v7784_v52 = vpack.c.bf16 %v2563_v22, %v2558_v6  ;;  %2614 = vrot.lane.b32.xlu1 %v2553_v50, %s5410_s16  ;;  %v10781_v21 = vmax.f32 %v7650_v18, 0.0  ;;  %v10787_v18 = vmax.f32 %v7678_v0, 0.0  ;;  %v10792_v0 = vmax.f32 %v7722_v59, 0.0 }
 0x5ab   :  { %v7787_v34 = vpack.c.bf16 %v2564_v28, %v2559_v43  ;;  %v2422_v15 = vpop.f32.mrb[72].mxu0  ;;  %v7851_v59 = vadd.f32 %v7511_v42, %v7509_v25 }
 0x5ac   :  { %10779 = vst [vmem:[#allocation50_spill] sm:$0xff] %v7784_v52  ;;  %v2423_v53 = vadd.f32 %v2422_v15, %v7565_v45  ;;  %v2424_v10 = vpop.f32.mrb[73].mxu0  ;;  %2628 = vrot.lane.b32.xlu0 %v2549_v33, %s5410_s16  ;;  %v10783_v33 = vmax.f32 %v7656_v38, 0.0  ;;  %v10788_v38 = vmax.f32 %v7684_v4, 0.0  ;;  %v10793_v4 = vmax.f32 %v7716_v44, 0.0 }
 0x5ad   :  { %10780 = vst [vmem:[#allocation51_spill] sm:$0xff] %v7787_v34  ;;  %v2425_v48 = vadd.f32 %v2424_v10, %v7565_v45  ;;  %v2426_v14 = vpop.f32.mrb[74].mxu0 }
 0x5ae   :  { %v2427_v8 = vadd.f32 %v2426_v14, %v7567_v1  ;;  %v2428_v35 = vpop.f32.mrb[75].mxu0  ;;  %2630 = vrot.lane.b32.xlu1 %v2554_v49, %s5410_s16  ;;  %v2568_v60 = vmax.f32 %v2423_v53, 0.0  ;;  %v10785_v49 = vmax.f32 %v7653_v30, 0.0  ;;  %v10786_v53 = vmax.f32 %v7659_v13, 0.0 }
 0x5af   :  { %v2429_v58 = vadd.f32 %v2428_v35, %v7567_v1  ;;  %v2569_v15 = vmax.f32 %v2425_v48, 0.0  ;;  %v10789_v30 = vmax.f32 %v7681_v54, 0.0  ;;  %v10790_v13 = vmax.f32 %v7688_v17, 0.0 }
 0x5b0   :  { %v2573_v50 = vmax.f32 %v2427_v8, 0.0  ;;  %2584 = vrot.lane.b32.xlu0 %v10781_v21, %s5410_s16  ;;  %v10794_v54 = vmax.f32 %v7726_v27, 0.0  ;;  %v10599_v27 = vmax.f32 %v7851_v59, 0.0  ;;  %v7910_v21 = vadd.f32 %v7519_v41, %v7525_v29 }
 0x5b1   :  { %v2574_v52 = vmax.f32 %v2429_v58, 0.0  ;;  %v7944_v14 = vadd.f32 %v7549_v23, %v7535_v55  ;;  %v7956_v35 = vadd.f32 %v7555_v26, %v7537_v20 }
 0x5b2   :  { %v7798_v34 = vpack.c.bf16 %v2573_v50, %v2568_v60  ;;  %2586 = vrot.lane.b32.xlu1 %v10783_v33, %s5410_s16  ;;  %v10572_v41 = vmax.f32 %v7910_v21, 0.0 }
 0x5b3   :  { %v7803_v10 = vpack.c.bf16 %v2574_v52, %v2569_v15 }
 0x5b4   :  { %10782 = vst [vmem:[#allocation52_spill] sm:$0xff] %v7798_v34  ;;  %2600 = vrot.lane.b32.xlu0 %v10785_v49, %s5410_s16  ;;  %v7979_v49 = vadd.f32 %v7542_v39, %v7537_v20 }
 0x5b5   :  { %10784 = vst [vmem:[#allocation53_spill] sm:$0xff] %v7803_v10 }
 0x5b6   :  { %2602 = vrot.lane.b32.xlu1 %v10786_v53, %s5410_s16  ;;  %v10570_v39 = vmax.f32 %v7979_v49, 0.0 }
 0x5b8   :  { %2616 = vrot.lane.b32.xlu0 %v2558_v6, %s5410_s16  ;;  %v10791_v6 = vmax.f32 %v7711_v46, 0.0  ;;  %v7846_v46 = vadd.f32 %v7505_v31, %v7503_v47  ;;  %v7862_v31 = vadd.f32 %v7497_v32, %v7509_v25  ;;  %v7879_v32 = vadd.f32 %v7507_v9, %v7509_v25 }
 0x5b9   :  { %v7895_v9 = vadd.f32 %v7531_v36, %v7525_v29 }
 0x5ba   :  { %2618 = vrot.lane.b32.xlu1 %v2563_v22, %s5410_s16  ;;  %v10600_v17 = vmax.f32 %v7846_v46, 0.0 }
 0x5bb   :  { %v10588_v36 = vmax.f32 %v7895_v9, 0.0 }
 0x5bc   :  { %2588 = vrot.lane.b32.xlu0 %v10787_v18, %s5410_s16 }
 0x5be   :  { %2590 = vrot.lane.b32.xlu1 %v10788_v38, %s5410_s16  ;;  %v7988_v38 = vadd.f32 %v7544_v12, %v7535_v55  ;;  %v8004_v12 = vadd.f32 %v7579_v51, %v7565_v45 }
 0x5c0   :  { %2604 = vrot.lane.b32.xlu0 %v10789_v30, %s5410_s16  ;;  %v7996_v30 = vadd.f32 %v7551_v7, %v7537_v20  ;;  %v10575_v51 = vmax.f32 %v8004_v12, 0.0 }
 0x5c2   :  { %2606 = vrot.lane.b32.xlu1 %v10790_v13, %s5410_s16  ;;  %v10582_v13 = vmax.f32 %v7988_v38, 0.0 }
 0x5c4   :  { %2644 = vrot.lane.b32.xlu0 %v10791_v6, %s5410_s16  ;;  %v10580_v6 = vmax.f32 %v7996_v30, 0.0 }
 0x5c6   :  { %2646 = vrot.lane.b32.xlu1 %v10792_v0, %s5410_s16  ;;  %v10796_v0 = vld [vmem:[#allocation24_spill] sm:$0xff] }
 0x5c7   :  { %v8012_v7 = vadd.f32 %v10796_v0, %v7567_v1 }
 0x5c8   :  { %2640 = vrot.lane.b32.xlu0 %v10793_v4, %s5410_s16  ;;  %v10797_v4 = vld [vmem:[#allocation16_spill] sm:$0xff] }
 0x5ca   :  { %2642 = vrot.lane.b32.xlu1 %v10794_v54, %s5410_s16  ;;  %v8019_v54 = vadd.f32 %v10797_v4, %v7565_v45 }
 0x5cc   :  { %2652 = vrot.lane.b32.xlu0 %v2570_v11, %s5410_s16  ;;  %v10591_v11 = vmax.f32 %v7879_v32, 0.0 }
 0x5ce   :  { %2654 = vrot.lane.b32.xlu1 %v2575_v5, %s5410_s16  ;;  %v7902_v5 = vadd.f32 %v7513_v2, %v7517_v37  ;;  %v7919_v2 = vadd.f32 %v7521_v56, %v7517_v37  ;;  %v7939_v56 = vld [vmem:[%s10441_s9 + $0x4] ss:$8 sps:$4 sm:$0xff]  }
 0x5cf   :  { %10795 = vst [vmem:[#allocation54_spill] sm:$0xff] %v7939_v56  ;;  %4898 = vmatprep.mubr.msk.bf16.mxu0 %vm3068_vm4, %v7939_v56  ;;  %4902 = vmatprep.mubr.msk.bf16.mxu1 %vm3068_vm4, %v7939_v56 }
 0x5d0   :  { %2648 = vrot.lane.b32.xlu0 %v2560_v16, %s5410_s16  ;;  %v10576_v16 = vmax.f32 %v7862_v31, 0.0  ;;  %v10573_v22 = vmax.f32 %v7902_v5, 0.0  ;;  %v10587_v48 = vmax.f32 %v7919_v2, 0.0 }
 0x5d2   :  { %2650 = vrot.lane.b32.xlu1 %v2565_v40, %s5410_s16  ;;  %v7856_v40 = vadd.f32 %v7493_v24, %v7503_v47  ;;  %v7871_v24 = vadd.f32 %v7499_v62, %v7503_v47  ;;  %v7887_v62 = vadd.f32 %v7527_v3, %v7517_v37 }
 0x5d4   :  { %2632 = vrot.lane.b32.xlu0 %v2559_v43, %s5410_s16  ;;  %v10578_v42 = vmax.f32 %v7856_v40, 0.0  ;;  %v10593_v44 = vmax.f32 %v7871_v24, 0.0  ;;  %v10590_v3 = vmax.f32 %v7887_v62, 0.0 }
 0x5d6   :  { %2634 = vrot.lane.b32.xlu1 %v2564_v28, %s5410_s16  ;;  %v7929_v28 = vadd.f32 %v7529_v19, %v7525_v29 }
 0x5d8   :  { %2620 = vrot.lane.b32.xlu0 %v2568_v60, %s5410_s16  ;;  %v10586_v8 = vmax.f32 %v7929_v28, 0.0  ;;  %v7966_v60 = vadd.f32 %v7533_v63, %v7535_v55  ;;  %v10583_v63 = vmax.f32 %v7956_v35, 0.0 }
 0x5da   :  { %2622 = vrot.lane.b32.xlu1 %v2573_v50, %s5410_s16  ;;  %v10585_v50 = vmax.f32 %v7944_v14, 0.0  ;;  %v10571_v18 = vmax.f32 %v7966_v60, 0.0 }
 0x5dc   :  { %2636 = vrot.lane.b32.xlu0 %v2569_v15, %s5410_s16 }
 0x5de   :  { %2638 = vrot.lane.b32.xlu1 %v2574_v52, %s5410_s16 }
 0x5e0   :  { %2772 = vrot.lane.b32.xlu0 %v10600_v17, %s5409_s0 }
 0x5e2   :  { %2774 = vrot.lane.b32.xlu1 %v10599_v27, %s5409_s0 }
 0x5e4   :  { %2788 = vrot.lane.b32.xlu0 %v10578_v42, %s5409_s0 }
 0x5e6   :  { %2790 = vrot.lane.b32.xlu1 %v10576_v16, %s5409_s0 }
 0x5e8   :  { %2756 = vrot.lane.b32.xlu0 %v10593_v44, %s5409_s0 }
 0x5ea   :  { %2758 = vrot.lane.b32.xlu1 %v10591_v11, %s5409_s0 }
 0x5ec   :  { %2776 = vrot.lane.b32.xlu0 %v10590_v3, %s5409_s0 }
 0x5ee   :  { %2778 = vrot.lane.b32.xlu1 %v10588_v36, %s5409_s0 }
 0x5ef   :  { %v7924_v43 = vpop.permute.xlu0 %2576 }
 0x5f0   :  { %2792 = vrot.lane.b32.xlu0 %v10573_v22, %s5409_s0 }
 0x5f1   :  { %v7934_v52 = vpop.permute.xlu1 %2578 }
 0x5f2   :  { %2794 = vrot.lane.b32.xlu1 %v10572_v41, %s5409_s0 }
 0x5f3   :  { %v2593_v19 = vpop.permute.xlu0 %2592 }
 0x5f4   :  { %v2680_v23 = vsel %vm94_vm1, %v7924_v43, %v2593_v19  ;;  %2760 = vrot.lane.b32.xlu0 %v10587_v48, %s5409_s0 }
 0x5f5   :  { %v2595_v58 = vpop.permute.xlu1 %2594  ;;  %v2697_v15 = vmul.f32 %v2680_v23, %v5617_v61  ;;  %v10798_v23 = vld [vmem:[#allocation20_spill] sm:$0xff] }
 0x5f6   :  { %v2681_v26 = vsel %vm94_vm1, %v7934_v52, %v2595_v58  ;;  %2762 = vrot.lane.b32.xlu1 %v10586_v8, %s5409_s0  ;;  %v10808_v8 = vld [vmem:[#allocation8_spill] sm:$0xff] }
 0x5f7   :  { %v2702_v33 = vmul.f32 %v2681_v26, %v5617_v61  ;;  %v8027_v26 = vadd.f32 %v10798_v23, %v7567_v1  ;;  %v10800_v23 = vld [vmem:[#allocation23_spill] sm:$0xff]  ;;  %v8098_v48 = vadd.f32 %v10808_v8, %v7517_v37 }
 0x5f8   :  { %2780 = vrot.lane.b32.xlu0 %v10585_v50, %s5409_s0 }
 0x5f9   :  { %v2737_v53 = vpack.c.bf16 %v2702_v33, %v2697_v15  ;;  %v10574_v15 = vmax.f32 %v8012_v7, 0.0  ;;  %v10577_v33 = vmax.f32 %v8019_v54, 0.0  ;;  %v10579_v4 = vmax.f32 %v8027_v26, 0.0 }
 0x5fa   :  { %2782 = vrot.lane.b32.xlu1 %v10583_v63, %s5409_s0  ;;  %v10597_v11 = vmax.f32 %v8098_v48, 0.0 }
 0x5fb   :  { %3081 = vmatprep.subr.bf16.mxu0 %v2737_v53  ;;  %v10799_v53 = vld [vmem:[#allocation21_spill] sm:$0xff] }
 0x5fc   :  { %2796 = vrot.lane.b32.xlu0 %v10571_v18, %s5409_s0  ;;  %v8036_v0 = vadd.f32 %v10799_v53, %v7565_v45  ;;  %v10801_v18 = vld [vmem:[#allocation18_spill] sm:$0xff] }
 0x5fd   :  { %v8051_v41 = vadd.f32 %v10801_v18, %v7503_v47 }
 0x5fe   :  { %2798 = vrot.lane.b32.xlu1 %v10570_v39, %s5409_s0  ;;  %v8044_v39 = vadd.f32 %v10800_v23, %v7567_v1  ;;  %v10581_v53 = vmax.f32 %v8036_v0, 0.0 }
 0x5ff   :  { %v10589_v18 = vmax.f32 %v8051_v41, 0.0 }
 0x600   :  { %2764 = vrot.lane.b32.xlu0 %v10582_v13, %s5409_s0  ;;  %v10584_v23 = vmax.f32 %v8044_v39, 0.0  ;;  %v10805_v13 = vld [vmem:[#allocation29_spill] sm:$0xff] }
 0x601   :  { %v8083_v63 = vadd.f32 %v10805_v13, %v7509_v25  ;;  %v10809_v13 = vld [vmem:[#allocation11_spill] sm:$0xff] }
 0x602   :  { %2766 = vrot.lane.b32.xlu1 %v10580_v6, %s5409_s0 }
 0x603   :  { %10806 = vst [vmem:[#allocation16_spill] sm:$0xff] %v8083_v63  ;;  %v10595_v8 = vmax.f32 %v8083_v63, 0.0 }
 0x604   :  { %2784 = vrot.lane.b32.xlu0 %v10575_v51, %s5409_s0 }
 0x606   :  { %2786 = vrot.lane.b32.xlu1 %v10574_v15, %s5409_s0  ;;  %v10802_v15 = vld [vmem:[#allocation17_spill] sm:$0xff] }
 0x607   :  { %v8059_v51 = vadd.f32 %v10802_v15, %v7509_v25 }
 0x608   :  { %2800 = vrot.lane.b32.xlu0 %v10577_v33, %s5409_s0  ;;  %v10803_v33 = vld [vmem:[#allocation27_spill] sm:$0xff] }
 0x609   :  { %v8068_v42 = vadd.f32 %v10803_v33, %v7503_v47  ;;  %v10807_v33 = vld [vmem:[#allocation6_spill] sm:$0xff] }
 0x60a   :  { %v2609_v22 = vpop.permute.xlu0 %2608  ;;  %2802 = vrot.lane.b32.xlu1 %v10579_v4, %s5409_s0 }
 0x60b   :  { %10804 = vst [vmem:[#allocation24_spill] sm:$0xff] %v8068_v42  ;;  %v2672_v47 = vsel %vm94_vm1, %v2593_v19, %v2609_v22  ;;  %v10594_v25 = vmax.f32 %v8068_v42, 0.0 }
 0x60c   :  { %v2611_v16 = vpop.permute.xlu1 %2610  ;;  %2768 = vrot.lane.b32.xlu0 %v10581_v53, %s5409_s0  ;;  %v10592_v53 = vmax.f32 %v8059_v51, 0.0 }
 0x60d   :  { %v2673_v4 = vsel %vm94_vm1, %v2595_v58, %v2611_v16 }
 0x60e   :  { %v8072_v6 = vpop.permute.xlu0 %2624  ;;  %2770 = vrot.lane.b32.xlu1 %v10584_v23, %s5409_s0  ;;  %v2703_v23 = vmul.f32 %v2673_v4, %v10807_v33  ;;  %v2698_v4 = vmul.f32 %v2672_v47, %v10807_v33 }
 0x60f   :  { %v2664_v15 = vsel %vm94_vm1, %v2609_v22, %v8072_v6 }
 0x610   :  { %v8087_v58 = vpop.permute.xlu1 %2626  ;;  %2804 = vrot.lane.b32.xlu0 %v10589_v18, %s5409_s0  ;;  %v2699_v22 = vmul.f32 %v2664_v15, %v10809_v13  ;;  %v2738_v15 = vpack.c.bf16 %v2703_v23, %v2698_v4 }
 0x611   :  { %v2665_v50 = vsel %vm94_vm1, %v2611_v16, %v8087_v58  ;;  %v10810_v16 = vld [vmem:[#allocation12_spill] sm:$0xff] }
 0x612   :  { %v2704_v19 = vmul.f32 %v2665_v50, %v10809_v13  ;;  %v8103_v36 = vpop.permute.xlu0 %2580  ;;  %2806 = vrot.lane.b32.xlu1 %v10592_v53, %s5409_s0  ;;  %v8111_v18 = vadd.f32 %v10810_v16, %v7525_v29  ;;  %v10811_v53 = vld [vmem:[#allocation26_spill] sm:$0xff] }
 0x613   :  { %v8122_v44 = vadd.f32 %v10811_v53, %v7517_v37 }
 0x614   :  { %v8114_v3 = vpop.permute.xlu1 %2582  ;;  %2820 = vrot.lane.b32.xlu0 %v10594_v25, %s5409_s0  ;;  %v2739_v50 = vpack.c.bf16 %v2704_v19, %v2699_v22  ;;  %v10596_v16 = vmax.f32 %v8111_v18, 0.0  ;;  %v10813_v25 = vld [vmem:[#allocation28_spill] sm:$0xff] }
 0x615   :  { %10812 = vst [vmem:[#allocation20_spill] sm:$0xff] %v8122_v44  ;;  %v8132_v22 = vadd.f32 %v10813_v25, %v7525_v29  ;;  %v10598_v37 = vmax.f32 %v8122_v44, 0.0  ;;  %v10815_v29 = vld [vmem:[#allocation33_spill] sm:$0xff] }
 0x616   :  { %3154 = vmatprep.subr.bf16.mxu1 %v2739_v50  ;;  %v8124_v47 = vpop.permute.xlu0 %2596  ;;  %2822 = vrot.lane.b32.xlu1 %v10595_v8, %s5409_s0  ;;  %v8149_v25 = vadd.f32 %v10815_v29, %v7535_v55 }
 0x617   :  { %3155 = vmatpush1.bf16.msra.mxu1 %v2738_v15  ;;  %10814 = vst [vmem:[#allocation21_spill] sm:$0xff] %v8132_v22  ;;  %v10601_v19 = vmax.f32 %v8132_v22, 0.0 }
 0x618   :  { %v8134_v23 = vpop.permute.xlu1 %2598  ;;  %2808 = vrot.lane.b32.xlu0 %v10597_v11, %s5409_s0  ;;  %10816 = vst [vmem:[#allocation23_spill] sm:$0xff] %v8149_v25  ;;  %v10611_v56 = vmax.f32 %v8149_v25, 0.0 }
 0x61a   :  { %v2613_v53 = vpop.permute.xlu0 %2612  ;;  %2810 = vrot.lane.b32.xlu1 %v10596_v16, %s5409_s0  ;;  %v10817_v16 = vld [vmem:[#allocation35_spill] sm:$0xff] }
 0x61b   :  { %v8161_v11 = vadd.f32 %v10817_v16, %v7537_v20  ;;  %v2674_v55 = vsel %vm94_vm1, %v8124_v47, %v2613_v53 }
 0x61c   :  { %v2615_v4 = vpop.permute.xlu1 %2614  ;;  %2824 = vrot.lane.b32.xlu0 %v10598_v37, %s5409_s0  ;;  %v10819_v37 = vld [vmem:[#allocation10_spill] sm:$0xff] }
 0x61d   :  { %v2675_v50 = vsel %vm94_vm1, %v8134_v23, %v2615_v4  ;;  %10818 = vst [vmem:[#allocation18_spill] sm:$0xff] %v8161_v11  ;;  %v10820_v27 = vmax.f32 %v10819_v37, 0.0  ;;  %v2708_v37 = vmul.f32 %v2674_v55, %v10807_v33 }
 0x61e   :  { %v2629_v15 = vpop.permute.xlu0 %2628  ;;  %2826 = vrot.lane.b32.xlu1 %v10601_v19, %s5409_s0  ;;  %v2713_v17 = vmul.f32 %v2675_v50, %v10807_v33 }
 0x61f   :  { %v2666_v8 = vsel %vm94_vm1, %v2613_v53, %v2629_v15  ;;  %v10821_v53 = vld [vmem:[#allocation5_spill] sm:$0xff] }
 0x620   :  { %v2631_v29 = vpop.permute.xlu1 %2630  ;;  %2812 = vrot.lane.b32.xlu0 %v10820_v27, %s5409_s0  ;;  %v2709_v22 = vmul.f32 %v2666_v8, %v10809_v13  ;;  %v10822_v44 = vmax.f32 %v10821_v53, 0.0  ;;  %v10609_v27 = vmax.f32 %v8161_v11, 0.0  ;;  %v2743_v8 = vpack.c.bf16 %v2713_v17, %v2708_v37  ;;  %v10827_v17 = vld [vmem:[#allocation19_spill] sm:$0xff]  ;;  %v10829_v37 = vld [vmem:[#allocation22_spill] sm:$0xff] }
 0x621   :  { %v2667_v19 = vsel %vm94_vm1, %v2615_v4, %v2631_v29  ;;  %v10831_v11 = vld [vmem:[#allocation3_spill] sm:$0xff] }
 0x622   :  { %v2714_v20 = vmul.f32 %v2667_v19, %v10809_v13  ;;  %v8175_v16 = vpop.permute.xlu0 %2584  ;;  %2814 = vrot.lane.b32.xlu1 %v10822_v44, %s5409_s0  ;;  %v10823_v19 = vld [vmem:[#allocation32_spill] sm:$0xff]  ;;  %v10825_v44 = vld [vmem:[#allocation34_spill] sm:$0xff] }
 0x623   :  { %v8189_v63 = vadd.f32 %v10823_v19, %v7565_v45  ;;  %v8198_v55 = vadd.f32 %v10825_v44, %v7567_v1  ;;  %v2984_v1 = vld [vmem:[%s10442_s10] sm:$0xff] }
 0x624   :  { %v8182_v50 = vpop.permute.xlu1 %2586  ;;  %2828 = vrot.lane.b32.xlu0 %v10611_v56, %s5409_s0  ;;  %v2744_v4 = vpack.c.bf16 %v2714_v20, %v2709_v22  ;;  %v10828_v22 = vmax.f32 %v10827_v17, 0.0  ;;  %v2985_v17 = vld [vmem:[%s10442_s10 + $0x8] sm:$0xff] }
 0x625   :  { %10824 = vst [vmem:[#allocation17_spill] sm:$0xff] %v8189_v63  ;;  %10826 = vst [vmem:[#allocation27_spill] sm:$0xff] %v8198_v55  ;;  %v10608_v45 = vmax.f32 %v8189_v63, 0.0 }
 0x626   :  { %3156 = vmatprep.subr.bf16.mxu1 %v2744_v4  ;;  %v8191_v42 = vpop.permute.xlu0 %2600  ;;  %2830 = vrot.lane.b32.xlu1 %v10609_v27, %s5409_s0  ;;  %v10830_v4 = vmax.f32 %v10829_v37, 0.0  ;;  %v2986_v37 = vld [vmem:[%s10442_s10 + $0x10] sm:$0xff] }
 0x627   :  { %3157 = vmatpush1.bf16.msra.mxu1 %v2743_v8  ;;  %v10610_v8 = vmax.f32 %v8198_v55, 0.0 }
 0x628   :  { %v8200_v53 = vpop.permute.xlu1 %2602  ;;  %2816 = vrot.lane.b32.xlu0 %v10828_v22, %s5409_s0 }
 0x62a   :  { %v8206_v20 = vpop.permute.xlu0 %2616  ;;  %2818 = vrot.lane.b32.xlu1 %v10830_v4, %s5409_s0 }
 0x62c   :  { %v8212_v19 = vpop.permute.xlu1 %2618  ;;  %2832 = vrot.lane.b32.xlu0 %v10608_v45, %s5409_s0  ;;  %v2987_v45 = vld [vmem:[%s10442_s10 + $0x18] sm:$0xff] }
 0x62e   :  { %v8220_v44 = vpop.permute.xlu0 %2588  ;;  %2834 = vrot.lane.b32.xlu1 %v10610_v8, %s5409_s0  ;;  %v2988_v8 = vld [vmem:[%s10442_s10 + $0x20] sm:$0xff] }
 0x630   :  { %v8228_v22 = vpop.permute.xlu1 %2590  ;;  %2994 = vperm.xlu0 %5342, %v2984_v1  }
 0x632   :  { %v8233_v4 = vpop.permute.xlu0 %2604  ;;  %2999 = vperm.xlu1 %5344, %v2985_v17   ;;  %v2989_v17 = vld [vmem:[%s10442_s10 + $0x28] sm:$0xff] }
 0x634   :  { %v8238_v27 = vpop.permute.xlu1 %2606  ;;  %3004 = vperm.xlu0 %5342, %v2986_v37   ;;  %v2683_v37 = vsel %vm94_vm1, %v8114_v3, %v8134_v23 }
 0x636   :  { %v2645_v56 = vpop.permute.xlu0 %2644  ;;  %3009 = vperm.xlu1 %5344, %v2987_v45   ;;  %v2990_v45 = vld [vmem:[%s10442_s10 + $0x30] sm:$0xff] }
 0x637   :  { %v2658_v1 = vsel %vm94_vm1, %v2629_v15, %v2645_v56 }
 0x638   :  { %v2647_v55 = vpop.permute.xlu1 %2646  ;;  %3014 = vperm.xlu0 %5342, %v2988_v8   ;;  %v8258_v15 = vmul.f32 %v2658_v1, %v10831_v11  ;;  %v2712_v1 = vmul.f32 %v2683_v37, %v5617_v61  ;;  %v4461_v37 = vld [vmem:[%s10443_s14] sm:$0x1f] }
 0x639   :  { %v2659_v63 = vsel %vm94_vm1, %v2631_v29, %v2647_v55  ;;  %v2991_v29 = vld [vmem:[%s10442_s10 + $0x38] sm:$0xff] }
 0x63a   :  { %10832 = vst [vmem:[#allocation29_spill] sm:$0xff] %v8258_v15  ;;  %v8261_v25 = vmul.f32 %v2659_v63, %v10831_v11  ;;  %v2641_v34 = vpop.permute.xlu0 %2640  ;;  %3019 = vperm.xlu1 %5344, %v2989_v17   ;;  %v2682_v63 = vsel %vm94_vm1, %v8103_v36, %v8124_v47 }
 0x63b   :  { %v2656_v8 = vsel %vm94_vm1, %v8072_v6, %v2641_v34  ;;  %v2688_v23 = vsel %vm94_vm1, %v2641_v34, %v7924_v43  ;;  %v2685_v34 = vsel %vm94_vm1, %v8182_v50, %v8200_v53  ;;  %v2691_v43 = vsel %vm94_vm1, %v2647_v55, %v8114_v3 }
 0x63c   :  { %10833 = vst [vmem:[#allocation6_spill] sm:$0xff] %v8261_v25  ;;  %v2643_v10 = vpop.permute.xlu1 %2642  ;;  %3024 = vperm.xlu0 %5342, %v2990_v45   ;;  %v10834_v45 = vld [vmem:[#allocation15_spill] sm:$0xff]  ;;  %v8297_v15 = vmul.f32 %v2656_v8, %v10831_v11 }
 0x63d   :  { %v2657_v6 = vsel %vm94_vm1, %v8087_v58, %v2643_v10  ;;  %v2689_v47 = vsel %vm94_vm1, %v2643_v10, %v7934_v52  ;;  %v2696_v17 = vmul.f32 %v2688_v23, %v10834_v45  ;;  %v2707_v58 = vmul.f32 %v2682_v63, %v5617_v61 }
 0x63e   :  { %v2701_v25 = vmul.f32 %v2689_v47, %v10834_v45  ;;  %v8301_v3 = vmul.f32 %v2657_v6, %v10831_v11  ;;  %v8303_v55 = vpop.permute.xlu0 %2652  ;;  %3029 = vperm.xlu1 %5344, %v2991_v29   ;;  %v2690_v10 = vsel %vm94_vm1, %v2645_v56, %v8103_v36  ;;  %v2684_v52 = vsel %vm94_vm1, %v8175_v16, %v8191_v42 }
 0x63f   :  { %v2711_v8 = vmul.f32 %v2691_v43, %v10834_v45  ;;  %v2722_v29 = vmul.f32 %v2685_v34, %v5617_v61  ;;  %v2742_v63 = vpack.c.bf16 %v2712_v1, %v2707_v58  ;;  %v2687_v36 = vsel %vm94_vm1, %v8228_v22, %v8238_v27 }
 0x640   :  { %v2736_v23 = vpack.c.bf16 %v2701_v25, %v2696_v17  ;;  %v2740_v6 = vpack.c.bf16 %v8301_v3, %v8297_v15  ;;  %v8316_v47 = vpop.permute.xlu1 %2654  ;;  %4464 = vperm.xlu0 %5342, %v4461_v37   ;;  %v2706_v56 = vmul.f32 %v2690_v10, %v10834_v45  ;;  %v2717_v25 = vmul.f32 %v2684_v52, %v5617_v61  ;;  %v8584_v3 = vld [vmem:[%s10441_s9 + $0x10] ss:$8 sps:$4 sm:$0xff]  }
 0x641   :  { %v2686_v1 = vsel %vm94_vm1, %v8220_v44, %v8233_v4  ;;  %v2732_v37 = vmul.f32 %v2687_v36, %v5617_v61  ;;  %v2695_v58 = vsel %vm94_vm1, %v8316_v47, %v8228_v22  ;;  %v2677_v52 = vsel %vm94_vm1, %v8200_v53, %v8212_v19 }
 0x642   :  { %3082 = vmatpush1.bf16.msra.mxu0 %v2736_v23  ;;  %v8324_v11 = vpop.permute.xlu0 %2648  ;;  %v2741_v34 = vpack.c.bf16 %v2711_v8, %v2706_v56  ;;  %v2747_v10 = vpack.c.bf16 %v2722_v29, %v2717_v25  ;;  %v2727_v22 = vmul.f32 %v2686_v1, %v5617_v61  ;;  %v2676_v53 = vsel %vm94_vm1, %v8191_v42, %v8206_v20 }
 0x643   :  { %v2692_v17 = vsel %vm94_vm1, %v8324_v11, %v8175_v16  ;;  %3083 = vmatprep.subr.bf16.mxu0 %v2742_v63  ;;  %v2731_v36 = vmul.f32 %v2695_v58, %v10834_v45  ;;  %v2723_v25 = vmul.f32 %v2677_v52, %v10807_v33 }
 0x644   :  { %v8335_v43 = vpop.permute.xlu1 %2650  ;;  %v2716_v8 = vmul.f32 %v2692_v17, %v10834_v45  ;;  %v2752_v17 = vpack.c.bf16 %v2732_v37, %v2727_v22 }
 0x645   :  { %v2693_v16 = vsel %vm94_vm1, %v8335_v43, %v8182_v50  ;;  %v2694_v50 = vsel %vm94_vm1, %v8303_v55, %v8220_v44 }
 0x646   :  { %v2721_v23 = vmul.f32 %v2693_v16, %v10834_v45  ;;  %3084 = vmatpush1.bf16.msra.mxu0 %v2741_v34  ;;  %v8352_v63 = vpop.permute.xlu0 %2632  ;;  %v2726_v1 = vmul.f32 %v2694_v50, %v10834_v45 }
 0x647   :  { %v2668_v29 = vsel %vm94_vm1, %v8206_v20, %v8352_v63  ;;  %3085 = vmatprep.subr.bf16.mxu0 %v2747_v10  ;;  %v2718_v20 = vmul.f32 %v2676_v53, %v10807_v33 }
 0x648   :  { %v2746_v56 = vpack.c.bf16 %v2721_v23, %v2716_v8  ;;  %v8368_v61 = vpop.permute.xlu1 %2634  ;;  %v2719_v34 = vmul.f32 %v2668_v29, %v10809_v13  ;;  %v2751_v58 = vpack.c.bf16 %v2731_v36, %v2726_v1  ;;  %v10835_v8 = vmax.f32 %v7846_v46, 0.0 }
 0x649   :  { %v2669_v44 = vsel %vm94_vm1, %v8212_v19, %v8368_v61  ;;  %v10836_v23 = vmax.f32 %v7851_v59, 0.0  ;;  %v2748_v37 = vpack.c.bf16 %v2723_v25, %v2718_v20  ;;  %v10837_v46 = vmax.f32 %v7871_v24, 0.0 }
 0x64a   :  { %v2724_v16 = vmul.f32 %v2669_v44, %v10809_v13  ;;  %3086 = vmatpush1.bf16.msra.mxu0 %v2746_v56  ;;  %v2621_v42 = vpop.permute.xlu0 %2620  ;;  %v10838_v59 = vmax.f32 %v7879_v32, 0.0  ;;  %v10839_v36 = vmax.f32 %v7887_v62, 0.0  ;;  %v10840_v56 = vmax.f32 %v7895_v9, 0.0 }
 0x64b   :  { %3087 = vmatprep.subr.bf16.mxu0 %v2752_v17  ;;  %v8383_v19 = vpack.c.bf16 %v10836_v23, %v10835_v8  ;;  %v10841_v9 = vmax.f32 %v7919_v2, 0.0  ;;  %v10843_v20 = vmax.f32 %v7944_v14, 0.0  ;;  %v10848_v14 = vmax.f32 %v7996_v30, 0.0 }
 0x64c   :  { %v2623_v10 = vpop.permute.xlu1 %2622  ;;  %v2749_v52 = vpack.c.bf16 %v2724_v16, %v2719_v34  ;;  %v8398_v29 = vpack.c.bf16 %v10838_v59, %v10837_v46  ;;  %v8409_v25 = vpack.c.bf16 %v10840_v56, %v10839_v36  ;;  %v10850_v23 = vmax.f32 %v7862_v31, 0.0 }
 0x64d   :  { %v2679_v45 = vsel %vm94_vm1, %v8238_v27, %v2623_v10  ;;  %v2678_v27 = vsel %vm94_vm1, %v8233_v4, %v2621_v42  ;;  %v10842_v4 = vmax.f32 %v7929_v28, 0.0  ;;  %v10847_v28 = vmax.f32 %v7988_v38, 0.0 }
 0x64e   :  { %3088 = vmatpush1.bf16.msra.mxu0 %v2751_v58  ;;  %3158 = vmatprep.subr.bf16.mxu1 %v2749_v52  ;;  %v8388_v22 = vpop.permute.xlu0 %2636  ;;  %v2733_v44 = vmul.f32 %v2679_v45, %v10807_v33  ;;  %v2728_v62 = vmul.f32 %v2678_v27, %v10807_v33  ;;  %v10845_v33 = vmax.f32 %v8051_v41, 0.0  ;;  %v10846_v52 = vmax.f32 %v8059_v51, 0.0 }
 0x64f   :  { %v2670_v50 = vsel %vm94_vm1, %v2621_v42, %v8388_v22  ;;  %3089 = vmatprep.subr.bf16.mxu0 %v8383_v19  ;;  %3159 = vmatpush1.bf16.msra.mxu1 %v2748_v37  ;;  %v8426_v34 = vpack.c.bf16 %v10842_v4, %v10841_v9  ;;  %v10849_v51 = vmax.f32 %v7856_v40, 0.0  ;;  %v10851_v45 = vmax.f32 %v8004_v12, 0.0  ;;  %v10865_v9 = vld [vmem:[#allocation25_spill] sm:$0xff] }
 0x650   :  { %v8403_v53 = vpop.permute.xlu1 %2638  ;;  %v2729_v32 = vmul.f32 %v2670_v50, %v10809_v13  ;;  %v8440_v8 = vpack.c.bf16 %v10846_v52, %v10845_v33  ;;  %v10852_v50 = vmax.f32 %v8012_v7, 0.0  ;;  %v10853_v38 = vmax.f32 %v8098_v48, 0.0  ;;  %v10870_v33 = vld [vmem:[#allocation43_spill] sm:$0xff] }
 0x651   :  { %v2671_v24 = vsel %vm94_vm1, %v2623_v10, %v8403_v53  ;;  %v2753_v10 = vpack.c.bf16 %v2733_v44, %v2728_v62  ;;  %v8459_v37 = vpack.c.bf16 %v10850_v23, %v10849_v51  ;;  %v10854_v30 = vmax.f32 %v8111_v18, 0.0  ;;  %v10859_v44 = vld [vmem:[#allocation31_spill] sm:$0xff]  ;;  %v10864_v62 = vld [vmem:[#allocation37_spill] sm:$0xff] }
 0x652   :  { %v2734_v17 = vmul.f32 %v2671_v24, %v10809_v13  ;;  %v8417_v1 = vpop.permute.xlu0 %2772  ;;  %3090 = vmatpush1.bf16.msra.mxu0 %v8398_v29  ;;  %v10844_v13 = vmax.f32 %v7956_v35, 0.0  ;;  %v8450_v35 = vpack.c.bf16 %v10848_v14, %v10847_v28  ;;  %v8465_v46 = vpack.c.bf16 %v10852_v50, %v10851_v45  ;;  %v10871_v14 = vld [vmem:[#allocation38_spill] sm:$0xff]  ;;  %v10874_v51 = vld [vmem:[#allocation47_spill] sm:$0xff] }
 0x653   :  { %3091 = vmatprep.subr.bf16.mxu0 %v8409_v25  ;;  %v8471_v59 = vpack.c.bf16 %v10854_v30, %v10853_v38  ;;  %v10855_v40 = vmax.f32 %v8036_v0, 0.0  ;;  %v10856_v31 = vmax.f32 %v8044_v39, 0.0  ;;  %v10857_v7 = vmax.f32 %v7902_v5, 0.0  ;;  %v10860_v39 = vld [vmem:[#allocation2_spill] sm:$0xff]  ;;  %v10875_v38 = vld [vmem:[#allocation40_spill] sm:$0xff] }
 0x654   :  { %v8428_v16 = vpop.permute.xlu1 %2774  ;;  %v2754_v42 = vpack.c.bf16 %v2734_v17, %v2729_v32  ;;  %v8434_v58 = vpack.c.bf16 %v10844_v13, %v10843_v20  ;;  %v10858_v18 = vmax.f32 %v7910_v21, 0.0  ;;  %v10861_v24 = vmax.f32 %v7966_v60, 0.0  ;;  %v10863_v17 = vld [vmem:[#allocation30_spill] sm:$0xff]  ;;  %v10868_v13 = vld [vmem:[#allocation36_spill] sm:$0xff] }
 0x655   :  { %v8482_v12 = vpack.c.bf16 %v10856_v31, %v10855_v40  ;;  %v10862_v5 = vmax.f32 %v7979_v49, 0.0  ;;  %v10867_v60 = vmax.f32 %v8027_v26, 0.0  ;;  %v10873_v26 = vld [vmem:[#allocation42_spill] sm:$0xff]  ;;  %v8548_v30 = vld [vmem:[%s10441_s9 + $0x14] ss:$8 sps:$4 sm:$0xff]   ;;  %v10877_v31 = vmov 0  }
 0x656   :  { %3160 = vmatprep.subr.bf16.mxu1 %v2754_v42  ;;  %v8442_v2 = vpop.permute.xlu0 %2788  ;;  %3092 = vmatpush1.bf16.msra.mxu0 %v8426_v34  ;;  %v8491_v36 = vpack.c.bf16 %v10858_v18, %v10857_v7  ;;  %v10866_v42 = vmax.f32 %v8019_v54, 0.0  ;;  %v10872_v54 = vld [vmem:[#allocation41_spill] sm:$0xff]  ;;  %v8540_v45 = vld [vmem:[%s10441_s9] ss:$8 sps:$4 sm:$0xff]   ;;  %v2663_v15 = vsel %vm94_vm1, %v8403_v53, %v8316_v47 }
 0x657   :  { %3093 = vmatprep.subr.bf16.mxu0 %v8434_v58  ;;  %3161 = vmatpush1.bf16.msra.mxu1 %v2753_v10  ;;  %v8505_v32 = vpack.c.bf16 %v10862_v5, %v10861_v24  ;;  %v10869_v10 = vld [vmem:[#allocation39_spill] sm:$0xff]  ;;  %v10876_v40 = vld [vmem:[#allocation46_spill] sm:$0xff]  ;;  %v2661_v24 = vsel %vm94_vm1, %v8368_v61, %v8335_v43 }
 0x658   :  { %3162 = vmatprep.subr.bf16.mxu1 %v8440_v8  ;;  %v8453_v41 = vpop.permute.xlu1 %2790  ;;  %v8519_v20 = vpack.c.bf16 %v10867_v60, %v10866_v42  ;;  %v10878_v7 = vld [vmem:[#allocation51_spill] sm:$0xff]  ;;  %v2660_v42 = vsel %vm94_vm1, %v8352_v63, %v8324_v11  ;;  %v10879_v60 = vld [vmem:[#allocation50_spill] sm:$0xff] }
 0x659   :  { %v10880_v43 = vld [vmem:[#allocation3_spill] sm:$0xff]  ;;  %v10882_v63 = vld [vmem:[#allocation6_spill] sm:$0xff] }
 0x65a   :  { %v8473_v27 = vpop.permute.xlu0 %2756  ;;  %3094 = vmatpush1.bf16.msra.mxu0 %v8450_v35  ;;  %v2725_v61 = vmul.f32 %v2661_v24, %v10880_v43  ;;  %v2720_v11 = vmul.f32 %v2660_v42, %v10880_v43  ;;  %v10883_v24 = vld [vmem:[#allocation29_spill] sm:$0xff]  ;;  %v2735_v53 = vmul.f32 %v2663_v15, %v10880_v43  ;;  %v8605_v42 = vld [vmem:[%s10441_s9 + $0x24] ss:$8 sps:$4 sm:$0xff]  }
 0x65b   :  { %3095 = vmatprep.subr.bf16.mxu0 %v8465_v46  ;;  %3163 = vmatpush1.bf16.msra.mxu1 %v8459_v37 }
 0x65c   :  { %3164 = vmatprep.subr.bf16.mxu1 %v8471_v59  ;;  %v8485_v48 = vpop.permute.xlu1 %2758  ;;  %v2750_v47 = vpack.c.bf16 %v2725_v61, %v2720_v11  ;;  %v10888_v61 = vld [vmem:[#allocation16_spill] sm:$0xff] }
 0x65d   :  { %v10889_v15 = vmax.f32 %v10888_v61, 0.0  ;;  %v8673_v61 = vld [vmem:[%s10441_s9 + $0x30] ss:$8 sps:$4 sm:$0xff]  }
 0x65e   :  { %v8493_v56 = vpop.permute.xlu0 %2776  ;;  %3096 = vmatpush1.bf16.msra.mxu0 %v8482_v12 }
 0x65f   :  { %3097 = vmatprep.subr.bf16.mxu0 %v10859_v44  ;;  %3165 = vmatpush1.bf16.msra.mxu1 %v8491_v36 }
 0x660   :  { %3166 = vmatprep.subr.bf16.mxu1 %v10860_v39  ;;  %v8499_v0 = vpop.permute.xlu1 %2778 }
 0x662   :  { %v8507_v21 = vpop.permute.xlu0 %2792  ;;  %3098 = vmatpush1.bf16.msra.mxu0 %v10863_v17 }
 0x663   :  { %3099 = vmatprep.subr.bf16.mxu0 %v10864_v62  ;;  %3167 = vmatpush1.bf16.msra.mxu1 %v8505_v32 }
 0x664   :  { %3168 = vmatprep.subr.bf16.mxu1 %v10865_v9  ;;  %v8513_v4 = vpop.permute.xlu1 %2794 }
 0x666   :  { %v8521_v49 = vpop.permute.xlu0 %2760  ;;  %3100 = vmatpush1.bf16.msra.mxu0 %v10868_v13 }
 0x667   :  { %3101 = vmatprep.subr.bf16.mxu0 %v10869_v10  ;;  %3169 = vmatpush1.bf16.msra.mxu1 %v8519_v20 }
 0x668   :  { %3170 = vmatprep.subr.bf16.mxu1 %v10870_v33  ;;  %v8527_v52 = vpop.permute.xlu1 %2762 }
 0x66a   :  { %v8529_v28 = vpop.permute.xlu0 %2780  ;;  %3102 = vmatpush1.bf16.msra.mxu0 %v10871_v14 }
 0x66b   :  { %3103 = vmatprep.subr.bf16.mxu0 %v10872_v54  ;;  %3171 = vmatpush1.bf16.msra.mxu1 %v10873_v26 }
 0x66c   :  { %3172 = vmatprep.subr.bf16.mxu1 %v10874_v51  ;;  %v8535_v23 = vpop.permute.xlu1 %2782  ;;  %v10885_v51 = vld [vmem:[#allocation52_spill] sm:$0xff] }
 0x66e   :  { %v8542_v50 = vpop.permute.xlu0 %2796  ;;  %3104 = vmatpush1.bf16.msra.mxu0 %v10875_v38 }
 0x66f   :  { %3173 = vmatpush1.bf16.msra.mxu1 %v10876_v40  ;;  %3227 = vmatprep.subr.bf16.mxu0 %v10877_v31 }
 0x670   :  { %3174 = vmatprep.subr.bf16.mxu1 %v10878_v7  ;;  %v8553_v18 = vpop.permute.xlu1 %2798  ;;  %v10881_v7 = vld [vmem:[#allocation53_spill] sm:$0xff] }
 0x671   :  { %3114 = vmatmul.mubr.bf16.vlgmr.msra.gmra.mrb[76].mxu0 %v8540_v45 }
 0x672   :  { %v8560_v5 = vpop.permute.xlu0 %2764  ;;  %3228 = vmatpush1.bf16.msra.mxu0 %v2740_v6  ;;  %4899 = vmatprep.mubr.msk.bf16.mxu0 %vm3068_vm4, %v8548_v30 }
 0x673   :  { %3175 = vmatpush1.bf16.msra.mxu1 %v10879_v60  ;;  %3229 = vmatprep.subr.bf16.mxu0 %v10877_v31  ;;  %v10884_v60 = vpack.c.bf16 %v10882_v63, %v10883_v24  ;;  %v8642_v24 = vld [vmem:[%s10441_s9 + $0x34] ss:$8 sps:$4 sm:$0xff]  }
 0x674   :  { %3176 = vmatprep.subr.bf16.mxu1 %v10881_v7  ;;  %v8575_v40 = vpop.permute.xlu1 %2766  ;;  %v2662_v7 = vsel %vm94_vm1, %v8388_v22, %v8303_v55 }
 0x675   :  { %v2730_v55 = vmul.f32 %v2662_v7, %v10880_v43  ;;  %v8622_v7 = vld [vmem:[%s10441_s9 + $0x20] ss:$8 sps:$4 sm:$0xff]  }
 0x676   :  { %v8587_v6 = vpop.permute.xlu0 %2784  ;;  %3230 = vmatpush1.bf16.msra.mxu0 %v10884_v60 }
 0x677   :  { %3177 = vmatpush1.bf16.msra.mxu1 %v10885_v51  ;;  %3231 = vmatprep.subr.bf16.mxu0 %v10877_v31  ;;  %v2755_v60 = vpack.c.bf16 %v2735_v53, %v2730_v55  ;;  %v10893_v55 = vld [vmem:[#allocation21_spill] sm:$0xff] }
 0x678   :  { %v8599_v26 = vpop.permute.xlu1 %2786  ;;  %3292 = vmatprep.subr.bf16.mxu1 %v8383_v19 }
 0x679   :  { %3124 = vmatmul.mubr.bf16.gmra.mrb[80].mxu0 %v8584_v3 }
 0x67a   :  { %3187 = vmatmul.mubr.bf16.vlgmr.msra.gmra.mrb[84].mxu1 %v8540_v45  ;;  %v8610_v22 = vpop.permute.xlu0 %2800  ;;  %3232 = vmatpush1.bf16.msra.mxu0 %v2750_v47 }
 0x67b   :  { %3293 = vmatpush1.bf16.msra.mxu1 %v8398_v29  ;;  %3233 = vmatprep.subr.bf16.mxu0 %v10877_v31  ;;  %v10886_v29 = vld [vmem:[#allocation24_spill] sm:$0xff] }
 0x67c   :  { %v8614_v19 = vpop.permute.xlu1 %2802  ;;  %3294 = vmatprep.subr.bf16.mxu1 %v8409_v25  ;;  %4900 = vmatprep.mubr.msk.bf16.mxu0 %vm3068_vm4, %v8605_v42  ;;  %v10887_v25 = vmax.f32 %v10886_v29, 0.0 }
 0x67d   :  { %4903 = vmatprep.mubr.msk.bf16.mxu1 %vm3068_vm4, %v8548_v30 }
 0x67e   :  { %v8626_v43 = vpop.permute.xlu0 %2768  ;;  %3234 = vmatpush1.bf16.msra.mxu0 %v2755_v60  ;;  %v8634_v11 = vpack.c.bf16 %v10889_v15, %v10887_v25  ;;  %v10894_v60 = vmax.f32 %v10893_v55, 0.0  ;;  %v10896_v15 = vld [vmem:[#allocation9_spill] sm:$0xff] }
 0x67f   :  { %3295 = vmatpush1.bf16.msra.mxu1 %v8426_v34  ;;  %3235 = vmatprep.subr.bf16.mxu0 %v10877_v31 }
 0x680   :  { %v8636_v63 = vpop.permute.xlu1 %2770  ;;  %3296 = vmatprep.subr.bf16.mxu1 %v8434_v58  ;;  %v10891_v58 = vld [vmem:[#allocation20_spill] sm:$0xff] }
 0x681   :  { %3134 = vmatmul.mubr.bf16.gmra.mrb[84].mxu0 %v8622_v7  ;;  %v10892_v53 = vmax.f32 %v10891_v58, 0.0 }
 0x682   :  { %3197 = vmatmul.mubr.bf16.gmra.mrb[88].mxu1 %v8584_v3  ;;  %v8646_v34 = vpop.permute.xlu0 %2804  ;;  %3236 = vmatpush1.bf16.msra.mxu0 %v8634_v11 }
 0x683   :  { %10890 = vst [vmem:[#allocation8_spill] sm:$0xff] %v8646_v34  ;;  %v2844_v47 = vsel %vm167_vm0, %v8442_v2, %v8646_v34  ;;  %3297 = vmatpush1.bf16.msra.mxu1 %v8450_v35  ;;  %3237 = vmatprep.subr.bf16.mxu0 %v10877_v31  ;;  %v8659_v29 = vpack.c.bf16 %v10894_v60, %v10892_v53  ;;  %v10900_v60 = vld [vmem:[#allocation23_spill] sm:$0xff] }
 0x684   :  { %v8661_v25 = vpop.permute.xlu1 %2806  ;;  %3298 = vmatprep.subr.bf16.mxu1 %v8465_v46  ;;  %4901 = vmatprep.mubr.msk.bf16.mxu0 %vm3068_vm4, %v8642_v24  ;;  %v8678_v58 = vmul.f32 %v2844_v47, %v10896_v15  ;;  %v10901_v51 = vmax.f32 %v10900_v60, 0.0  ;;  %v10902_v47 = vld [vmem:[#allocation18_spill] sm:$0xff] }
 0x685   :  { %10895 = vst [vmem:[#allocation11_spill] sm:$0xff] %v8661_v25  ;;  %v2845_v35 = vsel %vm167_vm0, %v8453_v41, %v8661_v25  ;;  %4904 = vmatprep.mubr.msk.bf16.mxu1 %vm3068_vm4, %v8605_v42  ;;  %v10903_v34 = vmax.f32 %v10902_v47, 0.0 }
 0x686   :  { %10897 = vst [vmem:[#allocation12_spill] sm:$0xff] %v8678_v58  ;;  %v8681_v46 = vmul.f32 %v2845_v35, %v10896_v15  ;;  %v8683_v53 = vpop.permute.xlu0 %2820  ;;  %3238 = vmatpush1.bf16.msra.mxu0 %v8659_v29  ;;  %v10909_v35 = vld [vmem:[#allocation27_spill] sm:$0xff] }
 0x687   :  { %10899 = vst [vmem:[#allocation28_spill] sm:$0xff] %v8683_v53  ;;  %v2868_v55 = vsel %vm167_vm0, %v8683_v53, %v8473_v27  ;;  %3299 = vmatpush1.bf16.msra.mxu1 %v8482_v12  ;;  %3239 = vmatprep.subr.bf16.mxu0 %v10877_v31  ;;  %v8696_v25 = vpack.c.bf16 %v10903_v34, %v10901_v51  ;;  %v10904_v53 = vld [vmem:[#allocation4_spill] sm:$0xff]  ;;  %v10910_v58 = vmax.f32 %v10909_v35, 0.0 }
 0x688   :  { %10898 = vst [vmem:[#allocation26_spill] sm:$0xff] %v8681_v46  ;;  %v8700_v15 = vpop.permute.xlu1 %2822  ;;  %3300 = vmatprep.subr.bf16.mxu1 %v10859_v44  ;;  %v8709_v60 = vmul.f32 %v2868_v55, %v10904_v53  ;;  %v10907_v44 = vld [vmem:[#allocation17_spill] sm:$0xff] }
 0x689   :  { %v2869_v12 = vsel %vm167_vm0, %v8700_v15, %v8485_v48  ;;  %3144 = vmatmul.mubr.bf16.gmra.mrb[88].mxu0 %v8673_v61  ;;  %v10908_v47 = vmax.f32 %v10907_v44, 0.0  ;;  %v10912_v44 = vld [vmem:[#allocation7_spill] sm:$0xff] }
 0x68a   :  { %10905 = vst [vmem:[#allocation33_spill] sm:$0xff] %v8709_v60  ;;  %v8712_v51 = vmul.f32 %v2869_v12, %v10904_v53  ;;  %3207 = vmatmul.mubr.bf16.gmra.mrb[92].mxu1 %v8622_v7  ;;  %v8715_v34 = vpop.permute.xlu0 %2808  ;;  %3240 = vmatpush1.bf16.msra.mxu0 %v8696_v25 }
 0x68b   :  { %10906 = vst [vmem:[#allocation35_spill] sm:$0xff] %v8715_v34  ;;  %3301 = vmatpush1.bf16.msra.mxu1 %v10863_v17  ;;  %3241 = vmatprep.subr.bf16.mxu0 %v10877_v31  ;;  %v8724_v46 = vpack.c.bf16 %v10910_v58, %v10908_v47  ;;  %v10911_v34 = vld [vmem:[#allocation54_spill] sm:$0xff]  ;;  %v2853_v17 = vsel %vm167_vm0, %v8428_v16, %v8453_v41 }
 0x68c   :  { %v8728_v12 = vpop.permute.xlu1 %2810  ;;  %3302 = vmatprep.subr.bf16.mxu1 %v10864_v62  ;;  %4905 = vmatprep.mubr.msk.bf16.mxu1 %vm3068_vm4, %v8642_v24  ;;  %v2852_v41 = vsel %vm167_vm0, %v8417_v1, %v8442_v2  ;;  %v2882_v47 = vmul.f32 %v2853_v17, %v10912_v44  ;;  %v10913_v2 = vld [vmem:[#allocation45_spill] sm:$0xff]  ;;  %v2855_v17 = vsel %vm167_vm0, %v8499_v0, %v8513_v4 }
 0x68d   :  { %4906 = vmatprep.mubr.msk.bf16.mxu0 %vm3068_vm4, %v10911_v34 }
 0x68e   :  { %v8739_v58 = vpop.permute.xlu0 %2824  ;;  %3242 = vmatpush1.bf16.msra.mxu0 %v8724_v46 }
 0x68f   :  { %v2870_v62 = vsel %vm167_vm0, %v8739_v58, %v8521_v49  ;;  %3303 = vmatpush1.bf16.msra.mxu1 %v10868_v13  ;;  %3243 = vmatprep.subr.bf16.mxu0 %v10877_v31  ;;  %v2861_v13 = vsel %vm167_vm0, %v8485_v48, %v8428_v16  ;;  %v2877_v16 = vmul.f32 %v2852_v41, %v10912_v44 }
 0x690   :  { %v8748_v35 = vpop.permute.xlu1 %2826  ;;  %3304 = vmatprep.subr.bf16.mxu1 %v10869_v10  ;;  %v8765_v60 = vmul.f32 %v2870_v62, %v10904_v53  ;;  %v2860_v48 = vsel %vm167_vm0, %v8473_v27, %v8417_v1  ;;  %v10914_v62 = vld [vmem:[#allocation14_spill] sm:$0xff]  ;;  %v2892_v41 = vmul.f32 %v2855_v17, %v10912_v44  ;;  %v2863_v1 = vsel %vm167_vm0, %v8527_v52, %v8499_v0  ;;  %v10915_v27 = vld [vmem:[#allocation44_spill] sm:$0xff] }
 0x691   :  { %v2871_v55 = vsel %vm167_vm0, %v8748_v35, %v8527_v52  ;;  %v2862_v0 = vsel %vm167_vm0, %v8521_v49, %v8493_v56  ;;  %v2856_v17 = vsel %vm167_vm0, %v8529_v28, %v8542_v50  ;;  %v2859_v49 = vsel %vm167_vm0, %v8599_v26, %v8614_v19 }
 0x692   :  { %v8768_v10 = vmul.f32 %v2871_v55, %v10904_v53  ;;  %3217 = vmatmul.mubr.bf16.gmra.mrb[96].mxu1 %v8673_v61  ;;  %3244 = vmatpush1.bf16.msra.mxu0 %v10913_v2  ;;  %v2881_v53 = vmul.f32 %v2861_v13, %v10914_v62  ;;  %v2876_v55 = vmul.f32 %v2860_v48, %v10914_v62  ;;  %v10916_v48 = vld [vmem:[#allocation49_spill] sm:$0xff] }
 0x693   :  { %3305 = vmatpush1.bf16.msra.mxu1 %v10871_v14  ;;  %3245 = vmatprep.subr.bf16.mxu0 %v10877_v31  ;;  %v2854_v14 = vsel %vm167_vm0, %v8493_v56, %v8507_v21  ;;  %v2886_v56 = vmul.f32 %v2862_v0, %v10914_v62 }
 0x694   :  { %3306 = vmatprep.subr.bf16.mxu1 %v10872_v54  ;;  %4910 = vmatprep.mubr.msk.bf16.mxu1 %vm3068_vm4, %v10911_v34  ;;  %v2917_v54 = vpack.c.bf16 %v2882_v47, %v2877_v16  ;;  %v2857_v34 = vsel %vm167_vm0, %v8535_v23, %v8553_v18  ;;  %v2887_v13 = vmul.f32 %v2854_v14, %v10912_v44 }
 0x695   :  { %v2916_v52 = vpack.c.bf16 %v2881_v53, %v2876_v55  ;;  %v2891_v47 = vmul.f32 %v2863_v1, %v10914_v62  ;;  %v2865_v16 = vsel %vm167_vm0, %v8575_v40, %v8535_v23  ;;  %v2897_v53 = vmul.f32 %v2856_v17, %v10912_v44 }
 0x696   :  { %3246 = vmatpush1.bf16.msra.mxu0 %v10915_v27  ;;  %v2922_v14 = vpack.c.bf16 %v2892_v41, %v2887_v13  ;;  %v2864_v23 = vsel %vm167_vm0, %v8560_v5, %v8529_v28  ;;  %v2901_v41 = vmul.f32 %v2865_v16, %v10914_v62  ;;  %v2858_v1 = vsel %vm167_vm0, %v8587_v6, %v8610_v22  ;;  %v10917_v13 = vld [vmem:[#allocation48_spill] sm:$0xff] }
 0x697   :  { %3307 = vmatpush1.bf16.msra.mxu1 %v10875_v38  ;;  %3247 = vmatprep.subr.bf16.mxu0 %v10877_v31  ;;  %v2902_v38 = vmul.f32 %v2857_v34, %v10912_v44  ;;  %v2921_v55 = vpack.c.bf16 %v2891_v47, %v2886_v56  ;;  %v2867_v34 = vsel %vm167_vm0, %v8636_v63, %v8599_v26 }
 0x698   :  { %3308 = vmatprep.subr.bf16.mxu1 %v2917_v54  ;;  %v2912_v54 = vmul.f32 %v2859_v49, %v10912_v44  ;;  %v2896_v28 = vmul.f32 %v2864_v23, %v10914_v62  ;;  %v2866_v47 = vsel %vm167_vm0, %v8626_v43, %v8587_v6  ;;  %v2911_v16 = vmul.f32 %v2867_v34, %v10914_v62  ;;  %v10921_v6 = vld [vmem:[#allocation46_spill] sm:$0xff]  ;;  %v10927_v23 = vld [vmem:[#allocation53_spill] sm:$0xff]  ;;  %v10929_v34 = vld [vmem:[#allocation52_spill] sm:$0xff] }
 0x699   :  { %v2927_v0 = vpack.c.bf16 %v2902_v38, %v2897_v53  ;;  %v10925_v38 = vld [vmem:[#allocation13_spill] sm:$0xff] }
 0x69a   :  { %3248 = vmatpush1.bf16.msra.mxu0 %v10916_v48  ;;  %v2926_v17 = vpack.c.bf16 %v2901_v41, %v2896_v28  ;;  %v10930_v28 = vld [vmem:[#allocation9_spill] sm:$0xff] }
 0x69b   :  { %3309 = vmatpush1.bf16.msra.mxu1 %v2916_v52  ;;  %3249 = vmatprep.subr.bf16.mxu0 %v10877_v31  ;;  %v2907_v52 = vmul.f32 %v2858_v1, %v10912_v44 }
 0x69c   :  { %3310 = vmatprep.subr.bf16.mxu1 %v2922_v14 }
 0x69d   :  { %v2932_v26 = vpack.c.bf16 %v2912_v54, %v2907_v52 }
 0x69e   :  { %3250 = vmatpush1.bf16.msra.mxu0 %v10917_v13 }
 0x69f   :  { %3311 = vmatpush1.bf16.msra.mxu1 %v2921_v55  ;;  %3365 = vmatprep.subr.bf16.mxu0 %v8440_v8  ;;  %v2906_v8 = vmul.f32 %v2866_v47, %v10914_v62  ;;  %v10928_v55 = vld [vmem:[#allocation35_spill] sm:$0xff] }
 0x6a0   :  { %3312 = vmatprep.subr.bf16.mxu1 %v2927_v0  ;;  %v2838_v41 = vsel %vm167_vm0, %v10928_v55, %v8739_v58 }
 0x6a1   :  { %3260 = vmatmul.mubr.bf16.vlgmr.msra.gmra.mrb[92].mxu0 %v8540_v45  ;;  %v2931_v44 = vpack.c.bf16 %v2911_v16, %v2906_v8 }
 0x6a2   :  { %3366 = vmatpush1.bf16.msra.mxu0 %v8459_v37  ;;  %4907 = vmatprep.mubr.msk.bf16.mxu0 %vm3068_vm4, %v8548_v30  ;;  %v2815_v37 = vpop.permute.xlu1 %2814 }
 0x6a3   :  { %3313 = vmatpush1.bf16.msra.mxu1 %v2926_v17  ;;  %3367 = vmatprep.subr.bf16.mxu0 %v8471_v59  ;;  %v2813_v59 = vpop.permute.xlu0 %2812  ;;  %v2849_v17 = vsel %vm167_vm0, %v8553_v18, %v2815_v37 }
 0x6a4   :  { %3314 = vmatprep.subr.bf16.mxu1 %v2932_v26 }
 0x6a6   :  { %3368 = vmatpush1.bf16.msra.mxu0 %v8491_v36  ;;  %v10918_v36 = vld [vmem:[#allocation42_spill] sm:$0xff] }
 0x6a7   :  { %3315 = vmatpush1.bf16.msra.mxu1 %v2931_v44  ;;  %3369 = vmatprep.subr.bf16.mxu0 %v10860_v39  ;;  %v8878_v39 = vpop.permute.xlu1 %2830  ;;  %v10931_v44 = vld [vmem:[#allocation26_spill] sm:$0xff] }
 0x6a8   :  { %3438 = vmatprep.subr.bf16.mxu1 %v10877_v31  ;;  %v2841_v58 = vsel %vm167_vm0, %v2815_v37, %v8878_v39 }
 0x6a9   :  { %3268 = vmatmul.mubr.bf16.gmra.mrb[96].mxu0 %v8584_v3 }
 0x6aa   :  { %3325 = vmatmul.mubr.bf16.vlgmr.msra.gmra.mrb[100].mxu1 %v8540_v45  ;;  %3370 = vmatpush1.bf16.msra.mxu0 %v8505_v32  ;;  %v10919_v32 = vld [vmem:[#allocation47_spill] sm:$0xff] }
 0x6ab   :  { %3371 = vmatprep.subr.bf16.mxu0 %v10865_v9  ;;  %3439 = vmatpush1.bf16.msra.mxu1 %v8634_v11  ;;  %v8885_v9 = vpop.permute.xlu0 %2828  ;;  %v10922_v11 = vld [vmem:[#allocation51_spill] sm:$0xff]  ;;  %v2819_v56 = vpop.permute.xlu1 %2818 }
 0x6ac   :  { %3440 = vmatprep.subr.bf16.mxu1 %v10877_v31  ;;  %4908 = vmatprep.mubr.msk.bf16.mxu0 %vm3068_vm4, %v8605_v42  ;;  %v2840_v47 = vsel %vm167_vm0, %v2813_v59, %v8885_v9 }
 0x6ad   :  { %4911 = vmatprep.mubr.msk.bf16.mxu1 %vm3068_vm4, %v8548_v30  ;;  %v2899_v18 = vmul.f32 %v2840_v47, %v10925_v38  ;;  %v5377_v47 = vld [vmem:[%s10444_s13 + $0x70] sm:$0xff]  }
 0x6ae   :  { %3372 = vmatpush1.bf16.msra.mxu0 %v8519_v20  ;;  %v10920_v20 = vld [vmem:[#allocation11_spill] sm:$0xff] }
 0x6af   :  { %3373 = vmatprep.subr.bf16.mxu0 %v10870_v33  ;;  %3441 = vmatpush1.bf16.msra.mxu1 %v8659_v29  ;;  %v2837_v33 = vsel %vm167_vm0, %v10920_v20, %v8700_v15  ;;  %v10923_v29 = vld [vmem:[#allocation28_spill] sm:$0xff]  ;;  %v2839_v15 = vsel %vm167_vm0, %v8728_v12, %v8748_v35  ;;  %v2817_v53 = vpop.permute.xlu0 %2816  ;;  %v2847_v35 = vsel %vm167_vm0, %v8513_v4, %v8728_v12  ;;  %v2835_v0 = vpop.permute.xlu1 %2834 }
 0x6b0   :  { %3442 = vmatprep.subr.bf16.mxu1 %v10877_v31  ;;  %v2884_v14 = vmul.f32 %v2837_v33, %v10925_v38  ;;  %v2894_v1 = vmul.f32 %v2839_v15, %v10925_v38  ;;  %v2846_v4 = vsel %vm167_vm0, %v8507_v21, %v10928_v55  ;;  %v2889_v12 = vmul.f32 %v2838_v41, %v10925_v38  ;;  %v5372_v55 = vld [vmem:[%s10444_s13 + $0x18] sm:$0xff]   ;;  %v5373_v41 = vld [vmem:[%s10444_s13 + $0x60] sm:$0xff]  }
 0x6b1   :  { %3276 = vmatmul.mubr.bf16.gmra.mrb[100].mxu0 %v8622_v7  ;;  %v2893_v52 = vmul.f32 %v2847_v35, %v10930_v28  ;;  %v2904_v21 = vmul.f32 %v2841_v58, %v10925_v38  ;;  %v2888_v8 = vmul.f32 %v2846_v4, %v10930_v28  ;;  %v2848_v20 = vsel %vm167_vm0, %v8542_v50, %v2813_v59  ;;  %v5374_v35 = vld [vmem:[%s10444_s13 + $0x20] sm:$0xff]  }
 0x6b2   :  { %3335 = vmatmul.mubr.bf16.gmra.mrb[104].mxu1 %v8584_v3  ;;  %3374 = vmatpush1.bf16.msra.mxu0 %v10918_v36  ;;  %v2924_v26 = vpack.c.bf16 %v2894_v1, %v2889_v12  ;;  %v10932_v36 = vld [vmem:[#allocation12_spill] sm:$0xff]  ;;  %v2903_v33 = vmul.f32 %v2849_v17, %v10930_v28 }
 0x6b3   :  { %3375 = vmatprep.subr.bf16.mxu0 %v10919_v32  ;;  %3443 = vmatpush1.bf16.msra.mxu1 %v8696_v25  ;;  %v10924_v25 = vld [vmem:[#allocation8_spill] sm:$0xff]  ;;  %v2833_v16 = vpop.permute.xlu0 %2832  ;;  %v10933_v32 = vpack.c.bf16 %v10931_v44, %v10932_v36  ;;  %v2923_v37 = vpack.c.bf16 %v2893_v52, %v2888_v8  ;;  %v2929_v59 = vpack.c.bf16 %v2904_v21, %v2899_v18  ;;  %v5380_v18 = vld [vmem:[%s10444_s13 + $0x38] sm:$0xff]  }
 0x6b4   :  { %3444 = vmatprep.subr.bf16.mxu1 %v10877_v31  ;;  %4909 = vmatprep.mubr.msk.bf16.mxu0 %vm3068_vm4, %v8642_v24  ;;  %v2836_v62 = vsel %vm167_vm0, %v10924_v25, %v10923_v29  ;;  %v2898_v29 = vmul.f32 %v2848_v20, %v10930_v28 }
 0x6b5   :  { %4912 = vmatprep.mubr.msk.bf16.mxu1 %vm3068_vm4, %v8605_v42  ;;  %v2879_v49 = vmul.f32 %v2836_v62, %v10925_v38 }
 0x6b6   :  { %3376 = vmatpush1.bf16.msra.mxu0 %v10921_v6  ;;  %v2842_v6 = vsel %vm167_vm0, %v2817_v53, %v2833_v16  ;;  %v2928_v62 = vpack.c.bf16 %v2903_v33, %v2898_v29 }
 0x6b7   :  { %3377 = vmatprep.subr.bf16.mxu0 %v10922_v11  ;;  %3445 = vmatpush1.bf16.msra.mxu1 %v8724_v46  ;;  %v10926_v46 = vld [vmem:[#allocation50_spill] sm:$0xff]  ;;  %v2919_v54 = vpack.c.bf16 %v2884_v14, %v2879_v49  ;;  %v2851_v11 = vsel %vm167_vm0, %v8614_v19, %v2819_v56  ;;  %v2909_v25 = vmul.f32 %v2842_v6, %v10925_v38  ;;  %v10936_v49 = vld [vmem:[#allocation4_spill] sm:$0xff] }
 0x6b8   :  { %3446 = vmatprep.subr.bf16.mxu1 %v10877_v31  ;;  %v2913_v14 = vmul.f32 %v2851_v11, %v10930_v28 }
 0x6b9   :  { %3284 = vmatmul.mubr.bf16.gmra.mrb[104].mxu0 %v8673_v61 }
 0x6ba   :  { %3345 = vmatmul.mubr.bf16.gmra.mrb[108].mxu1 %v8622_v7  ;;  %3378 = vmatpush1.bf16.msra.mxu0 %v10926_v46 }
 0x6bb   :  { %3379 = vmatprep.subr.bf16.mxu0 %v10927_v23  ;;  %3447 = vmatpush1.bf16.msra.mxu1 %v10913_v2  ;;  %v5405_v2 = vld [vmem:[%s10441_s9 + $0x4] ss:$8 sps:$4 sm:$0xff]  }
 0x6bc   :  { %3448 = vmatprep.subr.bf16.mxu1 %v10877_v31  ;;  %4913 = vmatprep.mubr.msk.bf16.mxu1 %vm3068_vm4, %v8642_v24 }
 0x6bd   :  { %4914 = vmatprep.mubr.msk.bf16.mxu0 %vm3068_vm4, %v5405_v2 }
 0x6be   :  { %3380 = vmatpush1.bf16.msra.mxu0 %v10929_v34 }
 0x6bf   :  { %3381 = vmatprep.subr.bf16.mxu0 %v2919_v54  ;;  %3449 = vmatpush1.bf16.msra.mxu1 %v10915_v27  ;;  %v2843_v27 = vsel %vm167_vm0, %v2819_v56, %v2835_v0  ;;  %v2873_v56 = vsel %vm167_vm0, %v8878_v39, %v8575_v40  ;;  %v2875_v40 = vsel %vm167_vm0, %v2835_v0, %v8636_v63  ;;  %v5375_v54 = vld [vmem:[%s10444_s13 + $0x68] sm:$0xff]  }
 0x6c0   :  { %3450 = vmatprep.subr.bf16.mxu1 %v10877_v31  ;;  %v2914_v50 = vmul.f32 %v2843_v27, %v10925_v38  ;;  %v2915_v23 = vmul.f32 %v2875_v40, %v10936_v49  ;;  %v5378_v27 = vld [vmem:[%s10444_s13 + $0x30] sm:$0xff]  }
 0x6c2   :  { %3355 = vmatmul.mubr.bf16.gmra.mrb[112].mxu1 %v8673_v61  ;;  %3382 = vmatpush1.bf16.msra.mxu0 %v10933_v32  ;;  %v2934_v19 = vpack.c.bf16 %v2914_v50, %v2909_v25  ;;  %v5379_v32 = vld [vmem:[%s10444_s13 + $0x78] sm:$0xff]   ;;  %v9076_v25 = vpop.permute.xlu0 %2994 }
 0x6c3   :  { %3383 = vmatprep.subr.bf16.mxu0 %v2924_v26  ;;  %3451 = vmatpush1.bf16.msra.mxu1 %v10916_v48  ;;  %v2850_v48 = vsel %vm167_vm0, %v8610_v22, %v2817_v53  ;;  %v10934_v22 = vld [vmem:[#allocation33_spill] sm:$0xff]  ;;  %v2905_v53 = vmul.f32 %v2873_v56, %v10936_v49 }
 0x6c4   :  { %3452 = vmatprep.subr.bf16.mxu1 %v10877_v31  ;;  %4918 = vmatprep.mubr.msk.bf16.mxu1 %vm3068_vm4, %v5405_v2  ;;  %v2908_v15 = vmul.f32 %v2850_v48, %v10930_v28  ;;  %v10935_v38 = vpack.c.bf16 %v8712_v51, %v10934_v22  ;;  %v10937_v51 = vpack.c.bf16 %v8768_v10, %v8765_v60  ;;  %v5376_v28 = vld [vmem:[%s10444_s13 + $0x28] sm:$0xff]  }
 0x6c6   :  { %3384 = vmatpush1.bf16.msra.mxu0 %v2923_v37  ;;  %v2933_v46 = vpack.c.bf16 %v2913_v14, %v2908_v15  ;;  %v9088_v22 = vpop.permute.xlu0 %3004 }
 0x6c7   :  { %3385 = vmatprep.subr.bf16.mxu0 %v2929_v59  ;;  %3453 = vmatpush1.bf16.msra.mxu1 %v10917_v13  ;;  %v2872_v13 = vsel %vm167_vm0, %v8885_v9, %v8560_v5  ;;  %v2874_v5 = vsel %vm167_vm0, %v2833_v16, %v8626_v43  ;;  %v5371_v43 = vld [vmem:[%s10444_s13 + $0x58] sm:$0xff]  }
 0x6c8   :  { %3454 = vmatprep.subr.bf16.mxu1 %v10877_v31  ;;  %v2900_v39 = vmul.f32 %v2872_v13, %v10936_v49  ;;  %v2910_v63 = vmul.f32 %v2874_v5, %v10936_v49 }
 0x6ca   :  { %3386 = vmatpush1.bf16.msra.mxu0 %v2928_v62  ;;  %v2930_v9 = vpack.c.bf16 %v2905_v53, %v2900_v39  ;;  %v2935_v60 = vpack.c.bf16 %v2915_v23, %v2910_v63  ;;  %v9078_v62 = vpop.permute.xlu1 %2999 }
 0x6cb   :  { %3387 = vmatprep.subr.bf16.mxu0 %v2934_v19  ;;  %3455 = vmatpush1.bf16.msra.mxu1 %v10935_v38 }
 0x6cc   :  { %3456 = vmatprep.subr.bf16.mxu1 %v10877_v31 }
 0x6ce   :  { %3388 = vmatpush1.bf16.msra.mxu0 %v2933_v46  ;;  %v9090_v38 = vpop.permute.xlu1 %3009 }
 0x6cf   :  { %3457 = vmatpush1.bf16.msra.mxu1 %v10937_v51  ;;  %5168 = vmatprep.subr.bf16.mxu0 %v5365_v57  ;;  %v9110_v51 = vpop.permute.xlu0 %3014 }
 0x6d0   :  { %3458 = vmatprep.subr.bf16.mxu1 %v10877_v31 }
 0x6d1   :  { %3398 = vmatmul.mubr.bf16.vlgmr.msra.gmra.mrb[108].mxu0 %v8540_v45 }
 0x6d2   :  { %4915 = vmatprep.mubr.msk.bf16.mxu0 %vm3068_vm4, %v8548_v30  ;;  %v9118_v23 = vpop.permute.xlu1 %3019 }
 0x6d3   :  { %3459 = vmatpush1.bf16.msra.mxu1 %v2930_v9 }
 0x6d4   :  { %3460 = vmatprep.subr.bf16.mxu1 %v10877_v31  ;;  %v5368_v31 = vld [vmem:[%s10444_s13 + $0x8] sm:$0xff]  }
 0x6d7   :  { %3461 = vmatpush1.bf16.msra.mxu1 %v2935_v60 }
 0x6d9   :  { %3408 = vmatmul.mubr.bf16.gmra.mrb[112].mxu0 %v8584_v3 }
 0x6da   :  { %3471 = vmatmul.mubr.bf16.vlgmr.msra.gmra.mrb[116].mxu1 %v8540_v45  ;;  %4916 = vmatprep.mubr.msk.bf16.mxu0 %vm3068_vm4, %v8605_v42  ;;  %v5366_v45 = vld [vmem:[%s10444_s13] sm:$0xff]  }
 0x6db   :  { %4919 = vmatprep.mubr.msk.bf16.mxu1 %vm3068_vm4, %v8548_v30  ;;  %5169 = vmatpush3.bf16.msra.mxu0 %v5366_v45  ;;  %v5367_v30 = vld [vmem:[%s10444_s13 + $0x48] sm:$0xff]  }
 0x6dc   :  { %5170 = vmatprep.subr.bf16.mxu0 %v5367_v30  ;;  %v5382_v30 = vld [vmem:[%s10444_s13 + $0x80] sm:$0xff]  }
 0x6df   :  { %5171 = vmatpush3.bf16.msra.mxu0 %v5368_v31 }
 0x6e1   :  { %3418 = vmatmul.mubr.bf16.gmra.mrb[116].mxu0 %v8622_v7 }
 0x6e2   :  { %3479 = vmatmul.mubr.bf16.gmra.mrb[120].mxu1 %v8584_v3  ;;  %4917 = vmatprep.mubr.msk.bf16.mxu0 %vm3068_vm4, %v8642_v24  ;;  %v5369_v3 = vld [vmem:[%s10444_s13 + $0x50] sm:$0xff]  }
 0x6e3   :  { %4920 = vmatprep.mubr.msk.bf16.mxu1 %vm3068_vm4, %v8605_v42  ;;  %v5370_v42 = vld [vmem:[%s10444_s13 + $0x10] sm:$0xff]   ;;  %5172 = vmatprep.subr.bf16.mxu0 %v5369_v3  ;;  %v4963_v3 = vld [vmem:[%s10445_s12 + $0x288] sm:$0xff] }
 0x6e4   :  { %5173 = vmatpush3.bf16.msra.mxu0 %v5370_v42 }
 0x6e5   :  { %5174 = vmatprep.subr.bf16.mxu0 %v5371_v43 }
 0x6e8   :  { %5175 = vmatpush3.bf16.msra.mxu0 %v5372_v55 }
 0x6e9   :  { %3428 = vmatmul.mubr.bf16.gmra.mrb[120].mxu0 %v8673_v61  ;;  %5176 = vmatprep.subr.bf16.mxu0 %v5373_v41 }
 0x6ea   :  { %3487 = vmatmul.mubr.bf16.gmra.mrb[124].mxu1 %v8622_v7 }
 0x6eb   :  { %4921 = vmatprep.mubr.msk.bf16.mxu1 %vm3068_vm4, %v8642_v24 }
 0x6ec   :  { %5177 = vmatpush3.bf16.msra.mxu0 %v5374_v35 }
 0x6ed   :  { %5178 = vmatprep.subr.bf16.mxu0 %v5375_v54 }
 0x6f0   :  { %5179 = vmatpush3.bf16.msra.mxu0 %v5376_v28 }
 0x6f1   :  { %5180 = vmatprep.subr.bf16.mxu0 %v5377_v47  ;;  %v9166_v47 = vpop.permute.xlu1 %3029 }
 0x6f2   :  { %3495 = vmatmul.mubr.bf16.gmra.mrb[128].mxu1 %v8673_v61  ;;  %10942 = vst [vmem:[#allocation19_spill] sm:$0xff] %v9166_v47 }
 0x6f4   :  { %5181 = vmatpush3.bf16.msra.mxu0 %v5378_v27  ;;  %v4962_v27 = vld [vmem:[%s10445_s12 + $0x280] sm:$0xff] }
 0x6f5   :  { %5182 = vmatprep.subr.bf16.mxu0 %v5379_v32 }
 0x6f8   :  { %5183 = vmatpush3.bf16.msra.mxu0 %v5380_v18 }
 0x744   :  { %v3115_v7 = vpop.f32.mrb[76].mxu0 }
 0x745   :  { %v3117_v24 = vpop.f32.mrb[77].mxu0  ;;  %v9093_v13 = vadd.f32 %v3115_v7, %v9076_v25 }
 0x746   :  { %v3119_v61 = vpop.f32.mrb[78].mxu0  ;;  %v9096_v46 = vadd.f32 %v3117_v24, %v9076_v25 }
 0x747   :  { %v3121_v10 = vpop.f32.mrb[79].mxu0  ;;  %v9099_v49 = vadd.f32 %v3119_v61, %v9078_v62  ;;  %v3503_v57 = vmax.f32 %v9093_v13, 0.0 }
 0x748   :  { %v9102_v53 = vadd.f32 %v3121_v10, %v9078_v62  ;;  %v3504_v45 = vmax.f32 %v9096_v46, 0.0  ;;  %v4927_v46 = vld [vmem:[%s10445_s12 + $0x168] sm:$0xff] }
 0x74c   :  { %v3125_v1 = vpop.f32.mrb[80].mxu0 }
 0x74d   :  { %v3127_v2 = vpop.f32.mrb[81].mxu0  ;;  %v3188_v58 = vpop.f32.mrb[84].mxu1  ;;  %v9105_v40 = vadd.f32 %v3125_v1, %v9088_v22  ;;  %v5002_v1 = vld [vmem:[%s10445_s12 + $0x3c0] sm:$0xff] }
 0x74e   :  { %v3129_v34 = vpop.f32.mrb[82].mxu0  ;;  %v3190_v4 = vpop.f32.mrb[85].mxu1  ;;  %v9108_v39 = vadd.f32 %v3127_v2, %v9088_v22  ;;  %v9113_v5 = vadd.f32 %v3188_v58, %v9076_v25 }
 0x74f   :  { %v3131_v12 = vpop.f32.mrb[83].mxu0  ;;  %v3192_v0 = vpop.f32.mrb[86].mxu1  ;;  %v9116_v9 = vadd.f32 %v3129_v34, %v9090_v38  ;;  %v9121_v63 = vadd.f32 %v3190_v4, %v9076_v25 }
 0x750   :  { %v3194_v52 = vpop.f32.mrb[87].mxu1  ;;  %v9124_v60 = vadd.f32 %v3131_v12, %v9090_v38  ;;  %v9130_v31 = vadd.f32 %v3192_v0, %v9078_v62  ;;  %v9154_v34 = vpop.permute.xlu0 %3024 }
 0x751   :  { %v9136_v43 = vadd.f32 %v3194_v52, %v9078_v62  ;;  %10939 = vst [vmem:[#allocation5_spill] sm:$0xff] %v9154_v34 }
 0x754   :  { %v3135_v17 = vpop.f32.mrb[84].mxu0 }
 0x755   :  { %v3137_v21 = vpop.f32.mrb[85].mxu0  ;;  %v3198_v16 = vpop.f32.mrb[88].mxu1  ;;  %v9141_v10 = vadd.f32 %v3135_v17, %v9110_v51 }
 0x756   :  { %v3139_v26 = vpop.f32.mrb[86].mxu0  ;;  %v3200_v8 = vpop.f32.mrb[89].mxu1  ;;  %v9144_v55 = vadd.f32 %v3137_v21, %v9110_v51  ;;  %v9149_v54 = vadd.f32 %v3198_v16, %v9088_v22 }
 0x757   :  { %v3141_v44 = vpop.f32.mrb[87].mxu0  ;;  %v3202_v36 = vpop.f32.mrb[90].mxu1  ;;  %v9152_v2 = vadd.f32 %v3139_v26, %v9118_v23  ;;  %v9158_v12 = vadd.f32 %v3200_v8, %v9088_v22 }
 0x758   :  { %v3204_v20 = vpop.f32.mrb[91].mxu1  ;;  %10938 = vst [vmem:[#allocation10_spill] sm:$0xff] %v9149_v54  ;;  %v9161_v0 = vadd.f32 %v3141_v44, %v9118_v23  ;;  %v9164_v28 = vadd.f32 %v3202_v36, %v9090_v38 }
 0x759   :  { %10940 = vst [vmem:[#allocation32_spill] sm:$0xff] %v9158_v12  ;;  %v9170_v21 = vadd.f32 %v3204_v20, %v9090_v38 }
 0x75a   :  { %10941 = vst [vmem:[#allocation34_spill] sm:$0xff] %v9164_v28 }
 0x75b   :  { %10943 = vst [vmem:[#allocation22_spill] sm:$0xff] %v9170_v21  ;;  %v5383_v21 = vld [vmem:[%s10444_s13 + $0xc8] sm:$0xff]  }
 0x75c   :  { %v3145_v37 = vpop.f32.mrb[88].mxu0 }
 0x75d   :  { %v3147_v33 = vpop.f32.mrb[89].mxu0  ;;  %v3208_v6 = vpop.f32.mrb[92].mxu1  ;;  %v9173_v16 = vadd.f32 %v3145_v37, %v9154_v34 }
 0x75e   :  { %v3149_v11 = vpop.f32.mrb[90].mxu0  ;;  %v3210_v50 = vpop.f32.mrb[93].mxu1  ;;  %v9176_v26 = vadd.f32 %v3147_v33, %v9154_v34  ;;  %v9181_v36 = vadd.f32 %v3208_v6, %v9110_v51 }
 0x75f   :  { %v3151_v59 = vpop.f32.mrb[91].mxu0  ;;  %v9072_v29 = vpop.f32.mrb[94].mxu1  ;;  %v9184_v32 = vadd.f32 %v3149_v11, %v9166_v47  ;;  %v9189_v37 = vadd.f32 %v3210_v50, %v9110_v51 }
 0x760   :  { %v9074_v48 = vpop.f32.mrb[95].mxu1  ;;  %10944 = vst [vmem:[#allocation15_spill] sm:$0xff] %v9181_v36  ;;  %v9192_v33 = vadd.f32 %v3151_v59, %v9166_v47  ;;  %v9199_v11 = vadd.f32 %v9072_v29, %v9118_v23 }
 0x761   :  { %10945 = vst [vmem:[#allocation31_spill] sm:$0xff] %v9189_v37  ;;  %v9206_v59 = vadd.f32 %v9074_v48, %v9118_v23 }
 0x762   :  { %10946 = vst [vmem:[#allocation2_spill] sm:$0xff] %v9199_v11  ;;  %v4928_v11 = vld [vmem:[%s10445_s12 + $0x170] sm:$0xff] }
 0x763   :  { %10947 = vst [vmem:[#allocation30_spill] sm:$0xff] %v9206_v59 }
 0x765   :  { %v9080_v14 = vpop.f32.mrb[96].mxu1 }
 0x766   :  { %v9082_v19 = vpop.f32.mrb[97].mxu1  ;;  %v9212_v6 = vadd.f32 %v9080_v14, %v9154_v34 }
 0x767   :  { %v9084_v56 = vpop.f32.mrb[98].mxu1  ;;  %v9216_v29 = vadd.f32 %v9082_v19, %v9154_v34 }
 0x768   :  { %v9086_v15 = vpop.f32.mrb[99].mxu1  ;;  %10948 = vst [vmem:[#allocation37_spill] sm:$0xff] %v9212_v6  ;;  %v9222_v48 = vadd.f32 %v9084_v56, %v9166_v47  ;;  %v3624_v56 = vld [vmem:[%s10445_s12 + $0x8] sm:$0xff] }
 0x769   :  { %10949 = vst [vmem:[#allocation25_spill] sm:$0xff] %v9216_v29 }
 0x76a   :  { %10950 = vst [vmem:[#allocation36_spill] sm:$0xff] %v9222_v48 }
 0x774   :  { %v3261_v41 = vpop.f32.mrb[92].mxu0 }
 0x775   :  { %v3263_v58 = vpop.f32.mrb[93].mxu0  ;;  %v9230_v19 = vadd.f32 %v3261_v41, %v9076_v25  ;;  %v4922_v41 = vld [vmem:[%s10445_s12 + $0x140] sm:$0xff] }
 0x776   :  { %v3264_v52 = vpop.f32.mrb[94].mxu0  ;;  %v9226_v58 = vadd.f32 %v9086_v15, %v9166_v47  ;;  %v3623_v15 = vld [vmem:[%s10445_s12] sm:$0xff] }
 0x777   :  { %v3266_v8 = vpop.f32.mrb[95].mxu0  ;;  %10952 = vst [vmem:[#allocation43_spill] sm:$0xff] %v9230_v19  ;;  %v9233_v17 = vadd.f32 %v3264_v52, %v9078_v62 }
 0x778   :  { %10951 = vst [vmem:[#allocation39_spill] sm:$0xff] %v9226_v58 }
 0x779   :  { %10953 = vst [vmem:[#allocation38_spill] sm:$0xff] %v9233_v17 }
 0x77c   :  { %v3269_v20 = vpop.f32.mrb[96].mxu0 }
 0x77d   :  { %v3271_v4 = vpop.f32.mrb[97].mxu0  ;;  %v3326_v14 = vpop.f32.mrb[100].mxu1  ;;  %v9238_v18 = vadd.f32 %v3269_v20, %v9088_v22  ;;  %v5042_v20 = vld [vmem:[%s10445_s12 + $0x500] sm:$0xff] }
 0x77e   :  { %v3327_v35 = vadd.f32 %v3326_v14, %v9076_v25  ;;  %v3272_v24 = vpop.f32.mrb[98].mxu0  ;;  %v3328_v8 = vpop.f32.mrb[101].mxu1 }
 0x77f   :  { %10954 = vst [vmem:[#allocation41_spill] sm:$0xff] %v9238_v18  ;;  %v9247_v4 = vadd.f32 %v3272_v24, %v9090_v38  ;;  %v3329_v52 = vadd.f32 %v3328_v8, %v9076_v25  ;;  %v3330_v14 = vpop.f32.mrb[102].mxu1  ;;  %v3274_v50 = vpop.f32.mrb[99].mxu0  ;;  %v3628_v8 = vld [vmem:[%s10445_s12 + $0x28] sm:$0xff] }
 0x780   :  { %v3543_v44 = vmax.f32 %v3327_v35, 0.0  ;;  %v3331_v24 = vadd.f32 %v3330_v14, %v9078_v62  ;;  %v3332_v61 = vpop.f32.mrb[103].mxu1  ;;  %v5381_v14 = vld [vmem:[%s10444_s13 + $0xc0] sm:$0xff]  }
 0x781   :  { %10955 = vst [vmem:[#allocation40_spill] sm:$0xff] %v9247_v4  ;;  %v3544_v35 = vmax.f32 %v3329_v52, 0.0  ;;  %v3333_v7 = vadd.f32 %v3332_v61, %v9078_v62  ;;  %v4923_v52 = vld [vmem:[%s10445_s12 + $0x148] sm:$0xff]  ;;  %5190 = vmatprep.subr.bf16.mxu1 %v5381_v14 }
 0x782   :  { %v3583_v50 = vmax.f32 %v3503_v57, %v3543_v44  ;;  %v3548_v61 = vmax.f32 %v3331_v24, 0.0  ;;  %v5003_v57 = vld [vmem:[%s10445_s12 + $0x3c8] sm:$0xff]  ;;  %5191 = vmatpush3.bf16.msra.mxu1 %v5382_v30 }
 0x783   :  { %v3584_v13 = vmax.f32 %v3504_v45, %v3544_v35  ;;  %v5043_v44 = vld [vmem:[%s10445_s12 + $0x508] sm:$0xff]  ;;  %v3549_v24 = vmax.f32 %v3333_v7, 0.0  ;;  %5192 = vmatprep.subr.bf16.mxu1 %v5383_v21  ;;  %v4972_v21 = vld [vmem:[%s10445_s12 + $0x2d0] sm:$0xff] }
 0x784   :  { %v3663_v58 = vmul.f32 %v3623_v15, %v3583_v50  ;;  %v3809_v48 = vmul.f32 %v4922_v41, %v3583_v50  ;;  %v3955_v29 = vmul.f32 %v4962_v27, %v3583_v50  ;;  %v4101_v6 = vmul.f32 %v5002_v1, %v3583_v50  ;;  %v3277_v45 = vpop.f32.mrb[100].mxu0  ;;  %v4967_v7 = vld [vmem:[%s10445_s12 + $0x2a8] sm:$0xff] }
 0x785   :  { %v4247_v35 = vmul.f32 %v5042_v20, %v3583_v50  ;;  %v3664_v42 = vmul.f32 %v3624_v56, %v3584_v13  ;;  %v3810_v4 = vmul.f32 %v4923_v52, %v3584_v13  ;;  %v3956_v59 = vmul.f32 %v4963_v3, %v3584_v13  ;;  %v5007_v1 = vld [vmem:[%s10445_s12 + $0x3e8] sm:$0xff]  ;;  %v3279_v15 = vpop.f32.mrb[101].mxu0  ;;  %v3336_v41 = vpop.f32.mrb[104].mxu1  ;;  %v3629_v52 = vld [vmem:[%s10445_s12 + $0x30] sm:$0xff] }
 0x786   :  { %v5047_v27 = vld [vmem:[%s10445_s12 + $0x528] sm:$0xff]  ;;  %v4102_v14 = vmul.f32 %v5003_v57, %v3584_v13  ;;  %v4248_v30 = vmul.f32 %v5043_v44, %v3584_v13  ;;  %v10956_v56 = vmax.f32 %v9099_v49, 0.0  ;;  %v10957_v3 = vmax.f32 %v9102_v53, 0.0  ;;  %v4968_v15 = vld [vmem:[%s10445_s12 + $0x2b0] sm:$0xff]  ;;  %v3280_v57 = vpop.f32.mrb[102].mxu0  ;;  %v3338_v13 = vpop.f32.mrb[105].mxu1 }
 0x787   :  { %v9323_v49 = vadd.f32 %v3277_v45, %v9110_v51  ;;  %v3337_v53 = vadd.f32 %v3336_v41, %v9088_v22  ;;  %v3339_v44 = vadd.f32 %v3338_v13, %v9088_v22 }
 0x788   :  { %v3588_v20 = vmax.f32 %v10956_v56, %v3548_v61  ;;  %v3589_v50 = vmax.f32 %v10957_v3, %v3549_v24  ;;  %v9327_v61 = vadd.f32 %v3280_v57, %v9118_v23  ;;  %v3340_v24 = vpop.f32.mrb[106].mxu1  ;;  %v3282_v56 = vpop.f32.mrb[103].mxu0  ;;  %v5008_v57 = vld [vmem:[%s10445_s12 + $0x3f0] sm:$0xff] }
 0x789   :  { %10958 = vst [vmem:[#allocation3_spill] sm:$0xff] %v9323_v49  ;;  %v3342_v17 = vpop.f32.mrb[107].mxu1 }
 0x78a   :  { %10959 = vst [vmem:[#allocation6_spill] sm:$0xff] %v9327_v61  ;;  %v3668_v3 = vmul.f32 %v3628_v8, %v3588_v20  ;;  %v3814_v18 = vmul.f32 %v4927_v46, %v3588_v20  ;;  %v3960_v37 = vmul.f32 %v4967_v7, %v3588_v20  ;;  %v4106_v36 = vmul.f32 %v5007_v1, %v3588_v20  ;;  %v5048_v8 = vld [vmem:[%s10445_s12 + $0x530] sm:$0xff] }
 0x78b   :  { %v4252_v45 = vmul.f32 %v5047_v27, %v3588_v20  ;;  %v3669_v28 = vmul.f32 %v3629_v52, %v3589_v50  ;;  %v3815_v19 = vmul.f32 %v4928_v11, %v3589_v50  ;;  %v3961_v41 = vmul.f32 %v4968_v15, %v3589_v50  ;;  %v3633_v11 = vld [vmem:[%s10445_s12 + $0x50] sm:$0xff] }
 0x78c   :  { %v3703_v46 = vadd.f32 %v3668_v3, %v3663_v58  ;;  %v3849_v7 = vadd.f32 %v3814_v18, %v3809_v48  ;;  %v3995_v1 = vadd.f32 %v3960_v37, %v3955_v29  ;;  %v4141_v13 = vadd.f32 %v4106_v36, %v4101_v6  ;;  %v4932_v20 = vld [vmem:[%s10445_s12 + $0x190] sm:$0xff] }
 0x78d   :  { %v4287_v56 = vadd.f32 %v4252_v45, %v4247_v35  ;;  %v3716_v12 = vadd.f32 %v3669_v28, %v3664_v42  ;;  %v3862_v54 = vadd.f32 %v3815_v19, %v3810_v4  ;;  %v4008_v27 = vadd.f32 %v3961_v41, %v3956_v59  ;;  %v3285_v42 = vpop.f32.mrb[104].mxu0  ;;  %v5384_v28 = vld [vmem:[%s10444_s13 + $0x88] sm:$0xff]   ;;  %v5385_v36 = vld [vmem:[%s10444_s13 + $0xd0] sm:$0xff]   ;;  %v3346_v35 = vpop.f32.mrb[108].mxu1  ;;  %v3634_v41 = vld [vmem:[%s10445_s12 + $0x58] sm:$0xff] }
 0x78e   :  { %v4107_v52 = vmul.f32 %v5008_v57, %v3589_v50  ;;  %v4253_v15 = vmul.f32 %v5048_v8, %v3589_v50  ;;  %v3553_v18 = vmax.f32 %v3337_v53, 0.0  ;;  %v5012_v37 = vld [vmem:[%s10445_s12 + $0x410] sm:$0xff]  ;;  %v3554_v29 = vmax.f32 %v3339_v44, 0.0  ;;  %v3287_v4 = vpop.f32.mrb[105].mxu0  ;;  %v4933_v57 = vld [vmem:[%s10445_s12 + $0x198] sm:$0xff]  ;;  %5193 = vmatpush3.bf16.msra.mxu1 %v5384_v28 }
 0x78f   :  { %v5052_v6 = vld [vmem:[%s10445_s12 + $0x550] sm:$0xff]  ;;  %v3341_v48 = vadd.f32 %v3340_v24, %v9090_v38  ;;  %v3343_v19 = vadd.f32 %v3342_v17, %v9090_v38  ;;  %v10960_v3 = vmax.f32 %v9105_v40, 0.0  ;;  %v4973_v44 = vld [vmem:[%s10445_s12 + $0x2d8] sm:$0xff]  ;;  %v9376_v17 = vadd.f32 %v3285_v42, %v9154_v34  ;;  %5194 = vmatprep.subr.bf16.mxu1 %v5385_v36 }
 0x790   :  { %v4154_v50 = vadd.f32 %v4107_v52, %v4102_v14  ;;  %v4300_v53 = vadd.f32 %v4253_v15, %v4248_v30  ;;  %v3288_v14 = vpop.f32.mrb[106].mxu0  ;;  %v3348_v30 = vpop.f32.mrb[109].mxu1  ;;  %v10962_v40 = vmax.f32 %v9108_v39, 0.0  ;;  %v9381_v15 = vadd.f32 %v3346_v35, %v9110_v51  ;;  %v5387_v42 = vld [vmem:[%s10444_s13 + $0x90] sm:$0xff]   ;;  %v5388_v39 = vld [vmem:[%s10444_s13 + $0xd8] sm:$0xff]  }
 0x791   :  { %v3593_v45 = vmax.f32 %v10960_v3, %v3553_v18  ;;  %10961 = vst [vmem:[#allocation29_spill] sm:$0xff] %v9376_v17  ;;  %v3558_v8 = vmax.f32 %v3341_v48, 0.0  ;;  %v3559_v52 = vmax.f32 %v3343_v19, 0.0  ;;  %v9383_v18 = vpop.f32.mrb[110].mxu1  ;;  %v3290_v4 = vpop.f32.mrb[107].mxu0  ;;  %v5013_v36 = vld [vmem:[%s10445_s12 + $0x418] sm:$0xff] }
 0x792   :  { %v3594_v24 = vmax.f32 %v10962_v40, %v3554_v29  ;;  %v9388_v61 = vpop.f32.mrb[111].mxu1  ;;  %v3638_v4 = vld [vmem:[%s10445_s12 + $0x78] sm:$0xff]  ;;  %5195 = vmatpush3.bf16.msra.mxu1 %v5387_v42  ;;  %v3639_v42 = vld [vmem:[%s10445_s12 + $0x80] sm:$0xff] }
 0x793   :  { %v3673_v3 = vmul.f32 %v3633_v11, %v3593_v45  ;;  %v3819_v59 = vmul.f32 %v4932_v20, %v3593_v45  ;;  %v3965_v58 = vmul.f32 %v4972_v21, %v3593_v45  ;;  %v4111_v28 = vmul.f32 %v5012_v37, %v3593_v45  ;;  %v5053_v11 = vld [vmem:[%s10445_s12 + $0x558] sm:$0xff]  ;;  %5196 = vmatprep.subr.bf16.mxu1 %v5388_v39 }
 0x794   :  { %v4257_v29 = vmul.f32 %v5052_v6, %v3593_v45  ;;  %v3674_v48 = vmul.f32 %v3634_v41, %v3594_v24  ;;  %v3820_v19 = vmul.f32 %v4933_v57, %v3594_v24  ;;  %v3966_v35 = vmul.f32 %v4973_v44, %v3594_v24  ;;  %v5390_v6 = vld [vmem:[%s10444_s13 + $0x98] sm:$0xff]  }
 0x795   :  { %v3704_v20 = vadd.f32 %v3703_v46, %v3673_v3  ;;  %v3850_v21 = vadd.f32 %v3849_v7, %v3819_v59  ;;  %v3996_v37 = vadd.f32 %v3995_v1, %v3965_v58  ;;  %v4142_v40 = vadd.f32 %v4141_v13, %v4111_v28  ;;  %v4937_v46 = vld [vmem:[%s10445_s12 + $0x1b8] sm:$0xff]  ;;  %v5391_v3 = vld [vmem:[%s10444_s13 + $0xe0] sm:$0xff]   ;;  %v3356_v39 = vpop.f32.mrb[112].mxu1 }
 0x796   :  { %v4288_v45 = vadd.f32 %v4287_v56, %v4257_v29  ;;  %v3717_v41 = vadd.f32 %v3716_v12, %v3674_v48  ;;  %v3863_v57 = vadd.f32 %v3862_v54, %v3820_v19  ;;  %v4009_v44 = vadd.f32 %v4008_v27, %v3966_v35  ;;  %v4977_v7 = vld [vmem:[%s10445_s12 + $0x2f8] sm:$0xff]  ;;  %5197 = vmatpush3.bf16.msra.mxu1 %v5390_v6 }
 0x797   :  { %v5017_v1 = vld [vmem:[%s10445_s12 + $0x438] sm:$0xff]  ;;  %v4112_v13 = vmul.f32 %v5013_v36, %v3594_v24  ;;  %v4258_v58 = vmul.f32 %v5053_v11, %v3594_v24  ;;  %v10963_v56 = vmax.f32 %v9116_v9, 0.0  ;;  %v10964_v27 = vmax.f32 %v9124_v60, 0.0  ;;  %v4938_v9 = vld [vmem:[%s10445_s12 + $0x1c0] sm:$0xff]  ;;  %v9439_v36 = vpop.f32.mrb[113].mxu1  ;;  %5198 = vmatprep.subr.bf16.mxu1 %v5391_v3 }
 0x798   :  { %v5057_v54 = vld [vmem:[%s10445_s12 + $0x578] sm:$0xff]  ;;  %v4978_v24 = vld [vmem:[%s10445_s12 + $0x300] sm:$0xff]  ;;  %v3563_v60 = vmax.f32 %v9381_v15, 0.0  ;;  %v3349_v28 = vadd.f32 %v3348_v30, %v9110_v51 }
 0x799   :  { %v3598_v12 = vmax.f32 %v10963_v56, %v3558_v8  ;;  %v3599_v59 = vmax.f32 %v10964_v27, %v3559_v52  ;;  %v9436_v52 = vadd.f32 %v3288_v14, %v9166_v47  ;;  %v4155_v29 = vadd.f32 %v4154_v50, %v4112_v13  ;;  %v5393_v11 = vld [vmem:[%s10444_s13 + $0xa0] sm:$0xff]  }
 0x79a   :  { %v4301_v48 = vadd.f32 %v4300_v53, %v4258_v58  ;;  %v5018_v14 = vld [vmem:[%s10445_s12 + $0x440] sm:$0xff]  ;;  %v9450_v53 = vpop.f32.mrb[114].mxu1  ;;  %5199 = vmatpush3.bf16.msra.mxu1 %v5393_v11 }
 0x79b   :  { %10965 = vst [vmem:[#allocation24_spill] sm:$0xff] %v9436_v52  ;;  %v3678_v19 = vmul.f32 %v3638_v4, %v3598_v12  ;;  %v3824_v35 = vmul.f32 %v4937_v46, %v3598_v12  ;;  %v3970_v56 = vmul.f32 %v4977_v7, %v3598_v12  ;;  %v4116_v27 = vmul.f32 %v5017_v1, %v3598_v12  ;;  %v5058_v50 = vld [vmem:[%s10445_s12 + $0x580] sm:$0xff]  ;;  %v9452_v13 = vpop.f32.mrb[115].mxu1  ;;  %v5394_v7 = vld [vmem:[%s10444_s13 + $0xe8] sm:$0xff]  }
 0x79c   :  { %v4262_v15 = vmul.f32 %v5057_v54, %v3598_v12  ;;  %v3679_v8 = vmul.f32 %v3639_v42, %v3599_v59  ;;  %v3825_v6 = vmul.f32 %v4938_v9, %v3599_v59  ;;  %v3971_v46 = vmul.f32 %v4978_v24, %v3599_v59  ;;  %v3643_v42 = vld [vmem:[%s10445_s12 + $0xa0] sm:$0xff]  ;;  %5200 = vmatprep.subr.bf16.mxu1 %v5394_v7 }
 0x79d   :  { %v3705_v30 = vadd.f32 %v3704_v20, %v3678_v19  ;;  %v3851_v4 = vadd.f32 %v3850_v21, %v3824_v35  ;;  %v3997_v1 = vadd.f32 %v3996_v37, %v3970_v56  ;;  %v4143_v58 = vadd.f32 %v4142_v40, %v4116_v27  ;;  %v4942_v20 = vld [vmem:[%s10445_s12 + $0x1e0] sm:$0xff]  ;;  %v5396_v40 = vld [vmem:[%s10444_s13 + $0xa8] sm:$0xff]  }
 0x79e   :  { %v4289_v12 = vadd.f32 %v4288_v45, %v4262_v15  ;;  %v3718_v54 = vadd.f32 %v3717_v41, %v3679_v8  ;;  %v3864_v21 = vadd.f32 %v3863_v57, %v3825_v6  ;;  %v4010_v3 = vadd.f32 %v4009_v44, %v3971_v46  ;;  %v4982_v19 = vld [vmem:[%s10445_s12 + $0x320] sm:$0xff]  ;;  %v5023_v6 = vld [vmem:[%s10445_s12 + $0x468] sm:$0xff]  ;;  %5201 = vmatpush3.bf16.msra.mxu1 %v5396_v40 }
 0x79f   :  { %v4117_v9 = vmul.f32 %v5018_v14, %v3599_v59  ;;  %v4263_v24 = vmul.f32 %v5058_v50, %v3599_v59  ;;  %v5022_v37 = vld [vmem:[%s10445_s12 + $0x460] sm:$0xff]  ;;  %v10966_v45 = vmax.f32 %v9141_v10, 0.0  ;;  %v3564_v59 = vmax.f32 %v3349_v28, 0.0  ;;  %v5397_v10 = vld [vmem:[%s10444_s13 + $0xf0] sm:$0xff]   ;;  %v5063_v46 = vld [vmem:[%s10445_s12 + $0x5a8] sm:$0xff] }
 0x7a0   :  { %v5062_v57 = vld [vmem:[%s10445_s12 + $0x5a0] sm:$0xff]  ;;  %v3351_v8 = vadd.f32 %v9383_v18, %v9118_v23  ;;  %v3353_v56 = vadd.f32 %v9388_v61, %v9118_v23  ;;  %v9483_v27 = vadd.f32 %v3356_v39, %v9154_v34  ;;  %v3644_v18 = vld [vmem:[%s10445_s12 + $0xa8] sm:$0xff]  ;;  %5202 = vmatprep.subr.bf16.mxu1 %v5397_v10 }
 0x7a1   :  { %v3603_v41 = vmax.f32 %v10966_v45, %v3563_v60  ;;  %v4156_v35 = vadd.f32 %v4155_v29, %v4117_v9  ;;  %v4302_v11 = vadd.f32 %v4301_v48, %v4263_v24  ;;  %v4943_v29 = vld [vmem:[%s10445_s12 + $0x1e8] sm:$0xff]  ;;  %v10967_v48 = vmax.f32 %v9144_v55, 0.0 }
 0x7a2   :  { %v4983_v61 = vld [vmem:[%s10445_s12 + $0x328] sm:$0xff]  ;;  %v3568_v7 = vmax.f32 %v3351_v8, 0.0  ;;  %v10968_v8 = vmax.f32 %v9152_v2, 0.0  ;;  %v4948_v2 = vld [vmem:[%s10445_s12 + $0x210] sm:$0xff] }
 0x7a3   :  { %v3683_v60 = vmul.f32 %v3643_v42, %v3603_v41  ;;  %v3829_v15 = vmul.f32 %v4942_v20, %v3603_v41  ;;  %v3975_v14 = vmul.f32 %v4982_v19, %v3603_v41  ;;  %v4121_v28 = vmul.f32 %v5022_v37, %v3603_v41  ;;  %v5399_v20 = vld [vmem:[%s10444_s13 + $0xb0] sm:$0xff]   ;;  %v5400_v37 = vld [vmem:[%s10444_s13 + $0xf8] sm:$0xff]   ;;  %v3648_v40 = vld [vmem:[%s10445_s12 + $0xc8] sm:$0xff] }
 0x7a4   :  { %v4267_v39 = vmul.f32 %v5062_v57, %v3603_v41  ;;  %v3604_v50 = vmax.f32 %v10967_v48, %v3564_v59  ;;  %v3569_v42 = vmax.f32 %v3353_v56, 0.0  ;;  %v5027_v56 = vld [vmem:[%s10445_s12 + $0x488] sm:$0xff]  ;;  %5203 = vmatpush3.bf16.msra.mxu1 %v5399_v20  ;;  %v3399_v20 = vpop.f32.mrb[108].mxu0 }
 0x7a5   :  { %v3706_v9 = vadd.f32 %v3705_v30, %v3683_v60  ;;  %v3852_v24 = vadd.f32 %v3851_v4, %v3829_v15  ;;  %v3998_v19 = vadd.f32 %v3997_v1, %v3975_v14  ;;  %v4144_v55 = vadd.f32 %v4143_v58, %v4121_v28  ;;  %v4947_v30 = vld [vmem:[%s10445_s12 + $0x208] sm:$0xff]  ;;  %v3649_v14 = vld [vmem:[%s10445_s12 + $0xd0] sm:$0xff]  ;;  %5204 = vmatprep.subr.bf16.mxu1 %v5400_v37 }
 0x7a6   :  { %v4290_v45 = vadd.f32 %v4289_v12, %v4267_v39  ;;  %v3684_v41 = vmul.f32 %v3644_v18, %v3604_v50  ;;  %v3830_v57 = vmul.f32 %v4943_v29, %v3604_v50  ;;  %v3976_v59 = vmul.f32 %v4983_v61, %v3604_v50  ;;  %v4987_v4 = vld [vmem:[%s10445_s12 + $0x348] sm:$0xff]  ;;  %v4988_v61 = vld [vmem:[%s10445_s12 + $0x350] sm:$0xff] }
 0x7a7   :  { %v4122_v1 = vmul.f32 %v5023_v6, %v3604_v50  ;;  %v4268_v58 = vmul.f32 %v5063_v46, %v3604_v50  ;;  %v3608_v12 = vmax.f32 %v10968_v8, %v3568_v7  ;;  %v5067_v10 = vld [vmem:[%s10445_s12 + $0x5c8] sm:$0xff]  ;;  %v10969_v60 = vmax.f32 %v9161_v0, 0.0  ;;  %v5402_v0 = vld [vmem:[%s10444_s13 + $0xb8] sm:$0xff]  }
 0x7a8   :  { %v3719_v28 = vadd.f32 %v3718_v54, %v3684_v41  ;;  %v3865_v18 = vadd.f32 %v3864_v21, %v3830_v57  ;;  %v4011_v29 = vadd.f32 %v4010_v3, %v3976_v59  ;;  %v3573_v39 = vmax.f32 %v9483_v27, 0.0  ;;  %v5068_v27 = vld [vmem:[%s10445_s12 + $0x5d0] sm:$0xff]  ;;  %v3401_v59 = vpop.f32.mrb[109].mxu0  ;;  %5205 = vmatpush3.bf16.msra.mxu1 %v5402_v0 }
 0x7a9   :  { %v3609_v15 = vmax.f32 %v10969_v60, %v3569_v42  ;;  %v4157_v48 = vadd.f32 %v4156_v35, %v4122_v1  ;;  %v4303_v50 = vadd.f32 %v4302_v11, %v4268_v58  ;;  %v3688_v54 = vmul.f32 %v3648_v40, %v3608_v12  ;;  %v5028_v42 = vld [vmem:[%s10445_s12 + $0x490] sm:$0xff]  ;;  %v3403_v58 = vpop.f32.mrb[110].mxu0 }
 0x7aa   :  { %v3834_v21 = vmul.f32 %v4947_v30, %v3608_v12  ;;  %v3980_v3 = vmul.f32 %v4987_v4, %v3608_v12  ;;  %v4126_v6 = vmul.f32 %v5027_v56, %v3608_v12  ;;  %v4272_v46 = vmul.f32 %v5067_v10, %v3608_v12  ;;  %v3653_v1 = vld [vmem:[%s10445_s12 + $0xf0] sm:$0xff]  ;;  %v3405_v56 = vpop.f32.mrb[111].mxu0 }
 0x7ab   :  { %v3689_v7 = vmul.f32 %v3649_v14, %v3609_v15  ;;  %v3707_v41 = vadd.f32 %v3706_v9, %v3688_v54  ;;  %v3835_v35 = vmul.f32 %v4948_v2, %v3609_v15  ;;  %v3981_v11 = vmul.f32 %v4988_v61, %v3609_v15 }
 0x7ac   :  { %v3853_v57 = vadd.f32 %v3852_v24, %v3834_v21  ;;  %v3999_v40 = vadd.f32 %v3998_v19, %v3980_v3  ;;  %v4145_v37 = vadd.f32 %v4144_v55, %v4126_v6  ;;  %v4291_v30 = vadd.f32 %v4290_v45, %v4272_v46  ;;  %v4952_v19 = vld [vmem:[%s10445_s12 + $0x230] sm:$0xff] }
 0x7ad   :  { %v9549_v4 = vadd.f32 %v3719_v28, %v3689_v7  ;;  %v9554_v8 = vadd.f32 %v3865_v18, %v3835_v35  ;;  %v9556_v12 = vadd.f32 %v4011_v29, %v3981_v11  ;;  %v4127_v9 = vmul.f32 %v5028_v42, %v3609_v15  ;;  %v4992_v55 = vld [vmem:[%s10445_s12 + $0x370] sm:$0xff]  ;;  %v5073_v35 = vld [vmem:[%s10445_s12 + $0x5f8] sm:$0xff]  ;;  %v9601_v11 = vpop.f32.mrb[112].mxu0 }
 0x7ae   :  { %v4273_v24 = vmul.f32 %v5068_v27, %v3609_v15  ;;  %v5032_v45 = vld [vmem:[%s10445_s12 + $0x4b0] sm:$0xff]  ;;  %v10970_v10 = vmax.f32 %v9173_v16, 0.0  ;;  %v3359_v14 = vadd.f32 %v9439_v36, %v9154_v34  ;;  %v3361_v28 = vadd.f32 %v9450_v53, %v9166_v47  ;;  %v3654_v53 = vld [vmem:[%s10445_s12 + $0xf8] sm:$0xff] }
 0x7af   :  { %v5072_v15 = vld [vmem:[%s10445_s12 + $0x5f0] sm:$0xff]  ;;  %v3363_v18 = vadd.f32 %v9452_v13, %v9166_v47  ;;  %v4158_v29 = vadd.f32 %v4157_v48, %v4127_v9  ;;  %v9581_v61 = vadd.f32 %v3399_v20, %v9076_v25  ;;  %v9584_v16 = vadd.f32 %v3401_v59, %v9076_v25  ;;  %v4953_v13 = vld [vmem:[%s10445_s12 + $0x238] sm:$0xff] }
 0x7b0   :  { %v3613_v60 = vmax.f32 %v10970_v10, %v3573_v39  ;;  %v9578_v2 = vadd.f32 %v4303_v50, %v4273_v24  ;;  %v3574_v3 = vmax.f32 %v3359_v14, 0.0  ;;  %v3578_v48 = vmax.f32 %v3361_v28, 0.0  ;;  %v4993_v27 = vld [vmem:[%s10445_s12 + $0x378] sm:$0xff] }
 0x7b1   :  { %v3579_v50 = vmax.f32 %v3363_v18, 0.0  ;;  %v5033_v20 = vld [vmem:[%s10445_s12 + $0x4b8] sm:$0xff]  ;;  %v9627_v10 = vadd.f32 %v3403_v58, %v9078_v62 }
 0x7b2   :  { %v3693_v39 = vmul.f32 %v3653_v1, %v3613_v60  ;;  %v3839_v0 = vmul.f32 %v4952_v19, %v3613_v60  ;;  %v3985_v54 = vmul.f32 %v4992_v55, %v3613_v60  ;;  %v4131_v21 = vmul.f32 %v5032_v45, %v3613_v60  ;;  %v3658_v1 = vld [vmem:[%s10445_s12 + $0x118] sm:$0xff] }
 0x7b3   :  { %v4277_v36 = vmul.f32 %v5072_v15, %v3613_v60  ;;  %v4957_v9 = vld [vmem:[%s10445_s12 + $0x258] sm:$0xff]  ;;  %v9630_v60 = vadd.f32 %v3405_v56, %v9078_v62 }
 0x7b4   :  { %v3708_v6 = vadd.f32 %v3707_v41, %v3693_v39  ;;  %v3854_v46 = vadd.f32 %v3853_v57, %v3839_v0  ;;  %v4000_v7 = vadd.f32 %v3999_v40, %v3985_v54  ;;  %v4146_v42 = vadd.f32 %v4145_v37, %v4131_v21  ;;  %v4997_v24 = vld [vmem:[%s10445_s12 + $0x398] sm:$0xff] }
 0x7b5   :  { %v4292_v59 = vadd.f32 %v4291_v30, %v4277_v36  ;;  %v10971_v41 = vmax.f32 %v9176_v26, 0.0  ;;  %v10972_v40 = vmax.f32 %v9184_v32, 0.0  ;;  %v10973_v30 = vmax.f32 %v9192_v33, 0.0  ;;  %v9620_v26 = vpop.f32.mrb[113].mxu0  ;;  %v9622_v32 = vpop.f32.mrb[116].mxu1  ;;  %v5037_v0 = vld [vmem:[%s10445_s12 + $0x4d8] sm:$0xff] }
 0x7b6   :  { %v9632_v15 = vpop.f32.mrb[114].mxu0  ;;  %v3474_v14 = vpop.f32.mrb[117].mxu1  ;;  %v5077_v54 = vld [vmem:[%s10445_s12 + $0x618] sm:$0xff] }
 0x7b7   :  { %v3614_v57 = vmax.f32 %v10971_v41, %v3574_v3  ;;  %v3618_v37 = vmax.f32 %v10972_v40, %v3578_v48  ;;  %v9618_v19 = vmax.f32 %v10973_v30, %v3579_v50  ;;  %v9640_v58 = vpop.f32.mrb[115].mxu0  ;;  %v9642_v21 = vpop.f32.mrb[118].mxu1  ;;  %v4958_v48 = vld [vmem:[%s10445_s12 + $0x260] sm:$0xff] }
 0x7b8   :  { %v4998_v50 = vld [vmem:[%s10445_s12 + $0x3a0] sm:$0xff] }
 0x7b9   :  { %v3694_v33 = vmul.f32 %v3654_v53, %v3614_v57  ;;  %v3840_v28 = vmul.f32 %v4953_v13, %v3614_v57  ;;  %v3986_v18 = vmul.f32 %v4993_v27, %v3614_v57  ;;  %v4132_v39 = vmul.f32 %v5033_v20, %v3614_v57  ;;  %v3659_v13 = vld [vmem:[%s10445_s12 + $0x120] sm:$0xff]  ;;  %v3477_v27 = vpop.f32.mrb[119].mxu1 }
 0x7ba   :  { %v9644_v56 = vmul.f32 %v5073_v35, %v3614_v57  ;;  %v3698_v36 = vmul.f32 %v3658_v1, %v3618_v37  ;;  %v3844_v3 = vmul.f32 %v4957_v9, %v3618_v37  ;;  %v3990_v53 = vmul.f32 %v4997_v24, %v3618_v37 }
 0x7bb   :  { %v3721_v20 = vadd.f32 %v9549_v4, %v3694_v33  ;;  %v3867_v35 = vadd.f32 %v9554_v8, %v3840_v28  ;;  %v4013_v41 = vadd.f32 %v9556_v12, %v3986_v18  ;;  %v9658_v57 = vadd.f32 %v4158_v29, %v4132_v39  ;;  %v5038_v8 = vld [vmem:[%s10445_s12 + $0x4e0] sm:$0xff]  ;;  %v9666_v12 = vpop.f32.mrb[116].mxu0  ;;  %v9676_v28 = vpop.f32.mrb[120].mxu1 }
 0x7bc   :  { %v3709_v40 = vadd.f32 %v3708_v6, %v3698_v36  ;;  %v3855_v1 = vadd.f32 %v3854_v46, %v3844_v3  ;;  %v4001_v9 = vadd.f32 %v4000_v7, %v3990_v53  ;;  %v4136_v24 = vmul.f32 %v5037_v0, %v3618_v37 }
 0x7bd   :  { %v4282_v30 = vmul.f32 %v5077_v54, %v3618_v37  ;;  %v3699_v14 = vmul.f32 %v3659_v13, %v9618_v19  ;;  %v3845_v44 = vmul.f32 %v4958_v48, %v9618_v19  ;;  %v3991_v45 = vmul.f32 %v4998_v50, %v9618_v19  ;;  %v9674_v37 = vpop.f32.mrb[117].mxu0  ;;  %v5078_v54 = vld [vmem:[%s10445_s12 + $0x620] sm:$0xff]  ;;  %v4924_v13 = vld [vmem:[%s10445_s12 + $0x150] sm:$0xff] }
 0x7be   :  { %v3710_v27 = vrot.slane %v3709_v40, 4  ;;  %v3856_v55 = vrot.slane %v3855_v1, 4  ;;  %v4002_v4 = vrot.slane %v4001_v9, 4  ;;  %v4147_v33 = vadd.f32 %v4146_v42, %v4136_v24 }
 0x7bf   :  { %v4293_v29 = vadd.f32 %v4292_v59, %v4282_v30  ;;  %v9668_v6 = vadd.f32 %v3721_v20, %v3699_v14  ;;  %v9670_v46 = vadd.f32 %v3867_v35, %v3845_v44  ;;  %v9672_v7 = vadd.f32 %v4013_v41, %v3991_v45  ;;  %v3625_v59 = vld [vmem:[%s10445_s12 + $0x10] sm:$0xff]  ;;  %v9684_v44 = vpop.f32.mrb[118].mxu0  ;;  %v3482_v45 = vpop.f32.mrb[121].mxu1 }
 0x7c0   :  { %v3711_v18 = vadd.f32 %v3710_v27, %v3709_v40  ;;  %v3857_v39 = vadd.f32 %v3856_v55, %v3855_v1  ;;  %v4003_v42 = vadd.f32 %v4002_v4, %v4001_v9  ;;  %v4148_v0 = vrot.slane %v4147_v33, 4  ;;  %v9694_v48 = vpop.f32.mrb[119].mxu0  ;;  %v9696_v50 = vpop.f32.mrb[122].mxu1  ;;  %v4964_v1 = vld [vmem:[%s10445_s12 + $0x290] sm:$0xff] }
 0x7c1   :  { %v4294_v36 = vrot.slane %v4293_v29, 4  ;;  %v9689_v55 = vmul.f32 %v5038_v8, %v9618_v19  ;;  %10974 = vst [vmem:[#allocation16_spill] sm:$0xff] %v9696_v50  ;;  %v5004_v9 = vld [vmem:[%s10445_s12 + $0x3d0] sm:$0xff]  ;;  %v3485_v24 = vpop.f32.mrb[123].mxu1  ;;  %v9709_v14 = vmul.f32 %v5078_v54, %v9618_v19  ;;  %v10975_v27 = vmax.f32 %v9581_v61, 0.0  ;;  %v4925_v61 = vld [vmem:[%s10445_s12 + $0x158] sm:$0xff] }
 0x7c2   :  { %v3712_v20 = vrot.slane %v3711_v18, 2  ;;  %v3858_v35 = vrot.slane %v3857_v39, 2  ;;  %v4004_v41 = vrot.slane %v4003_v42, 2  ;;  %v9698_v40 = vadd.f32 %v4148_v0, %v4147_v33  ;;  %v5044_v8 = vld [vmem:[%s10445_s12 + $0x510] sm:$0xff]  ;;  %v5045_v24 = vld [vmem:[%s10445_s12 + $0x518] sm:$0xff]  ;;  %v5010_v50 = vld [vmem:[%s10445_s12 + $0x400] sm:$0xff] }
 0x7c3   :  { %v9706_v30 = vadd.f32 %v4294_v36, %v4293_v29  ;;  %v10976_v4 = vmax.f32 %v9113_v5, 0.0  ;;  %v10977_v0 = vmax.f32 %v9584_v16, 0.0  ;;  %v10978_v45 = vmax.f32 %v9121_v63, 0.0  ;;  %v3626_v29 = vld [vmem:[%s10445_s12 + $0x18] sm:$0xff] }
 0x7c4   :  { %v9728_v19 = vadd.f32 %v3712_v20, %v3711_v18  ;;  %v9730_v5 = vadd.f32 %v3858_v35, %v3857_v39  ;;  %v9732_v54 = vadd.f32 %v4004_v41, %v4003_v42  ;;  %v4965_v63 = vld [vmem:[%s10445_s12 + $0x298] sm:$0xff]  ;;  %v10985_v42 = vmax.f32 %v9130_v31, 0.0 }
 0x7c5   :  { %v3585_v33 = vmax.f32 %v10976_v4, %v10975_v27  ;;  %v3586_v53 = vmax.f32 %v10978_v45, %v10977_v0  ;;  %v5005_v16 = vld [vmem:[%s10445_s12 + $0x3d8] sm:$0xff]  ;;  %v9746_v0 = vpop.f32.mrb[120].mxu0 }
 0x7c6   :  { %10979 = vst [vmem:[#allocation20_spill] sm:$0xff] %v9746_v0  ;;  %v9752_v17 = vpop.f32.mrb[121].mxu0 }
 0x7c7   :  { %v3665_v18 = vmul.f32 %v3625_v59, %v3585_v33  ;;  %v3811_v20 = vmul.f32 %v4924_v13, %v3585_v33  ;;  %v3957_v39 = vmul.f32 %v4964_v1, %v3585_v33  ;;  %v4103_v35 = vmul.f32 %v5004_v9, %v3585_v33  ;;  %10980 = vst [vmem:[#allocation21_spill] sm:$0xff] %v9752_v17  ;;  %v9754_v59 = vpop.f32.mrb[124].mxu1  ;;  %v3630_v1 = vld [vmem:[%s10445_s12 + $0x38] sm:$0xff] }
 0x7c8   :  { %v4249_v27 = vmul.f32 %v5044_v8, %v3585_v33  ;;  %v3666_v4 = vmul.f32 %v3626_v29, %v3586_v53  ;;  %v3812_v45 = vmul.f32 %v4925_v61, %v3586_v53  ;;  %v3958_v36 = vmul.f32 %v4965_v63, %v3586_v53  ;;  %10981 = vst [vmem:[#allocation23_spill] sm:$0xff] %v9754_v59  ;;  %v4929_v9 = vld [vmem:[%s10445_s12 + $0x178] sm:$0xff]  ;;  %v9768_v29 = vpop.f32.mrb[122].mxu0  ;;  %v3490_v61 = vpop.f32.mrb[125].mxu1 }
 0x7c9   :  { %v9748_v3 = vmul.f32 %v5005_v16, %v3586_v53  ;;  %v9750_v52 = vmul.f32 %v5045_v24, %v3586_v53  ;;  %v3550_v13 = vmax.f32 %v9627_v10, 0.0  ;;  %v3551_v33 = vmax.f32 %v9630_v60, 0.0  ;;  %10982 = vst [vmem:[#allocation18_spill] sm:$0xff] %v9768_v29  ;;  %v4969_v10 = vld [vmem:[%s10445_s12 + $0x2b8] sm:$0xff]  ;;  %v9787_v61 = vpop.f32.mrb[123].mxu0  ;;  %v9789_v41 = vpop.f32.mrb[126].mxu1 }
 0x7ca   :  { %v3410_v53 = vadd.f32 %v9601_v11, %v9088_v22  ;;  %v3412_v8 = vadd.f32 %v9620_v26, %v9088_v22  ;;  %v5009_v63 = vld [vmem:[%s10445_s12 + $0x3f8] sm:$0xff]  ;;  %v3473_v11 = vadd.f32 %v9622_v32, %v9076_v25  ;;  %v3414_v26 = vadd.f32 %v9632_v15, %v9090_v38  ;;  %10983 = vst [vmem:[#allocation17_spill] sm:$0xff] %v9787_v61  ;;  %v3631_v25 = vld [vmem:[%s10445_s12 + $0x40] sm:$0xff] }
 0x7cb   :  { %v5049_v60 = vld [vmem:[%s10445_s12 + $0x538] sm:$0xff]  ;;  %v3416_v16 = vadd.f32 %v9640_v58, %v9090_v38  ;;  %v3476_v24 = vadd.f32 %v9642_v21, %v9078_v62  ;;  %10984 = vst [vmem:[#allocation27_spill] sm:$0xff] %v9789_v41  ;;  %v3590_v49 = vmax.f32 %v10985_v42, %v3550_v13  ;;  %v10986_v29 = vmax.f32 %v9136_v43, 0.0  ;;  %v4930_v32 = vld [vmem:[%s10445_s12 + $0x180] sm:$0xff]  ;;  %v3493_v21 = vpop.f32.mrb[127].mxu1 }
 0x7cc   :  { %v4970_v62 = vld [vmem:[%s10445_s12 + $0x2c0] sm:$0xff]  ;;  %v3555_v15 = vmax.f32 %v3410_v53, 0.0  ;;  %v3556_v58 = vmax.f32 %v3412_v8, 0.0  ;;  %v3547_v31 = vmax.f32 %v3473_v11, 0.0  ;;  %v3560_v42 = vmax.f32 %v3414_v26, 0.0 }
 0x7cd   :  { %v3591_v47 = vmax.f32 %v10986_v29, %v3551_v33  ;;  %v3561_v13 = vmax.f32 %v3416_v16, 0.0  ;;  %v3552_v43 = vmax.f32 %v3476_v24, 0.0  ;;  %v3670_v33 = vmul.f32 %v3630_v1, %v3590_v49  ;;  %v5050_v53 = vld [vmem:[%s10445_s12 + $0x540] sm:$0xff] }
 0x7ce   :  { %v3816_v29 = vmul.f32 %v4929_v9, %v3590_v49  ;;  %v3962_v41 = vmul.f32 %v4969_v10, %v3590_v49  ;;  %v4108_v61 = vmul.f32 %v5009_v63, %v3590_v49  ;;  %v4254_v59 = vmul.f32 %v5049_v60, %v3590_v49  ;;  %v3635_v49 = vld [vmem:[%s10445_s12 + $0x60] sm:$0xff] }
 0x7cf   :  { %v3671_v17 = vmul.f32 %v3631_v25, %v3591_v47  ;;  %v3817_v0 = vmul.f32 %v4930_v32, %v3591_v47  ;;  %v3963_v34 = vmul.f32 %v4970_v62, %v3591_v47  ;;  %v3729_v8 = vadd.f32 %v3670_v33, %v3665_v18  ;;  %v4934_v60 = vld [vmem:[%s10445_s12 + $0x1a0] sm:$0xff]  ;;  %v9819_v18 = vpop.f32.mrb[128].mxu1 }
 0x7d0   :  { %v3875_v11 = vadd.f32 %v3816_v29, %v3811_v20  ;;  %v4021_v26 = vadd.f32 %v3962_v41, %v3957_v39  ;;  %v4167_v16 = vadd.f32 %v4108_v61, %v4103_v35  ;;  %v4313_v1 = vadd.f32 %v4254_v59, %v4249_v27  ;;  %v4974_v24 = vld [vmem:[%s10445_s12 + $0x2e0] sm:$0xff]  ;;  %10987 = vst [vmem:[#allocation54_spill] sm:$0xff] %v9819_v18  ;;  %v10990_v27 = vld [vmem:[#allocation32_spill] sm:$0xff]  ;;  %v4975_v59 = vld [vmem:[%s10445_s12 + $0x2e8] sm:$0xff] }
 0x7d1   :  { %v3742_v9 = vadd.f32 %v3671_v17, %v3666_v4  ;;  %v3888_v10 = vadd.f32 %v3817_v0, %v3812_v45  ;;  %v4034_v63 = vadd.f32 %v3963_v34, %v3958_v36  ;;  %v4109_v20 = vmul.f32 %v5010_v50, %v3591_v47  ;;  %v10988_v35 = vld [vmem:[#allocation10_spill] sm:$0xff]  ;;  %v3636_v45 = vld [vmem:[%s10445_s12 + $0x68] sm:$0xff]  ;;  %v3498_v50 = vpop.f32.mrb[129].mxu1 }
 0x7d2   :  { %v4255_v39 = vmul.f32 %v5050_v53, %v3591_v47  ;;  %v10989_v17 = vmax.f32 %v10988_v35, 0.0  ;;  %v5014_v34 = vld [vmem:[%s10445_s12 + $0x420] sm:$0xff]  ;;  %v10991_v4 = vmax.f32 %v10990_v27, 0.0  ;;  %v4935_v47 = vld [vmem:[%s10445_s12 + $0x1a8] sm:$0xff]  ;;  %v9852_v27 = vpop.f32.mrb[130].mxu1 }
 0x7d3   :  { %v5054_v36 = vld [vmem:[%s10445_s12 + $0x560] sm:$0xff]  ;;  %v10992_v61 = vld [vmem:[#allocation43_spill] sm:$0xff] }
 0x7d4   :  { %v3595_v41 = vmax.f32 %v10989_v17, %v3555_v15  ;;  %v3596_v0 = vmax.f32 %v10991_v4, %v3556_v58  ;;  %v10993_v25 = vmax.f32 %v10992_v61, 0.0  ;;  %v10994_v62 = vld [vmem:[#allocation34_spill] sm:$0xff]  ;;  %v4180_v4 = vadd.f32 %v4109_v20, %v9748_v3 }
 0x7d5   :  { %v10995_v15 = vmax.f32 %v10994_v62, 0.0  ;;  %v10996_v58 = vld [vmem:[#allocation22_spill] sm:$0xff]  ;;  %v4326_v50 = vadd.f32 %v4255_v39, %v9750_v52 }
 0x7d6   :  { %v3587_v32 = vmax.f32 %v10993_v25, %v3547_v31  ;;  %v10997_v33 = vmax.f32 %v10996_v58, 0.0  ;;  %v10998_v53 = vld [vmem:[#allocation38_spill] sm:$0xff]  ;;  %v3675_v18 = vmul.f32 %v3635_v49, %v3595_v41  ;;  %v3821_v61 = vmul.f32 %v4934_v60, %v3595_v41  ;;  %v3501_v31 = vpop.f32.mrb[131].mxu1 }
 0x7d7   :  { %v3600_v21 = vmax.f32 %v10995_v15, %v3560_v42  ;;  %v10999_v35 = vmax.f32 %v10998_v53, 0.0  ;;  %v3967_v25 = vmul.f32 %v4974_v24, %v3595_v41  ;;  %v4113_v62 = vmul.f32 %v5014_v34, %v3595_v41  ;;  %v3627_v3 = vld [vmem:[%s10445_s12 + $0x20] sm:$0xff] }
 0x7d8   :  { %v9846_v29 = vmax.f32 %v10997_v33, %v3561_v13  ;;  %v4259_v42 = vmul.f32 %v5054_v36, %v3595_v41  ;;  %v3676_v15 = vmul.f32 %v3636_v45, %v3596_v0  ;;  %v5015_v13 = vld [vmem:[%s10445_s12 + $0x428] sm:$0xff]  ;;  %v3730_v52 = vadd.f32 %v3729_v8, %v3675_v18  ;;  %v4926_v24 = vld [vmem:[%s10445_s12 + $0x160] sm:$0xff] }
 0x7d9   :  { %v9850_v17 = vmax.f32 %v10999_v35, %v3552_v43  ;;  %v5055_v43 = vld [vmem:[%s10445_s12 + $0x568] sm:$0xff]  ;;  %v3876_v49 = vadd.f32 %v3875_v11, %v3821_v61  ;;  %v3822_v60 = vmul.f32 %v4935_v47, %v3596_v0  ;;  %v3968_v20 = vmul.f32 %v4975_v59, %v3596_v0  ;;  %v4966_v39 = vld [vmem:[%s10445_s12 + $0x2a0] sm:$0xff] }
 0x7da   :  { %v5006_v41 = vld [vmem:[%s10445_s12 + $0x3e0] sm:$0xff]  ;;  %v4022_v34 = vadd.f32 %v4021_v26, %v3967_v25  ;;  %v4168_v36 = vadd.f32 %v4167_v16, %v4113_v62  ;;  %v4314_v45 = vadd.f32 %v4313_v1, %v4259_v42  ;;  %v3743_v58 = vadd.f32 %v3742_v9, %v3676_v15  ;;  %v3640_v11 = vld [vmem:[%s10445_s12 + $0x88] sm:$0xff] }
 0x7db   :  { %v5046_v8 = vld [vmem:[%s10445_s12 + $0x520] sm:$0xff]  ;;  %v4939_v18 = vld [vmem:[%s10445_s12 + $0x1c8] sm:$0xff]  ;;  %v3889_v47 = vadd.f32 %v3888_v10, %v3822_v60  ;;  %v4035_v59 = vadd.f32 %v4034_v63, %v3968_v20  ;;  %v4114_v33 = vmul.f32 %v5015_v13, %v3596_v0  ;;  %v4260_v53 = vmul.f32 %v5055_v43, %v3596_v0  ;;  %v3641_v10 = vld [vmem:[%s10445_s12 + $0x90] sm:$0xff] }
 0x7dc   :  { %v4979_v26 = vld [vmem:[%s10445_s12 + $0x308] sm:$0xff]  ;;  %v3667_v9 = vmul.f32 %v3627_v3, %v3587_v32  ;;  %v3813_v35 = vmul.f32 %v4926_v24, %v3587_v32  ;;  %v3959_v61 = vmul.f32 %v4966_v39, %v3587_v32  ;;  %v4105_v31 = vmul.f32 %v5006_v41, %v3587_v32  ;;  %v4940_v63 = vld [vmem:[%s10445_s12 + $0x1d0] sm:$0xff] }
 0x7dd   :  { %v5019_v16 = vld [vmem:[%s10445_s12 + $0x448] sm:$0xff]  ;;  %v4980_v0 = vld [vmem:[%s10445_s12 + $0x310] sm:$0xff]  ;;  %v4181_v25 = vadd.f32 %v4180_v4, %v4114_v33  ;;  %v4327_v62 = vadd.f32 %v4326_v50, %v4260_v53  ;;  %v4251_v42 = vmul.f32 %v5046_v8, %v3587_v32  ;;  %v3680_v15 = vmul.f32 %v3640_v11, %v3600_v21 }
 0x7de   :  { %v5059_v1 = vld [vmem:[%s10445_s12 + $0x588] sm:$0xff]  ;;  %v3826_v13 = vmul.f32 %v4939_v18, %v3600_v21  ;;  %v3972_v43 = vmul.f32 %v4979_v26, %v3600_v21  ;;  %v4118_v3 = vmul.f32 %v5019_v16, %v3600_v21  ;;  %v5020_v20 = vld [vmem:[%s10445_s12 + $0x450] sm:$0xff]  ;;  %v3681_v41 = vmul.f32 %v3641_v10, %v9846_v29 }
 0x7df   :  { %v4264_v60 = vmul.f32 %v5059_v1, %v3600_v21  ;;  %v5060_v24 = vld [vmem:[%s10445_s12 + $0x590] sm:$0xff]  ;;  %v9907_v39 = vadd.f32 %v3730_v52, %v3680_v15  ;;  %v3827_v4 = vmul.f32 %v4940_v63, %v9846_v29  ;;  %v3973_v32 = vmul.f32 %v4980_v0, %v9846_v29  ;;  %v3632_v21 = vld [vmem:[%s10445_s12 + $0x48] sm:$0xff] }
 0x7e0   :  { %v4931_v50 = vld [vmem:[%s10445_s12 + $0x188] sm:$0xff]  ;;  %v3877_v52 = vadd.f32 %v3876_v49, %v3826_v13  ;;  %v4023_v11 = vadd.f32 %v4022_v34, %v3972_v43  ;;  %v4169_v18 = vadd.f32 %v4168_v36, %v4118_v3  ;;  %v9927_v16 = vadd.f32 %v3743_v58, %v3681_v41 }
 0x7e1   :  { %v4971_v8 = vld [vmem:[%s10445_s12 + $0x2c8] sm:$0xff]  ;;  %v4315_v33 = vadd.f32 %v4314_v45, %v4264_v60  ;;  %v9929_v1 = vadd.f32 %v3889_v47, %v3827_v4  ;;  %v9931_v10 = vadd.f32 %v4035_v59, %v3973_v32  ;;  %v4119_v63 = vmul.f32 %v5020_v20, %v9846_v29 }
 0x7e2   :  { %v5011_v53 = vld [vmem:[%s10445_s12 + $0x408] sm:$0xff]  ;;  %v4265_v49 = vmul.f32 %v5060_v24, %v9846_v29  ;;  %v3672_v34 = vmul.f32 %v3632_v21, %v9850_v17  ;;  %v3818_v36 = vmul.f32 %v4931_v50, %v9850_v17  ;;  %v3964_v45 = vmul.f32 %v4971_v8, %v9850_v17  ;;  %v5064_v21 = vld [vmem:[%s10445_s12 + $0x5b0] sm:$0xff] }
 0x7e3   :  { %v5051_v26 = vld [vmem:[%s10445_s12 + $0x548] sm:$0xff]  ;;  %v9938_v0 = vadd.f32 %v4181_v25, %v4119_v63  ;;  %v4110_v15 = vmul.f32 %v5011_v53, %v9850_v17  ;;  %v3420_v47 = vadd.f32 %v9666_v12, %v9110_v51  ;;  %v3645_v25 = vld [vmem:[%s10445_s12 + $0xb0] sm:$0xff]  ;;  %v3422_v24 = vadd.f32 %v9674_v37, %v9110_v51 }
 0x7e4   :  { %v4256_v58 = vmul.f32 %v5051_v26, %v9850_v17  ;;  %v4328_v59 = vadd.f32 %v4327_v62, %v4265_v49  ;;  %v3755_v13 = vadd.f32 %v3672_v34, %v3667_v9  ;;  %v3901_v43 = vadd.f32 %v3818_v36, %v3813_v35  ;;  %v4944_v12 = vld [vmem:[%s10445_s12 + $0x1f0] sm:$0xff]  ;;  %v11002_v41 = vld [vmem:[#allocation15_spill] sm:$0xff] }
 0x7e5   :  { %v4047_v3 = vadd.f32 %v3964_v45, %v3959_v61  ;;  %v9944_v29 = vadd.f32 %v4110_v15, %v4105_v31  ;;  %v3565_v20 = vmax.f32 %v3420_v47, 0.0  ;;  %v4984_v17 = vld [vmem:[%s10445_s12 + $0x330] sm:$0xff]  ;;  %v3481_v35 = vadd.f32 %v9676_v28, %v9088_v22  ;;  %v11004_v45 = vld [vmem:[#allocation31_spill] sm:$0xff]  ;;  %v11006_v47 = vld [vmem:[#allocation41_spill] sm:$0xff] }
 0x7e6   :  { %v9946_v60 = vadd.f32 %v4256_v58, %v4251_v42  ;;  %v5024_v9 = vld [vmem:[%s10445_s12 + $0x470] sm:$0xff]  ;;  %v11000_v61 = vrot.slane %v9668_v6, 4  ;;  %v11001_v37 = vrot.slane %v9670_v46, 4  ;;  %v4015_v42 = vrot.slane %v9672_v7, 4  ;;  %v5065_v58 = vld [vmem:[%s10445_s12 + $0x5b8] sm:$0xff] }
 0x7e7   :  { %v11003_v4 = vmax.f32 %v11002_v41, 0.0  ;;  %v3566_v50 = vmax.f32 %v3422_v24, 0.0  ;;  %v4160_v22 = vadd.f32 %v9658_v57, %v9689_v55  ;;  %v3557_v28 = vmax.f32 %v3481_v35, 0.0  ;;  %v4945_v57 = vld [vmem:[%s10445_s12 + $0x1f8] sm:$0xff]  ;;  %v3637_v24 = vld [vmem:[%s10445_s12 + $0x70] sm:$0xff] }
 0x7e8   :  { %v3724_v31 = vadd.f32 %v11000_v61, %v9668_v6  ;;  %v3870_v62 = vadd.f32 %v11001_v37, %v9670_v46  ;;  %v4305_v6 = vadd.f32 %v9578_v2, %v9644_v56  ;;  %v3646_v46 = vld [vmem:[%s10445_s12 + $0xb8] sm:$0xff]  ;;  %v4016_v26 = vadd.f32 %v4015_v42, %v9672_v7  ;;  %v4976_v42 = vld [vmem:[%s10445_s12 + $0x2f0] sm:$0xff] }
 0x7e9   :  { %v3605_v32 = vmax.f32 %v11003_v4, %v3565_v20  ;;  %v4985_v2 = vld [vmem:[%s10445_s12 + $0x338] sm:$0xff]  ;;  %v11005_v15 = vmax.f32 %v11004_v45, 0.0  ;;  %v11007_v20 = vmax.f32 %v11006_v47, 0.0 }
 0x7ea   :  { %v3725_v8 = vrot.slane %v3724_v31, 2  ;;  %v3871_v53 = vrot.slane %v3870_v62, 2  ;;  %v5025_v56 = vld [vmem:[%s10445_s12 + $0x478] sm:$0xff]  ;;  %v4306_v45 = vadd.f32 %v4305_v6, %v9709_v14  ;;  %v11009_v6 = vrot.slane %v9730_v5, 1 }
 0x7eb   :  { %v3685_v63 = vmul.f32 %v3645_v25, %v3605_v32  ;;  %v3831_v49 = vmul.f32 %v4944_v12, %v3605_v32  ;;  %v3977_v34 = vmul.f32 %v4984_v17, %v3605_v32  ;;  %v4123_v36 = vmul.f32 %v5024_v9, %v3605_v32  ;;  %v4936_v12 = vld [vmem:[%s10445_s12 + $0x1b0] sm:$0xff]  ;;  %v3650_v14 = vld [vmem:[%s10445_s12 + $0xd8] sm:$0xff] }
 0x7ec   :  { %v4269_v55 = vmul.f32 %v5064_v21, %v3605_v32  ;;  %v3606_v7 = vmax.f32 %v11005_v15, %v3566_v50  ;;  %v3597_v25 = vmax.f32 %v11007_v20, %v3557_v28  ;;  %v3726_v17 = vadd.f32 %v3725_v8, %v3724_v31 }
 0x7ed   :  { %v10007_v9 = vadd.f32 %v9907_v39, %v3685_v63  ;;  %v10009_v35 = vadd.f32 %v3877_v52, %v3831_v49  ;;  %v10011_v61 = vadd.f32 %v4023_v11, %v3977_v34  ;;  %v10013_v37 = vadd.f32 %v4169_v18, %v4123_v36  ;;  %v5016_v52 = vld [vmem:[%s10445_s12 + $0x430] sm:$0xff] }
 0x7ee   :  { %v10018_v41 = vadd.f32 %v4315_v33, %v4269_v55  ;;  %v3686_v4 = vmul.f32 %v3646_v46, %v3606_v7  ;;  %v3832_v32 = vmul.f32 %v4945_v57, %v3606_v7  ;;  %v3978_v21 = vmul.f32 %v4985_v2, %v3606_v7  ;;  %v5056_v11 = vld [vmem:[%s10445_s12 + $0x570] sm:$0xff] }
 0x7ef   :  { %v4124_v31 = vmul.f32 %v5025_v56, %v3606_v7  ;;  %v4270_v50 = vmul.f32 %v5065_v58, %v3606_v7  ;;  %v3677_v39 = vmul.f32 %v3637_v24, %v3597_v25  ;;  %v3823_v28 = vmul.f32 %v4936_v12, %v3597_v25  ;;  %v4989_v24 = vld [vmem:[%s10445_s12 + $0x358] sm:$0xff]  ;;  %v11010_v12 = vld [vmem:[#allocation2_spill] sm:$0xff] }
 0x7f0   :  { %v10027_v18 = vadd.f32 %v9927_v16, %v3686_v4  ;;  %v10030_v33 = vadd.f32 %v9929_v1, %v3832_v32  ;;  %v10033_v46 = vadd.f32 %v9931_v10, %v3978_v21  ;;  %v3969_v8 = vmul.f32 %v4976_v42, %v3597_v25  ;;  %v5069_v42 = vld [vmem:[%s10445_s12 + $0x5d8] sm:$0xff] }
 0x7f1   :  { %v10036_v63 = vadd.f32 %v9938_v0, %v4124_v31  ;;  %v10038_v49 = vadd.f32 %v4328_v59, %v4270_v50  ;;  %v10040_v34 = vadd.f32 %v3755_v13, %v3677_v39  ;;  %v10042_v36 = vadd.f32 %v3901_v43, %v3823_v28 }
 0x7f2   :  { %v10044_v57 = vadd.f32 %v4047_v3, %v3969_v8  ;;  %v4115_v16 = vmul.f32 %v5016_v52, %v3597_v25  ;;  %v4261_v2 = vmul.f32 %v5056_v11, %v3597_v25  ;;  %v3727_v1 = vrot.slane %v3726_v17, 1  ;;  %v4949_v25 = vld [vmem:[%s10445_s12 + $0x218] sm:$0xff] }
 0x7f3   :  { %v3872_v56 = vadd.f32 %v3871_v53, %v3870_v62  ;;  %v4017_v55 = vrot.slane %v4016_v26, 2  ;;  %v4161_v10 = vrot.slane %v4160_v22, 4  ;;  %v3424_v13 = vadd.f32 %v9684_v44, %v9118_v23 }
 0x7f4   :  { %v10048_v15 = vadd.f32 %v9944_v29, %v4115_v16  ;;  %v10051_v0 = vadd.f32 %v9946_v60, %v4261_v2  ;;  %v3728_v59 = vadd.f32 %v3727_v1, %v3726_v17  ;;  %v4307_v58 = vrot.slane %v4306_v45, 4 }
 0x7f5   :  { %v3873_v43 = vrot.slane %v3872_v56, 1  ;;  %v4018_v3 = vadd.f32 %v4017_v55, %v4016_v26  ;;  %v4162_v7 = vadd.f32 %v4161_v10, %v4160_v22  ;;  %v3570_v62 = vmax.f32 %v3424_v13, 0.0 }
 0x7f6   :  { %v11008_v29 = vrot.slane %v9728_v19, 1  ;;  %v3861_v53 = vadd.f32 %v11009_v6, %v9730_v5  ;;  %v4006_v44 = vrot.slane %v9732_v54, 1  ;;  %v4308_v20 = vadd.f32 %v4307_v58, %v4306_v45 }
 0x7f7   :  { %v3874_v47 = vadd.f32 %v3873_v43, %v3872_v56  ;;  %v4019_v26 = vrot.slane %v4018_v3, 1  ;;  %v4163_v22 = vrot.slane %v4162_v7, 2  ;;  %v11011_v5 = vmax.f32 %v11010_v12, 0.0 }
 0x7f8   :  { %v3715_v60 = vadd.f32 %v11008_v29, %v9728_v19  ;;  %v5029_v19 = vld [vmem:[%s10445_s12 + $0x498] sm:$0xff]  ;;  %v4007_v4 = vadd.f32 %v4006_v44, %v9732_v54  ;;  %v11012_v32 = vrot.slane %v9698_v40, 2  ;;  %v4296_v31 = vrot.slane %v9706_v30, 2 }
 0x7f9   :  { %v3610_v17 = vmax.f32 %v11011_v5, %v3570_v62  ;;  %v4020_v50 = vadd.f32 %v4019_v26, %v4018_v3  ;;  %v4164_v39 = vadd.f32 %v4163_v22, %v4162_v7  ;;  %v4309_v28 = vrot.slane %v4308_v20, 2  ;;  %v11013_v62 = vld [vmem:[#allocation16_spill] sm:$0xff]  ;;  %v11014_v26 = vld [vmem:[#allocation5_spill] sm:$0xff] }
 0x7fa   :  { %v4151_v21 = vadd.f32 %v11012_v32, %v9698_v40  ;;  %v4354_v52 = vsel %vm4352_vm5, %v3728_v59, %v3874_v47  ;;  %v4297_v58 = vadd.f32 %v4296_v31, %v9706_v30  ;;  %v11015_v22 = vld [vmem:[#allocation20_spill] sm:$0xff]  ;;  %v5070_v31 = vld [vmem:[%s10445_s12 + $0x5e0] sm:$0xff] }
 0x7fb   :  { %v3690_v11 = vmul.f32 %v3650_v14, %v3610_v17  ;;  %v3836_v8 = vmul.f32 %v4949_v25, %v3610_v17  ;;  %v3982_v16 = vmul.f32 %v4989_v24, %v3610_v17  ;;  %v4128_v2 = vmul.f32 %v5029_v19, %v3610_v17  ;;  %v11016_v25 = vld [vmem:[#allocation21_spill] sm:$0xff]  ;;  %v11017_v19 = vld [vmem:[#allocation23_spill] sm:$0xff] }
 0x7fc   :  { %v4165_v1 = vrot.slane %v4164_v39, 1  ;;  %v4310_v56 = vadd.f32 %v4309_v28, %v4308_v20  ;;  %v4360_v55 = vsel %vm4358_vm6, %v4354_v52, %v4020_v50  ;;  %v4274_v54 = vmul.f32 %v5069_v42, %v3610_v17  ;;  %v4990_v20 = vld [vmem:[%s10445_s12 + $0x360] sm:$0xff]  ;;  %v11020_v50 = vld [vmem:[#allocation40_spill] sm:$0xff]  ;;  %v4941_v52 = vld [vmem:[%s10445_s12 + $0x1d8] sm:$0xff] }
 0x7fd   :  { %v10087_v10 = vadd.f32 %v10007_v9, %v3690_v11  ;;  %v10090_v40 = vadd.f32 %v10009_v35, %v3836_v8  ;;  %v10093_v45 = vadd.f32 %v10011_v61, %v3982_v16  ;;  %v10096_v59 = vadd.f32 %v10013_v37, %v4128_v2  ;;  %v11018_v42 = vld [vmem:[#allocation30_spill] sm:$0xff]  ;;  %v11022_v2 = vld [vmem:[#allocation19_spill] sm:$0xff] }
 0x7fe   :  { %v4166_v13 = vadd.f32 %v4165_v1, %v4164_v39  ;;  %v4311_v43 = vrot.slane %v4310_v56, 1  ;;  %v10099_v3 = vadd.f32 %v10018_v41, %v4274_v54  ;;  %v4152_v7 = vrot.slane %v4151_v21, 1  ;;  %v11023_v1 = vld [vmem:[#allocation18_spill] sm:$0xff] }
 0x7ff   :  { %v4353_v9 = vsel %vm4352_vm5, %v3715_v60, %v3861_v53  ;;  %v3426_v35 = vadd.f32 %v9694_v48, %v9118_v23  ;;  %v3484_v61 = vadd.f32 %v11013_v62, %v9090_v38  ;;  %v4298_v44 = vrot.slane %v4297_v58, 1  ;;  %v3651_v38 = vld [vmem:[%s10445_s12 + $0xe0] sm:$0xff] }
 0x800   :  { %v4312_v14 = vadd.f32 %v4311_v43, %v4310_v56  ;;  %v4366_v37 = vsel %vm4364_vm7, %v4360_v55, %v4166_v13  ;;  %v4153_v29 = vadd.f32 %v4152_v7, %v4151_v21  ;;  %v4359_v6 = vsel %vm4358_vm6, %v4353_v9, %v4007_v4  ;;  %v4950_v48 = vld [vmem:[%s10445_s12 + $0x220] sm:$0xff]  ;;  %v4981_v7 = vld [vmem:[%s10445_s12 + $0x318] sm:$0xff] }
 0x801   :  { %v3571_v41 = vmax.f32 %v3426_v35, 0.0  ;;  %v3562_v47 = vmax.f32 %v3484_v61, 0.0  ;;  %v3430_v30 = vadd.f32 %v11015_v22, %v11014_v26  ;;  %v3432_v24 = vadd.f32 %v11016_v25, %v11014_v26  ;;  %v5030_v21 = vld [vmem:[%s10445_s12 + $0x4a0] sm:$0xff]  ;;  %v5021_v61 = vld [vmem:[%s10445_s12 + $0x458] sm:$0xff]  ;;  %v3656_v25 = vld [vmem:[%s10445_s12 + $0x108] sm:$0xff] }
 0x802   :  { %v4372_v60 = vsel %vm4370_vm8, %v4366_v37, %v4312_v14  ;;  %v4365_v53 = vsel %vm4364_vm7, %v4359_v6, %v4153_v29  ;;  %v3489_v12 = vadd.f32 %v11017_v19, %v9110_v51  ;;  %v4299_v17 = vadd.f32 %v4298_v44, %v4297_v58  ;;  %v3642_v51 = vld [vmem:[%s10445_s12 + $0x98] sm:$0xff] }
 0x803   :  { %v4377_v5 = vpack.c.bf16 %v4372_v60, %v4372_v60  ;;  %v11019_v4 = vmax.f32 %v11018_v42, 0.0  ;;  %v11021_v39 = vmax.f32 %v11020_v50, 0.0  ;;  %v3575_v11 = vmax.f32 %v3430_v30, 0.0  ;;  %v5061_v14 = vld [vmem:[%s10445_s12 + $0x598] sm:$0xff]  ;;  %v3655_v60 = vld [vmem:[%s10445_s12 + $0x100] sm:$0xff]  ;;  %v11028_v42 = vld [vmem:[#allocation3_spill] sm:$0xff] }
 0x804   :  { %v3576_v8 = vmax.f32 %v3432_v24, 0.0  ;;  %v3567_v16 = vmax.f32 %v3489_v12, 0.0  ;;  %v10144_v56 = vadd.f32 %v11023_v1, %v11022_v2  ;;  %v4371_v55 = vsel %vm4370_vm8, %v4365_v53, %v4299_v17  ;;  %v11024_v53 = vld [vmem:[#allocation37_spill] sm:$0xff]  ;;  %v4995_v17 = vld [vmem:[%s10445_s12 + $0x388] sm:$0xff] }
 0x805   :  { %v3611_v32 = vmax.f32 %v11019_v4, %v3571_v41  ;;  %v3602_v28 = vmax.f32 %v11021_v39, %v3562_v47  ;;  %4739 = vmatprep.mubr.bf16.mxu0 %v4377_v5  ;;  %v4376_v58 = vpack.c.bf16 %v4371_v55, %v4371_v55  ;;  %v4955_v5 = vld [vmem:[%s10445_s12 + $0x248] sm:$0xff]  ;;  %v11029_v4 = vmax.f32 %v11028_v42, 0.0 }
 0x807   :  { %v3691_v54 = vmul.f32 %v3651_v38, %v3611_v32  ;;  %v3837_v13 = vmul.f32 %v4950_v48, %v3611_v32  ;;  %v3983_v43 = vmul.f32 %v4990_v20, %v3611_v32  ;;  %v4129_v9 = vmul.f32 %v5030_v21, %v3611_v32  ;;  %4740 = vmatmul.mubr.bf16.vlgmr.msra.gmra.mrb[124].mxu0 %v4376_v58  ;;  %v5034_v48 = vld [vmem:[%s10445_s12 + $0x4c0] sm:$0xff] }
 0x808   :  { %v4275_v35 = vmul.f32 %v5070_v31, %v3611_v32  ;;  %v3682_v62 = vmul.f32 %v3642_v51, %v3602_v28  ;;  %v3828_v44 = vmul.f32 %v4941_v52, %v3602_v28  ;;  %v3974_v30 = vmul.f32 %v4981_v7, %v3602_v28  ;;  %v5074_v20 = vld [vmem:[%s10445_s12 + $0x600] sm:$0xff] }
 0x809   :  { %v3746_v37 = vadd.f32 %v10027_v18, %v3691_v54  ;;  %v3892_v29 = vadd.f32 %v10030_v33, %v3837_v13  ;;  %v4038_v6 = vadd.f32 %v10033_v46, %v3983_v43  ;;  %v4184_v41 = vadd.f32 %v10036_v63, %v4129_v9  ;;  %v4954_v18 = vld [vmem:[%s10445_s12 + $0x240] sm:$0xff] }
 0x80a   :  { %v10161_v47 = vadd.f32 %v10038_v49, %v4275_v35  ;;  %v3757_v22 = vadd.f32 %v10040_v34, %v3682_v62  ;;  %v4994_v33 = vld [vmem:[%s10445_s12 + $0x380] sm:$0xff]  ;;  %v3903_v46 = vadd.f32 %v10042_v36, %v3828_v44  ;;  %v4120_v63 = vmul.f32 %v5021_v61, %v3602_v28  ;;  %v11026_v36 = vld [vmem:[#allocation25_spill] sm:$0xff] }
 0x80b   :  { %v4266_v49 = vmul.f32 %v5061_v14, %v3602_v28  ;;  %v11025_v38 = vmax.f32 %v11024_v53, 0.0  ;;  %v4049_v24 = vadd.f32 %v10044_v57, %v3974_v30  ;;  %v11027_v19 = vmax.f32 %v11026_v36, 0.0  ;;  %v4946_v54 = vld [vmem:[%s10445_s12 + $0x200] sm:$0xff]  ;;  %v5079_v53 = vld [vmem:[%s10445_s12 + $0x628] sm:$0xff] }
 0x80c   :  { %v3607_v32 = vmax.f32 %v11029_v4, %v3567_v16  ;;  %v3580_v21 = vmax.f32 %v10144_v56, 0.0  ;;  %v4195_v31 = vadd.f32 %v10048_v15, %v4120_v63  ;;  %v5075_v16 = vld [vmem:[%s10445_s12 + $0x608] sm:$0xff]  ;;  %v3647_v15 = vld [vmem:[%s10445_s12 + $0xc0] sm:$0xff] }
 0x80d   :  { %v3615_v34 = vmax.f32 %v11025_v38, %v3575_v11  ;;  %v3616_v12 = vmax.f32 %v11027_v19, %v3576_v8  ;;  %v4341_v57 = vadd.f32 %v10051_v0, %v4266_v49  ;;  %v5035_v8 = vld [vmem:[%s10445_s12 + $0x4c8] sm:$0xff]  ;;  %v4986_v13 = vld [vmem:[%s10445_s12 + $0x340] sm:$0xff]  ;;  %v11032_v38 = vld [vmem:[#allocation17_spill] sm:$0xff] }
 0x80e   :  { %v5026_v43 = vld [vmem:[%s10445_s12 + $0x480] sm:$0xff]  ;;  %v3687_v44 = vmul.f32 %v3647_v15, %v3607_v32  ;;  %v3833_v30 = vmul.f32 %v4946_v54, %v3607_v32  ;;  %v5039_v49 = vld [vmem:[%s10445_s12 + $0x4e8] sm:$0xff] }
 0x80f   :  { %v3695_v50 = vmul.f32 %v3655_v60, %v3615_v34  ;;  %v3841_v39 = vmul.f32 %v4954_v18, %v3615_v34  ;;  %v3987_v28 = vmul.f32 %v4994_v33, %v3615_v34  ;;  %v4133_v51 = vmul.f32 %v5034_v48, %v3615_v34  ;;  %v5066_v9 = vld [vmem:[%s10445_s12 + $0x5c0] sm:$0xff]  ;;  %v5389_v54 = vld [vmem:[%s10444_s13 + $0x108] sm:$0xff]  }
 0x810   :  { %v4279_v52 = vmul.f32 %v5074_v20, %v3615_v34  ;;  %v3696_v11 = vmul.f32 %v3656_v25, %v3616_v12  ;;  %v3842_v56 = vmul.f32 %v4955_v5, %v3616_v12  ;;  %v3988_v55 = vmul.f32 %v4995_v17, %v3616_v12  ;;  %v5386_v17 = vld [vmem:[%s10444_s13 + $0x100] sm:$0xff]  }
 0x811   :  { %v3734_v0 = vadd.f32 %v10087_v10, %v3695_v50  ;;  %v3880_v1 = vadd.f32 %v10090_v40, %v3841_v39  ;;  %v4026_v7 = vadd.f32 %v10093_v45, %v3987_v28  ;;  %v4172_v10 = vadd.f32 %v10096_v59, %v4133_v51  ;;  %v3660_v45 = vld [vmem:[%s10445_s12 + $0x128] sm:$0xff] }
 0x812   :  { %v4318_v40 = vadd.f32 %v10099_v3, %v4279_v52  ;;  %v3747_v58 = vadd.f32 %v3746_v37, %v3696_v11  ;;  %v3893_v35 = vadd.f32 %v3892_v29, %v3842_v56  ;;  %v10225_v62 = vadd.f32 %v4038_v6, %v3988_v55  ;;  %v4959_v59 = vld [vmem:[%s10445_s12 + $0x268] sm:$0xff]  ;;  %v11030_v6 = vld [vmem:[#allocation36_spill] sm:$0xff]  ;;  %v11036_v56 = vld [vmem:[#allocation54_spill] sm:$0xff] }
 0x813   :  { %v4134_v61 = vmul.f32 %v5035_v8, %v3616_v12  ;;  %v10227_v14 = vmul.f32 %v5075_v16, %v3616_v12  ;;  %v3979_v60 = vmul.f32 %v4986_v13, %v3607_v32  ;;  %v4125_v18 = vmul.f32 %v5026_v43, %v3607_v32  ;;  %v4999_v3 = vld [vmem:[%s10445_s12 + $0x3a8] sm:$0xff] }
 0x814   :  { %v4271_v29 = vmul.f32 %v5066_v9, %v3607_v32  ;;  %v11031_v33 = vmax.f32 %v11030_v6, 0.0  ;;  %v3436_v34 = vadd.f32 %v11032_v38, %v11022_v2  ;;  %v10250_v48 = vadd.f32 %v3757_v22, %v3687_v44  ;;  %v11033_v22 = vld [vmem:[#allocation27_spill] sm:$0xff] }
 0x815   :  { %v10238_v37 = vadd.f32 %v4184_v41, %v4134_v61  ;;  %v10252_v20 = vadd.f32 %v3903_v46, %v3833_v30  ;;  %v10254_v41 = vadd.f32 %v4049_v24, %v3979_v60  ;;  %v10256_v25 = vadd.f32 %v4195_v31, %v4125_v18  ;;  %v3661_v31 = vld [vmem:[%s10445_s12 + $0x130] sm:$0xff]  ;;  %v11034_v51 = vld [vmem:[#allocation39_spill] sm:$0xff] }
 0x816   :  { %v3620_v63 = vmax.f32 %v11031_v33, %v3580_v21  ;;  %v10258_v36 = vadd.f32 %v4341_v57, %v4271_v29  ;;  %v3581_v32 = vmax.f32 %v3436_v34, 0.0  ;;  %v3492_v46 = vadd.f32 %v11033_v22, %v9118_v23  ;;  %v4960_v57 = vld [vmem:[%s10445_s12 + $0x270] sm:$0xff]  ;;  %v3652_v38 = vld [vmem:[%s10445_s12 + $0xe8] sm:$0xff] }
 0x817   :  { %v11035_v52 = vmax.f32 %v11034_v51, 0.0  ;;  %v5000_v23 = vld [vmem:[%s10445_s12 + $0x3b0] sm:$0xff]  ;;  %v5411_v16 = vmov 0.0   ;;  %v3497_v55 = vadd.f32 %v11036_v56, %v11014_v26 }
 0x818   :  { %v3700_v19 = vmul.f32 %v3660_v45, %v3620_v63  ;;  %v3846_v12 = vmul.f32 %v4959_v59, %v3620_v63  ;;  %v3992_v5 = vmul.f32 %v4999_v3, %v3620_v63  ;;  %v4138_v42 = vmul.f32 %v5039_v49, %v3620_v63  ;;  %5313 = vmatprep.subr.bf16.mxu0 %v5411_v16  ;;  %v5040_v30 = vld [vmem:[%s10445_s12 + $0x4f0] sm:$0xff] }
 0x819   :  { %v4284_v4 = vmul.f32 %v5079_v53, %v3620_v63  ;;  %v3621_v11 = vmax.f32 %v11035_v52, %v3581_v32  ;;  %v3572_v8 = vmax.f32 %v3492_v46, 0.0  ;;  %5314 = vmatpush3.bf16.msra.mxu0 %v5386_v17  ;;  %v5080_v59 = vld [vmem:[%s10445_s12 + $0x630] sm:$0xff]  ;;  %v4991_v17 = vld [vmem:[%s10445_s12 + $0x368] sm:$0xff]  ;;  %5329 = vmatprep.mubr.msk.bf16.mxu0 %vm5412_vm9, %v5411_v16 }
 0x81a   :  { %v3735_v21 = vadd.f32 %v3734_v0, %v3700_v19  ;;  %v3881_v24 = vadd.f32 %v3880_v1, %v3846_v12  ;;  %v4027_v50 = vadd.f32 %v4026_v7, %v3992_v5  ;;  %v4173_v39 = vadd.f32 %v4172_v10, %v4138_v42  ;;  %5315 = vmatprep.subr.bf16.mxu0 %v5411_v16  ;;  %v5392_v63 = vld [vmem:[%s10444_s13 + $0x110] sm:$0xff]   ;;  %v4951_v5 = vld [vmem:[%s10445_s12 + $0x228] sm:$0xff] }
 0x81b   :  { %v4319_v28 = vadd.f32 %v4318_v40, %v4284_v4  ;;  %v3701_v7 = vmul.f32 %v3661_v31, %v3621_v11  ;;  %v3847_v10 = vmul.f32 %v4960_v57, %v3621_v11  ;;  %v3993_v44 = vmul.f32 %v5000_v23, %v3621_v11  ;;  %v5031_v42 = vld [vmem:[%s10445_s12 + $0x4a8] sm:$0xff]  ;;  %v11037_v4 = vld [vmem:[#allocation6_spill] sm:$0xff] }
 0x81c   :  { %v3736_v15 = vrot.slane %v3735_v21, 4  ;;  %v3882_v0 = vrot.slane %v3881_v24, 4  ;;  %v4028_v1 = vrot.slane %v4027_v50, 4  ;;  %v4174_v13 = vrot.slane %v4173_v39, 4  ;;  %v5071_v46 = vld [vmem:[%s10445_s12 + $0x5e8] sm:$0xff] }
 0x81d   :  { %v4320_v43 = vrot.slane %v4319_v28, 4  ;;  %v3748_v18 = vadd.f32 %v3747_v58, %v3701_v7  ;;  %v3894_v45 = vadd.f32 %v3893_v35, %v3847_v10  ;;  %v10294_v33 = vadd.f32 %v10225_v62, %v3993_v44  ;;  %5316 = vmatpush3.bf16.msra.mxu0 %v5389_v54  ;;  %v5036_v54 = vld [vmem:[%s10445_s12 + $0x4d0] sm:$0xff] }
 0x81e   :  { %v3737_v40 = vadd.f32 %v3736_v15, %v3735_v21  ;;  %v3883_v9 = vadd.f32 %v3882_v0, %v3881_v24  ;;  %v4029_v61 = vadd.f32 %v4028_v1, %v4027_v50  ;;  %v10286_v26 = vadd.f32 %v4174_v13, %v4173_v39  ;;  %5317 = vmatprep.subr.bf16.mxu0 %v5411_v16  ;;  %v5395_v39 = vld [vmem:[%s10444_s13 + $0x118] sm:$0xff]   ;;  %v4996_v15 = vld [vmem:[%s10445_s12 + $0x390] sm:$0xff] }
 0x81f   :  { %v10288_v60 = vadd.f32 %v4320_v43, %v4319_v28  ;;  %v3749_v53 = vrot.slane %v3748_v18, 4  ;;  %v3895_v58 = vrot.slane %v3894_v45, 4  ;;  %v10300_v35 = vmul.f32 %v5040_v30, %v3621_v11  ;;  %v11039_v1 = vld [vmem:[#allocation29_spill] sm:$0xff]  ;;  %v5076_v13 = vld [vmem:[%s10445_s12 + $0x610] sm:$0xff] }
 0x820   :  { %v3738_v3 = vrot.slane %v3737_v40, 2  ;;  %v3884_v29 = vrot.slane %v3883_v9, 2  ;;  %v4030_v6 = vrot.slane %v4029_v61, 2  ;;  %v4176_v49 = vrot.slane %v10286_v26, 2 }
 0x821   :  { %v10312_v12 = vmul.f32 %v5080_v59, %v3621_v11  ;;  %v11038_v32 = vmax.f32 %v11037_v4, 0.0  ;;  %v3577_v21 = vmax.f32 %v3497_v55, 0.0  ;;  %v3500_v24 = vadd.f32 %v9852_v27, %v11022_v2  ;;  %5318 = vmatpush3.bf16.msra.mxu0 %v5392_v63  ;;  %v3657_v27 = vld [vmem:[%s10445_s12 + $0x110] sm:$0xff]  ;;  %v3662_v59 = vld [vmem:[%s10445_s12 + $0x138] sm:$0xff] }
 0x822   :  { %v10306_v34 = vadd.f32 %v3738_v3, %v3737_v40  ;;  %v10308_v62 = vadd.f32 %v3884_v29, %v3883_v9  ;;  %v10310_v19 = vadd.f32 %v4030_v6, %v4029_v61  ;;  %v3750_v50 = vadd.f32 %v3749_v53, %v3748_v18  ;;  %v4956_v2 = vld [vmem:[%s10445_s12 + $0x250] sm:$0xff]  ;;  %5319 = vmatprep.subr.bf16.mxu0 %v5411_v16  ;;  %v4961_v3 = vld [vmem:[%s10445_s12 + $0x278] sm:$0xff] }
 0x823   :  { %v3612_v22 = vmax.f32 %v11038_v32, %v3572_v8  ;;  %v3896_v28 = vadd.f32 %v3895_v58, %v3894_v45  ;;  %v4041_v51 = vrot.slane %v10294_v33, 4  ;;  %v11040_v56 = vmax.f32 %v11039_v1, 0.0  ;;  %v5001_v6 = vld [vmem:[%s10445_s12 + $0x3b8] sm:$0xff] }
 0x824   :  { %v3740_v31 = vrot.slane %v10306_v34, 1  ;;  %v3886_v57 = vrot.slane %v10308_v62, 1  ;;  %v3582_v43 = vmax.f32 %v3500_v24, 0.0  ;;  %v3751_v7 = vrot.slane %v3750_v50, 2  ;;  %v5041_v63 = vld [vmem:[%s10445_s12 + $0x4f8] sm:$0xff] }
 0x825   :  { %v3692_v52 = vmul.f32 %v3652_v38, %v3612_v22  ;;  %v3838_v11 = vmul.f32 %v4951_v5, %v3612_v22  ;;  %v3984_v23 = vmul.f32 %v4991_v17, %v3612_v22  ;;  %v4130_v8 = vmul.f32 %v5031_v42, %v3612_v22  ;;  %5320 = vmatpush3.bf16.msra.mxu0 %v5395_v39  ;;  %v5081_v53 = vld [vmem:[%s10445_s12 + $0x638] sm:$0xff] }
 0x826   :  { %v4276_v0 = vmul.f32 %v5071_v46, %v3612_v22  ;;  %v3617_v55 = vmax.f32 %v11040_v56, %v3577_v21  ;;  %5321 = vmatprep.subr.bf16.mxu0 %v5411_v16  ;;  %v3752_v58 = vadd.f32 %v3751_v7, %v3750_v50  ;;  %v3897_v42 = vrot.slane %v3896_v28, 2 }
 0x827   :  { %v3759_v10 = vadd.f32 %v10250_v48, %v3692_v52  ;;  %v3905_v40 = vadd.f32 %v10252_v20, %v3838_v11  ;;  %v4051_v9 = vadd.f32 %v10254_v41, %v3984_v23  ;;  %v4197_v61 = vadd.f32 %v10256_v25, %v4130_v8  ;;  %v5398_v48 = vld [vmem:[%s10444_s13 + $0x120] sm:$0xff]   ;;  %v11041_v25 = vld [vmem:[#allocation24_spill] sm:$0xff]  ;;  %v5401_v52 = vld [vmem:[%s10444_s13 + $0x128] sm:$0xff]  }
 0x828   :  { %v4343_v44 = vadd.f32 %v10258_v36, %v4276_v0  ;;  %v3697_v30 = vmul.f32 %v3657_v27, %v3617_v55  ;;  %v3843_v18 = vmul.f32 %v4956_v2, %v3617_v55  ;;  %v3989_v45 = vmul.f32 %v4996_v15, %v3617_v55 }
 0x829   :  { %v4135_v20 = vmul.f32 %v5036_v54, %v3617_v55  ;;  %v4281_v41 = vmul.f32 %v5076_v13, %v3617_v55  ;;  %v11042_v36 = vmax.f32 %v11041_v25, 0.0  ;;  %5322 = vmatpush3.bf16.msra.mxu0 %v5398_v48  ;;  %v3753_v11 = vrot.slane %v3752_v58, 1 }
 0x82a   :  { %v3760_v38 = vadd.f32 %v3759_v10, %v3697_v30  ;;  %v3906_v5 = vadd.f32 %v3905_v40, %v3843_v18  ;;  %v4052_v17 = vadd.f32 %v4051_v9, %v3989_v45  ;;  %5323 = vmatprep.subr.bf16.mxu0 %v5411_v16  ;;  %v3898_v50 = vadd.f32 %v3897_v42, %v3896_v28 }
 0x82b   :  { %v3622_v29 = vmax.f32 %v11042_v36, %v3582_v43  ;;  %v4198_v4 = vadd.f32 %v4197_v61, %v4135_v20  ;;  %v4344_v32 = vadd.f32 %v4343_v44, %v4281_v41  ;;  %v4042_v27 = vadd.f32 %v4041_v51, %v10294_v33  ;;  %v5403_v33 = vld [vmem:[%s10444_s13 + $0x130] sm:$0xff]  }
 0x82c   :  { %v3754_v1 = vadd.f32 %v3753_v11, %v3752_v58  ;;  %v3899_v54 = vrot.slane %v3898_v50, 1  ;;  %v4186_v10 = vadd.f32 %v10238_v37, %v10300_v35  ;;  %v4331_v28 = vadd.f32 %v10161_v47, %v10227_v14 }
 0x82d   :  { %v3702_v22 = vmul.f32 %v3662_v59, %v3622_v29  ;;  %v3848_v46 = vmul.f32 %v4961_v3, %v3622_v29  ;;  %v3994_v21 = vmul.f32 %v5001_v6, %v3622_v29  ;;  %v4140_v24 = vmul.f32 %v5041_v63, %v3622_v29  ;;  %5324 = vmatpush3.bf16.msra.mxu0 %v5401_v52 }
 0x82e   :  { %v4286_v39 = vmul.f32 %v5081_v53, %v3622_v29  ;;  %v4043_v13 = vrot.slane %v4042_v27, 2  ;;  %v3900_v9 = vadd.f32 %v3899_v54, %v3898_v50  ;;  %5325 = vmatprep.subr.bf16.mxu0 %v5411_v16  ;;  %v4187_v30 = vrot.slane %v4186_v10, 4 }
 0x82f   :  { %v3761_v23 = vadd.f32 %v3760_v38, %v3702_v22  ;;  %v3907_v8 = vadd.f32 %v3906_v5, %v3848_v46  ;;  %v4053_v2 = vadd.f32 %v4052_v17, %v3994_v21  ;;  %v4199_v15 = vadd.f32 %v4198_v4, %v4140_v24 }
 0x830   :  { %v10385_v0 = vadd.f32 %v4344_v32, %v4286_v39  ;;  %v4044_v61 = vadd.f32 %v4043_v13, %v4042_v27  ;;  %v4332_v18 = vadd.f32 %v4331_v28, %v10312_v12  ;;  %v3741_v37 = vadd.f32 %v3740_v31, %v10306_v34  ;;  %v5404_v12 = vld [vmem:[%s10444_s13 + $0x138] sm:$0xff]  }
 0x831   :  { %v3762_v56 = vrot.slane %v3761_v23, 4  ;;  %v3908_v55 = vrot.slane %v3907_v8, 4  ;;  %v4054_v43 = vrot.slane %v4053_v2, 4  ;;  %v4200_v7 = vrot.slane %v4199_v15, 4  ;;  %5326 = vmatpush3.bf16.msra.mxu0 %v5403_v33 }
 0x832   :  { %v4045_v14 = vrot.slane %v4044_v61, 1  ;;  %v4356_v45 = vsel %vm4352_vm5, %v3754_v1, %v3900_v9  ;;  %v4188_v59 = vadd.f32 %v4187_v30, %v4186_v10  ;;  %v4333_v3 = vrot.slane %v4332_v18, 4  ;;  %5327 = vmatprep.subr.bf16.mxu0 %v5411_v16 }
 0x833   :  { %v3763_v51 = vadd.f32 %v3762_v56, %v3761_v23  ;;  %v3909_v40 = vadd.f32 %v3908_v55, %v3907_v8  ;;  %v4055_v44 = vadd.f32 %v4054_v43, %v4053_v2  ;;  %v3887_v48 = vadd.f32 %v3886_v57, %v10308_v62 }
 0x834   :  { %v4032_v20 = vrot.slane %v10310_v19, 1  ;;  %v4046_v41 = vadd.f32 %v4045_v14, %v4044_v61  ;;  %v4177_v34 = vadd.f32 %v4176_v49, %v10286_v26  ;;  %v4322_v31 = vrot.slane %v10288_v60, 2 }
 0x835   :  { %v3764_v35 = vrot.slane %v3763_v51, 2  ;;  %v3910_v47 = vrot.slane %v3909_v40, 2  ;;  %v4189_v25 = vrot.slane %v4188_v59, 2  ;;  %v4334_v36 = vadd.f32 %v4333_v3, %v4332_v18  ;;  %5328 = vmatpush3.bf16.msra.mxu0 %v5404_v12 }
 0x836   :  { %v4033_v62 = vadd.f32 %v4032_v20, %v10310_v19  ;;  %v4355_v57 = vsel %vm4352_vm5, %v3741_v37, %v3887_v48  ;;  %v4362_v29 = vsel %vm4358_vm6, %v4356_v45, %v4046_v41  ;;  %v4178_v6 = vrot.slane %v4177_v34, 1 }
 0x837   :  { %v4323_v63 = vadd.f32 %v4322_v31, %v10288_v60  ;;  %v3765_v53 = vadd.f32 %v3764_v35, %v3763_v51  ;;  %v4190_v26 = vadd.f32 %v4189_v25, %v4188_v59  ;;  %v4335_v49 = vrot.slane %v4334_v36, 2  ;;  %v4465_v59 = vpop.permute.xlu0 %4464 }
 0x838   :  { %v4361_v58 = vsel %vm4358_vm6, %v4355_v57, %v4033_v62  ;;  %v3911_v38 = vadd.f32 %v3910_v47, %v3909_v40  ;;  %v4179_v5 = vadd.f32 %v4178_v6, %v4177_v34  ;;  %v4056_v42 = vrot.slane %v4055_v44, 2 }
 0x839   :  { %v4324_v17 = vrot.slane %v4323_v63, 1  ;;  %v3766_v19 = vrot.slane %v3765_v53, 1  ;;  %v4191_v4 = vrot.slane %v4190_v26, 1  ;;  %v4336_v32 = vadd.f32 %v4335_v49, %v4334_v36 }
 0x83a   :  { %v3912_v22 = vrot.slane %v3911_v38, 1  ;;  %v4201_v16 = vadd.f32 %v4200_v7, %v4199_v15  ;;  %v4367_v21 = vsel %vm4364_vm7, %v4361_v58, %v4179_v5  ;;  %v4057_v60 = vadd.f32 %v4056_v42, %v4055_v44 }
 0x83b   :  { %v4325_v46 = vadd.f32 %v4324_v17, %v4323_v63  ;;  %v3767_v24 = vadd.f32 %v3766_v19, %v3765_v53  ;;  %v4192_v39 = vadd.f32 %v4191_v4, %v4190_v26  ;;  %v4337_v52 = vrot.slane %v4336_v32, 1 }
 0x83c   :  { %v3913_v11 = vadd.f32 %v3912_v22, %v3911_v38  ;;  %v4202_v23 = vrot.slane %v4201_v16, 2  ;;  %v4058_v50 = vrot.slane %v4057_v60, 1  ;;  %v4346_v27 = vrot.slane %v10385_v0, 4 }
 0x83d   :  { %v4373_v8 = vsel %vm4370_vm8, %v4367_v21, %v4325_v46  ;;  %v4338_v2 = vadd.f32 %v4337_v52, %v4336_v32  ;;  %v4368_v1 = vsel %vm4364_vm7, %v4362_v29, %v4192_v39 }
 0x83e   :  { %v4203_v56 = vadd.f32 %v4202_v23, %v4201_v16  ;;  %v4059_v55 = vadd.f32 %v4058_v50, %v4057_v60  ;;  %v4347_v15 = vadd.f32 %v4346_v27, %v10385_v0  ;;  %v4357_v54 = vsel %vm4352_vm5, %v3767_v24, %v3913_v11 }
 0x83f   :  { %v4374_v13 = vsel %vm4370_vm8, %v4368_v1, %v4338_v2  ;;  %v4378_v33 = vpack.c.bf16 %v4373_v8, %v4373_v8 }
 0x840   :  { %v4204_v43 = vrot.slane %v4203_v56, 1  ;;  %v4379_v7 = vpack.c.bf16 %v4374_v13, %v4374_v13  ;;  %v4348_v10 = vrot.slane %v4347_v15, 2  ;;  %v4363_v28 = vsel %vm4358_vm6, %v4357_v54, %v4059_v55 }
 0x842   :  { %v4205_v51 = vadd.f32 %v4204_v43, %v4203_v56  ;;  %4779 = vmatprep.mubr.bf16.mxu1 %v4379_v7  ;;  %v4349_v40 = vadd.f32 %v4348_v10, %v4347_v15 }
 0x843   :  { %4780 = vmatmul.mubr.bf16.vlgmr.msra.gmra.mrb[132].mxu1 %v4378_v33 }
 0x844   :  { %v4369_v9 = vsel %vm4364_vm7, %v4363_v28, %v4205_v51  ;;  %v4350_v61 = vrot.slane %v4349_v40, 1 }
 0x846   :  { %v4351_v44 = vadd.f32 %v4350_v61, %v4349_v40 }
 0x848   :  { %v4375_v0 = vsel %vm4370_vm8, %v4369_v9, %v4351_v44 }
 0x849   :  { %v4380_v30 = vpack.c.bf16 %v4375_v0, %v4375_v0 }
 0x84b   :  { %5330 = vmatmul.mubr.bf16.vlgmr.msra.gmra.mrb[128].mxu0 %v4380_v30 }
 0x8da   :  { %v5184_v18 = vpop.f32.mrb[124].mxu0 }
 0x8db   :  { %v5185_v37 = vpop.f32.mrb[125].mxu0 }
 0x8dc   :  { %v5186_v35 = vadd.f32 %v5185_v37, %v5184_v18  ;;  %v5187_v47 = vpop.f32.mrb[126].mxu0 }
 0x8dd   :  { %v5188_v14 = vpop.f32.mrb[127].mxu0 }
 0x8de   :  { %v4742_v48 = vadd.f32 %v5186_v35, %v4465_v59 }
 0x916   :  { %v5206_v45 = vpop.f32.mrb[132].mxu1 }
 0x917   :  { %v5207_v3 = vpop.f32.mrb[133].mxu1 }
 0x918   :  { %v5208_v20 = vadd.f32 %v5207_v3, %v5206_v45  ;;  %v5209_v12 = vpop.f32.mrb[134].mxu1 }
 0x919   :  { %v5210_v41 = vpop.f32.mrb[135].mxu1 }
 0x91a   :  { %v4782_v34 = vadd.f32 %v5208_v20, %v4742_v48 }
 0x91e   :  { %v4821_v31 = vpop.f32.mrb[128].mxu0 }
 0x91f   :  { %v4822_v25 = vadd.f32 %v4821_v31, %v4782_v34  ;;  %v5331_v36 = vpop.f32.mrb[129].mxu0 }
 0x920   :  { %v4824_v62 = vpop.f32.mrb[130].mxu0 }
 0x921   :  { %4828 = vst.msk [vmem:[%s10446_s15] sm:$0x1f] %vm4827_vm10, %v4822_v25  ;;  %v5332_v57 = vpop.f32.mrb[131].mxu0 }

</bundles_post_ra>
